<compile_context>
chip_gen: v7x
topology: tpu7x:2x2x1
jax: 0.10.0
libtpu: 0.0.40
codegen_flags: <defaults>
</compile_context>

<pallas_src>
import functools

import jax
import jax.numpy as jnp
from jax.experimental import pallas as pl
from jax.experimental.pallas import tpu as pltpu


# ----------------------------------------------------------------------------
# Pallas kernels
# ----------------------------------------------------------------------------
def _pointconv_kernel(*refs, K, M, relu, modulate):
    """Score-weighted point conv + folded BN (+ReLU) (+mask modulation)."""
    if modulate:
        (sx_ref, nb_ref, S_ref, W_ref, scale_ref, shift_ref,
         cm0_ref, cm1_ref, pt_ref, o_ref) = refs
    else:
        (sx_ref, nb_ref, S_ref, W_ref, scale_ref, shift_ref, o_ref) = refs

    sx = sx_ref[0]            # [TN, 3*K]  coordinate-major: col = d*K + k
    nb = nb_ref[0]            # [TN, K, Ci]
    S = S_ref[...]            # [3, M]
    tn = sx.shape[0]
    ci = nb.shape[-1]
    co = o_ref.shape[-1]

    # scorenet logits[t, k, m] = sum_d sx[t, d*K + k] * S[d, m]
    logits = jnp.zeros((tn, K, M), jnp.float32)
    for d in range(3):                       # 3 coords, static unroll
        sx_d = sx[:, d * K:(d + 1) * K]      # [TN, K] static lane slice
        s_d = S[d:d + 1, :]                  # [1, M]
        logits = logits + sx_d[:, :, None] * s_d[None, :, :]

    mx = jnp.max(logits, axis=-1, keepdims=True)
    ex = jnp.exp(logits - mx)
    denom = jnp.sum(ex, axis=-1, keepdims=True)
    scores = ex * pl.reciprocal(denom, approx=True)          # [TN, K, M]

    # score-weighted aggregation + per-direction weight bank.
    # Intermediates stay <= [TN, K, Ci]; matmuls run on the MXU.
    acc = jnp.zeros((tn, co), jnp.float32)
    for m in range(M):                       # M small (kernel_size=5)
        agg_m = jnp.sum(scores[:, :, m:m + 1] * nb, axis=1)  # [TN, Ci]
        acc = acc + jnp.dot(agg_m, W_ref[m * ci:(m + 1) * ci, :],
                            preferred_element_type=jnp.float32)

    acc = acc * scale_ref[...] + shift_ref[...]
    if relu:
        acc = jnp.maximum(acc, 0.0)
    if modulate:
        # out * ch_mask[..., 1] * pt_mask + out * ch_mask[..., 0]
        acc = acc * cm1_ref[...] * pt_ref[0] + acc * cm0_ref[...]
    o_ref[0] = acc


def _pointwise_kernel(x_ref, w_ref, scale_ref, shift_ref, o_ref, *, relu):
    """1x1 point conv (n_neighbors=1) + folded BN + optional ReLU."""
    y = jnp.dot(x_ref[0], w_ref[...], preferred_element_type=jnp.float32)
    y = y * scale_ref[...] + shift_ref[...]
    if relu:
        y = jnp.maximum(y, 0.0)
    o_ref[0] = y


def _tail_kernel(*refs, project):
    """Fused tail (1x1 conv + bias + BN) + shortcut (proj or identity) + ReLU."""
    if project:
        (cat_ref, tw_ref, tb_ref, ts_ref, tsh_ref,
         fea_ref, sw_ref, ss_ref, ssh_ref, o_ref) = refs
    else:
        (cat_ref, tw_ref, tb_ref, ts_ref, tsh_ref, fea_ref, o_ref) = refs

    t = jnp.dot(cat_ref[0], tw_ref[...], preferred_element_type=jnp.float32)
    t = t + tb_ref[...]
    t = t * ts_ref[...] + tsh_ref[...]

    if project:
        s = jnp.dot(fea_ref[0], sw_ref[...], preferred_element_type=jnp.float32)
        s = s * ss_ref[...] + ssh_ref[...]
    else:
        s = fea_ref[0]                       # identity shortcut (Cin == Cout)

    o_ref[0] = jnp.maximum(t + s, 0.0)


# ----------------------------------------------------------------------------
# pallas_call wrappers
# ----------------------------------------------------------------------------
def _n_tile(n, target=256):
    """Largest N-tile <= target that divides N (multiple of 8 when tiling)."""
    if n <= target:
        return n
    for t in range(target, 7, -1):
        if n % t == 0 and t % 8 == 0:
            return t
    return n


def _par(n_axes):
    return pltpu.CompilerParams(dimension_semantics=("parallel",) * n_axes)


def pointconv(sxyz_flat, nb_fea, S, W2, scale, shift, relu,
              ch0=None, ch1=None, pt_mask=None):
    B, N, K3 = sxyz_flat.shape
    _, _, K, Ci = nb_fea.shape
    M = S.shape[1]
    Co = W2.shape[1]
    TN = _n_tile(N)
    nt = N // TN
    modulate = pt_mask is not None
    kernel = functools.partial(_pointconv_kernel, K=K, M=M, relu=relu,
                               modulate=modulate)

    in_specs = [
        pl.BlockSpec((1, TN, K3), lambda b, t: (b, t, 0)),
        pl.BlockSpec((1, TN, K, Ci), lambda b, t: (b, t, 0, 0)),
        pl.BlockSpec((3, M), lambda b, t: (0, 0)),
        pl.BlockSpec((M * Ci, Co), lambda b, t: (0, 0)),
        pl.BlockSpec((1, Co), lambda b, t: (0, 0)),
        pl.BlockSpec((1, Co), lambda b, t: (0, 0)),
    ]
    args = [sxyz_flat, nb_fea, S, W2,
            scale.reshape(1, Co), shift.reshape(1, Co)]
    if modulate:
        in_specs += [
            pl.BlockSpec((1, Co), lambda b, t: (0, 0)),
            pl.BlockSpec((1, Co), lambda b, t: (0, 0)),
            pl.BlockSpec((1, TN, 1), lambda b, t: (b, t, 0)),
        ]
        args += [ch0.reshape(1, Co), ch1.reshape(1, Co), pt_mask]

    return pl.pallas_call(
        kernel,
        out_shape=jax.ShapeDtypeStruct((B, N, Co), jnp.float32),
        grid_spec=pltpu.PrefetchScalarGridSpec(
            num_scalar_prefetch=0,
            grid=(B, nt),
            in_specs=in_specs,
            out_specs=pl.BlockSpec((1, TN, Co), lambda b, t: (b, t, 0)),
        ),
        compiler_params=_par(2),
    )(*args)


def pointwise(x, W, scale, shift, relu):
    B, N, Ci = x.shape
    Co = W.shape[1]
    TN = _n_tile(N)
    nt = N // TN
    kernel = functools.partial(_pointwise_kernel, relu=relu)
    return pl.pallas_call(
        kernel,
        out_shape=jax.ShapeDtypeStruct((B, N, Co), jnp.float32),
        grid_spec=pltpu.PrefetchScalarGridSpec(
            num_scalar_prefetch=0,
            grid=(B, nt),
            in_specs=[
                pl.BlockSpec((1, TN, Ci), lambda b, t: (b, t, 0)),
                pl.BlockSpec((Ci, Co), lambda b, t: (0, 0)),
                pl.BlockSpec((1, Co), lambda b, t: (0, 0)),
                pl.BlockSpec((1, Co), lambda b, t: (0, 0)),
            ],
            out_specs=pl.BlockSpec((1, TN, Co), lambda b, t: (b, t, 0)),
        ),
        compiler_params=_par(2),
    )(x, W, scale.reshape(1, Co), shift.reshape(1, Co))


def tail_shortcut(cat, tail_w, tail_b, tail_scale, tail_shift,
                  fea, sc_w=None, sc_scale=None, sc_shift=None):
    B, N, Ccat = cat.shape
    Ci = fea.shape[2]
    Co = tail_w.shape[1]
    TN = _n_tile(N)
    nt = N // TN
    project = sc_w is not None
    kernel = functools.partial(_tail_kernel, project=project)

    in_specs = [
        pl.BlockSpec((1, TN, Ccat), lambda b, t: (b, t, 0)),
        pl.BlockSpec((Ccat, Co), lambda b, t: (0, 0)),
        pl.BlockSpec((1, Co), lambda b, t: (0, 0)),
        pl.BlockSpec((1, Co), lambda b, t: (0, 0)),
        pl.BlockSpec((1, Co), lambda b, t: (0, 0)),
        pl.BlockSpec((1, TN, Ci), lambda b, t: (b, t, 0)),
    ]
    args = [cat, tail_w, tail_b.reshape(1, Co), tail_scale.reshape(1, Co),
            tail_shift.reshape(1, Co), fea]
    if project:
        in_specs += [
            pl.BlockSpec((Ci, Co), lambda b, t: (0, 0)),
            pl.BlockSpec((1, Co), lambda b, t: (0, 0)),
            pl.BlockSpec((1, Co), lambda b, t: (0, 0)),
        ]
        args += [sc_w, sc_scale.reshape(1, Co), sc_shift.reshape(1, Co)]

    return pl.pallas_call(
        kernel,
        out_shape=jax.ShapeDtypeStruct((B, N, Co), jnp.float32),
        grid_spec=pltpu.PrefetchScalarGridSpec(
            num_scalar_prefetch=0,
            grid=(B, nt),
            in_specs=in_specs,
            out_specs=pl.BlockSpec((1, TN, Co), lambda b, t: (b, t, 0)),
        ),
        compiler_params=_par(2),
    )(*args)


# ----------------------------------------------------------------------------
# Parameters & forward (plain-JAX glue)
# ----------------------------------------------------------------------------
def _bn_fold(key, c, eps=1e-5):
    k1, k2, k3, k4 = jax.random.split(key, 4)
    gamma = jax.random.uniform(k1, (c,), jnp.float32, 0.5, 1.5)
    beta = jax.random.normal(k2, (c,), jnp.float32) * 0.1
    mean = jax.random.normal(k3, (c,), jnp.float32) * 0.1
    var = jax.random.uniform(k4, (c,), jnp.float32, 0.5, 1.5)
    scale = gamma / jnp.sqrt(var + eps)
    shift = beta - mean * scale
    return scale, shift


def init_params(key, in_channels, out_channels, n_layers=2, kernel_size=5):
    keys = iter(jax.random.split(key, 64))
    cm = in_channels // 4

    def w(shape, s=0.3):
        return jax.random.normal(next(keys), shape, jnp.float32) * s

    p = {}
    # pt_mask sub-network: BasicConv(Ci, Ci//4, 1), (Ci//4, Ci//4, K), (Ci//4, 2, K)
    p['pm0_w'] = w((in_channels, cm))
    p['pm0_scale'], p['pm0_shift'] = _bn_fold(next(keys), cm)
    p['pm1_S'] = w((3, kernel_size), 1.0)
    p['pm1_W2'] = w((kernel_size * cm, cm))          # weight bank flattened [M*Ci, Co]
    p['pm1_scale'], p['pm1_shift'] = _bn_fold(next(keys), cm)
    p['pm2_S'] = w((3, kernel_size), 1.0)
    p['pm2_W2'] = w((kernel_size * cm, 2))

    # body PointConvs
    c_prev = in_channels
    for i in range(n_layers):
        p[f'body{i}_S'] = w((3, kernel_size), 1.0)
        p[f'body{i}_W2'] = w((kernel_size * c_prev, out_channels))
        p[f'body{i}_scale'], p[f'body{i}_shift'] = _bn_fold(next(keys), out_channels)
        c_prev = out_channels

    # channel mask parameter (n_layers, out_channels, 2)
    p['ch_mask'] = jax.random.uniform(next(keys), (n_layers, out_channels, 2),
                                      jnp.float32)

    # tail (1x1 PointConv with bias + BN)
    p['tail_w'] = w((n_layers * out_channels, out_channels))
    p['tail_b'] = w((out_channels,), 0.1)
    p['tail_scale'], p['tail_shift'] = _bn_fold(next(keys), out_channels)

    # shortcut (1x1 conv + BN) only when in_channels != out_channels
    if in_channels != out_channels:
        p['sc_w'] = w((in_channels, out_channels))
        p['sc_scale'], p['sc_shift'] = _bn_fold(next(keys), out_channels)
    return p


def _batch_gather(feat_pm, idx):
    # feat_pm: [B, N, C], idx: [B, N, K] -> [B, N, K, C]
    # TODO(synk): could be replaced by an in-kernel DMA gather (scalar-prefetch
    #   knn_idx) to avoid writing/re-reading the K-times-larger tensor in HBM.
    return jax.vmap(lambda f, i: f[i])(feat_pm, idx)


def basic_block_forward(params, xyz, fea, knn_idx,
                        n_layers=2, radius=1.0, tau=1.0):
    """xyz [B,3,N], fea [B,Cin,N], knn_idx [B,N,K] (torch layouts) -> [B,Cout,N]."""
    B, Cin, N = fea.shape
    K = knn_idx.shape[-1]
    xyz = xyz[..., :N]
    xyz_pm = jnp.transpose(xyz, (0, 2, 1)).astype(jnp.float32)   # [B, N, 3]
    fea_pm = jnp.transpose(fea, (0, 2, 1)).astype(jnp.float32)   # [B, N, Cin]

    nb_xyz = _batch_gather(xyz_pm, knn_idx)                      # [B, N, K, 3]
    rel_xyz = nb_xyz - xyz_pm[:, :, None, :]
    sxyz = rel_xyz / radius
    # lane-dense, coordinate-major scorenet input: column = d*K + k
    sxyz_flat = jnp.transpose(sxyz, (0, 1, 3, 2)).reshape(B, N, 3 * K)

    # --- pt_mask branch ---
    m0 = pointwise(fea_pm, params['pm0_w'],
                   params['pm0_scale'], params['pm0_shift'], relu=True)
    m1 = pointconv(sxyz_flat, _batch_gather(m0, knn_idx),
                   params['pm1_S'], params['pm1_W2'],
                   params['pm1_scale'], params['pm1_shift'], relu=True)
    m2 = pointconv(sxyz_flat, _batch_gather(m1, knn_idx),
                   params['pm2_S'], params['pm2_W2'],
                   jnp.ones((2,), jnp.float32), jnp.zeros((2,), jnp.float32),
                   relu=False)                                   # [B, N, 2]
    pt_mask = jax.nn.softmax(m2 / tau, axis=-1)[..., 1:2]        # [B, N, 1]

    # --- channel mask (deterministic softmax stand-in for gumbel_softmax) ---
    ch_mask = jax.nn.softmax(params['ch_mask'] / tau, axis=-1)   # [L, Cout, 2]

    # --- body (mask modulation fused into the pointconv epilogue) ---
    prev = fea_pm
    buffer = []
    for i in range(n_layers):
        nb = _batch_gather(prev, knn_idx)
        h = pointconv(sxyz_flat, nb,
                      params[f'body{i}_S'], params[f'body{i}_W2'],
                      params[f'body{i}_scale'], params[f'body{i}_shift'],
                      relu=True,
                      ch0=ch_mask[i, :, 0], ch1=ch_mask[i, :, 1],
                      pt_mask=pt_mask)                           # [B, N, Cout]
        buffer.append(h)
        prev = h
    cat = jnp.concatenate(buffer, axis=-1)                       # [B, N, L*Cout]

    # --- tail + shortcut + residual ReLU (fused kernel) ---
    out_pm = tail_shortcut(cat, params['tail_w'], params['tail_b'],
                           params['tail_scale'], params['tail_shift'],
                           fea_pm,
                           params.get('sc_w'), params.get('sc_scale'),
                           params.get('sc_shift'))
    return jnp.transpose(out_pm, (0, 2, 1))                      # [B, Cout, N]


# ----------------------------------------------------------------------------
if __name__ == "__main__":
    B, N, K = 2, 16, 8
    in_channels, out_channels, n_layers = 16, 32, 2

    key = jax.random.PRNGKey(0)
    k_xyz, k_fea, k_idx, k_par = jax.random.split(key, 4)

    xyz = jax.random.normal(k_xyz, (B, 3, N), jnp.float32)
    fea = jax.random.normal(k_fea, (B, in_channels, N), jnp.float32)
    knn_idx = jax.random.randint(k_idx, (B, N, K), 0, N, jnp.int32)

    params = init_params(k_par, in_channels, out_channels, n_layers=n_layers)

    fwd = jax.jit(functools.partial(basic_block_forward,
                                    n_layers=n_layers, radius=1.0, tau=1.0))
    out = fwd(params, xyz, fea, knn_idx)
    out = jax.block_until_ready(out)

    assert out.shape == (B, out_channels, N)
    assert bool(jnp.all(jnp.isfinite(out)))
    print("KERNEL_OK")
</pallas_src>

<mosaic_0001>
module attributes {stable_mosaic.version = 11 : i64} {
  func.func @_pointwise_kernel(%arg0: i32, %arg1: i32, %arg2: memref<1x16x16xf32, #tpu.memory_space<vmem>>, %arg3: memref<16x4xf32, #tpu.memory_space<vmem>>, %arg4: memref<1x4xf32, #tpu.memory_space<vmem>>, %arg5: memref<1x4xf32, #tpu.memory_space<vmem>>, %arg6: memref<1x16x4xf32, #tpu.memory_space<vmem>>) attributes {dimension_semantics = [#tpu.dimension_semantics<parallel>, #tpu.dimension_semantics<parallel>], iteration_bounds = array<i64: 2, 1>, scalar_prefetch = 0 : i64, scratch_operands = 0 : i64, tpu.core_type = #tpu.core_type<tc>, window_params = [{transform_indices = @transform_0, window_bounds = array<i64: 1, 16, 16>}, {pipeline_mode = #tpu.pipeline_mode<synchronous>, transform_indices = @transform_1, window_bounds = array<i64: 16, 4>}, {pipeline_mode = #tpu.pipeline_mode<synchronous>, transform_indices = @transform_2, window_bounds = array<i64: 1, 4>}, {pipeline_mode = #tpu.pipeline_mode<synchronous>, transform_indices = @transform_3, window_bounds = array<i64: 1, 4>}, {transform_indices = @transform_4, window_bounds = array<i64: 1, 16, 4>}]} {
    %c0 = arith.constant 0 : index
    %c0_0 = arith.constant 0 : index
    %c0_1 = arith.constant 0 : index
    %0 = vector.load %arg2[%c0, %c0_0, %c0_1] : memref<1x16x16xf32, #tpu.memory_space<vmem>>, vector<1x16x16xf32>
    %1 = vector.shape_cast %0 : vector<1x16x16xf32> to vector<16x16xf32>
    %c0_2 = arith.constant 0 : index
    %c0_3 = arith.constant 0 : index
    %2 = vector.load %arg3[%c0_2, %c0_3] : memref<16x4xf32, #tpu.memory_space<vmem>>, vector<16x4xf32>
    %cst = arith.constant dense<0.000000e+00> : vector<16x4xf32>
    %3 = tpu.matmul %1, %2, %cst {dimension_numbers = #tpu.dot_dimension_numbers<[1], [0], [0], [1], [0, 0, 1, 1], [], []>} : vector<16x16xf32>, vector<16x4xf32>, vector<16x4xf32> -> vector<16x4xf32>
    %c0_4 = arith.constant 0 : index
    %c0_5 = arith.constant 0 : index
    %4 = vector.load %arg4[%c0_4, %c0_5] : memref<1x4xf32, #tpu.memory_space<vmem>>, vector<1x4xf32>
    %5 = vector.broadcast %4 : vector<1x4xf32> to vector<16x4xf32>
    %6 = arith.mulf %3, %5 : vector<16x4xf32>
    %c0_6 = arith.constant 0 : index
    %c0_7 = arith.constant 0 : index
    %7 = vector.load %arg5[%c0_6, %c0_7] : memref<1x4xf32, #tpu.memory_space<vmem>>, vector<1x4xf32>
    %8 = vector.broadcast %7 : vector<1x4xf32> to vector<16x4xf32>
    %9 = arith.addf %6, %8 : vector<16x4xf32>
    %cst_8 = arith.constant 0.000000e+00 : f32
    %10 = vector.broadcast %cst_8 : f32 to vector<16x4xf32>
    %11 = arith.maximumf %9, %10 : vector<16x4xf32>
    %c0_9 = arith.constant 0 : index
    %c0_10 = arith.constant 0 : index
    %c0_11 = arith.constant 0 : index
    %12 = vector.load %arg6[%c0_9, %c0_10, %c0_11] : memref<1x16x4xf32, #tpu.memory_space<vmem>>, vector<1x16x4xf32>
    %13 = vector.shape_cast %12 : vector<1x16x4xf32> to vector<16x4xf32>
    %14 = vector.shape_cast %11 : vector<16x4xf32> to vector<1x16x4xf32>
    tpu.vector_store %arg6[%c0_9, %c0_10, %c0_11], %14 {strides = array<i32>} : memref<1x16x4xf32, #tpu.memory_space<vmem>>, vector<1x16x4xf32>,
    return
  }
  func.func @transform_0(%arg0: i32, %arg1: i32) -> (i32, i32, i32) {
    %c0_i32 = arith.constant 0 : i32
    %c0_i32_0 = arith.constant 0 : i32
    return %arg0, %arg1, %c0_i32 : i32, i32, i32
  }
  func.func @transform_1(%arg0: i32, %arg1: i32) -> (i32, i32) {
    %c0_i32 = arith.constant 0 : i32
    %c0_i32_0 = arith.constant 0 : i32
    %c0_i32_1 = arith.constant 0 : i32
    return %c0_i32, %c0_i32_0 : i32, i32
  }
  func.func @transform_2(%arg0: i32, %arg1: i32) -> (i32, i32) {
    %c0_i32 = arith.constant 0 : i32
    %c0_i32_0 = arith.constant 0 : i32
    %c0_i32_1 = arith.constant 0 : i32
    return %c0_i32, %c0_i32_0 : i32, i32
  }
  func.func @transform_3(%arg0: i32, %arg1: i32) -> (i32, i32) {
    %c0_i32 = arith.constant 0 : i32
    %c0_i32_0 = arith.constant 0 : i32
    %c0_i32_1 = arith.constant 0 : i32
    return %c0_i32, %c0_i32_0 : i32, i32
  }
  func.func @transform_4(%arg0: i32, %arg1: i32) -> (i32, i32, i32) {
    %c0_i32 = arith.constant 0 : i32
    %c0_i32_0 = arith.constant 0 : i32
    return %arg0, %arg1, %c0_i32 : i32, i32, i32
  }
}

module attributes {stable_mosaic.version = 11 : i64} {
  func.func @_pointconv_kernel(%arg0: i32, %arg1: i32, %arg2: memref<1x16x24xf32, #tpu.memory_space<vmem>>, %arg3: memref<1x16x8x4xf32, #tpu.memory_space<vmem>>, %arg4: memref<3x5xf32, #tpu.memory_space<vmem>>, %arg5: memref<20x4xf32, #tpu.memory_space<vmem>>, %arg6: memref<1x4xf32, #tpu.memory_space<vmem>>, %arg7: memref<1x4xf32, #tpu.memory_space<vmem>>, %arg8: memref<1x16x4xf32, #tpu.memory_space<vmem>>) attributes {dimension_semantics = [#tpu.dimension_semantics<parallel>, #tpu.dimension_semantics<parallel>], iteration_bounds = array<i64: 2, 1>, scalar_prefetch = 0 : i64, scratch_operands = 0 : i64, tpu.core_type = #tpu.core_type<tc>, window_params = [{transform_indices = @transform_0, window_bounds = array<i64: 1, 16, 24>}, {transform_indices = @transform_1, window_bounds = array<i64: 1, 16, 8, 4>}, {pipeline_mode = #tpu.pipeline_mode<synchronous>, transform_indices = @transform_2, window_bounds = array<i64: 3, 5>}, {pipeline_mode = #tpu.pipeline_mode<synchronous>, transform_indices = @transform_3, window_bounds = array<i64: 20, 4>}, {pipeline_mode = #tpu.pipeline_mode<synchronous>, transform_indices = @transform_4, window_bounds = array<i64: 1, 4>}, {pipeline_mode = #tpu.pipeline_mode<synchronous>, transform_indices = @transform_5, window_bounds = array<i64: 1, 4>}, {transform_indices = @transform_6, window_bounds = array<i64: 1, 16, 4>}]} {
    %c0 = arith.constant 0 : index
    %c0_0 = arith.constant 0 : index
    %c0_1 = arith.constant 0 : index
    %0 = vector.load %arg2[%c0, %c0_0, %c0_1] : memref<1x16x24xf32, #tpu.memory_space<vmem>>, vector<1x16x24xf32>
    %1 = vector.shape_cast %0 : vector<1x16x24xf32> to vector<16x24xf32>
    %c0_2 = arith.constant 0 : index
    %c0_3 = arith.constant 0 : index
    %c0_4 = arith.constant 0 : index
    %c0_5 = arith.constant 0 : index
    %2 = vector.load %arg3[%c0_2, %c0_3, %c0_4, %c0_5] : memref<1x16x8x4xf32, #tpu.memory_space<vmem>>, vector<1x16x8x4xf32>
    %3 = vector.shape_cast %2 : vector<1x16x8x4xf32> to vector<16x8x4xf32>
    %c0_6 = arith.constant 0 : index
    %c0_7 = arith.constant 0 : index
    %4 = vector.load %arg4[%c0_6, %c0_7] : memref<3x5xf32, #tpu.memory_space<vmem>>, vector<3x5xf32>
    %cst = arith.constant 0.000000e+00 : f32
    %5 = vector.broadcast %cst : f32 to vector<16x8x5xf32>
    %6 = vector.extract_strided_slice %1 {offsets = [0, 0], sizes = [16, 8], strides = [1, 1]} : vector<16x24xf32> to vector<16x8xf32>
    %7 = vector.extract_strided_slice %4 {offsets = [0, 0], sizes = [1, 5], strides = [1, 1]} : vector<3x5xf32> to vector<1x5xf32>
    %8 = vector.shape_cast %6 : vector<16x8xf32> to vector<16x8x1xf32>
    %9 = vector.shape_cast %7 : vector<1x5xf32> to vector<1x1x5xf32>
    %10 = vector.broadcast %8 : vector<16x8x1xf32> to vector<16x8x5xf32>
    %11 = vector.broadcast %9 : vector<1x1x5xf32> to vector<16x8x5xf32>
    %12 = arith.mulf %10, %11 : vector<16x8x5xf32>
    %13 = arith.addf %5, %12 : vector<16x8x5xf32>
    %14 = vector.extract_strided_slice %1 {offsets = [0, 8], sizes = [16, 8], strides = [1, 1]} : vector<16x24xf32> to vector<16x8xf32>
    %15 = vector.extract_strided_slice %4 {offsets = [1, 0], sizes = [1, 5], strides = [1, 1]} : vector<3x5xf32> to vector<1x5xf32>
    %16 = vector.shape_cast %14 : vector<16x8xf32> to vector<16x8x1xf32>
    %17 = vector.shape_cast %15 : vector<1x5xf32> to vector<1x1x5xf32>
    %18 = vector.broadcast %16 : vector<16x8x1xf32> to vector<16x8x5xf32>
    %19 = vector.broadcast %17 : vector<1x1x5xf32> to vector<16x8x5xf32>
    %20 = arith.mulf %18, %19 : vector<16x8x5xf32>
    %21 = arith.addf %13, %20 : vector<16x8x5xf32>
    %22 = vector.extract_strided_slice %1 {offsets = [0, 16], sizes = [16, 8], strides = [1, 1]} : vector<16x24xf32> to vector<16x8xf32>
    %23 = vector.extract_strided_slice %4 {offsets = [2, 0], sizes = [1, 5], strides = [1, 1]} : vector<3x5xf32> to vector<1x5xf32>
    %24 = vector.shape_cast %22 : vector<16x8xf32> to vector<16x8x1xf32>
    %25 = vector.shape_cast %23 : vector<1x5xf32> to vector<1x1x5xf32>
    %26 = vector.broadcast %24 : vector<16x8x1xf32> to vector<16x8x5xf32>
    %27 = vector.broadcast %25 : vector<1x1x5xf32> to vector<16x8x5xf32>
    %28 = arith.mulf %26, %27 : vector<16x8x5xf32>
    %29 = arith.addf %21, %28 : vector<16x8x5xf32>
    %cst_8 = arith.constant dense<0xFF800000> : vector<16x8xf32>
    %30 = vector.multi_reduction <maximumf>, %29, %cst_8 [2] : vector<16x8x5xf32> to vector<16x8xf32>
    %31 = vector.shape_cast %30 : vector<16x8xf32> to vector<16x8x1xf32>
    %32 = vector.broadcast %31 : vector<16x8x1xf32> to vector<16x8x5xf32>
    %33 = arith.subf %29, %32 : vector<16x8x5xf32>
    %34 = math.exp %33 : vector<16x8x5xf32>
    %cst_9 = arith.constant dense<0.000000e+00> : vector<16x8xf32>
    %35 = vector.multi_reduction <add>, %34, %cst_9 [2] : vector<16x8x5xf32> to vector<16x8xf32>
    %36 = vector.shape_cast %35 : vector<16x8xf32> to vector<16x8x1xf32>
    %37 = tpu.reciprocal %36 {approx = true} : vector<16x8x1xf32> -> vector<16x8x1xf32>
    %38 = vector.broadcast %37 : vector<16x8x1xf32> to vector<16x8x5xf32>
    %39 = arith.mulf %34, %38 : vector<16x8x5xf32>
    %cst_10 = arith.constant 0.000000e+00 : f32
    %40 = vector.broadcast %cst_10 : f32 to vector<16x4xf32>
    %41 = vector.extract_strided_slice %39 {offsets = [0, 0, 0], sizes = [16, 8, 1], strides = [1, 1, 1]} : vector<16x8x5xf32> to vector<16x8x1xf32>
    %42 = vector.broadcast %41 : vector<16x8x1xf32> to vector<16x8x4xf32>
    %43 = arith.mulf %42, %3 : vector<16x8x4xf32>
    %cst_11 = arith.constant dense<0.000000e+00> : vector<16x4xf32>
    %44 = vector.multi_reduction <add>, %43, %cst_11 [1] : vector<16x8x4xf32> to vector<16x4xf32>
    %c0_12 = arith.constant 0 : index
    %c0_13 = arith.constant 0 : index
    %45 = vector.load %arg5[%c0_12, %c0_13] : memref<20x4xf32, #tpu.memory_space<vmem>>, vector<4x4xf32>
    %cst_14 = arith.constant dense<0.000000e+00> : vector<16x4xf32>
    %46 = tpu.matmul %44, %45, %cst_14 {dimension_numbers = #tpu.dot_dimension_numbers<[1], [0], [0], [1], [0, 0, 1, 1], [], []>} : vector<16x4xf32>, vector<4x4xf32>, vector<16x4xf32> -> vector<16x4xf32>
    %47 = arith.addf %40, %46 : vector<16x4xf32>
    %48 = vector.extract_strided_slice %39 {offsets = [0, 0, 1], sizes = [16, 8, 1], strides = [1, 1, 1]} : vector<16x8x5xf32> to vector<16x8x1xf32>
    %49 = vector.broadcast %48 : vector<16x8x1xf32> to vector<16x8x4xf32>
    %50 = arith.mulf %49, %3 : vector<16x8x4xf32>
    %cst_15 = arith.constant dense<0.000000e+00> : vector<16x4xf32>
    %51 = vector.multi_reduction <add>, %50, %cst_15 [1] : vector<16x8x4xf32> to vector<16x4xf32>
    %c4 = arith.constant 4 : index
    %c0_16 = arith.constant 0 : index
    %52 = vector.load %arg5[%c4, %c0_16] : memref<20x4xf32, #tpu.memory_space<vmem>>, vector<4x4xf32>
    %cst_17 = arith.constant dense<0.000000e+00> : vector<16x4xf32>
    %53 = tpu.matmul %51, %52, %cst_17 {dimension_numbers = #tpu.dot_dimension_numbers<[1], [0], [0], [1], [0, 0, 1, 1], [], []>} : vector<16x4xf32>, vector<4x4xf32>, vector<16x4xf32> -> vector<16x4xf32>
    %54 = arith.addf %47, %53 : vector<16x4xf32>
    %55 = vector.extract_strided_slice %39 {offsets = [0, 0, 2], sizes = [16, 8, 1], strides = [1, 1, 1]} : vector<16x8x5xf32> to vector<16x8x1xf32>
    %56 = vector.broadcast %55 : vector<16x8x1xf32> to vector<16x8x4xf32>
    %57 = arith.mulf %56, %3 : vector<16x8x4xf32>
    %cst_18 = arith.constant dense<0.000000e+00> : vector<16x4xf32>
    %58 = vector.multi_reduction <add>, %57, %cst_18 [1] : vector<16x8x4xf32> to vector<16x4xf32>
    %c8 = arith.constant 8 : index
    %c0_19 = arith.constant 0 : index
    %59 = vector.load %arg5[%c8, %c0_19] : memref<20x4xf32, #tpu.memory_space<vmem>>, vector<4x4xf32>
    %cst_20 = arith.constant dense<0.000000e+00> : vector<16x4xf32>
    %60 = tpu.matmul %58, %59, %cst_20 {dimension_numbers = #tpu.dot_dimension_numbers<[1], [0], [0], [1], [0, 0, 1, 1], [], []>} : vector<16x4xf32>, vector<4x4xf32>, vector<16x4xf32> -> vector<16x4xf32>
    %61 = arith.addf %54, %60 : vector<16x4xf32>
    %62 = vector.extract_strided_slice %39 {offsets = [0, 0, 3], sizes = [16, 8, 1], strides = [1, 1, 1]} : vector<16x8x5xf32> to vector<16x8x1xf32>
    %63 = vector.broadcast %62 : vector<16x8x1xf32> to vector<16x8x4xf32>
    %64 = arith.mulf %63, %3 : vector<16x8x4xf32>
    %cst_21 = arith.constant dense<0.000000e+00> : vector<16x4xf32>
    %65 = vector.multi_reduction <add>, %64, %cst_21 [1] : vector<16x8x4xf32> to vector<16x4xf32>
    %c12 = arith.constant 12 : index
    %c0_22 = arith.constant 0 : index
    %66 = vector.load %arg5[%c12, %c0_22] : memref<20x4xf32, #tpu.memory_space<vmem>>, vector<4x4xf32>
    %cst_23 = arith.constant dense<0.000000e+00> : vector<16x4xf32>
    %67 = tpu.matmul %65, %66, %cst_23 {dimension_numbers = #tpu.dot_dimension_numbers<[1], [0], [0], [1], [0, 0, 1, 1], [], []>} : vector<16x4xf32>, vector<4x4xf32>, vector<16x4xf32> -> vector<16x4xf32>
    %68 = arith.addf %61, %67 : vector<16x4xf32>
    %69 = vector.extract_strided_slice %39 {offsets = [0, 0, 4], sizes = [16, 8, 1], strides = [1, 1, 1]} : vector<16x8x5xf32> to vector<16x8x1xf32>
    %70 = vector.broadcast %69 : vector<16x8x1xf32> to vector<16x8x4xf32>
    %71 = arith.mulf %70, %3 : vector<16x8x4xf32>
    %cst_24 = arith.constant dense<0.000000e+00> : vector<16x4xf32>
    %72 = vector.multi_reduction <add>, %71, %cst_24 [1] : vector<16x8x4xf32> to vector<16x4xf32>
    %c16 = arith.constant 16 : index
    %c0_25 = arith.constant 0 : index
    %73 = vector.load %arg5[%c16, %c0_25] : memref<20x4xf32, #tpu.memory_space<vmem>>, vector<4x4xf32>
    %cst_26 = arith.constant dense<0.000000e+00> : vector<16x4xf32>
    %74 = tpu.matmul %72, %73, %cst_26 {dimension_numbers = #tpu.dot_dimension_numbers<[1], [0], [0], [1], [0, 0, 1, 1], [], []>} : vector<16x4xf32>, vector<4x4xf32>, vector<16x4xf32> -> vector<16x4xf32>
    %75 = arith.addf %68, %74 : vector<16x4xf32>
    %c0_27 = arith.constant 0 : index
    %c0_28 = arith.constant 0 : index
    %76 = vector.load %arg6[%c0_27, %c0_28] : memref<1x4xf32, #tpu.memory_space<vmem>>, vector<1x4xf32>
    %77 = vector.broadcast %76 : vector<1x4xf32> to vector<16x4xf32>
    %78 = arith.mulf %75, %77 : vector<16x4xf32>
    %c0_29 = arith.constant 0 : index
    %c0_30 = arith.constant 0 : index
    %79 = vector.load %arg7[%c0_29, %c0_30] : memref<1x4xf32, #tpu.memory_space<vmem>>, vector<1x4xf32>
    %80 = vector.broadcast %79 : vector<1x4xf32> to vector<16x4xf32>
    %81 = arith.addf %78, %80 : vector<16x4xf32>
    %cst_31 = arith.constant 0.000000e+00 : f32
    %82 = vector.broadcast %cst_31 : f32 to vector<16x4xf32>
    %83 = arith.maximumf %81, %82 : vector<16x4xf32>
    %c0_32 = arith.constant 0 : index
    %c0_33 = arith.constant 0 : index
    %c0_34 = arith.constant 0 : index
    %84 = vector.load %arg8[%c0_32, %c0_33, %c0_34] : memref<1x16x4xf32, #tpu.memory_space<vmem>>, vector<1x16x4xf32>
    %85 = vector.shape_cast %84 : vector<1x16x4xf32> to vector<16x4xf32>
    %86 = vector.shape_cast %83 : vector<16x4xf32> to vector<1x16x4xf32>
    tpu.vector_store %arg8[%c0_32, %c0_33, %c0_34], %86 {strides = array<i32>} : memref<1x16x4xf32, #tpu.memory_space<vmem>>, vector<1x16x4xf32>,
    return
  }
  func.func @transform_0(%arg0: i32, %arg1: i32) -> (i32, i32, i32) {
    %c0_i32 = arith.constant 0 : i32
    %c0_i32_0 = arith.constant 0 : i32
    return %arg0, %arg1, %c0_i32 : i32, i32, i32
  }
  func.func @transform_1(%arg0: i32, %arg1: i32) -> (i32, i32, i32, i32) {
    %c0_i32 = arith.constant 0 : i32
    %c0_i32_0 = arith.constant 0 : i32
    %c0_i32_1 = arith.constant 0 : i32
    return %arg0, %arg1, %c0_i32, %c0_i32_0 : i32, i32, i32, i32
  }
  func.func @transform_2(%arg0: i32, %arg1: i32) -> (i32, i32) {
    %c0_i32 = arith.constant 0 : i32
    %c0_i32_0 = arith.constant 0 : i32
    %c0_i32_1 = arith.constant 0 : i32
    return %c0_i32, %c0_i32_0 : i32, i32
  }
  func.func @transform_3(%arg0: i32, %arg1: i32) -> (i32, i32) {
    %c0_i32 = arith.constant 0 : i32
    %c0_i32_0 = arith.constant 0 : i32
    %c0_i32_1 = arith.constant 0 : i32
    return %c0_i32, %c0_i32_0 : i32, i32
  }
  func.func @transform_4(%arg0: i32, %arg1: i32) -> (i32, i32) {
    %c0_i32 = arith.constant 0 : i32
    %c0_i32_0 = arith.constant 0 : i32
    %c0_i32_1 = arith.constant 0 : i32
    return %c0_i32, %c0_i32_0 : i32, i32
  }
  func.func @transform_5(%arg0: i32, %arg1: i32) -> (i32, i32) {
    %c0_i32 = arith.constant 0 : i32
    %c0_i32_0 = arith.constant 0 : i32
    %c0_i32_1 = arith.constant 0 : i32
    return %c0_i32, %c0_i32_0 : i32, i32
  }
  func.func @transform_6(%arg0: i32, %arg1: i32) -> (i32, i32, i32) {
    %c0_i32 = arith.constant 0 : i32
    %c0_i32_0 = arith.constant 0 : i32
    return %arg0, %arg1, %c0_i32 : i32, i32, i32
  }
}

module attributes {stable_mosaic.version = 11 : i64} {
  func.func @_pointconv_kernel(%arg0: i32, %arg1: i32, %arg2: memref<1x16x24xf32, #tpu.memory_space<vmem>>, %arg3: memref<1x16x8x4xf32, #tpu.memory_space<vmem>>, %arg4: memref<3x5xf32, #tpu.memory_space<vmem>>, %arg5: memref<20x2xf32, #tpu.memory_space<vmem>>, %arg6: memref<1x2xf32, #tpu.memory_space<vmem>>, %arg7: memref<1x2xf32, #tpu.memory_space<vmem>>, %arg8: memref<1x16x2xf32, #tpu.memory_space<vmem>>) attributes {dimension_semantics = [#tpu.dimension_semantics<parallel>, #tpu.dimension_semantics<parallel>], iteration_bounds = array<i64: 2, 1>, scalar_prefetch = 0 : i64, scratch_operands = 0 : i64, tpu.core_type = #tpu.core_type<tc>, window_params = [{transform_indices = @transform_0, window_bounds = array<i64: 1, 16, 24>}, {transform_indices = @transform_1, window_bounds = array<i64: 1, 16, 8, 4>}, {pipeline_mode = #tpu.pipeline_mode<synchronous>, transform_indices = @transform_2, window_bounds = array<i64: 3, 5>}, {pipeline_mode = #tpu.pipeline_mode<synchronous>, transform_indices = @transform_3, window_bounds = array<i64: 20, 2>}, {pipeline_mode = #tpu.pipeline_mode<synchronous>, transform_indices = @transform_4, window_bounds = array<i64: 1, 2>}, {pipeline_mode = #tpu.pipeline_mode<synchronous>, transform_indices = @transform_5, window_bounds = array<i64: 1, 2>}, {transform_indices = @transform_6, window_bounds = array<i64: 1, 16, 2>}]} {
    %c0 = arith.constant 0 : index
    %c0_0 = arith.constant 0 : index
    %c0_1 = arith.constant 0 : index
    %0 = vector.load %arg2[%c0, %c0_0, %c0_1] : memref<1x16x24xf32, #tpu.memory_space<vmem>>, vector<1x16x24xf32>
    %1 = vector.shape_cast %0 : vector<1x16x24xf32> to vector<16x24xf32>
    %c0_2 = arith.constant 0 : index
    %c0_3 = arith.constant 0 : index
    %c0_4 = arith.constant 0 : index
    %c0_5 = arith.constant 0 : index
    %2 = vector.load %arg3[%c0_2, %c0_3, %c0_4, %c0_5] : memref<1x16x8x4xf32, #tpu.memory_space<vmem>>, vector<1x16x8x4xf32>
    %3 = vector.shape_cast %2 : vector<1x16x8x4xf32> to vector<16x8x4xf32>
    %c0_6 = arith.constant 0 : index
    %c0_7 = arith.constant 0 : index
    %4 = vector.load %arg4[%c0_6, %c0_7] : memref<3x5xf32, #tpu.memory_space<vmem>>, vector<3x5xf32>
    %cst = arith.constant 0.000000e+00 : f32
    %5 = vector.broadcast %cst : f32 to vector<16x8x5xf32>
    %6 = vector.extract_strided_slice %1 {offsets = [0, 0], sizes = [16, 8], strides = [1, 1]} : vector<16x24xf32> to vector<16x8xf32>
    %7 = vector.extract_strided_slice %4 {offsets = [0, 0], sizes = [1, 5], strides = [1, 1]} : vector<3x5xf32> to vector<1x5xf32>
    %8 = vector.shape_cast %6 : vector<16x8xf32> to vector<16x8x1xf32>
    %9 = vector.shape_cast %7 : vector<1x5xf32> to vector<1x1x5xf32>
    %10 = vector.broadcast %8 : vector<16x8x1xf32> to vector<16x8x5xf32>
    %11 = vector.broadcast %9 : vector<1x1x5xf32> to vector<16x8x5xf32>
    %12 = arith.mulf %10, %11 : vector<16x8x5xf32>
    %13 = arith.addf %5, %12 : vector<16x8x5xf32>
    %14 = vector.extract_strided_slice %1 {offsets = [0, 8], sizes = [16, 8], strides = [1, 1]} : vector<16x24xf32> to vector<16x8xf32>
    %15 = vector.extract_strided_slice %4 {offsets = [1, 0], sizes = [1, 5], strides = [1, 1]} : vector<3x5xf32> to vector<1x5xf32>
    %16 = vector.shape_cast %14 : vector<16x8xf32> to vector<16x8x1xf32>
    %17 = vector.shape_cast %15 : vector<1x5xf32> to vector<1x1x5xf32>
    %18 = vector.broadcast %16 : vector<16x8x1xf32> to vector<16x8x5xf32>
    %19 = vector.broadcast %17 : vector<1x1x5xf32> to vector<16x8x5xf32>
    %20 = arith.mulf %18, %19 : vector<16x8x5xf32>
    %21 = arith.addf %13, %20 : vector<16x8x5xf32>
    %22 = vector.extract_strided_slice %1 {offsets = [0, 16], sizes = [16, 8], strides = [1, 1]} : vector<16x24xf32> to vector<16x8xf32>
    %23 = vector.extract_strided_slice %4 {offsets = [2, 0], sizes = [1, 5], strides = [1, 1]} : vector<3x5xf32> to vector<1x5xf32>
    %24 = vector.shape_cast %22 : vector<16x8xf32> to vector<16x8x1xf32>
    %25 = vector.shape_cast %23 : vector<1x5xf32> to vector<1x1x5xf32>
    %26 = vector.broadcast %24 : vector<16x8x1xf32> to vector<16x8x5xf32>
    %27 = vector.broadcast %25 : vector<1x1x5xf32> to vector<16x8x5xf32>
    %28 = arith.mulf %26, %27 : vector<16x8x5xf32>
    %29 = arith.addf %21, %28 : vector<16x8x5xf32>
    %cst_8 = arith.constant dense<0xFF800000> : vector<16x8xf32>
    %30 = vector.multi_reduction <maximumf>, %29, %cst_8 [2] : vector<16x8x5xf32> to vector<16x8xf32>
    %31 = vector.shape_cast %30 : vector<16x8xf32> to vector<16x8x1xf32>
    %32 = vector.broadcast %31 : vector<16x8x1xf32> to vector<16x8x5xf32>
    %33 = arith.subf %29, %32 : vector<16x8x5xf32>
    %34 = math.exp %33 : vector<16x8x5xf32>
    %cst_9 = arith.constant dense<0.000000e+00> : vector<16x8xf32>
    %35 = vector.multi_reduction <add>, %34, %cst_9 [2] : vector<16x8x5xf32> to vector<16x8xf32>
    %36 = vector.shape_cast %35 : vector<16x8xf32> to vector<16x8x1xf32>
    %37 = tpu.reciprocal %36 {approx = true} : vector<16x8x1xf32> -> vector<16x8x1xf32>
    %38 = vector.broadcast %37 : vector<16x8x1xf32> to vector<16x8x5xf32>
    %39 = arith.mulf %34, %38 : vector<16x8x5xf32>
    %cst_10 = arith.constant 0.000000e+00 : f32
    %40 = vector.broadcast %cst_10 : f32 to vector<16x2xf32>
    %41 = vector.extract_strided_slice %39 {offsets = [0, 0, 0], sizes = [16, 8, 1], strides = [1, 1, 1]} : vector<16x8x5xf32> to vector<16x8x1xf32>
    %42 = vector.broadcast %41 : vector<16x8x1xf32> to vector<16x8x4xf32>
    %43 = arith.mulf %42, %3 : vector<16x8x4xf32>
    %cst_11 = arith.constant dense<0.000000e+00> : vector<16x4xf32>
    %44 = vector.multi_reduction <add>, %43, %cst_11 [1] : vector<16x8x4xf32> to vector<16x4xf32>
    %c0_12 = arith.constant 0 : index
    %c0_13 = arith.constant 0 : index
    %45 = vector.load %arg5[%c0_12, %c0_13] : memref<20x2xf32, #tpu.memory_space<vmem>>, vector<4x2xf32>
    %cst_14 = arith.constant dense<0.000000e+00> : vector<16x2xf32>
    %46 = tpu.matmul %44, %45, %cst_14 {dimension_numbers = #tpu.dot_dimension_numbers<[1], [0], [0], [1], [0, 0, 1, 1], [], []>} : vector<16x4xf32>, vector<4x2xf32>, vector<16x2xf32> -> vector<16x2xf32>
    %47 = arith.addf %40, %46 : vector<16x2xf32>
    %48 = vector.extract_strided_slice %39 {offsets = [0, 0, 1], sizes = [16, 8, 1], strides = [1, 1, 1]} : vector<16x8x5xf32> to vector<16x8x1xf32>
    %49 = vector.broadcast %48 : vector<16x8x1xf32> to vector<16x8x4xf32>
    %50 = arith.mulf %49, %3 : vector<16x8x4xf32>
    %cst_15 = arith.constant dense<0.000000e+00> : vector<16x4xf32>
    %51 = vector.multi_reduction <add>, %50, %cst_15 [1] : vector<16x8x4xf32> to vector<16x4xf32>
    %c4 = arith.constant 4 : index
    %c0_16 = arith.constant 0 : index
    %52 = vector.load %arg5[%c4, %c0_16] : memref<20x2xf32, #tpu.memory_space<vmem>>, vector<4x2xf32>
    %cst_17 = arith.constant dense<0.000000e+00> : vector<16x2xf32>
    %53 = tpu.matmul %51, %52, %cst_17 {dimension_numbers = #tpu.dot_dimension_numbers<[1], [0], [0], [1], [0, 0, 1, 1], [], []>} : vector<16x4xf32>, vector<4x2xf32>, vector<16x2xf32> -> vector<16x2xf32>
    %54 = arith.addf %47, %53 : vector<16x2xf32>
    %55 = vector.extract_strided_slice %39 {offsets = [0, 0, 2], sizes = [16, 8, 1], strides = [1, 1, 1]} : vector<16x8x5xf32> to vector<16x8x1xf32>
    %56 = vector.broadcast %55 : vector<16x8x1xf32> to vector<16x8x4xf32>
    %57 = arith.mulf %56, %3 : vector<16x8x4xf32>
    %cst_18 = arith.constant dense<0.000000e+00> : vector<16x4xf32>
    %58 = vector.multi_reduction <add>, %57, %cst_18 [1] : vector<16x8x4xf32> to vector<16x4xf32>
    %c8 = arith.constant 8 : index
    %c0_19 = arith.constant 0 : index
    %59 = vector.load %arg5[%c8, %c0_19] : memref<20x2xf32, #tpu.memory_space<vmem>>, vector<4x2xf32>
    %cst_20 = arith.constant dense<0.000000e+00> : vector<16x2xf32>
    %60 = tpu.matmul %58, %59, %cst_20 {dimension_numbers = #tpu.dot_dimension_numbers<[1], [0], [0], [1], [0, 0, 1, 1], [], []>} : vector<16x4xf32>, vector<4x2xf32>, vector<16x2xf32> -> vector<16x2xf32>
    %61 = arith.addf %54, %60 : vector<16x2xf32>
    %62 = vector.extract_strided_slice %39 {offsets = [0, 0, 3], sizes = [16, 8, 1], strides = [1, 1, 1]} : vector<16x8x5xf32> to vector<16x8x1xf32>
    %63 = vector.broadcast %62 : vector<16x8x1xf32> to vector<16x8x4xf32>
    %64 = arith.mulf %63, %3 : vector<16x8x4xf32>
    %cst_21 = arith.constant dense<0.000000e+00> : vector<16x4xf32>
    %65 = vector.multi_reduction <add>, %64, %cst_21 [1] : vector<16x8x4xf32> to vector<16x4xf32>
    %c12 = arith.constant 12 : index
    %c0_22 = arith.constant 0 : index
    %66 = vector.load %arg5[%c12, %c0_22] : memref<20x2xf32, #tpu.memory_space<vmem>>, vector<4x2xf32>
    %cst_23 = arith.constant dense<0.000000e+00> : vector<16x2xf32>
    %67 = tpu.matmul %65, %66, %cst_23 {dimension_numbers = #tpu.dot_dimension_numbers<[1], [0], [0], [1], [0, 0, 1, 1], [], []>} : vector<16x4xf32>, vector<4x2xf32>, vector<16x2xf32> -> vector<16x2xf32>
    %68 = arith.addf %61, %67 : vector<16x2xf32>
    %69 = vector.extract_strided_slice %39 {offsets = [0, 0, 4], sizes = [16, 8, 1], strides = [1, 1, 1]} : vector<16x8x5xf32> to vector<16x8x1xf32>
    %70 = vector.broadcast %69 : vector<16x8x1xf32> to vector<16x8x4xf32>
    %71 = arith.mulf %70, %3 : vector<16x8x4xf32>
    %cst_24 = arith.constant dense<0.000000e+00> : vector<16x4xf32>
    %72 = vector.multi_reduction <add>, %71, %cst_24 [1] : vector<16x8x4xf32> to vector<16x4xf32>
    %c16 = arith.constant 16 : index
    %c0_25 = arith.constant 0 : index
    %73 = vector.load %arg5[%c16, %c0_25] : memref<20x2xf32, #tpu.memory_space<vmem>>, vector<4x2xf32>
    %cst_26 = arith.constant dense<0.000000e+00> : vector<16x2xf32>
    %74 = tpu.matmul %72, %73, %cst_26 {dimension_numbers = #tpu.dot_dimension_numbers<[1], [0], [0], [1], [0, 0, 1, 1], [], []>} : vector<16x4xf32>, vector<4x2xf32>, vector<16x2xf32> -> vector<16x2xf32>
    %75 = arith.addf %68, %74 : vector<16x2xf32>
    %c0_27 = arith.constant 0 : index
    %c0_28 = arith.constant 0 : index
    %76 = vector.load %arg6[%c0_27, %c0_28] : memref<1x2xf32, #tpu.memory_space<vmem>>, vector<1x2xf32>
    %77 = vector.broadcast %76 : vector<1x2xf32> to vector<16x2xf32>
    %78 = arith.mulf %75, %77 : vector<16x2xf32>
    %c0_29 = arith.constant 0 : index
    %c0_30 = arith.constant 0 : index
    %79 = vector.load %arg7[%c0_29, %c0_30] : memref<1x2xf32, #tpu.memory_space<vmem>>, vector<1x2xf32>
    %80 = vector.broadcast %79 : vector<1x2xf32> to vector<16x2xf32>
    %81 = arith.addf %78, %80 : vector<16x2xf32>
    %c0_31 = arith.constant 0 : index
    %c0_32 = arith.constant 0 : index
    %c0_33 = arith.constant 0 : index
    %82 = vector.load %arg8[%c0_31, %c0_32, %c0_33] : memref<1x16x2xf32, #tpu.memory_space<vmem>>, vector<1x16x2xf32>
    %83 = vector.shape_cast %82 : vector<1x16x2xf32> to vector<16x2xf32>
    %84 = vector.shape_cast %81 : vector<16x2xf32> to vector<1x16x2xf32>
    tpu.vector_store %arg8[%c0_31, %c0_32, %c0_33], %84 {strides = array<i32>} : memref<1x16x2xf32, #tpu.memory_space<vmem>>, vector<1x16x2xf32>,
    return
  }
  func.func @transform_0(%arg0: i32, %arg1: i32) -> (i32, i32, i32) {
    %c0_i32 = arith.constant 0 : i32
    %c0_i32_0 = arith.constant 0 : i32
    return %arg0, %arg1, %c0_i32 : i32, i32, i32
  }
  func.func @transform_1(%arg0: i32, %arg1: i32) -> (i32, i32, i32, i32) {
    %c0_i32 = arith.constant 0 : i32
    %c0_i32_0 = arith.constant 0 : i32
    %c0_i32_1 = arith.constant 0 : i32
    return %arg0, %arg1, %c0_i32, %c0_i32_0 : i32, i32, i32, i32
  }
  func.func @transform_2(%arg0: i32, %arg1: i32) -> (i32, i32) {
    %c0_i32 = arith.constant 0 : i32
    %c0_i32_0 = arith.constant 0 : i32
    %c0_i32_1 = arith.constant 0 : i32
    return %c0_i32, %c0_i32_0 : i32, i32
  }
  func.func @transform_3(%arg0: i32, %arg1: i32) -> (i32, i32) {
    %c0_i32 = arith.constant 0 : i32
    %c0_i32_0 = arith.constant 0 : i32
    %c0_i32_1 = arith.constant 0 : i32
    return %c0_i32, %c0_i32_0 : i32, i32
  }
  func.func @transform_4(%arg0: i32, %arg1: i32) -> (i32, i32) {
    %c0_i32 = arith.constant 0 : i32
    %c0_i32_0 = arith.constant 0 : i32
    %c0_i32_1 = arith.constant 0 : i32
    return %c0_i32, %c0_i32_0 : i32, i32
  }
  func.func @transform_5(%arg0: i32, %arg1: i32) -> (i32, i32) {
    %c0_i32 = arith.constant 0 : i32
    %c0_i32_0 = arith.constant 0 : i32
    %c0_i32_1 = arith.constant 0 : i32
    return %c0_i32, %c0_i32_0 : i32, i32
  }
  func.func @transform_6(%arg0: i32, %arg1: i32) -> (i32, i32, i32) {
    %c0_i32 = arith.constant 0 : i32
    %c0_i32_0 = arith.constant 0 : i32
    return %arg0, %arg1, %c0_i32 : i32, i32, i32
  }
}

module attributes {stable_mosaic.version = 11 : i64} {
  func.func @_pointconv_kernel(%arg0: i32, %arg1: i32, %arg2: memref<1x16x24xf32, #tpu.memory_space<vmem>>, %arg3: memref<1x16x8x16xf32, #tpu.memory_space<vmem>>, %arg4: memref<3x5xf32, #tpu.memory_space<vmem>>, %arg5: memref<80x32xf32, #tpu.memory_space<vmem>>, %arg6: memref<1x32xf32, #tpu.memory_space<vmem>>, %arg7: memref<1x32xf32, #tpu.memory_space<vmem>>, %arg8: memref<1x32xf32, #tpu.memory_space<vmem>>, %arg9: memref<1x32xf32, #tpu.memory_space<vmem>>, %arg10: memref<1x16x1xf32, #tpu.memory_space<vmem>>, %arg11: memref<1x16x32xf32, #tpu.memory_space<vmem>>) attributes {dimension_semantics = [#tpu.dimension_semantics<parallel>, #tpu.dimension_semantics<parallel>], iteration_bounds = array<i64: 2, 1>, scalar_prefetch = 0 : i64, scratch_operands = 0 : i64, tpu.core_type = #tpu.core_type<tc>, window_params = [{transform_indices = @transform_0, window_bounds = array<i64: 1, 16, 24>}, {transform_indices = @transform_1, window_bounds = array<i64: 1, 16, 8, 16>}, {pipeline_mode = #tpu.pipeline_mode<synchronous>, transform_indices = @transform_2, window_bounds = array<i64: 3, 5>}, {pipeline_mode = #tpu.pipeline_mode<synchronous>, transform_indices = @transform_3, window_bounds = array<i64: 80, 32>}, {pipeline_mode = #tpu.pipeline_mode<synchronous>, transform_indices = @transform_4, window_bounds = array<i64: 1, 32>}, {pipeline_mode = #tpu.pipeline_mode<synchronous>, transform_indices = @transform_5, window_bounds = array<i64: 1, 32>}, {pipeline_mode = #tpu.pipeline_mode<synchronous>, transform_indices = @transform_6, window_bounds = array<i64: 1, 32>}, {pipeline_mode = #tpu.pipeline_mode<synchronous>, transform_indices = @transform_7, window_bounds = array<i64: 1, 32>}, {transform_indices = @transform_8, window_bounds = array<i64: 1, 16, 1>}, {transform_indices = @transform_9, window_bounds = array<i64: 1, 16, 32>}]} {
    %c0 = arith.constant 0 : index
    %c0_0 = arith.constant 0 : index
    %c0_1 = arith.constant 0 : index
    %0 = vector.load %arg2[%c0, %c0_0, %c0_1] : memref<1x16x24xf32, #tpu.memory_space<vmem>>, vector<1x16x24xf32>
    %1 = vector.shape_cast %0 : vector<1x16x24xf32> to vector<16x24xf32>
    %c0_2 = arith.constant 0 : index
    %c0_3 = arith.constant 0 : index
    %c0_4 = arith.constant 0 : index
    %c0_5 = arith.constant 0 : index
    %2 = vector.load %arg3[%c0_2, %c0_3, %c0_4, %c0_5] : memref<1x16x8x16xf32, #tpu.memory_space<vmem>>, vector<1x16x8x16xf32>
    %3 = vector.shape_cast %2 : vector<1x16x8x16xf32> to vector<16x8x16xf32>
    %c0_6 = arith.constant 0 : index
    %c0_7 = arith.constant 0 : index
    %4 = vector.load %arg4[%c0_6, %c0_7] : memref<3x5xf32, #tpu.memory_space<vmem>>, vector<3x5xf32>
    %cst = arith.constant 0.000000e+00 : f32
    %5 = vector.broadcast %cst : f32 to vector<16x8x5xf32>
    %6 = vector.extract_strided_slice %1 {offsets = [0, 0], sizes = [16, 8], strides = [1, 1]} : vector<16x24xf32> to vector<16x8xf32>
    %7 = vector.extract_strided_slice %4 {offsets = [0, 0], sizes = [1, 5], strides = [1, 1]} : vector<3x5xf32> to vector<1x5xf32>
    %8 = vector.shape_cast %6 : vector<16x8xf32> to vector<16x8x1xf32>
    %9 = vector.shape_cast %7 : vector<1x5xf32> to vector<1x1x5xf32>
    %10 = vector.broadcast %8 : vector<16x8x1xf32> to vector<16x8x5xf32>
    %11 = vector.broadcast %9 : vector<1x1x5xf32> to vector<16x8x5xf32>
    %12 = arith.mulf %10, %11 : vector<16x8x5xf32>
    %13 = arith.addf %5, %12 : vector<16x8x5xf32>
    %14 = vector.extract_strided_slice %1 {offsets = [0, 8], sizes = [16, 8], strides = [1, 1]} : vector<16x24xf32> to vector<16x8xf32>
    %15 = vector.extract_strided_slice %4 {offsets = [1, 0], sizes = [1, 5], strides = [1, 1]} : vector<3x5xf32> to vector<1x5xf32>
    %16 = vector.shape_cast %14 : vector<16x8xf32> to vector<16x8x1xf32>
    %17 = vector.shape_cast %15 : vector<1x5xf32> to vector<1x1x5xf32>
    %18 = vector.broadcast %16 : vector<16x8x1xf32> to vector<16x8x5xf32>
    %19 = vector.broadcast %17 : vector<1x1x5xf32> to vector<16x8x5xf32>
    %20 = arith.mulf %18, %19 : vector<16x8x5xf32>
    %21 = arith.addf %13, %20 : vector<16x8x5xf32>
    %22 = vector.extract_strided_slice %1 {offsets = [0, 16], sizes = [16, 8], strides = [1, 1]} : vector<16x24xf32> to vector<16x8xf32>
    %23 = vector.extract_strided_slice %4 {offsets = [2, 0], sizes = [1, 5], strides = [1, 1]} : vector<3x5xf32> to vector<1x5xf32>
    %24 = vector.shape_cast %22 : vector<16x8xf32> to vector<16x8x1xf32>
    %25 = vector.shape_cast %23 : vector<1x5xf32> to vector<1x1x5xf32>
    %26 = vector.broadcast %24 : vector<16x8x1xf32> to vector<16x8x5xf32>
    %27 = vector.broadcast %25 : vector<1x1x5xf32> to vector<16x8x5xf32>
    %28 = arith.mulf %26, %27 : vector<16x8x5xf32>
    %29 = arith.addf %21, %28 : vector<16x8x5xf32>
    %cst_8 = arith.constant dense<0xFF800000> : vector<16x8xf32>
    %30 = vector.multi_reduction <maximumf>, %29, %cst_8 [2] : vector<16x8x5xf32> to vector<16x8xf32>
    %31 = vector.shape_cast %30 : vector<16x8xf32> to vector<16x8x1xf32>
    %32 = vector.broadcast %31 : vector<16x8x1xf32> to vector<16x8x5xf32>
    %33 = arith.subf %29, %32 : vector<16x8x5xf32>
    %34 = math.exp %33 : vector<16x8x5xf32>
    %cst_9 = arith.constant dense<0.000000e+00> : vector<16x8xf32>
    %35 = vector.multi_reduction <add>, %34, %cst_9 [2] : vector<16x8x5xf32> to vector<16x8xf32>
    %36 = vector.shape_cast %35 : vector<16x8xf32> to vector<16x8x1xf32>
    %37 = tpu.reciprocal %36 {approx = true} : vector<16x8x1xf32> -> vector<16x8x1xf32>
    %38 = vector.broadcast %37 : vector<16x8x1xf32> to vector<16x8x5xf32>
    %39 = arith.mulf %34, %38 : vector<16x8x5xf32>
    %cst_10 = arith.constant 0.000000e+00 : f32
    %40 = vector.broadcast %cst_10 : f32 to vector<16x32xf32>
    %41 = vector.extract_strided_slice %39 {offsets = [0, 0, 0], sizes = [16, 8, 1], strides = [1, 1, 1]} : vector<16x8x5xf32> to vector<16x8x1xf32>
    %42 = vector.broadcast %41 : vector<16x8x1xf32> to vector<16x8x16xf32>
    %43 = arith.mulf %42, %3 : vector<16x8x16xf32>
    %cst_11 = arith.constant dense<0.000000e+00> : vector<16x16xf32>
    %44 = vector.multi_reduction <add>, %43, %cst_11 [1] : vector<16x8x16xf32> to vector<16x16xf32>
    %c0_12 = arith.constant 0 : index
    %c0_13 = arith.constant 0 : index
    %45 = vector.load %arg5[%c0_12, %c0_13] : memref<80x32xf32, #tpu.memory_space<vmem>>, vector<16x32xf32>
    %cst_14 = arith.constant dense<0.000000e+00> : vector<16x32xf32>
    %46 = tpu.matmul %44, %45, %cst_14 {dimension_numbers = #tpu.dot_dimension_numbers<[1], [0], [0], [1], [0, 0, 1, 1], [], []>} : vector<16x16xf32>, vector<16x32xf32>, vector<16x32xf32> -> vector<16x32xf32>
    %47 = arith.addf %40, %46 : vector<16x32xf32>
    %48 = vector.extract_strided_slice %39 {offsets = [0, 0, 1], sizes = [16, 8, 1], strides = [1, 1, 1]} : vector<16x8x5xf32> to vector<16x8x1xf32>
    %49 = vector.broadcast %48 : vector<16x8x1xf32> to vector<16x8x16xf32>
    %50 = arith.mulf %49, %3 : vector<16x8x16xf32>
    %cst_15 = arith.constant dense<0.000000e+00> : vector<16x16xf32>
    %51 = vector.multi_reduction <add>, %50, %cst_15 [1] : vector<16x8x16xf32> to vector<16x16xf32>
    %c16 = arith.constant 16 : index
    %c0_16 = arith.constant 0 : index
    %52 = vector.load %arg5[%c16, %c0_16] : memref<80x32xf32, #tpu.memory_space<vmem>>, vector<16x32xf32>
    %cst_17 = arith.constant dense<0.000000e+00> : vector<16x32xf32>
    %53 = tpu.matmul %51, %52, %cst_17 {dimension_numbers = #tpu.dot_dimension_numbers<[1], [0], [0], [1], [0, 0, 1, 1], [], []>} : vector<16x16xf32>, vector<16x32xf32>, vector<16x32xf32> -> vector<16x32xf32>
    %54 = arith.addf %47, %53 : vector<16x32xf32>
    %55 = vector.extract_strided_slice %39 {offsets = [0, 0, 2], sizes = [16, 8, 1], strides = [1, 1, 1]} : vector<16x8x5xf32> to vector<16x8x1xf32>
    %56 = vector.broadcast %55 : vector<16x8x1xf32> to vector<16x8x16xf32>
    %57 = arith.mulf %56, %3 : vector<16x8x16xf32>
    %cst_18 = arith.constant dense<0.000000e+00> : vector<16x16xf32>
    %58 = vector.multi_reduction <add>, %57, %cst_18 [1] : vector<16x8x16xf32> to vector<16x16xf32>
    %c32 = arith.constant 32 : index
    %c0_19 = arith.constant 0 : index
    %59 = vector.load %arg5[%c32, %c0_19] : memref<80x32xf32, #tpu.memory_space<vmem>>, vector<16x32xf32>
    %cst_20 = arith.constant dense<0.000000e+00> : vector<16x32xf32>
    %60 = tpu.matmul %58, %59, %cst_20 {dimension_numbers = #tpu.dot_dimension_numbers<[1], [0], [0], [1], [0, 0, 1, 1], [], []>} : vector<16x16xf32>, vector<16x32xf32>, vector<16x32xf32> -> vector<16x32xf32>
    %61 = arith.addf %54, %60 : vector<16x32xf32>
    %62 = vector.extract_strided_slice %39 {offsets = [0, 0, 3], sizes = [16, 8, 1], strides = [1, 1, 1]} : vector<16x8x5xf32> to vector<16x8x1xf32>
    %63 = vector.broadcast %62 : vector<16x8x1xf32> to vector<16x8x16xf32>
    %64 = arith.mulf %63, %3 : vector<16x8x16xf32>
    %cst_21 = arith.constant dense<0.000000e+00> : vector<16x16xf32>
    %65 = vector.multi_reduction <add>, %64, %cst_21 [1] : vector<16x8x16xf32> to vector<16x16xf32>
    %c48 = arith.constant 48 : index
    %c0_22 = arith.constant 0 : index
    %66 = vector.load %arg5[%c48, %c0_22] : memref<80x32xf32, #tpu.memory_space<vmem>>, vector<16x32xf32>
    %cst_23 = arith.constant dense<0.000000e+00> : vector<16x32xf32>
    %67 = tpu.matmul %65, %66, %cst_23 {dimension_numbers = #tpu.dot_dimension_numbers<[1], [0], [0], [1], [0, 0, 1, 1], [], []>} : vector<16x16xf32>, vector<16x32xf32>, vector<16x32xf32> -> vector<16x32xf32>
    %68 = arith.addf %61, %67 : vector<16x32xf32>
    %69 = vector.extract_strided_slice %39 {offsets = [0, 0, 4], sizes = [16, 8, 1], strides = [1, 1, 1]} : vector<16x8x5xf32> to vector<16x8x1xf32>
    %70 = vector.broadcast %69 : vector<16x8x1xf32> to vector<16x8x16xf32>
    %71 = arith.mulf %70, %3 : vector<16x8x16xf32>
    %cst_24 = arith.constant dense<0.000000e+00> : vector<16x16xf32>
    %72 = vector.multi_reduction <add>, %71, %cst_24 [1] : vector<16x8x16xf32> to vector<16x16xf32>
    %c64 = arith.constant 64 : index
    %c0_25 = arith.constant 0 : index
    %73 = vector.load %arg5[%c64, %c0_25] : memref<80x32xf32, #tpu.memory_space<vmem>>, vector<16x32xf32>
    %cst_26 = arith.constant dense<0.000000e+00> : vector<16x32xf32>
    %74 = tpu.matmul %72, %73, %cst_26 {dimension_numbers = #tpu.dot_dimension_numbers<[1], [0], [0], [1], [0, 0, 1, 1], [], []>} : vector<16x16xf32>, vector<16x32xf32>, vector<16x32xf32> -> vector<16x32xf32>
    %75 = arith.addf %68, %74 : vector<16x32xf32>
    %c0_27 = arith.constant 0 : index
    %c0_28 = arith.constant 0 : index
    %76 = vector.load %arg6[%c0_27, %c0_28] : memref<1x32xf32, #tpu.memory_space<vmem>>, vector<1x32xf32>
    %77 = vector.broadcast %76 : vector<1x32xf32> to vector<16x32xf32>
    %78 = arith.mulf %75, %77 : vector<16x32xf32>
    %c0_29 = arith.constant 0 : index
    %c0_30 = arith.constant 0 : index
    %79 = vector.load %arg7[%c0_29, %c0_30] : memref<1x32xf32, #tpu.memory_space<vmem>>, vector<1x32xf32>
    %80 = vector.broadcast %79 : vector<1x32xf32> to vector<16x32xf32>
    %81 = arith.addf %78, %80 : vector<16x32xf32>
    %cst_31 = arith.constant 0.000000e+00 : f32
    %82 = vector.broadcast %cst_31 : f32 to vector<16x32xf32>
    %83 = arith.maximumf %81, %82 : vector<16x32xf32>
    %c0_32 = arith.constant 0 : index
    %c0_33 = arith.constant 0 : index
    %84 = vector.load %arg9[%c0_32, %c0_33] : memref<1x32xf32, #tpu.memory_space<vmem>>, vector<1x32xf32>
    %85 = vector.broadcast %84 : vector<1x32xf32> to vector<16x32xf32>
    %86 = arith.mulf %83, %85 : vector<16x32xf32>
    %c0_34 = arith.constant 0 : index
    %c0_35 = arith.constant 0 : index
    %c0_36 = arith.constant 0 : index
    %87 = vector.load %arg10[%c0_34, %c0_35, %c0_36] : memref<1x16x1xf32, #tpu.memory_space<vmem>>, vector<1x16x1xf32>
    %88 = vector.shape_cast %87 : vector<1x16x1xf32> to vector<16x1xf32>
    %89 = vector.broadcast %88 : vector<16x1xf32> to vector<16x32xf32>
    %90 = arith.mulf %86, %89 : vector<16x32xf32>
    %c0_37 = arith.constant 0 : index
    %c0_38 = arith.constant 0 : index
    %91 = vector.load %arg8[%c0_37, %c0_38] : memref<1x32xf32, #tpu.memory_space<vmem>>, vector<1x32xf32>
    %92 = vector.broadcast %91 : vector<1x32xf32> to vector<16x32xf32>
    %93 = arith.mulf %83, %92 : vector<16x32xf32>
    %94 = arith.addf %90, %93 : vector<16x32xf32>
    %c0_39 = arith.constant 0 : index
    %c0_40 = arith.constant 0 : index
    %c0_41 = arith.constant 0 : index
    %95 = vector.load %arg11[%c0_39, %c0_40, %c0_41] : memref<1x16x32xf32, #tpu.memory_space<vmem>>, vector<1x16x32xf32>
    %96 = vector.shape_cast %95 : vector<1x16x32xf32> to vector<16x32xf32>
    %97 = vector.shape_cast %94 : vector<16x32xf32> to vector<1x16x32xf32>
    tpu.vector_store %arg11[%c0_39, %c0_40, %c0_41], %97 {strides = array<i32>} : memref<1x16x32xf32, #tpu.memory_space<vmem>>, vector<1x16x32xf32>,
    return
  }
  func.func @transform_0(%arg0: i32, %arg1: i32) -> (i32, i32, i32) {
    %c0_i32 = arith.constant 0 : i32
    %c0_i32_0 = arith.constant 0 : i32
    return %arg0, %arg1, %c0_i32 : i32, i32, i32
  }
  func.func @transform_1(%arg0: i32, %arg1: i32) -> (i32, i32, i32, i32) {
    %c0_i32 = arith.constant 0 : i32
    %c0_i32_0 = arith.constant 0 : i32
    %c0_i32_1 = arith.constant 0 : i32
    return %arg0, %arg1, %c0_i32, %c0_i32_0 : i32, i32, i32, i32
  }
  func.func @transform_2(%arg0: i32, %arg1: i32) -> (i32, i32) {
    %c0_i32 = arith.constant 0 : i32
    %c0_i32_0 = arith.constant 0 : i32
    %c0_i32_1 = arith.constant 0 : i32
    return %c0_i32, %c0_i32_0 : i32, i32
  }
  func.func @transform_3(%arg0: i32, %arg1: i32) -> (i32, i32) {
    %c0_i32 = arith.constant 0 : i32
    %c0_i32_0 = arith.constant 0 : i32
    %c0_i32_1 = arith.constant 0 : i32
    return %c0_i32, %c0_i32_0 : i32, i32
  }
  func.func @transform_4(%arg0: i32, %arg1: i32) -> (i32, i32) {
    %c0_i32 = arith.constant 0 : i32
    %c0_i32_0 = arith.constant 0 : i32
    %c0_i32_1 = arith.constant 0 : i32
    return %c0_i32, %c0_i32_0 : i32, i32
  }
  func.func @transform_5(%arg0: i32, %arg1: i32) -> (i32, i32) {
    %c0_i32 = arith.constant 0 : i32
    %c0_i32_0 = arith.constant 0 : i32
    %c0_i32_1 = arith.constant 0 : i32
    return %c0_i32, %c0_i32_0 : i32, i32
  }
  func.func @transform_6(%arg0: i32, %arg1: i32) -> (i32, i32) {
    %c0_i32 = arith.constant 0 : i32
    %c0_i32_0 = arith.constant 0 : i32
    %c0_i32_1 = arith.constant 0 : i32
    return %c0_i32, %c0_i32_0 : i32, i32
  }
  func.func @transform_7(%arg0: i32, %arg1: i32) -> (i32, i32) {
    %c0_i32 = arith.constant 0 : i32
    %c0_i32_0 = arith.constant 0 : i32
    %c0_i32_1 = arith.constant 0 : i32
    return %c0_i32, %c0_i32_0 : i32, i32
  }
  func.func @transform_8(%arg0: i32, %arg1: i32) -> (i32, i32, i32) {
    %c0_i32 = arith.constant 0 : i32
    %c0_i32_0 = arith.constant 0 : i32
    return %arg0, %arg1, %c0_i32 : i32, i32, i32
  }
  func.func @transform_9(%arg0: i32, %arg1: i32) -> (i32, i32, i32) {
    %c0_i32 = arith.constant 0 : i32
    %c0_i32_0 = arith.constant 0 : i32
    return %arg0, %arg1, %c0_i32 : i32, i32, i32
  }
}

module attributes {stable_mosaic.version = 11 : i64} {
  func.func @_pointconv_kernel(%arg0: i32, %arg1: i32, %arg2: memref<1x16x24xf32, #tpu.memory_space<vmem>>, %arg3: memref<1x16x8x32xf32, #tpu.memory_space<vmem>>, %arg4: memref<3x5xf32, #tpu.memory_space<vmem>>, %arg5: memref<160x32xf32, #tpu.memory_space<vmem>>, %arg6: memref<1x32xf32, #tpu.memory_space<vmem>>, %arg7: memref<1x32xf32, #tpu.memory_space<vmem>>, %arg8: memref<1x32xf32, #tpu.memory_space<vmem>>, %arg9: memref<1x32xf32, #tpu.memory_space<vmem>>, %arg10: memref<1x16x1xf32, #tpu.memory_space<vmem>>, %arg11: memref<1x16x32xf32, #tpu.memory_space<vmem>>) attributes {dimension_semantics = [#tpu.dimension_semantics<parallel>, #tpu.dimension_semantics<parallel>], iteration_bounds = array<i64: 2, 1>, scalar_prefetch = 0 : i64, scratch_operands = 0 : i64, tpu.core_type = #tpu.core_type<tc>, window_params = [{transform_indices = @transform_0, window_bounds = array<i64: 1, 16, 24>}, {transform_indices = @transform_1, window_bounds = array<i64: 1, 16, 8, 32>}, {pipeline_mode = #tpu.pipeline_mode<synchronous>, transform_indices = @transform_2, window_bounds = array<i64: 3, 5>}, {pipeline_mode = #tpu.pipeline_mode<synchronous>, transform_indices = @transform_3, window_bounds = array<i64: 160, 32>}, {pipeline_mode = #tpu.pipeline_mode<synchronous>, transform_indices = @transform_4, window_bounds = array<i64: 1, 32>}, {pipeline_mode = #tpu.pipeline_mode<synchronous>, transform_indices = @transform_5, window_bounds = array<i64: 1, 32>}, {pipeline_mode = #tpu.pipeline_mode<synchronous>, transform_indices = @transform_6, window_bounds = array<i64: 1, 32>}, {pipeline_mode = #tpu.pipeline_mode<synchronous>, transform_indices = @transform_7, window_bounds = array<i64: 1, 32>}, {transform_indices = @transform_8, window_bounds = array<i64: 1, 16, 1>}, {transform_indices = @transform_9, window_bounds = array<i64: 1, 16, 32>}]} {
    %c0 = arith.constant 0 : index
    %c0_0 = arith.constant 0 : index
    %c0_1 = arith.constant 0 : index
    %0 = vector.load %arg2[%c0, %c0_0, %c0_1] : memref<1x16x24xf32, #tpu.memory_space<vmem>>, vector<1x16x24xf32>
    %1 = vector.shape_cast %0 : vector<1x16x24xf32> to vector<16x24xf32>
    %c0_2 = arith.constant 0 : index
    %c0_3 = arith.constant 0 : index
    %c0_4 = arith.constant 0 : index
    %c0_5 = arith.constant 0 : index
    %2 = vector.load %arg3[%c0_2, %c0_3, %c0_4, %c0_5] : memref<1x16x8x32xf32, #tpu.memory_space<vmem>>, vector<1x16x8x32xf32>
    %3 = vector.shape_cast %2 : vector<1x16x8x32xf32> to vector<16x8x32xf32>
    %c0_6 = arith.constant 0 : index
    %c0_7 = arith.constant 0 : index
    %4 = vector.load %arg4[%c0_6, %c0_7] : memref<3x5xf32, #tpu.memory_space<vmem>>, vector<3x5xf32>
    %cst = arith.constant 0.000000e+00 : f32
    %5 = vector.broadcast %cst : f32 to vector<16x8x5xf32>
    %6 = vector.extract_strided_slice %1 {offsets = [0, 0], sizes = [16, 8], strides = [1, 1]} : vector<16x24xf32> to vector<16x8xf32>
    %7 = vector.extract_strided_slice %4 {offsets = [0, 0], sizes = [1, 5], strides = [1, 1]} : vector<3x5xf32> to vector<1x5xf32>
    %8 = vector.shape_cast %6 : vector<16x8xf32> to vector<16x8x1xf32>
    %9 = vector.shape_cast %7 : vector<1x5xf32> to vector<1x1x5xf32>
    %10 = vector.broadcast %8 : vector<16x8x1xf32> to vector<16x8x5xf32>
    %11 = vector.broadcast %9 : vector<1x1x5xf32> to vector<16x8x5xf32>
    %12 = arith.mulf %10, %11 : vector<16x8x5xf32>
    %13 = arith.addf %5, %12 : vector<16x8x5xf32>
    %14 = vector.extract_strided_slice %1 {offsets = [0, 8], sizes = [16, 8], strides = [1, 1]} : vector<16x24xf32> to vector<16x8xf32>
    %15 = vector.extract_strided_slice %4 {offsets = [1, 0], sizes = [1, 5], strides = [1, 1]} : vector<3x5xf32> to vector<1x5xf32>
    %16 = vector.shape_cast %14 : vector<16x8xf32> to vector<16x8x1xf32>
    %17 = vector.shape_cast %15 : vector<1x5xf32> to vector<1x1x5xf32>
    %18 = vector.broadcast %16 : vector<16x8x1xf32> to vector<16x8x5xf32>
    %19 = vector.broadcast %17 : vector<1x1x5xf32> to vector<16x8x5xf32>
    %20 = arith.mulf %18, %19 : vector<16x8x5xf32>
    %21 = arith.addf %13, %20 : vector<16x8x5xf32>
    %22 = vector.extract_strided_slice %1 {offsets = [0, 16], sizes = [16, 8], strides = [1, 1]} : vector<16x24xf32> to vector<16x8xf32>
    %23 = vector.extract_strided_slice %4 {offsets = [2, 0], sizes = [1, 5], strides = [1, 1]} : vector<3x5xf32> to vector<1x5xf32>
    %24 = vector.shape_cast %22 : vector<16x8xf32> to vector<16x8x1xf32>
    %25 = vector.shape_cast %23 : vector<1x5xf32> to vector<1x1x5xf32>
    %26 = vector.broadcast %24 : vector<16x8x1xf32> to vector<16x8x5xf32>
    %27 = vector.broadcast %25 : vector<1x1x5xf32> to vector<16x8x5xf32>
    %28 = arith.mulf %26, %27 : vector<16x8x5xf32>
    %29 = arith.addf %21, %28 : vector<16x8x5xf32>
    %cst_8 = arith.constant dense<0xFF800000> : vector<16x8xf32>
    %30 = vector.multi_reduction <maximumf>, %29, %cst_8 [2] : vector<16x8x5xf32> to vector<16x8xf32>
    %31 = vector.shape_cast %30 : vector<16x8xf32> to vector<16x8x1xf32>
    %32 = vector.broadcast %31 : vector<16x8x1xf32> to vector<16x8x5xf32>
    %33 = arith.subf %29, %32 : vector<16x8x5xf32>
    %34 = math.exp %33 : vector<16x8x5xf32>
    %cst_9 = arith.constant dense<0.000000e+00> : vector<16x8xf32>
    %35 = vector.multi_reduction <add>, %34, %cst_9 [2] : vector<16x8x5xf32> to vector<16x8xf32>
    %36 = vector.shape_cast %35 : vector<16x8xf32> to vector<16x8x1xf32>
    %37 = tpu.reciprocal %36 {approx = true} : vector<16x8x1xf32> -> vector<16x8x1xf32>
    %38 = vector.broadcast %37 : vector<16x8x1xf32> to vector<16x8x5xf32>
    %39 = arith.mulf %34, %38 : vector<16x8x5xf32>
    %cst_10 = arith.constant 0.000000e+00 : f32
    %40 = vector.broadcast %cst_10 : f32 to vector<16x32xf32>
    %41 = vector.extract_strided_slice %39 {offsets = [0, 0, 0], sizes = [16, 8, 1], strides = [1, 1, 1]} : vector<16x8x5xf32> to vector<16x8x1xf32>
    %42 = vector.broadcast %41 : vector<16x8x1xf32> to vector<16x8x32xf32>
    %43 = arith.mulf %42, %3 : vector<16x8x32xf32>
    %cst_11 = arith.constant dense<0.000000e+00> : vector<16x32xf32>
    %44 = vector.multi_reduction <add>, %43, %cst_11 [1] : vector<16x8x32xf32> to vector<16x32xf32>
    %c0_12 = arith.constant 0 : index
    %c0_13 = arith.constant 0 : index
    %45 = vector.load %arg5[%c0_12, %c0_13] : memref<160x32xf32, #tpu.memory_space<vmem>>, vector<32x32xf32>
    %cst_14 = arith.constant dense<0.000000e+00> : vector<16x32xf32>
    %46 = tpu.matmul %44, %45, %cst_14 {dimension_numbers = #tpu.dot_dimension_numbers<[1], [0], [0], [1], [0, 0, 1, 1], [], []>} : vector<16x32xf32>, vector<32x32xf32>, vector<16x32xf32> -> vector<16x32xf32>
    %47 = arith.addf %40, %46 : vector<16x32xf32>
    %48 = vector.extract_strided_slice %39 {offsets = [0, 0, 1], sizes = [16, 8, 1], strides = [1, 1, 1]} : vector<16x8x5xf32> to vector<16x8x1xf32>
    %49 = vector.broadcast %48 : vector<16x8x1xf32> to vector<16x8x32xf32>
    %50 = arith.mulf %49, %3 : vector<16x8x32xf32>
    %cst_15 = arith.constant dense<0.000000e+00> : vector<16x32xf32>
    %51 = vector.multi_reduction <add>, %50, %cst_15 [1] : vector<16x8x32xf32> to vector<16x32xf32>
    %c32 = arith.constant 32 : index
    %c0_16 = arith.constant 0 : index
    %52 = vector.load %arg5[%c32, %c0_16] : memref<160x32xf32, #tpu.memory_space<vmem>>, vector<32x32xf32>
    %cst_17 = arith.constant dense<0.000000e+00> : vector<16x32xf32>
    %53 = tpu.matmul %51, %52, %cst_17 {dimension_numbers = #tpu.dot_dimension_numbers<[1], [0], [0], [1], [0, 0, 1, 1], [], []>} : vector<16x32xf32>, vector<32x32xf32>, vector<16x32xf32> -> vector<16x32xf32>
    %54 = arith.addf %47, %53 : vector<16x32xf32>
    %55 = vector.extract_strided_slice %39 {offsets = [0, 0, 2], sizes = [16, 8, 1], strides = [1, 1, 1]} : vector<16x8x5xf32> to vector<16x8x1xf32>
    %56 = vector.broadcast %55 : vector<16x8x1xf32> to vector<16x8x32xf32>
    %57 = arith.mulf %56, %3 : vector<16x8x32xf32>
    %cst_18 = arith.constant dense<0.000000e+00> : vector<16x32xf32>
    %58 = vector.multi_reduction <add>, %57, %cst_18 [1] : vector<16x8x32xf32> to vector<16x32xf32>
    %c64 = arith.constant 64 : index
    %c0_19 = arith.constant 0 : index
    %59 = vector.load %arg5[%c64, %c0_19] : memref<160x32xf32, #tpu.memory_space<vmem>>, vector<32x32xf32>
    %cst_20 = arith.constant dense<0.000000e+00> : vector<16x32xf32>
    %60 = tpu.matmul %58, %59, %cst_20 {dimension_numbers = #tpu.dot_dimension_numbers<[1], [0], [0], [1], [0, 0, 1, 1], [], []>} : vector<16x32xf32>, vector<32x32xf32>, vector<16x32xf32> -> vector<16x32xf32>
    %61 = arith.addf %54, %60 : vector<16x32xf32>
    %62 = vector.extract_strided_slice %39 {offsets = [0, 0, 3], sizes = [16, 8, 1], strides = [1, 1, 1]} : vector<16x8x5xf32> to vector<16x8x1xf32>
    %63 = vector.broadcast %62 : vector<16x8x1xf32> to vector<16x8x32xf32>
    %64 = arith.mulf %63, %3 : vector<16x8x32xf32>
    %cst_21 = arith.constant dense<0.000000e+00> : vector<16x32xf32>
    %65 = vector.multi_reduction <add>, %64, %cst_21 [1] : vector<16x8x32xf32> to vector<16x32xf32>
    %c96 = arith.constant 96 : index
    %c0_22 = arith.constant 0 : index
    %66 = vector.load %arg5[%c96, %c0_22] : memref<160x32xf32, #tpu.memory_space<vmem>>, vector<32x32xf32>
    %cst_23 = arith.constant dense<0.000000e+00> : vector<16x32xf32>
    %67 = tpu.matmul %65, %66, %cst_23 {dimension_numbers = #tpu.dot_dimension_numbers<[1], [0], [0], [1], [0, 0, 1, 1], [], []>} : vector<16x32xf32>, vector<32x32xf32>, vector<16x32xf32> -> vector<16x32xf32>
    %68 = arith.addf %61, %67 : vector<16x32xf32>
    %69 = vector.extract_strided_slice %39 {offsets = [0, 0, 4], sizes = [16, 8, 1], strides = [1, 1, 1]} : vector<16x8x5xf32> to vector<16x8x1xf32>
    %70 = vector.broadcast %69 : vector<16x8x1xf32> to vector<16x8x32xf32>
    %71 = arith.mulf %70, %3 : vector<16x8x32xf32>
    %cst_24 = arith.constant dense<0.000000e+00> : vector<16x32xf32>
    %72 = vector.multi_reduction <add>, %71, %cst_24 [1] : vector<16x8x32xf32> to vector<16x32xf32>
    %c128 = arith.constant 128 : index
    %c0_25 = arith.constant 0 : index
    %73 = vector.load %arg5[%c128, %c0_25] : memref<160x32xf32, #tpu.memory_space<vmem>>, vector<32x32xf32>
    %cst_26 = arith.constant dense<0.000000e+00> : vector<16x32xf32>
    %74 = tpu.matmul %72, %73, %cst_26 {dimension_numbers = #tpu.dot_dimension_numbers<[1], [0], [0], [1], [0, 0, 1, 1], [], []>} : vector<16x32xf32>, vector<32x32xf32>, vector<16x32xf32> -> vector<16x32xf32>
    %75 = arith.addf %68, %74 : vector<16x32xf32>
    %c0_27 = arith.constant 0 : index
    %c0_28 = arith.constant 0 : index
    %76 = vector.load %arg6[%c0_27, %c0_28] : memref<1x32xf32, #tpu.memory_space<vmem>>, vector<1x32xf32>
    %77 = vector.broadcast %76 : vector<1x32xf32> to vector<16x32xf32>
    %78 = arith.mulf %75, %77 : vector<16x32xf32>
    %c0_29 = arith.constant 0 : index
    %c0_30 = arith.constant 0 : index
    %79 = vector.load %arg7[%c0_29, %c0_30] : memref<1x32xf32, #tpu.memory_space<vmem>>, vector<1x32xf32>
    %80 = vector.broadcast %79 : vector<1x32xf32> to vector<16x32xf32>
    %81 = arith.addf %78, %80 : vector<16x32xf32>
    %cst_31 = arith.constant 0.000000e+00 : f32
    %82 = vector.broadcast %cst_31 : f32 to vector<16x32xf32>
    %83 = arith.maximumf %81, %82 : vector<16x32xf32>
    %c0_32 = arith.constant 0 : index
    %c0_33 = arith.constant 0 : index
    %84 = vector.load %arg9[%c0_32, %c0_33] : memref<1x32xf32, #tpu.memory_space<vmem>>, vector<1x32xf32>
    %85 = vector.broadcast %84 : vector<1x32xf32> to vector<16x32xf32>
    %86 = arith.mulf %83, %85 : vector<16x32xf32>
    %c0_34 = arith.constant 0 : index
    %c0_35 = arith.constant 0 : index
    %c0_36 = arith.constant 0 : index
    %87 = vector.load %arg10[%c0_34, %c0_35, %c0_36] : memref<1x16x1xf32, #tpu.memory_space<vmem>>, vector<1x16x1xf32>
    %88 = vector.shape_cast %87 : vector<1x16x1xf32> to vector<16x1xf32>
    %89 = vector.broadcast %88 : vector<16x1xf32> to vector<16x32xf32>
    %90 = arith.mulf %86, %89 : vector<16x32xf32>
    %c0_37 = arith.constant 0 : index
    %c0_38 = arith.constant 0 : index
    %91 = vector.load %arg8[%c0_37, %c0_38] : memref<1x32xf32, #tpu.memory_space<vmem>>, vector<1x32xf32>
    %92 = vector.broadcast %91 : vector<1x32xf32> to vector<16x32xf32>
    %93 = arith.mulf %83, %92 : vector<16x32xf32>
    %94 = arith.addf %90, %93 : vector<16x32xf32>
    %c0_39 = arith.constant 0 : index
    %c0_40 = arith.constant 0 : index
    %c0_41 = arith.constant 0 : index
    %95 = vector.load %arg11[%c0_39, %c0_40, %c0_41] : memref<1x16x32xf32, #tpu.memory_space<vmem>>, vector<1x16x32xf32>
    %96 = vector.shape_cast %95 : vector<1x16x32xf32> to vector<16x32xf32>
    %97 = vector.shape_cast %94 : vector<16x32xf32> to vector<1x16x32xf32>
    tpu.vector_store %arg11[%c0_39, %c0_40, %c0_41], %97 {strides = array<i32>} : memref<1x16x32xf32, #tpu.memory_space<vmem>>, vector<1x16x32xf32>,
    return
  }
  func.func @transform_0(%arg0: i32, %arg1: i32) -> (i32, i32, i32) {
    %c0_i32 = arith.constant 0 : i32
    %c0_i32_0 = arith.constant 0 : i32
    return %arg0, %arg1, %c0_i32 : i32, i32, i32
  }
  func.func @transform_1(%arg0: i32, %arg1: i32) -> (i32, i32, i32, i32) {
    %c0_i32 = arith.constant 0 : i32
    %c0_i32_0 = arith.constant 0 : i32
    %c0_i32_1 = arith.constant 0 : i32
    return %arg0, %arg1, %c0_i32, %c0_i32_0 : i32, i32, i32, i32
  }
  func.func @transform_2(%arg0: i32, %arg1: i32) -> (i32, i32) {
    %c0_i32 = arith.constant 0 : i32
    %c0_i32_0 = arith.constant 0 : i32
    %c0_i32_1 = arith.constant 0 : i32
    return %c0_i32, %c0_i32_0 : i32, i32
  }
  func.func @transform_3(%arg0: i32, %arg1: i32) -> (i32, i32) {
    %c0_i32 = arith.constant 0 : i32
    %c0_i32_0 = arith.constant 0 : i32
    %c0_i32_1 = arith.constant 0 : i32
    return %c0_i32, %c0_i32_0 : i32, i32
  }
  func.func @transform_4(%arg0: i32, %arg1: i32) -> (i32, i32) {
    %c0_i32 = arith.constant 0 : i32
    %c0_i32_0 = arith.constant 0 : i32
    %c0_i32_1 = arith.constant 0 : i32
    return %c0_i32, %c0_i32_0 : i32, i32
  }
  func.func @transform_5(%arg0: i32, %arg1: i32) -> (i32, i32) {
    %c0_i32 = arith.constant 0 : i32
    %c0_i32_0 = arith.constant 0 : i32
    %c0_i32_1 = arith.constant 0 : i32
    return %c0_i32, %c0_i32_0 : i32, i32
  }
  func.func @transform_6(%arg0: i32, %arg1: i32) -> (i32, i32) {
    %c0_i32 = arith.constant 0 : i32
    %c0_i32_0 = arith.constant 0 : i32
    %c0_i32_1 = arith.constant 0 : i32
    return %c0_i32, %c0_i32_0 : i32, i32
  }
  func.func @transform_7(%arg0: i32, %arg1: i32) -> (i32, i32) {
    %c0_i32 = arith.constant 0 : i32
    %c0_i32_0 = arith.constant 0 : i32
    %c0_i32_1 = arith.constant 0 : i32
    return %c0_i32, %c0_i32_0 : i32, i32
  }
  func.func @transform_8(%arg0: i32, %arg1: i32) -> (i32, i32, i32) {
    %c0_i32 = arith.constant 0 : i32
    %c0_i32_0 = arith.constant 0 : i32
    return %arg0, %arg1, %c0_i32 : i32, i32, i32
  }
  func.func @transform_9(%arg0: i32, %arg1: i32) -> (i32, i32, i32) {
    %c0_i32 = arith.constant 0 : i32
    %c0_i32_0 = arith.constant 0 : i32
    return %arg0, %arg1, %c0_i32 : i32, i32, i32
  }
}

module attributes {stable_mosaic.version = 11 : i64} {
  func.func @_tail_kernel(%arg0: i32, %arg1: i32, %arg2: memref<1x16x64xf32, #tpu.memory_space<vmem>>, %arg3: memref<64x32xf32, #tpu.memory_space<vmem>>, %arg4: memref<1x32xf32, #tpu.memory_space<vmem>>, %arg5: memref<1x32xf32, #tpu.memory_space<vmem>>, %arg6: memref<1x32xf32, #tpu.memory_space<vmem>>, %arg7: memref<1x16x16xf32, #tpu.memory_space<vmem>>, %arg8: memref<16x32xf32, #tpu.memory_space<vmem>>, %arg9: memref<1x32xf32, #tpu.memory_space<vmem>>, %arg10: memref<1x32xf32, #tpu.memory_space<vmem>>, %arg11: memref<1x16x32xf32, #tpu.memory_space<vmem>>) attributes {dimension_semantics = [#tpu.dimension_semantics<parallel>, #tpu.dimension_semantics<parallel>], iteration_bounds = array<i64: 2, 1>, scalar_prefetch = 0 : i64, scratch_operands = 0 : i64, tpu.core_type = #tpu.core_type<tc>, window_params = [{transform_indices = @transform_0, window_bounds = array<i64: 1, 16, 64>}, {pipeline_mode = #tpu.pipeline_mode<synchronous>, transform_indices = @transform_1, window_bounds = array<i64: 64, 32>}, {pipeline_mode = #tpu.pipeline_mode<synchronous>, transform_indices = @transform_2, window_bounds = array<i64: 1, 32>}, {pipeline_mode = #tpu.pipeline_mode<synchronous>, transform_indices = @transform_3, window_bounds = array<i64: 1, 32>}, {pipeline_mode = #tpu.pipeline_mode<synchronous>, transform_indices = @transform_4, window_bounds = array<i64: 1, 32>}, {transform_indices = @transform_5, window_bounds = array<i64: 1, 16, 16>}, {pipeline_mode = #tpu.pipeline_mode<synchronous>, transform_indices = @transform_6, window_bounds = array<i64: 16, 32>}, {pipeline_mode = #tpu.pipeline_mode<synchronous>, transform_indices = @transform_7, window_bounds = array<i64: 1, 32>}, {pipeline_mode = #tpu.pipeline_mode<synchronous>, transform_indices = @transform_8, window_bounds = array<i64: 1, 32>}, {transform_indices = @transform_9, window_bounds = array<i64: 1, 16, 32>}]} {
    %c0 = arith.constant 0 : index
    %c0_0 = arith.constant 0 : index
    %c0_1 = arith.constant 0 : index
    %0 = vector.load %arg2[%c0, %c0_0, %c0_1] : memref<1x16x64xf32, #tpu.memory_space<vmem>>, vector<1x16x64xf32>
    %1 = vector.shape_cast %0 : vector<1x16x64xf32> to vector<16x64xf32>
    %c0_2 = arith.constant 0 : index
    %c0_3 = arith.constant 0 : index
    %2 = vector.load %arg3[%c0_2, %c0_3] : memref<64x32xf32, #tpu.memory_space<vmem>>, vector<64x32xf32>
    %cst = arith.constant dense<0.000000e+00> : vector<16x32xf32>
    %3 = tpu.matmul %1, %2, %cst {dimension_numbers = #tpu.dot_dimension_numbers<[1], [0], [0], [1], [0, 0, 1, 1], [], []>} : vector<16x64xf32>, vector<64x32xf32>, vector<16x32xf32> -> vector<16x32xf32>
    %c0_4 = arith.constant 0 : index
    %c0_5 = arith.constant 0 : index
    %4 = vector.load %arg4[%c0_4, %c0_5] : memref<1x32xf32, #tpu.memory_space<vmem>>, vector<1x32xf32>
    %5 = vector.broadcast %4 : vector<1x32xf32> to vector<16x32xf32>
    %6 = arith.addf %3, %5 : vector<16x32xf32>
    %c0_6 = arith.constant 0 : index
    %c0_7 = arith.constant 0 : index
    %7 = vector.load %arg5[%c0_6, %c0_7] : memref<1x32xf32, #tpu.memory_space<vmem>>, vector<1x32xf32>
    %8 = vector.broadcast %7 : vector<1x32xf32> to vector<16x32xf32>
    %9 = arith.mulf %6, %8 : vector<16x32xf32>
    %c0_8 = arith.constant 0 : index
    %c0_9 = arith.constant 0 : index
    %10 = vector.load %arg6[%c0_8, %c0_9] : memref<1x32xf32, #tpu.memory_space<vmem>>, vector<1x32xf32>
    %11 = vector.broadcast %10 : vector<1x32xf32> to vector<16x32xf32>
    %12 = arith.addf %9, %11 : vector<16x32xf32>
    %c0_10 = arith.constant 0 : index
    %c0_11 = arith.constant 0 : index
    %c0_12 = arith.constant 0 : index
    %13 = vector.load %arg7[%c0_10, %c0_11, %c0_12] : memref<1x16x16xf32, #tpu.memory_space<vmem>>, vector<1x16x16xf32>
    %14 = vector.shape_cast %13 : vector<1x16x16xf32> to vector<16x16xf32>
    %c0_13 = arith.constant 0 : index
    %c0_14 = arith.constant 0 : index
    %15 = vector.load %arg8[%c0_13, %c0_14] : memref<16x32xf32, #tpu.memory_space<vmem>>, vector<16x32xf32>
    %cst_15 = arith.constant dense<0.000000e+00> : vector<16x32xf32>
    %16 = tpu.matmul %14, %15, %cst_15 {dimension_numbers = #tpu.dot_dimension_numbers<[1], [0], [0], [1], [0, 0, 1, 1], [], []>} : vector<16x16xf32>, vector<16x32xf32>, vector<16x32xf32> -> vector<16x32xf32>
    %c0_16 = arith.constant 0 : index
    %c0_17 = arith.constant 0 : index
    %17 = vector.load %arg9[%c0_16, %c0_17] : memref<1x32xf32, #tpu.memory_space<vmem>>, vector<1x32xf32>
    %18 = vector.broadcast %17 : vector<1x32xf32> to vector<16x32xf32>
    %19 = arith.mulf %16, %18 : vector<16x32xf32>
    %c0_18 = arith.constant 0 : index
    %c0_19 = arith.constant 0 : index
    %20 = vector.load %arg10[%c0_18, %c0_19] : memref<1x32xf32, #tpu.memory_space<vmem>>, vector<1x32xf32>
    %21 = vector.broadcast %20 : vector<1x32xf32> to vector<16x32xf32>
    %22 = arith.addf %19, %21 : vector<16x32xf32>
    %23 = arith.addf %12, %22 : vector<16x32xf32>
    %cst_20 = arith.constant 0.000000e+00 : f32
    %24 = vector.broadcast %cst_20 : f32 to vector<16x32xf32>
    %25 = arith.maximumf %23, %24 : vector<16x32xf32>
    %c0_21 = arith.constant 0 : index
    %c0_22 = arith.constant 0 : index
    %c0_23 = arith.constant 0 : index
    %26 = vector.load %arg11[%c0_21, %c0_22, %c0_23] : memref<1x16x32xf32, #tpu.memory_space<vmem>>, vector<1x16x32xf32>
    %27 = vector.shape_cast %26 : vector<1x16x32xf32> to vector<16x32xf32>
    %28 = vector.shape_cast %25 : vector<16x32xf32> to vector<1x16x32xf32>
    tpu.vector_store %arg11[%c0_21, %c0_22, %c0_23], %28 {strides = array<i32>} : memref<1x16x32xf32, #tpu.memory_space<vmem>>, vector<1x16x32xf32>,
    return
  }
  func.func @transform_0(%arg0: i32, %arg1: i32) -> (i32, i32, i32) {
    %c0_i32 = arith.constant 0 : i32
    %c0_i32_0 = arith.constant 0 : i32
    return %arg0, %arg1, %c0_i32 : i32, i32, i32
  }
  func.func @transform_1(%arg0: i32, %arg1: i32) -> (i32, i32) {
    %c0_i32 = arith.constant 0 : i32
    %c0_i32_0 = arith.constant 0 : i32
    %c0_i32_1 = arith.constant 0 : i32
    return %c0_i32, %c0_i32_0 : i32, i32
  }
  func.func @transform_2(%arg0: i32, %arg1: i32) -> (i32, i32) {
    %c0_i32 = arith.constant 0 : i32
    %c0_i32_0 = arith.constant 0 : i32
    %c0_i32_1 = arith.constant 0 : i32
    return %c0_i32, %c0_i32_0 : i32, i32
  }
  func.func @transform_3(%arg0: i32, %arg1: i32) -> (i32, i32) {
    %c0_i32 = arith.constant 0 : i32
    %c0_i32_0 = arith.constant 0 : i32
    %c0_i32_1 = arith.constant 0 : i32
    return %c0_i32, %c0_i32_0 : i32, i32
  }
  func.func @transform_4(%arg0: i32, %arg1: i32) -> (i32, i32) {
    %c0_i32 = arith.constant 0 : i32
    %c0_i32_0 = arith.constant 0 : i32
    %c0_i32_1 = arith.constant 0 : i32
    return %c0_i32, %c0_i32_0 : i32, i32
  }
  func.func @transform_5(%arg0: i32, %arg1: i32) -> (i32, i32, i32) {
    %c0_i32 = arith.constant 0 : i32
    %c0_i32_0 = arith.constant 0 : i32
    return %arg0, %arg1, %c0_i32 : i32, i32, i32
  }
  func.func @transform_6(%arg0: i32, %arg1: i32) -> (i32, i32) {
    %c0_i32 = arith.constant 0 : i32
    %c0_i32_0 = arith.constant 0 : i32
    %c0_i32_1 = arith.constant 0 : i32
    return %c0_i32, %c0_i32_0 : i32, i32
  }
  func.func @transform_7(%arg0: i32, %arg1: i32) -> (i32, i32) {
    %c0_i32 = arith.constant 0 : i32
    %c0_i32_0 = arith.constant 0 : i32
    %c0_i32_1 = arith.constant 0 : i32
    return %c0_i32, %c0_i32_0 : i32, i32
  }
  func.func @transform_8(%arg0: i32, %arg1: i32) -> (i32, i32) {
    %c0_i32 = arith.constant 0 : i32
    %c0_i32_0 = arith.constant 0 : i32
    %c0_i32_1 = arith.constant 0 : i32
    return %c0_i32, %c0_i32_0 : i32, i32
  }
  func.func @transform_9(%arg0: i32, %arg1: i32) -> (i32, i32, i32) {
    %c0_i32 = arith.constant 0 : i32
    %c0_i32_0 = arith.constant 0 : i32
    return %arg0, %arg1, %c0_i32 : i32, i32, i32
  }
}

</mosaic_0001>

<bundles_post_ra>
// kernel: basic_block_forward.6
= control target key start
LH: loop header
LB: loop body
LE: loop exit
PB: predicated region body
PF: predicated region fallthrough
CT: control target
= control target key end

     0   :  { %s538_s15 = smov 0   ;;  %s540_s16 = smov 0   ;;  %s583_s0 = inlined_call_operand.vmem [shape: f32[2,16,16], index: 0, kind: input, shape index: {}]   ;;  %s584_s1 = inlined_call_operand.vmem [shape: f32[16,4], index: 1, kind: input, shape index: {}]   ;;  %s585_s2 = inlined_call_operand.vmem [shape: f32[1,4], index: 2, kind: input, shape index: {}]   ;;  %s586_s3 = inlined_call_operand.vmem [shape: f32[1,4], index: 3, kind: input, shape index: {}]   ;;  %s587_s4 = inlined_call_operand.vmem [shape: f32[2,16,4], index: 4, kind: output, shape index: {}]  }
   0x1   :  { %s542_s17 = smov 0  }
   0x2 LB: > { %s26_s18 = sadd.s32 1, %s507_s16  ;;  %p437_p0 = scmp.ge.s32.totalorder %s511_s17, 1  ;;  %s511_s17 = sphi %s542_s17, %s14_s17   ;;  %s507_s16 = sphi %s540_s16, %s589_s16   ;;  %s503_s15 = sphi %s538_s15, %s588_s15  }
   0x3   : > { %p28_p1 = scmp.ge.s32.totalorder %s26_s18, 2  ;;  %p183_p2 = scmp.lt.s32.totalorder %s511_s17, 3 }
   0x5   : > { %s591_s18 = smov (%p28_p1, %s26_s18), 0  ;;  %p184_p3 = pnand %p437_p0, %p183_p2 }
   0x6   : > { %v239_v0 = vld [vmem:[%s584_s1] sm:$0xff] (!%p184_p3)  ;;  %v240_v1 = vld [vmem:[%s584_s1 + $0x8] sm:$0xff] (!%p184_p3)  ;;  %p218_p4 = scmp.lt.s32.totalorder (!%p184_p3), %s503_s15, 1  ;;  %vm241_vm0 = vcmask (!%p184_p3), 130048   ;;  %vm343_vm1 = vcmask (!%p184_p3), 31744  }
   0x7   : > { %187 = sbr.rel (%p184_p3) target bundleno = 239 (0xef), region = 36  ;;  %v461_v2 = vpack.c.bf16 (!%p184_p3), %v240_v1, %v239_v0  ;;  %v444_v5 = vld [vmem:[%s585_s2] ss:$0 sm:$0xff] (!%p184_p3) }
   0x8   : > { %v445_v7 = vld [vmem:[%s586_s3] ss:$0 sm:$0xff] (!%p184_p3) }
   0x9   : > { %462 = vmatprep.subr.bf16.mxu0 (!%p184_p3), %v461_v2 }
   0xa   : > { %464 = vmatpush3.bf16.msra.mxu0 (!%p184_p3), %v461_v2 }
   0xe   : > { %s593_s15 = smov (!%p218_p4, %s503_s15), 1 }
   0xf   : > { %s448_s23 = sshll.u32 %s593_s15, 4 }
  0x10   : > { %s225_s26 = scalar_lea.vmem %s583_s0, %s448_s23  ;;  %s235_s7 = scalar_lea.vmem %s587_s4, %s448_s23 }
  0x11   : > { %v237_v3 = vld [vmem:[%s225_s26] sm:$0xff]  ;;  %v238_v4 = vld [vmem:[%s225_s26 + $0x8] sm:$0xff] }
  0x12   : > { %458 = vmatprep.mubr.msk.f32.mxu0 %vm241_vm0, %v237_v3 }
  0x13   : > { %459 = vmatmul.mubr.msk.f32.vlgmr.msra.gmra.mrb[0].mxu0 %vm241_vm0, %v238_v4 }
  0xe6   : > { %v460_v6 = vpop.f32.mrb[0].mxu0 }
  0xe7   : > { %v331_v8 = vmul.f32 %v460_v6, %v444_v5  ;;  %v314_v9 = vpop.f32.mrb[1].mxu0 }
  0xe8   : > { %v330_v10 = vmul.f32 %v444_v5, %v314_v9 }
  0xe9   : > { %v340_v11 = vadd.f32 %v445_v7, %v331_v8 }
  0xea   : > { %v339_v12 = vadd.f32 %v445_v7, %v330_v10 }
  0xeb   : > { %v342_v13 = vmax.f32 %v340_v11, 0.0 }
  0xec   : > { %v341_v14 = vmax.f32 %v339_v12, 0.0 }
  0xed   : > { %345 = vst.msk [vmem:[%s235_s7 + $0x8] sm:$0xff] %vm343_vm1, %v342_v13 }
  0xee   : > { %344 = vst.msk [vmem:[%s235_s7] sm:$0xff] %vm343_vm1, %v341_v14 }
  0xef PF: > { %s14_s17 = sadd.s32 1, %s511_s17   ;;  %s588_s15 = smov %s507_s16 }
  0xf0   : > { %p11_p5 = scmp.ge.s32.totalorder %s14_s17, 4   ;;  %s589_s16 = smov %s591_s18 }
  0xf2   :  { %13 = sbr.rel (!%p11_p5) target bundleno = 2 (0x2), region = 66 }

// kernel: basic_block_forward.7
= control target key start
LH: loop header
LB: loop body
LE: loop exit
PB: predicated region body
PF: predicated region fallthrough
CT: control target
= control target key end

     0   :  { %s2853_s21 = smov 0   ;;  %s2855_s22 = smov 0   ;;  %s3777_s0 = inlined_call_operand.vmem [shape: f32[2,16,24], index: 0, kind: input, shape index: {}]   ;;  %s3778_s1 = inlined_call_operand.vmem [shape: f32[2,16,8,4], index: 1, kind: input, shape index: {}]   ;;  %s3779_s2 = inlined_call_operand.vmem [shape: f32[3,5], index: 2, kind: input, shape index: {}]   ;;  %s3780_s3 = inlined_call_operand.vmem [shape: f32[20,4], index: 3, kind: input, shape index: {}]   ;;  %s3781_s4 = inlined_call_operand.vmem [shape: f32[1,4], index: 4, kind: input, shape index: {}]   ;;  %s3782_s5 = inlined_call_operand.vmem [shape: f32[1,4], index: 5, kind: input, shape index: {}]   ;;  %s3783_s6 = inlined_call_operand.vmem [shape: f32[2,16,4], index: 6, kind: output, shape index: {}]  }
   0x1   :  { %s2857_s23 = smov 0  }
   0x2 LB: > { %s28_s24 = sadd.s32 1, %s2807_s22  ;;  %p2558_p0 = scmp.ge.s32.totalorder %s2811_s23, 1  ;;  %s2811_s23 = sphi %s2857_s23, %s16_s23   ;;  %s2807_s22 = sphi %s2855_s22, %s3802_s22   ;;  %s2803_s21 = sphi %s2853_s21, %s3801_s21  }
   0x3   : > { %p30_p1 = scmp.ge.s32.totalorder %s28_s24, 2  ;;  %p250_p2 = scmp.lt.s32.totalorder %s2811_s23, 3 }
   0x5   : > { %s3804_s24 = smov (%p30_p1, %s28_s24), 0  ;;  %p251_p3 = pnand %p2558_p0, %p250_p2 }
   0x7   : > { %254 = sbr.rel (%p251_p3) target bundleno = 1096 (0x448), region = 44 }
   0xe   : > { %p298_p4 = scmp.lt.s32.totalorder %s2803_s21, 1  ;;  %v346_v0 = vlaneseq  ;;  %v345_v28 = vld [vmem:[%s3779_s2] sm:$0x7]  ;;  %vm694_vm0 = vcmask 39936   ;;  %vm1315_vm1 = vcmask 1043456   ;;  %vm967_vm2 = vcmask 31744  }
   0xf   : > { %vm1290_vm3 = vcmask 1041409   ;;  %vm1292_vm4 = vcmask 1042434   ;;  %vm1294_vm5 = vcmask 1043459   ;;  %vm1296_vm6 = vcmask 1044484  }
  0x10   : > { %s3806_s21 = smov (!%p298_p4, %s2803_s21), 1  ;;  %v2873_v1 = vshrl.u32 %v346_v0, 7  ;;  %vm1298_vm7 = vcmask 1045509   ;;  %vm1300_vm8 = vcmask 1046534   ;;  %vm1302_vm9 = vcmask 1047559  }
  0x11   : > { %s2584_s25 = sshll.u32 %s3806_s21, 4  ;;  %s2585_s9 = sshll.u32 %s3806_s21, 7 }
  0x12   : > { %v2877_v2 = vsub.s32 0, %v2873_v1  ;;  %s305_s28 = scalar_lea.vmem %s3777_s0, %s2584_s25  ;;  %v2885_v3 = vsub.s32 1, %v2873_v1  ;;  %v397_v5 = vsub.s32 7, %v2873_v1  ;;  %v2891_v8 = vsub.s32 2, %v2873_v1  ;;  %s3245_s12 = scalar_lea.vmem %s3778_s1, %s2585_s9 }
  0x13   : > { %v327_v4 = vld [vmem:[%s305_s28] sm:$0xff]  ;;  %v328_v9 = vld [vmem:[%s305_s28 + $0x8] sm:$0xff]  ;;  %v369_v15 = vsub.s32 3, %v2873_v1  ;;  %v376_v18 = vsub.s32 4, %v2873_v1  ;;  %v383_v21 = vsub.s32 5, %v2873_v1  ;;  %v390_v24 = vsub.s32 6, %v2873_v1  ;;  %s325_s8 = scalar_lea.vmem %s3783_s6, %s2584_s25 }
  0x14   : > { %v349_v6 = vrot.slane %v327_v4, %v2877_v2  ;;  %v356_v7 = vrot.slane %v327_v4, %v2885_v3  ;;  %v398_v10 = vrot.slane %v327_v4, %v397_v5  ;;  %v454_v11 = vrot.slane %v328_v9, %v397_v5 }
  0x15   : > { %v405_v12 = vrot.slane %v328_v9, %v2877_v2  ;;  %v363_v13 = vrot.slane %v327_v4, %v2891_v8  ;;  %v412_v14 = vrot.slane %v328_v9, %v2885_v3  ;;  %v419_v16 = vrot.slane %v328_v9, %v2891_v8 }
  0x16   : > { %496 = vbcast.lane.b32.xlu1 %v349_v6, 264  ;;  %351 = vbcast.lane.b32.xlu0 %v349_v6, 256  ;;  %v370_v17 = vrot.slane %v327_v4, %v369_v15  ;;  %v426_v19 = vrot.slane %v328_v9, %v369_v15  ;;  %v377_v20 = vrot.slane %v327_v4, %v376_v18 }
  0x17   : > { %v384_v22 = vrot.slane %v327_v4, %v383_v21  ;;  %v433_v23 = vrot.slane %v328_v9, %v376_v18  ;;  %v391_v25 = vrot.slane %v327_v4, %v390_v24  ;;  %v440_v26 = vrot.slane %v328_v9, %v383_v21 }
  0x18   : > { %v447_v27 = vrot.slane %v328_v9, %v390_v24  ;;  %v2905_v29 = vrot.slane %v345_v28, %v2877_v2  ;;  %v2908_v30 = vrot.slane %v345_v28, %v2885_v3  ;;  %v2922_v61 = vrot.slane %v345_v28, %v2891_v8 }
  0x1a   : > { %500 = vbcast.lane.b32.xlu1 %v356_v7, 264  ;;  %358 = vbcast.lane.b32.xlu0 %v356_v7, 256 }
  0x1e   : > { %407 = vbcast.lane.b32.xlu1 %v405_v12, 256  ;;  %365 = vbcast.lane.b32.xlu0 %v363_v13, 256 }
  0x22   : > { %504 = vbcast.lane.b32.xlu1 %v363_v13, 264  ;;  %414 = vbcast.lane.b32.xlu0 %v412_v14, 256 }
  0x26   : > { %532 = vbcast.lane.b32.xlu1 %v412_v14, 264  ;;  %528 = vbcast.lane.b32.xlu0 %v405_v12, 264 }
  0x2a   : > { %421 = vbcast.lane.b32.xlu1 %v419_v16, 256  ;;  %372 = vbcast.lane.b32.xlu0 %v370_v17, 256 }
  0x2e   : > { %536 = vbcast.lane.b32.xlu1 %v419_v16, 264  ;;  %508 = vbcast.lane.b32.xlu0 %v370_v17, 264 }
  0x32   : > { %600 = vbcast.lane.b32.xlu1 %v356_v7, 272  ;;  %596 = vbcast.lane.b32.xlu0 %v349_v6, 272 }
  0x36   : > { %428 = vbcast.lane.b32.xlu1 %v426_v19, 256  ;;  %379 = vbcast.lane.b32.xlu0 %v377_v20, 256 }
  0x3a   : > { %540 = vbcast.lane.b32.xlu1 %v426_v19, 264  ;;  %512 = vbcast.lane.b32.xlu0 %v377_v20, 264 }
  0x3e   : > { %628 = vbcast.lane.b32.xlu1 %v405_v12, 272  ;;  %604 = vbcast.lane.b32.xlu0 %v363_v13, 272 }
  0x42   : > { %386 = vbcast.lane.b32.xlu1 %v384_v22, 256  ;;  %632 = vbcast.lane.b32.xlu0 %v412_v14, 272 }
  0x46   : > { %516 = vbcast.lane.b32.xlu1 %v384_v22, 264  ;;  %435 = vbcast.lane.b32.xlu0 %v433_v23, 256 }
  0x4a   : > { %608 = vbcast.lane.b32.xlu1 %v370_v17, 272  ;;  %544 = vbcast.lane.b32.xlu0 %v433_v23, 264 }
  0x4e   : > { %393 = vbcast.lane.b32.xlu1 %v391_v25, 256  ;;  %636 = vbcast.lane.b32.xlu0 %v419_v16, 272 }
  0x52   : > { %520 = vbcast.lane.b32.xlu1 %v391_v25, 264  ;;  %442 = vbcast.lane.b32.xlu0 %v440_v26, 256 }
  0x56   : > { %612 = vbcast.lane.b32.xlu1 %v377_v20, 272  ;;  %548 = vbcast.lane.b32.xlu0 %v440_v26, 264 }
  0x5a   : > { %400 = vbcast.lane.b32.xlu1 %v398_v10, 256  ;;  %640 = vbcast.lane.b32.xlu0 %v426_v19, 272 }
  0x5e   : > { %524 = vbcast.lane.b32.xlu1 %v398_v10, 264  ;;  %449 = vbcast.lane.b32.xlu0 %v447_v27, 256 }
  0x62   : > { %616 = vbcast.lane.b32.xlu1 %v384_v22, 272  ;;  %552 = vbcast.lane.b32.xlu0 %v447_v27, 264 }
  0x66   : > { %456 = vbcast.lane.b32.xlu1 %v454_v11, 256  ;;  %644 = vbcast.lane.b32.xlu0 %v433_v23, 272 }
  0x6a   : > { %620 = vbcast.lane.b32.xlu1 %v391_v25, 272  ;;  %556 = vbcast.lane.b32.xlu0 %v454_v11, 264 }
  0x6e   : > { %624 = vbcast.lane.b32.xlu1 %v398_v10, 272  ;;  %648 = vbcast.lane.b32.xlu0 %v440_v26, 272 }
  0x72   : > { %656 = vbcast.lane.b32.xlu1 %v454_v11, 272  ;;  %652 = vbcast.lane.b32.xlu0 %v447_v27, 272 }
  0x88   : > { %v497_v31 = vpop.permute.xlu1 %496  ;;  %v352_v32 = vpop.permute.xlu0 %351 }
  0x89   : > { %v562_v33 = vmul.f32 %v2908_v30, %v497_v31  ;;  %v462_v34 = vmul.f32 %v2905_v29, %v352_v32 }
  0x8b   : > { %v578_v35 = vadd.f32 %v562_v33, %v462_v34 }
  0x8c   : > { %v501_v36 = vpop.permute.xlu1 %500  ;;  %v359_v37 = vpop.permute.xlu0 %358 }
  0x8d   : > { %v563_v38 = vmul.f32 %v2908_v30, %v501_v36  ;;  %v463_v39 = vmul.f32 %v2905_v29, %v359_v37 }
  0x8f   : > { %v579_v40 = vadd.f32 %v563_v38, %v463_v39 }
  0x90   : > { %v408_v41 = vpop.permute.xlu1 %407  ;;  %v366_v42 = vpop.permute.xlu0 %365 }
  0x91   : > { %v464_v45 = vmul.f32 %v2905_v29, %v366_v42  ;;  %v470_v47 = vmul.f32 %v2905_v29, %v408_v41 }
  0x94   : > { %v505_v43 = vpop.permute.xlu1 %504  ;;  %v415_v44 = vpop.permute.xlu0 %414 }
  0x95   : > { %v564_v46 = vmul.f32 %v2908_v30, %v505_v43  ;;  %v471_v51 = vmul.f32 %v2905_v29, %v415_v44 }
  0x97   : > { %v580_v48 = vadd.f32 %v564_v46, %v464_v45 }
  0x98   : > { %v533_v49 = vpop.permute.xlu1 %532  ;;  %v529_v50 = vpop.permute.xlu0 %528 }
  0x99   : > { %v571_v52 = vmul.f32 %v2908_v30, %v533_v49  ;;  %v570_v53 = vmul.f32 %v2908_v30, %v529_v50 }
  0x9b   : > { %v587_v54 = vadd.f32 %v571_v52, %v471_v51  ;;  %v586_v55 = vadd.f32 %v570_v53, %v470_v47 }
  0x9c   : > { %v422_v56 = vpop.permute.xlu1 %421  ;;  %v373_v57 = vpop.permute.xlu0 %372 }
  0x9d   : > { %v472_v58 = vmul.f32 %v2905_v29, %v422_v56  ;;  %v465_v62 = vmul.f32 %v2905_v29, %v373_v57 }
  0xa0   : > { %v537_v59 = vpop.permute.xlu1 %536  ;;  %v509_v60 = vpop.permute.xlu0 %508 }
  0xa1   : > { %v572_v63 = vmul.f32 %v2908_v30, %v537_v59  ;;  %v565_v0 = vmul.f32 %v2908_v30, %v509_v60 }
  0xa3   : > { %v588_v1 = vadd.f32 %v572_v63, %v472_v58  ;;  %v581_v2 = vadd.f32 %v565_v0, %v465_v62 }
  0xa4   : > { %v601_v3 = vpop.permute.xlu1 %600  ;;  %v597_v4 = vpop.permute.xlu0 %596 }
  0xa5   : > { %v663_v5 = vmul.f32 %v2922_v61, %v601_v3  ;;  %v662_v6 = vmul.f32 %v2922_v61, %v597_v4 }
  0xa7   : > { %v2929_v7 = vadd.f32 %v663_v5, %v579_v40  ;;  %v2931_v9 = vadd.f32 %v662_v6, %v578_v35 }
  0xa8   : > { %v429_v8 = vpop.permute.xlu1 %428  ;;  %v380_v10 = vpop.permute.xlu0 %379 }
  0xa9   : > { %v698_v11 = vsel %vm694_vm0, %v2929_v7, -inf  ;;  %v695_v12 = vsel %vm694_vm0, %v2931_v9, -inf  ;;  %v473_v13 = vmul.f32 %v2905_v29, %v429_v8  ;;  %v466_v16 = vmul.f32 %v2905_v29, %v380_v10 }
  0xaa   : > { %699 = vmax.xlane.f32.xlu1 %v698_v11  ;;  %696 = vmax.xlane.f32.xlu0 %v695_v12 }
  0xac   : > { %v541_v14 = vpop.permute.xlu1 %540  ;;  %v513_v15 = vpop.permute.xlu0 %512 }
  0xad   : > { %v573_v17 = vmul.f32 %v2908_v30, %v541_v14  ;;  %v566_v18 = vmul.f32 %v2908_v30, %v513_v15 }
  0xaf   : > { %v589_v19 = vadd.f32 %v573_v17, %v473_v13  ;;  %v582_v20 = vadd.f32 %v566_v18, %v466_v16 }
  0xb0   : > { %v629_v21 = vpop.permute.xlu1 %628  ;;  %v605_v22 = vpop.permute.xlu0 %604 }
  0xb1   : > { %v670_v23 = vmul.f32 %v2922_v61, %v629_v21  ;;  %v664_v24 = vmul.f32 %v2922_v61, %v605_v22 }
  0xb3   : > { %v2943_v25 = vadd.f32 %v664_v24, %v580_v48  ;;  %v2945_v26 = vadd.f32 %v670_v23, %v586_v55 }
  0xb4   : > { %v387_v27 = vpop.permute.xlu1 %386  ;;  %v633_v28 = vpop.permute.xlu0 %632 }
  0xb5   : > { %v671_v31 = vmul.f32 %v2922_v61, %v633_v28  ;;  %v701_v32 = vsel %vm694_vm0, %v2943_v25, -inf  ;;  %v467_v33 = vmul.f32 %v2905_v29, %v387_v27  ;;  %v719_v38 = vsel %vm694_vm0, %v2945_v26, -inf }
  0xb6   : > { %702 = vmax.xlane.f32.xlu0 %v701_v32 }
  0xb7   : > { %v2951_v34 = vadd.f32 %v671_v31, %v587_v54 }
  0xb8   : > { %v517_v35 = vpop.permute.xlu1 %516  ;;  %v436_v36 = vpop.permute.xlu0 %435 }
  0xb9   : > { %v567_v37 = vmul.f32 %v2908_v30, %v517_v35  ;;  %v722_v39 = vsel %vm694_vm0, %v2951_v34, -inf  ;;  %v474_v43 = vmul.f32 %v2905_v29, %v436_v36 }
  0xba   : > { %720 = vmax.xlane.f32.xlu0 %v719_v38  ;;  %723 = vmax.xlane.f32.xlu1 %v722_v39 }
  0xbb   : > { %v583_v40 = vadd.f32 %v567_v37, %v467_v33 }
  0xbc   : > { %v609_v41 = vpop.permute.xlu1 %608  ;;  %v545_v42 = vpop.permute.xlu0 %544 }
  0xbd   : > { %v665_v44 = vmul.f32 %v2922_v61, %v609_v41  ;;  %v574_v45 = vmul.f32 %v2908_v30, %v545_v42 }
  0xbf   : > { %v590_v46 = vadd.f32 %v574_v45, %v474_v43  ;;  %v2961_v47 = vadd.f32 %v665_v44, %v581_v2 }
  0xc0   : > { %v394_v48 = vpop.permute.xlu1 %393  ;;  %v637_v49 = vpop.permute.xlu0 %636 }
  0xc1   : > { %v672_v50 = vmul.f32 %v2922_v61, %v637_v49  ;;  %v704_v51 = vsel %vm694_vm0, %v2961_v47, -inf  ;;  %v468_v52 = vmul.f32 %v2905_v29, %v394_v48 }
  0xc2   : > { %705 = vmax.xlane.f32.xlu0 %v704_v51 }
  0xc3   : > { %v2967_v53 = vadd.f32 %v672_v50, %v588_v1 }
  0xc4   : > { %v521_v54 = vpop.permute.xlu1 %520  ;;  %v443_v55 = vpop.permute.xlu0 %442 }
  0xc5   : > { %v568_v56 = vmul.f32 %v2908_v30, %v521_v54  ;;  %v725_v57 = vsel %vm694_vm0, %v2967_v53, -inf  ;;  %v475_v62 = vmul.f32 %v2905_v29, %v443_v55 }
  0xc6   : > { %726 = vmax.xlane.f32.xlu1 %v725_v57 }
  0xc7   : > { %v584_v58 = vadd.f32 %v568_v56, %v468_v52 }
  0xc8   : > { %v613_v59 = vpop.permute.xlu1 %612  ;;  %v549_v60 = vpop.permute.xlu0 %548 }
  0xc9   : > { %v666_v63 = vmul.f32 %v2922_v61, %v613_v59  ;;  %v575_v0 = vmul.f32 %v2908_v30, %v549_v60 }
  0xcb   : > { %v591_v2 = vadd.f32 %v575_v0, %v475_v62  ;;  %v2975_v1 = vadd.f32 %v666_v63, %v582_v20 }
  0xcc   : > { %v401_v3 = vpop.permute.xlu1 %400  ;;  %v641_v4 = vpop.permute.xlu0 %640 }
  0xcd   : > { %v673_v5 = vmul.f32 %v2922_v61, %v641_v4  ;;  %v707_v6 = vsel %vm694_vm0, %v2975_v1, -inf  ;;  %v469_v8 = vmul.f32 %v2905_v29, %v401_v3 }
  0xce   : > { %708 = vmax.xlane.f32.xlu0 %v707_v6 }
  0xcf   : > { %v2981_v10 = vadd.f32 %v673_v5, %v589_v19 }
  0xd0   : > { %v525_v11 = vpop.permute.xlu1 %524  ;;  %v450_v12 = vpop.permute.xlu0 %449 }
  0xd1   : > { %v569_v13 = vmul.f32 %v2908_v30, %v525_v11  ;;  %v728_v14 = vsel %vm694_vm0, %v2981_v10, -inf  ;;  %v476_v18 = vmul.f32 %v2905_v29, %v450_v12 }
  0xd2   : > { %729 = vmax.xlane.f32.xlu1 %v728_v14 }
  0xd3   : > { %v585_v15 = vadd.f32 %v569_v13, %v469_v8 }
  0xd4   : > { %v617_v16 = vpop.permute.xlu1 %616  ;;  %v553_v17 = vpop.permute.xlu0 %552 }
  0xd5   : > { %v667_v20 = vmul.f32 %v2922_v61, %v617_v16  ;;  %v576_v21 = vmul.f32 %v2908_v30, %v553_v17 }
  0xd7   : > { %v592_v22 = vadd.f32 %v576_v21, %v476_v18  ;;  %v2989_v19 = vadd.f32 %v667_v20, %v583_v40 }
  0xd8   : > { %v457_v23 = vpop.permute.xlu1 %456  ;;  %v645_v24 = vpop.permute.xlu0 %644 }
  0xd9   : > { %v674_v27 = vmul.f32 %v2922_v61, %v645_v24  ;;  %v710_v28 = vsel %vm694_vm0, %v2989_v19, -inf  ;;  %v477_v31 = vmul.f32 %v2905_v29, %v457_v23 }
  0xda   : > { %711 = vmax.xlane.f32.xlu0 %v710_v28 }
  0xdb   : > { %v2995_v32 = vadd.f32 %v674_v27, %v590_v46 }
  0xdc   : > { %v621_v33 = vpop.permute.xlu1 %620  ;;  %v557_v35 = vpop.permute.xlu0 %556 }
  0xdd   : > { %v668_v36 = vmul.f32 %v2922_v61, %v621_v33  ;;  %v577_v37 = vmul.f32 %v2908_v30, %v557_v35  ;;  %v731_v38 = vsel %vm694_vm0, %v2995_v32, -inf }
  0xde   : > { %732 = vmax.xlane.f32.xlu1 %v731_v38 }
  0xdf   : > { %v593_v39 = vadd.f32 %v577_v37, %v477_v31  ;;  %v3001_v40 = vadd.f32 %v668_v36, %v584_v58 }
  0xe0   : > { %v625_v41 = vpop.permute.xlu1 %624  ;;  %v649_v42 = vpop.permute.xlu0 %648 }
  0xe1   : > { %v669_v43 = vmul.f32 %v2922_v61, %v625_v41  ;;  %v675_v29 = vmul.f32 %v2922_v61, %v649_v42  ;;  %v713_v44 = vsel %vm694_vm0, %v3001_v40, -inf }
  0xe2   : > { %714 = vmax.xlane.f32.xlu0 %v713_v44 }
  0xe3   : > { %v3007_v45 = vadd.f32 %v669_v43, %v585_v15  ;;  %v3009_v30 = vadd.f32 %v675_v29, %v591_v2 }
  0xe4   : > { %v657_v46 = vpop.permute.xlu1 %656  ;;  %v653_v48 = vpop.permute.xlu0 %652 }
  0xe5   : > { %v677_v49 = vmul.f32 %v2922_v61, %v657_v46  ;;  %v676_v50 = vmul.f32 %v2922_v61, %v653_v48  ;;  %v716_v51 = vsel %vm694_vm0, %v3007_v45, -inf  ;;  %v734_v52 = vsel %vm694_vm0, %v3009_v30, -inf }
  0xe6   : > { %717 = vmax.xlane.f32.xlu0 %v716_v51  ;;  %735 = vmax.xlane.f32.xlu1 %v734_v52 }
  0xe7   : > { %v3017_v54 = vadd.f32 %v677_v49, %v593_v39  ;;  %v3019_v55 = vadd.f32 %v676_v50, %v592_v22  ;;  %v2813_v39 = vmov 2  }
  0xe8   : > { %2665 = vset.pattern.permute.xlu0 %v2813_v39 }
  0xe9   : > { %v740_v56 = vsel %vm694_vm0, %v3017_v54, -inf  ;;  %v737_v57 = vsel %vm694_vm0, %v3019_v55, -inf }
  0xea   : > { %741 = vmax.xlane.f32.xlu0 %v740_v56  ;;  %738 = vmax.xlane.f32.xlu1 %v737_v57 }
 0x137   : > { %v700_v61 = vpop.xlane.xlu1 %699  ;;  %v697_v58 = vpop.xlane.xlu0 %696 }
 0x138   : > { %v744_v59 = vsub.f32 %v2929_v7, %v700_v61  ;;  %v743_v60 = vsub.f32 %v2931_v9, %v697_v58 }
 0x13a   : > { %v761_v62 = vmul.f32 1.442695, %v744_v59  ;;  %v759_v63 = vmul.f32 1.442695, %v743_v60 }
 0x13c   : > { %2709 = vpow2.f32 %v761_v62 }
 0x13d   : > { %2711 = vpow2.f32 %v759_v63 }
 0x143   : > { %v703_v0 = vpop.xlane.xlu0 %702 }
 0x144   : > { %v745_v2 = vsub.f32 %v2943_v25, %v703_v0 }
 0x146   : > { %v3028_v3 = vpop.eup %2709  ;;  %v763_v4 = vmul.f32 1.442695, %v745_v2 }
 0x147   : > { %v3030_v5 = vpop.eup %2711  ;;  %v724_v6 = vpop.xlane.xlu1 %723  ;;  %v794_v11 = vsel %vm694_vm0, %v3028_v3, 0.0 }
 0x148   : > { %v721_v8 = vpop.xlane.xlu0 %720  ;;  %2713 = vpow2.f32 %v763_v4  ;;  %v752_v7 = vsub.f32 %v2951_v34, %v724_v6  ;;  %795 = vadd.xlane.f32.xlu0 %v794_v11  ;;  %v791_v12 = vsel %vm694_vm0, %v3030_v5, 0.0 }
 0x149   : > { %v751_v9 = vsub.f32 %v2945_v26, %v721_v8  ;;  %792 = vadd.xlane.f32.xlu1 %v791_v12 }
 0x14a   : > { %v777_v25 = vmul.f32 1.442695, %v752_v7 }
 0x14b   : > { %v775_v13 = vmul.f32 1.442695, %v751_v9 }
 0x14c   : > { %2715 = vpow2.f32 %v777_v25 }
 0x14d   : > { %2717 = vpow2.f32 %v775_v13 }
 0x14f   : > { %v706_v14 = vpop.xlane.xlu0 %705 }
 0x150   : > { %v746_v15 = vsub.f32 %v2961_v47, %v706_v14 }
 0x152   : > { %v3039_v16 = vpop.eup %2713  ;;  %v765_v17 = vmul.f32 1.442695, %v746_v15 }
 0x153   : > { %v727_v18 = vpop.xlane.xlu1 %726  ;;  %v797_v34 = vsel %vm694_vm0, %v3039_v16, 0.0 }
 0x154   : > { %2719 = vpow2.f32 %v765_v17  ;;  %v753_v26 = vsub.f32 %v2967_v53, %v727_v18  ;;  %798 = vadd.xlane.f32.xlu1 %v797_v34 }
 0x156   : > { %v3044_v20 = vpop.eup %2715  ;;  %v779_v21 = vmul.f32 1.442695, %v753_v26 }
 0x157   : > { %v3046_v22 = vpop.eup %2717  ;;  %v818_v23 = vsel %vm694_vm0, %v3044_v20, 0.0 }
 0x158   : > { %2721 = vpow2.f32 %v779_v21  ;;  %819 = vadd.xlane.f32.xlu1 %v818_v23  ;;  %v815_v47 = vsel %vm694_vm0, %v3046_v22, 0.0 }
 0x159   : > { %816 = vadd.xlane.f32.xlu0 %v815_v47 }
 0x15b   : > { %v709_v24 = vpop.xlane.xlu0 %708 }
 0x15c   : > { %v747_v27 = vsub.f32 %v2975_v1, %v709_v24  ;;  %v2814_v1 = vmov 0  }
 0x15d   : > { %2664 = vset.pattern.permute.xlu1 %v2814_v1 }
 0x15e   : > { %v3053_v28 = vpop.eup %2719  ;;  %v767_v53 = vmul.f32 1.442695, %v747_v27 }
 0x15f   : > { %v730_v31 = vpop.xlane.xlu1 %729  ;;  %v800_v33 = vsel %vm694_vm0, %v3053_v28, 0.0 }
 0x160   : > { %2723 = vpow2.f32 %v767_v53  ;;  %v754_v35 = vsub.f32 %v2981_v10, %v730_v31  ;;  %801 = vadd.xlane.f32.xlu0 %v800_v33 }
 0x162   : > { %v3058_v36 = vpop.eup %2721  ;;  %v781_v37 = vmul.f32 1.442695, %v754_v35 }
 0x163   : > { %v821_v38 = vsel %vm694_vm0, %v3058_v36, 0.0 }
 0x164   : > { %2725 = vpow2.f32 %v781_v37  ;;  %822 = vadd.xlane.f32.xlu1 %v821_v38 }
 0x167   : > { %v712_v41 = vpop.xlane.xlu0 %711 }
 0x168   : > { %v748_v42 = vsub.f32 %v2989_v19, %v712_v41 }
 0x16a   : > { %v3065_v43 = vpop.eup %2723  ;;  %v769_v10 = vmul.f32 1.442695, %v748_v42 }
 0x16b   : > { %v733_v29 = vpop.xlane.xlu1 %732  ;;  %v803_v44 = vsel %vm694_vm0, %v3065_v43, 0.0 }
 0x16c   : > { %2727 = vpow2.f32 %v769_v10  ;;  %v755_v46 = vsub.f32 %v2995_v32, %v733_v29  ;;  %804 = vadd.xlane.f32.xlu0 %v803_v44 }
 0x16e   : > { %v3070_v48 = vpop.eup %2725  ;;  %v783_v49 = vmul.f32 1.442695, %v755_v46 }
 0x16f   : > { %v715_v50 = vpop.xlane.xlu0 %714  ;;  %v824_v51 = vsel %vm694_vm0, %v3070_v48, 0.0 }
 0x170   : > { %2729 = vpow2.f32 %v783_v49  ;;  %v749_v19 = vsub.f32 %v3001_v40, %v715_v50  ;;  %825 = vadd.xlane.f32.xlu1 %v824_v51 }
 0x172   : > { %v771_v52 = vmul.f32 1.442695, %v749_v19 }
 0x173   : > { %v736_v56 = vpop.xlane.xlu1 %735  ;;  %v718_v57 = vpop.xlane.xlu0 %717 }
 0x174   : > { %2731 = vpow2.f32 %v771_v52  ;;  %v756_v61 = vsub.f32 %v3009_v30, %v736_v56  ;;  %v750_v32 = vsub.f32 %v3007_v45, %v718_v57 }
 0x176   : > { %v3077_v58 = vpop.eup %2727  ;;  %v785_v59 = vmul.f32 1.442695, %v756_v61  ;;  %v773_v60 = vmul.f32 1.442695, %v750_v32 }
 0x177   : > { %v739_v62 = vpop.xlane.xlu1 %738  ;;  %v742_v63 = vpop.xlane.xlu0 %741  ;;  %v806_v0 = vsel %vm694_vm0, %v3077_v58, 0.0 }
 0x178   : > { %2733 = vpow2.f32 %v785_v59  ;;  %v757_v40 = vsub.f32 %v3019_v55, %v739_v62  ;;  %v758_v2 = vsub.f32 %v3017_v54, %v742_v63  ;;  %807 = vadd.xlane.f32.xlu0 %v806_v0 }
 0x179   : > { %2735 = vpow2.f32 %v773_v60 }
 0x17a   : > { %v3083_v4 = vpop.eup %2729  ;;  %v787_v30 = vmul.f32 1.442695, %v757_v40  ;;  %v789_v45 = vmul.f32 1.442695, %v758_v2  ;;  %v2815_v2 = vmov 1  }
 0x17b   : > { %v827_v6 = vsel %vm694_vm0, %v3083_v4, 0.0 }
 0x17c   : > { %2737 = vpow2.f32 %v787_v30  ;;  %828 = vadd.xlane.f32.xlu1 %v827_v6  ;;  %v1698_v30 = vld [vmem:[%s3780_s3 + $0x8] sm:$0xf] }
 0x17d   : > { %2739 = vpow2.f32 %v789_v45  ;;  %2612 = vmatprep.subr.msk.mxu0 %vm1315_vm1, %v1698_v30 }
 0x17e   : > { %v3087_v8 = vpop.eup %2731  ;;  %2613 = vmatpush3.msk.msra.mxu0 %vm1315_vm1, %v1698_v30 }
 0x17f   : > { %v809_v11 = vsel %vm694_vm0, %v3087_v8, 0.0 }
 0x180   : > { %810 = vadd.xlane.f32.xlu0 %v809_v11 }
 0x182   : > { %v3091_v55 = vpop.eup %2733 }
 0x183   : > { %v3093_v54 = vpop.eup %2735  ;;  %v830_v7 = vsel %vm694_vm0, %v3091_v55, 0.0 }
 0x184   : > { %831 = vadd.xlane.f32.xlu1 %v830_v7  ;;  %v812_v9 = vsel %vm694_vm0, %v3093_v54, 0.0  ;;  %v3249_v7 = vld [vmem:[%s3245_s12 + $0x8] sm:$0xff] }
 0x185   : > { %813 = vadd.xlane.f32.xlu0 %v812_v9  ;;  %v3253_v9 = vld [vmem:[%s3245_s12] sm:$0xff] }
 0x186   : > { %v3099_v12 = vpop.eup %2737 }
 0x187   : > { %v3101_v25 = vpop.eup %2739  ;;  %v833_v13 = vsel %vm694_vm0, %v3099_v12, 0.0 }
 0x188   : > { %834 = vadd.xlane.f32.xlu1 %v833_v13  ;;  %v836_v14 = vsel %vm694_vm0, %v3101_v25, 0.0 }
 0x189   : > { %837 = vadd.xlane.f32.xlu0 %v836_v14 }
 0x1d5   : > { %v796_v17 = vpop.xlane.xlu0 %795 }
 0x1d6   : > { %v793_v15 = vpop.xlane.xlu1 %792 }
 0x1d7   : > { %2741 = vrcp.f32 %v793_v15  ;;  %v3260_v15 = vld [vmem:[%s3245_s12 + $0x10] sm:$0xff] }
 0x1d8   : > { %2743 = vrcp.f32 %v796_v17 }
 0x1e1   : > { %v2742_v18 = vpop.eup %2741  ;;  %v799_v34 = vpop.xlane.xlu1 %798 }
 0x1e2   : > { %2745 = vrcp.f32 %v799_v34  ;;  %v3108_v26 = vmul.f32 %v2742_v18, %v3030_v5  ;;  %v2744_v21 = vpop.eup %2743  ;;  %v3265_v18 = vld [vmem:[%s3245_s12 + $0x48] sm:$0xff] }
 0x1e3   : > { %v3113_v24 = vmul.f32 %v2744_v21, %v3028_v3 }
 0x1e4   : > { %873 = vperm.xlu1 %2664, %v3108_v26   ;;  %1507 = vperm.xlu0 %2665, %v3108_v26  }
 0x1e5   : > { %v820_v23 = vpop.xlane.xlu1 %819 }
 0x1e6   : > { %v817_v47 = vpop.xlane.xlu0 %816 }
 0x1e7   : > { %2747 = vrcp.f32 %v817_v47  ;;  %v1273_v47 = vld [vmem:[%s3780_s3 + $0x4] sm:$0xf] }
 0x1e8   : > { %2666 = vset.pattern.permute.xlu1 %v2813_v39  ;;  %2749 = vrcp.f32 %v820_v23  ;;  %2602 = vmatprep.subr.msk.mxu1 %vm1315_vm1, %v1273_v47 }
 0x1e9   : > { %1511 = vperm.xlu1 %2666, %v3113_v24   ;;  %2603 = vmatpush3.msk.msra.mxu1 %vm1315_vm1, %v1273_v47 }
 0x1ec   : > { %v2746_v27 = vpop.eup %2745 }
 0x1ed   : > { %v802_v53 = vpop.xlane.xlu0 %801  ;;  %v3118_v5 = vmul.f32 %v2746_v27, %v3039_v16 }
 0x1ee   : > { %2751 = vrcp.f32 %v802_v53  ;;  %v3275_v53 = vld [vmem:[%s3245_s12 + $0x40] sm:$0xff] }
 0x1ef   : > { %1515 = vperm.xlu1 %2666, %v3118_v5  }
 0x1f1   : > { %v2748_v31 = vpop.eup %2747  ;;  %v823_v33 = vpop.xlane.xlu1 %822 }
 0x1f2   : > { %v3122_v35 = vmul.f32 %v2748_v31, %v3046_v22  ;;  %2753 = vrcp.f32 %v823_v33  ;;  %v2750_v3 = vpop.eup %2749 }
 0x1f3   : > { %v3126_v37 = vmul.f32 %v2750_v3, %v3044_v20 }
 0x1f4   : > { %1539 = vperm.xlu1 %2666, %v3122_v35  }
 0x1f8   : > { %v2752_v38 = vpop.eup %2751  ;;  %1543 = vperm.xlu1 %2666, %v3126_v37  }
 0x1f9   : > { %v3130_v16 = vmul.f32 %v2752_v38, %v3053_v28  ;;  %v805_v39 = vpop.xlane.xlu0 %804 }
 0x1fa   : > { %2755 = vrcp.f32 %v805_v39 }
 0x1fc   : > { %v2754_v41 = vpop.eup %2753  ;;  %1519 = vperm.xlu1 %2666, %v3130_v16  }
 0x1fd   : > { %v826_v22 = vpop.xlane.xlu1 %825  ;;  %v3134_v42 = vmul.f32 %v2754_v41, %v3058_v36 }
 0x1fe   : > { %2757 = vrcp.f32 %v826_v22 }
 0x200   : > { %1547 = vperm.xlu1 %2666, %v3134_v42  }
 0x204   : > { %v2756_v20 = vpop.eup %2755 }
 0x205   : > { %v3138_v10 = vmul.f32 %v2756_v20, %v3065_v43  ;;  %v808_v29 = vpop.xlane.xlu0 %807  ;;  %v3288_v20 = vld [vmem:[%s3245_s12 + $0x18] sm:$0xff] }
 0x206   : > { %2759 = vrcp.f32 %v808_v29  ;;  %v3291_v29 = vld [vmem:[%s3245_s12 + $0x20] sm:$0xff] }
 0x207   : > { %1523 = vperm.xlu1 %2666, %v3138_v10  }
 0x208   : > { %v2758_v28 = vpop.eup %2757 }
 0x209   : > { %v829_v44 = vpop.xlane.xlu1 %828  ;;  %v3142_v46 = vmul.f32 %v2758_v28, %v3070_v48 }
 0x20a   : > { %2761 = vrcp.f32 %v829_v44 }
 0x20b   : > { %1551 = vperm.xlu1 %2666, %v3142_v46  }
 0x20d   : > { %v811_v36 = vpop.xlane.xlu0 %810 }
 0x20e   : > { %2763 = vrcp.f32 %v811_v36  ;;  %v3295_v36 = vld [vmem:[%s3245_s12 + $0x50] sm:$0xff] }
 0x210   : > { %v2760_v49 = vpop.eup %2759 }
 0x211   : > { %v3146_v50 = vmul.f32 %v2760_v49, %v3077_v58  ;;  %v832_v43 = vpop.xlane.xlu1 %831 }
 0x212   : > { %2765 = vrcp.f32 %v832_v43  ;;  %v814_v51 = vpop.xlane.xlu0 %813 }
 0x213   : > { %2767 = vrcp.f32 %v814_v51  ;;  %1527 = vperm.xlu0 %2665, %v3146_v50   ;;  %v3300_v51 = vld [vmem:[%s3245_s12 + $0x58] sm:$0xff] }
 0x214   : > { %v2762_v19 = vpop.eup %2761 }
 0x215   : > { %v835_v52 = vpop.xlane.xlu1 %834  ;;  %v3150_v48 = vmul.f32 %v2762_v19, %v3083_v4  ;;  %v2816_v4 = vmov 3  }
 0x216   : > { %2769 = vrcp.f32 %v835_v52  ;;  %v838_v56 = vpop.xlane.xlu0 %837 }
 0x217   : > { %2771 = vrcp.f32 %v838_v56  ;;  %1555 = vperm.xlu1 %2666, %v3150_v48  }
 0x218   : > { %v2764_v57 = vpop.eup %2763 }
 0x219   : > { %v3154_v61 = vmul.f32 %v2764_v57, %v3087_v8  ;;  %v3784_v8 = vmov 4  }
 0x21b   : > { %1531 = vperm.xlu0 %2665, %v3154_v61  }
 0x21c   : > { %v2766_v32 = vpop.eup %2765 }
 0x21d   : > { %v2768_v58 = vpop.eup %2767  ;;  %v3158_v59 = vmul.f32 %v2766_v32, %v3091_v55  ;;  %v3308_v32 = vld [vmem:[%s3245_s12 + $0x28] sm:$0xff] }
 0x21e   : > { %v3161_v60 = vmul.f32 %v2768_v58, %v3093_v54 }
 0x21f   : > { %1559 = vperm.xlu1 %2666, %v3158_v59  }
 0x220   : > { %v2770_v62 = vpop.eup %2769  ;;  %1535 = vperm.xlu0 %2665, %v3161_v60  }
 0x221   : > { %v2772_v63 = vpop.eup %2771  ;;  %v3166_v0 = vmul.f32 %v2770_v62, %v3099_v12 }
 0x222   : > { %v3169_v40 = vmul.f32 %v2772_v63, %v3101_v25 }
 0x223   : > { %1563 = vperm.xlu1 %2666, %v3166_v0  }
 0x224   : > { %1567 = vperm.xlu0 %2665, %v3169_v40  }
 0x227   : > { %2667 = vset.pattern.permute.xlu1 %v2815_v2 }
 0x228   : > { %2668 = vset.pattern.permute.xlu0 %v2815_v2  ;;  %1082 = vperm.xlu1 %2667, %v3108_v26  }
 0x229   : > { %1086 = vperm.xlu0 %2668, %v3113_v24  }
 0x22c   : > { %2669 = vset.pattern.permute.xlu1 %v2816_v4 }
 0x22d   : > { %1090 = vperm.xlu0 %2668, %v3118_v5   ;;  %1814 = vperm.xlu1 %2669, %v3108_v26  }
 0x231   : > { %1118 = vperm.xlu0 %2668, %v3126_v37   ;;  %1818 = vperm.xlu1 %2669, %v3113_v24  }
 0x235   : > { %2672 = vset.pattern.permute.xlu0 %v2816_v4  ;;  %2670 = vset.pattern.permute.xlu1 %v2815_v2 }
 0x236   : > { %1846 = vperm.xlu0 %2672, %v3122_v35   ;;  %1114 = vperm.xlu1 %2670, %v3122_v35  }
 0x23a   : > { %2674 = vset.pattern.permute.xlu0 %v2815_v2  ;;  %2671 = vset.pattern.permute.xlu1 %v2816_v4 }
 0x23b   : > { %1122 = vperm.xlu0 %2674, %v3134_v42   ;;  %1822 = vperm.xlu1 %2671, %v3118_v5  }
 0x23f   : > { %1098 = vperm.xlu0 %2674, %v3138_v10   ;;  %1850 = vperm.xlu1 %2671, %v3126_v37  }
 0x243   : > { %2677 = vset.pattern.permute.xlu0 %v2816_v4  ;;  %2673 = vset.pattern.permute.xlu1 %v2815_v2 }
 0x244   : > { %1830 = vperm.xlu0 %2677, %v3138_v10   ;;  %1094 = vperm.xlu1 %2673, %v3130_v16  }
 0x248   : > { %2680 = vset.pattern.permute.xlu0 %v2815_v2  ;;  %2675 = vset.pattern.permute.xlu1 %v2816_v4 }
 0x249   : > { %1130 = vperm.xlu0 %2680, %v3150_v48   ;;  %1826 = vperm.xlu1 %2675, %v3130_v16  }
 0x24d   : > { %1106 = vperm.xlu0 %2680, %v3154_v61   ;;  %1854 = vperm.xlu1 %2675, %v3134_v42  }
 0x251   : > { %2683 = vset.pattern.permute.xlu0 %v2816_v4  ;;  %2676 = vset.pattern.permute.xlu1 %v2815_v2 }
 0x252   : > { %1838 = vperm.xlu0 %2683, %v3154_v61   ;;  %1126 = vperm.xlu1 %2676, %v3142_v46  }
 0x256   : > { %2686 = vset.pattern.permute.xlu0 %v2815_v2  ;;  %2678 = vset.pattern.permute.xlu1 %v2816_v4 }
 0x257   : > { %1138 = vperm.xlu0 %2686, %v3166_v0   ;;  %1858 = vperm.xlu1 %2678, %v3142_v46  }
 0x25b   : > { %1142 = vperm.xlu0 %2686, %v3169_v40   ;;  %2679 = vset.pattern.permute.xlu1 %v2815_v2 }
 0x25c   : > { %1102 = vperm.xlu1 %2679, %v3146_v50  }
 0x25f   : > { %2688 = vset.pattern.permute.xlu0 %v2814_v1 }
 0x260   : > { %878 = vperm.xlu0 %2688, %v3113_v24   ;;  %2681 = vset.pattern.permute.xlu1 %v2816_v4 }
 0x261   : > { %1834 = vperm.xlu1 %2681, %v3146_v50  }
 0x263   : > { %v3222_v45 = vpop.permute.xlu1 %873  ;;  %v1508_v12 = vpop.permute.xlu0 %1507 }
 0x264   : > { %3792 = vst [vmem:[#allocation2_spill] sm:$0xff] %v3222_v45  ;;  %883 = vperm.xlu0 %2688, %v3118_v5   ;;  %v1570_v14 = vmul.f32 %v1508_v12, %v3253_v9  ;;  %v3319_v12 = vld [vmem:[%s3245_s12 + $0x60] sm:$0xff] }
 0x265   : > { %1862 = vperm.xlu1 %2681, %v3150_v48  }
 0x266   : > { %v1586_v23 = vsel %vm967_vm2, %v1570_v14, 0.0 }
 0x267   : > { %v1587_v33 = vrot.slane %v1586_v23, 4 }
 0x268   : > { %918 = vperm.xlu0 %2688, %v3126_v37   ;;  %v1512_v6 = vpop.permute.xlu1 %1511 }
 0x269   : > { %2682 = vset.pattern.permute.xlu1 %v2815_v2  ;;  %v1571_v13 = vmul.f32 %v1512_v6, %v3249_v7 }
 0x26a   : > { %1134 = vperm.xlu1 %2682, %v3158_v59  }
 0x26b   : > { %v1593_v17 = vsel %vm967_vm2, %v1571_v13, 0.0 }
 0x26c   : > { %2692 = vset.pattern.permute.xlu0 %v3784_v8  ;;  %v1594_v27 = vrot.slane %v1593_v17, 4 }
 0x26d   : > { %2153 = vperm.xlu0 %2692, %v3122_v35  }
 0x26e   : > { %v1516_v11 = vpop.permute.xlu1 %1515  ;;  %2684 = vset.pattern.permute.xlu1 %v2816_v4  ;;  %v1595_v41 = vadd.f32 %v1594_v27, %v1593_v17 }
 0x26f   : > { %1866 = vperm.xlu1 %2684, %v3158_v59   ;;  %v1572_v34 = vmul.f32 %v1516_v11, %v3260_v15 }
 0x270   : > { %v1596_v49 = vrot.slane %v1595_v41, 2 }
 0x271   : > { %2694 = vset.pattern.permute.xlu0 %v2814_v1  ;;  %v1600_v3 = vsel %vm967_vm2, %v1572_v34, 0.0  ;;  %v3326_v34 = vld [vmem:[%s3780_s3 + $0xc] sm:$0xf] }
 0x272   : > { %923 = vperm.xlu0 %2694, %v3134_v42   ;;  %v1597_v63 = vadd.f32 %v1596_v49, %v1595_v41  ;;  %2617 = vmatprep.subr.msk.mxu0 %vm1315_vm1, %v3326_v34  ;;  %v3334_v41 = vld [vmem:[%s3245_s12 + $0x30] sm:$0xff] }
 0x273   : > { %v1540_v55 = vpop.permute.xlu1 %1539  ;;  %2685 = vset.pattern.permute.xlu1 %v2815_v2 }
 0x274   : > { %1110 = vperm.xlu1 %2685, %v3161_v60   ;;  %v1578_v39 = vmul.f32 %v1540_v55, %v3275_v53 }
 0x276   : > { %893 = vperm.xlu0 %2694, %v3138_v10   ;;  %v1642_v28 = vsel %vm967_vm2, %v1578_v39, 0.0 }
 0x277   : > { %v1544_v54 = vpop.permute.xlu1 %1543  ;;  %v1643_v57 = vrot.slane %v1642_v28, 4 }
 0x278   : > { %2687 = vset.pattern.permute.xlu1 %v2816_v4  ;;  %v1579_v31 = vmul.f32 %v1544_v54, %v3265_v18 }
 0x279   : > { %1842 = vperm.xlu1 %2687, %v3161_v60   ;;  %v1644_v55 = vadd.f32 %v1643_v57, %v1642_v28 }
 0x27a   : > { %2697 = vset.pattern.permute.xlu0 %v3784_v8  ;;  %v1649_v22 = vsel %vm967_vm2, %v1579_v31, 0.0 }
 0x27b   : > { %2137 = vperm.xlu0 %2697, %v3138_v10   ;;  %v1520_v25 = vpop.permute.xlu1 %1519  ;;  %v1588_v10 = vadd.f32 %v1587_v33, %v1586_v23  ;;  %v1650_v44 = vrot.slane %v1649_v22, 4 }
 0x27c   : > { %v1573_v43 = vmul.f32 %v1520_v25, %v3288_v20 }
 0x27d   : > { %1870 = vperm.xlu1 %2687, %v3166_v0   ;;  %v1589_v56 = vrot.slane %v1588_v10, 2  ;;  %v1651_v58 = vadd.f32 %v1650_v44, %v1649_v22 }
 0x27e   : > { %v1607_v2 = vsel %vm967_vm2, %v1573_v43, 0.0 }
 0x27f   : > { %2700 = vset.pattern.permute.xlu0 %v2814_v1  ;;  %v1548_v21 = vpop.permute.xlu1 %1547  ;;  %v1590_v11 = vadd.f32 %v1589_v56, %v1588_v10  ;;  %v1652_v25 = vrot.slane %v1651_v58, 2  ;;  %v1608_v13 = vrot.slane %v1607_v2, 4 }
 0x280   : > { %933 = vperm.xlu0 %2700, %v3150_v48  }
 0x281   : > { %1874 = vperm.xlu1 %2687, %v3169_v40   ;;  %v1653_v22 = vadd.f32 %v1652_v25, %v1651_v58  ;;  %v3342_v58 = vld [vmem:[%s3245_s12 + $0x68] sm:$0xff] }
 0x282   : > { %3793 = vst [vmem:[#allocation3_spill] sm:$0xff] %v3342_v58 }
 0x284   : > { %903 = vperm.xlu0 %2700, %v3154_v61  }
 0x285   : > { %2689 = vset.pattern.permute.xlu1 %v3784_v8 }
 0x286   : > { %2121 = vperm.xlu1 %2689, %v3108_v26   ;;  %v1524_v38 = vpop.permute.xlu1 %1523  ;;  %v1601_v26 = vrot.slane %v1600_v3, 4 }
 0x287   : > { %v1574_v52 = vmul.f32 %v1524_v38, %v3291_v29  ;;  %v1645_v38 = vrot.slane %v1644_v55, 2 }
 0x288   : > { %2703 = vset.pattern.permute.xlu0 %v3784_v8  ;;  %v1602_v19 = vadd.f32 %v1601_v26, %v1600_v3  ;;  %v1591_v3 = vrot.slane %v1590_v11, 1  ;;  %v1609_v26 = vadd.f32 %v1608_v13, %v1607_v2 }
 0x289   : > { %2145 = vperm.xlu0 %2703, %v3154_v61   ;;  %v1580_v61 = vmul.f32 %v1548_v21, %v3295_v36  ;;  %v1614_v6 = vsel %vm967_vm2, %v1574_v52, 0.0  ;;  %v1598_v21 = vrot.slane %v1597_v63, 1 }
 0x28a   : > { %2125 = vperm.xlu1 %2689, %v3113_v24   ;;  %v1552_v24 = vpop.permute.xlu1 %1551  ;;  %v1603_v30 = vrot.slane %v1602_v19, 2  ;;  %v1615_v23 = vrot.slane %v1614_v6, 4  ;;  %v1592_v57 = vadd.f32 %v1591_v3, %v1590_v11  ;;  %v1610_v2 = vrot.slane %v1609_v26, 2 }
 0x28b   : > { %v1581_v62 = vmul.f32 %v1552_v24, %v3300_v51  ;;  %v1656_v54 = vsel %vm967_vm2, %v1580_v61, 0.0  ;;  %v1599_v28 = vadd.f32 %v1598_v21, %v1597_v63 }
 0x28c   : > { %v1657_v27 = vrot.slane %v1656_v54, 4  ;;  %v1616_v44 = vadd.f32 %v1615_v23, %v1614_v6  ;;  %v1611_v3 = vadd.f32 %v1610_v2, %v1609_v26 }
 0x28d   : > { %2706 = vset.pattern.permute.xlu0 %v2814_v1  ;;  %v1663_v14 = vsel %vm967_vm2, %v1581_v62, 0.0  ;;  %v1654_v62 = vrot.slane %v1653_v22, 1  ;;  %v3350_v6 = vsel %vm1290_vm3, %v1599_v28, %v1592_v57 }
 0x28e   : > { %943 = vperm.xlu0 %2706, %v3166_v0   ;;  %2690 = vset.pattern.permute.xlu1 %v2814_v1  ;;  %v1664_v39 = vrot.slane %v1663_v14, 4 }
 0x28f   : > { %913 = vperm.xlu1 %2690, %v3122_v35  }
 0x290   : > { %v1665_v61 = vadd.f32 %v1664_v39, %v1663_v14  ;;  %v3365_v39 = vld [vmem:[%s3245_s12 + $0x78] sm:$0xff] }
 0x291   : > { %3795 = vst [vmem:[#allocation5_spill] sm:$0xff] %v3365_v39 }
 0x292   : > { %948 = vperm.xlu0 %2706, %v3169_v40   ;;  %v1528_v4 = vpop.permute.xlu0 %1527  ;;  %v1666_v23 = vrot.slane %v1665_v61, 2 }
 0x293   : > { %v1575_v35 = vmul.f32 %v1528_v4, %v3308_v32  ;;  %2691 = vset.pattern.permute.xlu1 %v3784_v8 }
 0x294   : > { %2129 = vperm.xlu1 %2691, %v3118_v5   ;;  %v1604_v5 = vadd.f32 %v1603_v30, %v1602_v19  ;;  %v1658_v19 = vadd.f32 %v1657_v27, %v1656_v54  ;;  %v3347_v30 = vld [vmem:[%s3245_s12 + $0x38] sm:$0xff]  ;;  %v1667_v2 = vadd.f32 %v1666_v23, %v1665_v61 }
 0x295   : > { %v1621_v17 = vsel %vm967_vm2, %v1575_v35, 0.0  ;;  %3794 = vst [vmem:[#allocation4_spill] sm:$0xff] %v3347_v30  ;;  %v1617_v35 = vrot.slane %v1616_v44, 2 }
 0x296   : > { %v1556_v47 = vpop.permute.xlu1 %1555  ;;  %2708 = vset.pattern.permute.xlu0 %v3784_v8  ;;  %v1622_v31 = vrot.slane %v1621_v17, 4  ;;  %v1605_v24 = vrot.slane %v1604_v5, 1  ;;  %v1659_v25 = vrot.slane %v1658_v19, 2 }
 0x297   : > { %v1582_v33 = vmul.f32 %v1556_v47, %v3319_v12 }
 0x298   : > { %2157 = vperm.xlu1 %2691, %v3126_v37   ;;  %v1623_v52 = vadd.f32 %v1622_v31, %v1621_v17  ;;  %v3338_v37 = vadd.f32 %v1645_v38, %v1644_v55  ;;  %v3352_v54 = vadd.f32 %v1605_v24, %v1604_v5  ;;  %v3358_v31 = vld [vmem:[%s3245_s12 + $0x70] sm:$0xff] }
 0x299   : > { %v1670_v10 = vsel %vm967_vm2, %v1582_v33, 0.0  ;;  %v3360_v33 = vadd.f32 %v1654_v62, %v1653_v22  ;;  %v1660_v22 = vadd.f32 %v1659_v25, %v1658_v19 }
 0x29a   : > { %v1671_v49 = vrot.slane %v1670_v10, 4  ;;  %v1532_v43 = vpop.permute.xlu0 %1531  ;;  %v1624_v13 = vrot.slane %v1623_v52, 2  ;;  %v1647_v21 = vrot.slane %v3338_v37, 1 }
 0x29b   : > { %v1576_v56 = vmul.f32 %v1532_v43, %v3334_v41  ;;  %v1661_v61 = vrot.slane %v1660_v22, 1 }
 0x29c   : > { %2693 = vset.pattern.permute.xlu1 %v2814_v1  ;;  %v1672_v63 = vadd.f32 %v1671_v49, %v1670_v10  ;;  %v1618_v10 = vadd.f32 %v1617_v35, %v1616_v44  ;;  %v1612_v35 = vrot.slane %v1611_v3, 1 }
 0x29d   : > { %v1628_v4 = vsel %vm967_vm2, %v1576_v56, 0.0  ;;  %888 = vperm.xlu1 %2693, %v3130_v16   ;;  %v1625_v56 = vadd.f32 %v1624_v13, %v1623_v52  ;;  %v1662_v45 = vadd.f32 %v1661_v61, %v1660_v22 }
 0x29e   : > { %v1629_v11 = vrot.slane %v1628_v4, 4  ;;  %v1560_v55 = vpop.permute.xlu1 %1559  ;;  %v1673_v5 = vrot.slane %v1672_v63, 2 }
 0x29f   : > { %v1583_v14 = vmul.f32 %v1560_v55, %v3342_v58  ;;  %v1536_v17 = vpop.permute.xlu0 %1535  ;;  %v1626_v13 = vrot.slane %v1625_v56, 1 }
 0x2a0   : > { %v1630_v47 = vadd.f32 %v1629_v11, %v1628_v4  ;;  %v1577_v27 = vmul.f32 %v1536_v17, %v3347_v30  ;;  %v1674_v55 = vadd.f32 %v1673_v5, %v1672_v63 }
 0x2a1   : > { %v1677_v38 = vsel %vm967_vm2, %v1583_v14, 0.0  ;;  %2695 = vset.pattern.permute.xlu1 %v3784_v8  ;;  %v1627_v30 = vadd.f32 %v1626_v13, %v1625_v56 }
 0x2a2   : > { %v1631_v28 = vrot.slane %v1630_v47, 2  ;;  %v1678_v49 = vrot.slane %v1677_v38, 4  ;;  %v1635_v43 = vsel %vm967_vm2, %v1577_v27, 0.0  ;;  %v1564_v24 = vpop.permute.xlu1 %1563  ;;  %2133 = vperm.xlu1 %2695, %v3130_v16   ;;  %v1619_v16 = vrot.slane %v1618_v10, 1 }
 0x2a3   : > { %v1636_v26 = vrot.slane %v1635_v43, 4  ;;  %v1584_v57 = vmul.f32 %v1564_v24, %v3358_v31  ;;  %v1568_v62 = vpop.permute.xlu0 %1567  ;;  %v1675_v24 = vrot.slane %v1674_v55, 1 }
 0x2a4   : > { %v1632_v4 = vadd.f32 %v1631_v28, %v1630_v47  ;;  %v1679_v11 = vadd.f32 %v1678_v49, %v1677_v38  ;;  %v1585_v44 = vmul.f32 %v1568_v62, %v3365_v39  ;;  %v1668_v38 = vrot.slane %v1667_v2, 1 }
 0x2a5   : > { %v1637_v14 = vadd.f32 %v1636_v26, %v1635_v43  ;;  %v1684_v17 = vsel %vm967_vm2, %v1584_v57, 0.0  ;;  %v1613_v43 = vadd.f32 %v1612_v35, %v1611_v3  ;;  %v1648_v62 = vadd.f32 %v1647_v21, %v3338_v37 }
 0x2a6   : > { %v1680_v19 = vrot.slane %v1679_v11, 2  ;;  %v1685_v52 = vrot.slane %v1684_v17, 4  ;;  %v1691_v25 = vsel %vm967_vm2, %v1585_v44, 0.0  ;;  %2161 = vperm.xlu1 %2695, %v3134_v42   ;;  %v1633_v28 = vrot.slane %v1632_v4, 1 }
 0x2a7   : > { %v1638_v23 = vrot.slane %v1637_v14, 2  ;;  %v1692_v47 = vrot.slane %v1691_v25, 4  ;;  %v1083_v27 = vpop.permute.xlu1 %1082  ;;  %v1620_v44 = vadd.f32 %v1619_v16, %v1618_v10  ;;  %v1716_v37 = vsel %vm1292_vm4, %v3352_v54, %v3350_v6 }
 0x2a8   : > { %v1681_v63 = vadd.f32 %v1680_v19, %v1679_v11  ;;  %v1686_v5 = vadd.f32 %v1685_v52, %v1684_v17  ;;  %v1087_v49 = vpop.permute.xlu0 %1086  ;;  %v1669_v11 = vadd.f32 %v1668_v38, %v1667_v2  ;;  %v1634_v35 = vadd.f32 %v1633_v28, %v1632_v4 }
 0x2a9   : > { %v1639_v26 = vadd.f32 %v1638_v23, %v1637_v14  ;;  %v1693_v57 = vadd.f32 %v1692_v47, %v1691_v25  ;;  %v1722_v21 = vsel %vm1290_vm3, %v3360_v33, %v1648_v62  ;;  %v1676_v10 = vadd.f32 %v1675_v24, %v1674_v55 }
 0x2aa   : > { %v1682_v8 = vrot.slane %v1681_v63, 1  ;;  %v1687_v42 = vrot.slane %v1686_v5, 2  ;;  %2696 = vset.pattern.permute.xlu1 %v2814_v1  ;;  %v1717_v22 = vsel %vm1294_vm5, %v1613_v43, %v1716_v37  ;;  %v1723_v25 = vsel %vm1292_vm4, %v1662_v45, %v1722_v21 }
 0x2ab   : > { %v1694_v58 = vrot.slane %v1693_v57, 2  ;;  %928 = vperm.xlu1 %2696, %v3142_v46   ;;  %v1640_v39 = vrot.slane %v1639_v26, 1  ;;  %v1718_v2 = vsel %vm1296_vm6, %v1620_v44, %v1717_v22  ;;  %v3796_v4 = vmov 4  }
 0x2ac   : > { %v1688_v17 = vadd.f32 %v1687_v42, %v1686_v5  ;;  %v1091_v19 = vpop.permute.xlu0 %1090  ;;  %v1815_v3 = vpop.permute.xlu1 %1814  ;;  %v1683_v56 = vadd.f32 %v1682_v8, %v1681_v63  ;;  %v1719_v13 = vsel %vm1298_vm7, %v1627_v30, %v1718_v2  ;;  %v1724_v6 = vsel %vm1294_vm5, %v1669_v11, %v1723_v25 }
 0x2ad   : > { %v1695_v14 = vadd.f32 %v1694_v58, %v1693_v57  ;;  %v1641_v52 = vadd.f32 %v1640_v39, %v1639_v26  ;;  %v1720_v33 = vsel %vm1300_vm8, %v1634_v35, %v1719_v13  ;;  %v1725_v23 = vsel %vm1296_vm6, %v1676_v10, %v1724_v6 }
 0x2ae   : > { %v1689_v16 = vrot.slane %v1688_v17, 1  ;;  %v1726_v45 = vsel %vm1298_vm7, %v1683_v56, %v1725_v23  ;;  %v1145_v28 = vmul.f32 %v1083_v27, %v3253_v9  ;;  %v1146_v63 = vmul.f32 %v1087_v49, %v3249_v7 }
 0x2af   : > { %v1696_v61 = vrot.slane %v1695_v14, 1  ;;  %2698 = vset.pattern.permute.xlu1 %v3796_v4  ;;  %v1721_v39 = vsel %vm1302_vm9, %v1641_v52, %v1720_v33  ;;  %v1147_v57 = vmul.f32 %v1091_v19, %v3260_v15  ;;  %v1877_v49 = vmul.f32 %v1815_v3, %v3253_v9 }
 0x2b0   : > { %v1690_v54 = vadd.f32 %v1689_v16, %v1688_v17  ;;  %v1119_v58 = vpop.permute.xlu0 %1118  ;;  %v1819_v55 = vpop.permute.xlu1 %1818  ;;  %2165 = vperm.xlu1 %2698, %v3142_v46   ;;  %2614 = vmatprep.mubr.msk.f32.mxu0 %vm967_vm2, %v1721_v39  ;;  %v1161_v43 = vsel %vm967_vm2, %v1145_v28, 0.0  ;;  %v1168_v24 = vsel %vm967_vm2, %v1146_v63, 0.0 }
 0x2b1   : > { %v1697_v8 = vadd.f32 %v1696_v61, %v1695_v14  ;;  %v1169_v27 = vrot.slane %v1168_v24, 4  ;;  %v1175_v44 = vsel %vm967_vm2, %v1147_v57, 0.0  ;;  %v1878_v42 = vmul.f32 %v1819_v55, %v3249_v7 }
 0x2b2   : > { %v1727_v30 = vsel %vm1300_vm8, %v1690_v54, %v1726_v45  ;;  %v1893_v35 = vsel %vm967_vm2, %v1877_v49, 0.0  ;;  %v1154_v19 = vmul.f32 %v1119_v58, %v3265_v18 }
 0x2b3   : > { %v1728_v47 = vsel %vm1302_vm9, %v1697_v8, %v1727_v30  ;;  %v1170_v17 = vadd.f32 %v1169_v27, %v1168_v24  ;;  %v1894_v21 = vrot.slane %v1893_v35, 4  ;;  %v1900_v9 = vsel %vm967_vm2, %v1878_v42, 0.0 }
 0x2b4   : > { %2699 = vset.pattern.permute.xlu1 %v2814_v1  ;;  %2615 = vmatmul.mubr.msk.f32.vlgmr.msra.gmra.mrb[0].mxu0 %vm967_vm2, %v1728_v47  ;;  %v1224_v14 = vsel %vm967_vm2, %v1154_v19, 0.0  ;;  %v1901_v25 = vrot.slane %v1900_v9, 4 }
 0x2b5   : > { %v1115_v38 = vpop.permute.xlu1 %1114  ;;  %898 = vperm.xlu1 %2699, %v3146_v50   ;;  %v1847_v46 = vpop.permute.xlu0 %1846  ;;  %2618 = vmatpush3.msk.msra.mxu0 %vm1315_vm1, %v3326_v34  ;;  %v1162_v34 = vrot.slane %v1161_v43, 4  ;;  %v1171_v7 = vrot.slane %v1170_v17, 2  ;;  %v1895_v13 = vadd.f32 %v1894_v21, %v1893_v35  ;;  %v1225_v6 = vrot.slane %v1224_v14, 4 }
 0x2b6   : > { %v1153_v3 = vmul.f32 %v1115_v38, %v3275_v53  ;;  %v1885_v61 = vmul.f32 %v1847_v46, %v3275_v53 }
 0x2b7   : > { %v1163_v11 = vadd.f32 %v1162_v34, %v1161_v43  ;;  %v1172_v58 = vadd.f32 %v1171_v7, %v1170_v17  ;;  %v1896_v53 = vrot.slane %v1895_v13, 2  ;;  %v1226_v30 = vadd.f32 %v1225_v6, %v1224_v14 }
 0x2b8   : > { %v1217_v54 = vsel %vm967_vm2, %v1153_v3, 0.0 }
 0x2b9   : > { %2701 = vset.pattern.permute.xlu1 %v3796_v4  ;;  %v1164_v10 = vrot.slane %v1163_v11, 2  ;;  %v1218_v45 = vrot.slane %v1217_v54, 4  ;;  %v1173_v28 = vrot.slane %v1172_v58, 1  ;;  %v1897_v49 = vadd.f32 %v1896_v53, %v1895_v13 }
 0x2ba   : > { %v1823_v5 = vpop.permute.xlu1 %1822  ;;  %2141 = vperm.xlu1 %2701, %v3146_v50   ;;  %v1123_v26 = vpop.permute.xlu0 %1122 }
 0x2bb   : > { %v1155_v22 = vmul.f32 %v1123_v26, %v3295_v36  ;;  %v1879_v16 = vmul.f32 %v1823_v5, %v3260_v15  ;;  %v1165_v33 = vadd.f32 %v1164_v10, %v1163_v11  ;;  %v1902_v15 = vadd.f32 %v1901_v25, %v1900_v9 }
 0x2bc   : > { %v1219_v57 = vadd.f32 %v1218_v45, %v1217_v54  ;;  %v1174_v35 = vadd.f32 %v1173_v28, %v1172_v58 }
 0x2bd   : > { %v1231_v55 = vsel %vm967_vm2, %v1155_v22, 0.0  ;;  %v1907_v39 = vsel %vm967_vm2, %v1879_v16, 0.0  ;;  %v1166_v46 = vrot.slane %v1165_v33, 1 }
 0x2be   : > { %v3408_v62 = vpop.permute.xlu1 %1850  ;;  %2169 = vperm.xlu1 %2701, %v3150_v48   ;;  %v1099_v50 = vpop.permute.xlu0 %1098  ;;  %v1176_v48 = vrot.slane %v1175_v44, 4  ;;  %v1232_v47 = vrot.slane %v1231_v55, 4  ;;  %v1908_v63 = vrot.slane %v1907_v39, 4  ;;  %v1220_v3 = vrot.slane %v1219_v57, 2 }
 0x2bf   : > { %v1149_v24 = vmul.f32 %v1099_v50, %v3291_v29  ;;  %v1886_v11 = vmul.f32 %v3408_v62, %v3265_v18  ;;  %v1167_v17 = vadd.f32 %v1166_v46, %v1165_v33  ;;  %v1898_v62 = vrot.slane %v1897_v49, 1 }
 0x2c0   : > { %v1177_v56 = vadd.f32 %v1176_v48, %v1175_v44  ;;  %v1227_v44 = vrot.slane %v1226_v30, 2  ;;  %v1233_v42 = vadd.f32 %v1232_v47, %v1231_v55  ;;  %v1909_v50 = vadd.f32 %v1908_v63, %v1907_v39 }
 0x2c1   : > { %v1956_v14 = vsel %vm967_vm2, %v1886_v11, 0.0  ;;  %v1221_v6 = vadd.f32 %v1220_v3, %v1219_v57  ;;  %v1899_v55 = vadd.f32 %v1898_v62, %v1897_v49  ;;  %v3472_v3 = vld [vmem:[%s3780_s3] sm:$0xf] }
 0x2c2   : > { %2702 = vset.pattern.permute.xlu1 %v2814_v1  ;;  %v1178_v8 = vrot.slane %v1177_v56, 2  ;;  %v1234_v7 = vrot.slane %v1233_v42, 2  ;;  %v1957_v54 = vrot.slane %v1956_v14, 4  ;;  %2607 = vmatprep.subr.msk.mxu1 %vm1315_vm1, %v3472_v3 }
 0x2c3   : > { %v1095_v37 = vpop.permute.xlu1 %1094  ;;  %938 = vperm.xlu1 %2702, %v3158_v59   ;;  %v1831_v52 = vpop.permute.xlu0 %1830 }
 0x2c4   : > { %v1179_v5 = vadd.f32 %v1178_v8, %v1177_v56  ;;  %v1881_v26 = vmul.f32 %v1831_v52, %v3291_v29  ;;  %v1148_v34 = vmul.f32 %v1095_v37, %v3288_v20  ;;  %v1189_v37 = vsel %vm967_vm2, %v1149_v24, 0.0 }
 0x2c5   : > { %v1190_v56 = vrot.slane %v1189_v37, 4  ;;  %v1235_v8 = vadd.f32 %v1234_v7, %v1233_v42 }
 0x2c6   : > { %v1180_v19 = vrot.slane %v1179_v5, 1  ;;  %v1921_v21 = vsel %vm967_vm2, %v1881_v26, 0.0  ;;  %v1182_v10 = vsel %vm967_vm2, %v1148_v34, 0.0 }
 0x2c7   : > { %2704 = vset.pattern.permute.xlu1 %v3796_v4  ;;  %v1922_v16 = vrot.slane %v1921_v21, 4  ;;  %v1191_v45 = vadd.f32 %v1190_v56, %v1189_v37  ;;  %v1236_v26 = vrot.slane %v1235_v8, 1 }
 0x2c8   : > { %v1827_v2 = vpop.permute.xlu1 %1826  ;;  %2173 = vperm.xlu1 %2704, %v3158_v59   ;;  %v1949_v59 = vsel %vm967_vm2, %v1885_v61, 0.0  ;;  %v1131_v38 = vpop.permute.xlu0 %1130  ;;  %v1183_v61 = vrot.slane %v1182_v10, 4  ;;  %v1181_v58 = vadd.f32 %v1180_v19, %v1179_v5  ;;  %v1958_v5 = vadd.f32 %v1957_v54, %v1956_v14 }
 0x2c9   : > { %v1950_v43 = vrot.slane %v1949_v59, 4  ;;  %v1880_v29 = vmul.f32 %v1827_v2, %v3288_v20  ;;  %v1157_v18 = vmul.f32 %v1131_v38, %v3319_v12  ;;  %v1910_v20 = vrot.slane %v1909_v50, 2 }
 0x2ca   : > { %v1291_v2 = vsel %vm1290_vm3, %v1174_v35, %v1167_v17  ;;  %v1923_v53 = vadd.f32 %v1922_v16, %v1921_v21  ;;  %v1184_v38 = vadd.f32 %v1183_v61, %v1182_v10  ;;  %v1959_v37 = vrot.slane %v1958_v5, 2 }
 0x2cb   : > { %v1951_v48 = vadd.f32 %v1950_v43, %v1949_v59  ;;  %v1914_v52 = vsel %vm967_vm2, %v1880_v29, 0.0  ;;  %v1245_v33 = vsel %vm967_vm2, %v1157_v18, 0.0  ;;  %v1911_v59 = vadd.f32 %v1910_v20, %v1909_v50 }
 0x2cc   : > { %v3429_v23 = vpop.permute.xlu1 %1854  ;;  %2705 = vset.pattern.permute.xlu1 %v2814_v1  ;;  %v1903_v1 = vrot.slane %v1902_v15, 2  ;;  %v1915_v39 = vrot.slane %v1914_v52, 4  ;;  %v1246_v46 = vrot.slane %v1245_v33, 4  ;;  %v1222_v43 = vrot.slane %v1221_v6, 1 }
 0x2cd   : > { %908 = vperm.xlu1 %2705, %v3161_v60   ;;  %v1952_v25 = vrot.slane %v1951_v48, 2  ;;  %v3461_v57 = vsel %vm1292_vm4, %v1181_v58, %v1291_v2  ;;  %v1912_v49 = vrot.slane %v1911_v59, 1  ;;  %v1924_v42 = vrot.slane %v1923_v53, 2 }
 0x2ce   : > { %v1904_v9 = vadd.f32 %v1903_v1, %v1902_v15  ;;  %v1916_v1 = vadd.f32 %v1915_v39, %v1914_v52  ;;  %v1247_v17 = vadd.f32 %v1246_v46, %v1245_v33  ;;  %v3478_v2 = vadd.f32 %v1959_v37, %v1958_v5 }
 0x2cf   : > { %v3454_v47 = vadd.f32 %v1952_v25, %v1951_v48  ;;  %v1223_v48 = vadd.f32 %v1222_v43, %v1221_v6  ;;  %v1913_v10 = vadd.f32 %v1912_v49, %v1911_v59  ;;  %v1925_v62 = vadd.f32 %v1924_v42, %v1923_v53  ;;  %v3490_v59 = vld [vmem:[%s3780_s3 + $0x10] sm:$0xf] }
 0x2d0   : > { %v1905_v13 = vrot.slane %v1904_v9, 1  ;;  %v1917_v21 = vrot.slane %v1916_v1, 2  ;;  %v1248_v14 = vrot.slane %v1247_v17, 2  ;;  %2622 = vmatprep.subr.msk.mxu0 %vm1315_vm1, %v3490_v59 }
 0x2d1   : > { %v1127_v27 = vpop.permute.xlu1 %1126  ;;  %2707 = vset.pattern.permute.xlu1 %v3796_v4  ;;  %v1107_v4 = vpop.permute.xlu0 %1106  ;;  %v1954_v11 = vrot.slane %v3454_v47, 1  ;;  %v1926_v39 = vrot.slane %v1925_v62, 1 }
 0x2d2   : > { %2149 = vperm.xlu1 %2707, %v3161_v60   ;;  %v1228_v60 = vadd.f32 %v1227_v44, %v1226_v30  ;;  %v1156_v28 = vmul.f32 %v1127_v27, %v3300_v51  ;;  %v1906_v63 = vadd.f32 %v1905_v13, %v1904_v9  ;;  %v1151_v24 = vmul.f32 %v1107_v4, %v3334_v41 }
 0x2d3   : > { %v1192_v44 = vrot.slane %v1191_v45, 2  ;;  %v1185_v27 = vrot.slane %v1184_v38, 2  ;;  %v1918_v6 = vadd.f32 %v1917_v21, %v1916_v1  ;;  %v3502_v42 = vadd.f32 %v1926_v39, %v1925_v62 }
 0x2d4   : > { %v1238_v35 = vsel %vm967_vm2, %v1156_v28, 0.0  ;;  %v2022_v19 = vsel %vm1290_vm3, %v1906_v63, %v1899_v55 }
 0x2d5   : > { %v1839_v15 = vpop.permute.xlu0 %1838  ;;  %v1193_v18 = vadd.f32 %v1192_v44, %v1191_v45  ;;  %v1186_v7 = vadd.f32 %v1185_v27, %v1184_v38  ;;  %v2023_v55 = vsel %vm1292_vm4, %v1913_v10, %v2022_v19  ;;  %v3797_v38 = vld [vmem:[#allocation5_spill] sm:$0xff]  ;;  %v1919_v43 = vrot.slane %v1918_v6, 1 }
 0x2d6   : > { %v3447_v22 = vpop.permute.xlu1 %1858  ;;  %2177 = vperm.xlu1 %2707, %v3166_v0   ;;  %v1229_v0 = vrot.slane %v1228_v60, 1  ;;  %v1883_v61 = vmul.f32 %v1839_v15, %v3334_v41  ;;  %v1249_v15 = vadd.f32 %v1248_v14, %v1247_v17 }
 0x2d7   : > { %v1187_v41 = vrot.slane %v1186_v7, 1  ;;  %v1888_v5 = vmul.f32 %v3447_v22, %v3300_v51  ;;  %v1920_v37 = vadd.f32 %v1919_v43, %v1918_v6 }
 0x2d8   : > { %v1230_v34 = vadd.f32 %v1229_v0, %v1228_v60  ;;  %v1239_v60 = vrot.slane %v1238_v35, 4 }
 0x2d9   : > { %v1139_v50 = vpop.permute.xlu0 %1138  ;;  %v1188_v27 = vadd.f32 %v1187_v41, %v1186_v7  ;;  %v2024_v6 = vsel %vm1294_vm5, %v1920_v37, %v2023_v55  ;;  %v3799_v55 = vld [vmem:[#allocation4_spill] sm:$0xff] }
 0x2da   : > { %2181 = vperm.xlu1 %2707, %v3169_v40   ;;  %v1887_v40 = vmul.f32 %v3429_v23, %v3295_v36  ;;  %v1203_v36 = vsel %vm967_vm2, %v1151_v24, 0.0  ;;  %v1237_v23 = vadd.f32 %v1236_v26, %v1235_v8  ;;  %v1159_v56 = vmul.f32 %v1139_v50, %v3358_v31  ;;  %v3798_v26 = vld [vmem:[#allocation3_spill] sm:$0xff] }
 0x2db   : > { %v1103_v30 = vpop.permute.xlu1 %1102  ;;  %v1204_v20 = vrot.slane %v1203_v36, 4  ;;  %v1304_v52 = vsel %vm1290_vm3, %v1230_v34, %v1223_v48  ;;  %v1194_v8 = vrot.slane %v1193_v18, 1  ;;  %v1240_v0 = vadd.f32 %v1239_v60, %v1238_v35 }
 0x2dc   : > { %v1963_v4 = vsel %vm967_vm2, %v1887_v40, 0.0  ;;  %v1150_v9 = vmul.f32 %v1103_v30, %v3308_v32  ;;  %v3482_v13 = vsel %vm1292_vm4, %v1237_v23, %v1304_v52  ;;  %v1259_v53 = vsel %vm967_vm2, %v1159_v56, 0.0 }
 0x2dd   : > { %v1964_v25 = vrot.slane %v1963_v4, 4  ;;  %v1143_v54 = vpop.permute.xlu0 %1142  ;;  %v1205_v45 = vadd.f32 %v1204_v20, %v1203_v36  ;;  %v1195_v40 = vadd.f32 %v1194_v8, %v1193_v18  ;;  %v1961_v34 = vrot.slane %v3478_v2, 1 }
 0x2de   : > { %v1196_v33 = vsel %vm967_vm2, %v1150_v9, 0.0  ;;  %v1160_v46 = vmul.f32 %v1143_v54, %v3797_v38  ;;  %v1241_v49 = vrot.slane %v1240_v0, 2  ;;  %v1260_v44 = vrot.slane %v1259_v53, 4 }
 0x2df   : > { %v1965_v30 = vadd.f32 %v1964_v25, %v1963_v4  ;;  %v1197_v28 = vrot.slane %v1196_v33, 4  ;;  %v1206_v17 = vrot.slane %v1205_v45, 2  ;;  %v1250_v48 = vrot.slane %v1249_v15, 1 }
 0x2e0   : > { %v1835_v29 = vpop.permute.xlu1 %1834  ;;  %v1266_v50 = vsel %vm967_vm2, %v1160_v46, 0.0  ;;  %v1970_v23 = vsel %vm967_vm2, %v1888_v5, 0.0  ;;  %v1242_v4 = vadd.f32 %v1241_v49, %v1240_v0  ;;  %v1261_v9 = vadd.f32 %v1260_v44, %v1259_v53 }
 0x2e1   : > { %v1882_v58 = vmul.f32 %v1835_v29, %v3308_v32  ;;  %v1935_v32 = vsel %vm967_vm2, %v1883_v61, 0.0  ;;  %v1198_v29 = vadd.f32 %v1197_v28, %v1196_v33  ;;  %v3505_v19 = vpop.permute.xlu0 %878  ;;  %v1966_v36 = vrot.slane %v1965_v30, 2 }
 0x2e2   : > { %v1936_v35 = vrot.slane %v1935_v32, 4  ;;  %v1207_v62 = vadd.f32 %v1206_v17, %v1205_v45  ;;  %v1267_v7 = vrot.slane %v1266_v50, 4  ;;  %v1295_v25 = vsel %vm1294_vm5, %v1188_v27, %v3461_v57 }
 0x2e3   : > { %v1928_v24 = vsel %vm967_vm2, %v1882_v58, 0.0  ;;  %v1199_v20 = vrot.slane %v1198_v29, 2  ;;  %v1251_v61 = vadd.f32 %v1250_v48, %v1249_v15  ;;  %v3514_v54 = vadd.f32 %v1966_v36, %v1965_v30 }
 0x2e4   : > { %v1863_v16 = vpop.permute.xlu1 %1862  ;;  %v1929_v51 = vrot.slane %v1928_v24, 4  ;;  %v1937_v60 = vadd.f32 %v1936_v35, %v1935_v32  ;;  %v1971_v33 = vrot.slane %v1970_v23, 4  ;;  %v1243_v58 = vrot.slane %v1242_v4, 1 }
 0x2e5   : > { %v1889_v10 = vmul.f32 %v1863_v16, %v3319_v12  ;;  %v1262_v12 = vrot.slane %v1261_v9, 2  ;;  %v3516_v16 = vpop.permute.xlu0 %883  ;;  %v1208_v41 = vrot.slane %v1207_v62, 1  ;;  %v1268_v53 = vadd.f32 %v1267_v7, %v1266_v50 }
 0x2e6   : > { %v1930_v56 = vadd.f32 %v1929_v51, %v1928_v24  ;;  %v1938_v45 = vrot.slane %v1937_v60, 2  ;;  %v1200_v57 = vadd.f32 %v1199_v20, %v1198_v29  ;;  %v1968_v28 = vrot.slane %v3514_v54, 1 }
 0x2e7   : > { %v1977_v8 = vsel %vm967_vm2, %v1889_v10, 0.0  ;;  %v1297_v5 = vsel %vm1296_vm6, %v1195_v40, %v1295_v25  ;;  %v1244_v24 = vadd.f32 %v1243_v58, %v1242_v4  ;;  %v1269_v44 = vrot.slane %v1268_v53, 2 }
 0x2e8   : > { %v1931_v15 = vrot.slane %v1930_v56, 2  ;;  %v1978_v43 = vrot.slane %v1977_v8, 4  ;;  %v1209_v50 = vadd.f32 %v1208_v41, %v1207_v62  ;;  %v1939_v29 = vadd.f32 %v1938_v45, %v1937_v60 }
 0x2e9   : > { %v1135_v63 = vpop.permute.xlu1 %1134  ;;  %v1201_v51 = vrot.slane %v1200_v57, 1  ;;  %v3524_v48 = vpop.permute.xlu0 %918  ;;  %v1306_v4 = vsel %vm1294_vm5, %v1244_v24, %v3482_v13  ;;  %v1270_v62 = vadd.f32 %v1269_v44, %v1268_v53 }
 0x2ea   : > { %v1158_v1 = vmul.f32 %v1135_v63, %v3798_v26  ;;  %v1972_v63 = vadd.f32 %v1971_v33, %v1970_v23  ;;  %v1979_v23 = vadd.f32 %v1978_v43, %v1977_v8  ;;  %v1307_v41 = vsel %vm1296_vm6, %v1251_v61, %v1306_v4 }
 0x2eb   : > { %v1271_v45 = vrot.slane %v1270_v62, 1 }
 0x2ec   : > { %v1252_v22 = vsel %vm967_vm2, %v1158_v1, 0.0  ;;  %v1973_v36 = vrot.slane %v1972_v63, 2 }
 0x2ed   : > { %v1253_v18 = vrot.slane %v1252_v22, 4  ;;  %v3533_v13 = vpop.permute.xlu0 %2153 }
 0x2ee   : > { %v1867_v21 = vpop.permute.xlu1 %1866  ;;  %v1974_v58 = vadd.f32 %v1973_v36, %v1972_v63 }
 0x2ef   : > { %v1890_v14 = vmul.f32 %v1867_v21, %v3798_v26  ;;  %v1254_v52 = vadd.f32 %v1253_v18, %v1252_v22  ;;  %v1263_v26 = vadd.f32 %v1262_v12, %v1261_v9  ;;  %v1932_v22 = vadd.f32 %v1931_v15, %v1930_v56 }
 0x2f0   : > { %v2025_v21 = vsel %vm1296_vm6, %v3502_v42, %v2024_v6  ;;  %v1940_v56 = vrot.slane %v1939_v29, 1  ;;  %v1980_v12 = vrot.slane %v1979_v23, 2 }
 0x2f1   : > { %v1255_v39 = vrot.slane %v1254_v52, 2  ;;  %v1984_v32 = vsel %vm967_vm2, %v1890_v14, 0.0  ;;  %v1264_v9 = vrot.slane %v1263_v26, 1  ;;  %v1933_v25 = vrot.slane %v1932_v22, 1 }
 0x2f2   : > { %v1985_v1 = vrot.slane %v1984_v32, 4  ;;  %v1941_v63 = vadd.f32 %v1940_v56, %v1939_v29  ;;  %v1981_v43 = vadd.f32 %v1980_v12, %v1979_v23 }
 0x2f3   : > { %v1111_v0 = vpop.permute.xlu1 %1110  ;;  %v1256_v46 = vadd.f32 %v1255_v39, %v1254_v52  ;;  %v1202_v52 = vadd.f32 %v1201_v51, %v1200_v57  ;;  %v1265_v8 = vadd.f32 %v1264_v9, %v1263_v26 }
 0x2f4   : > { %v1152_v30 = vmul.f32 %v1111_v0, %v3799_v55  ;;  %v1986_v10 = vadd.f32 %v1985_v1, %v1984_v32  ;;  %v1982_v23 = vrot.slane %v1981_v43, 1 }
 0x2f5   : > { %v1257_v27 = vrot.slane %v1256_v46, 1 }
 0x2f6   : > { %v1210_v49 = vsel %vm967_vm2, %v1152_v30, 0.0  ;;  %v1987_v39 = vrot.slane %v1986_v10, 2  ;;  %v1299_v30 = vsel %vm1298_vm7, %v1202_v52, %v1297_v5  ;;  %v1983_v56 = vadd.f32 %v1982_v23, %v1981_v43 }
 0x2f7   : > { %v1211_v17 = vrot.slane %v1210_v49, 4  ;;  %v1258_v60 = vadd.f32 %v1257_v27, %v1256_v46  ;;  %v1934_v46 = vadd.f32 %v1933_v25, %v1932_v22  ;;  %v1272_v27 = vadd.f32 %v1271_v45, %v1270_v62 }
 0x2f8   : > { %v1843_v35 = vpop.permute.xlu1 %1842  ;;  %v1988_v1 = vadd.f32 %v1987_v39, %v1986_v10  ;;  %v1301_v51 = vsel %vm1300_vm8, %v1209_v50, %v1299_v30  ;;  %v1975_v22 = vrot.slane %v1974_v58, 1  ;;  %v1962_v50 = vadd.f32 %v1961_v34, %v3478_v2 }
 0x2f9   : > { %v1884_v37 = vmul.f32 %v1843_v35, %v3799_v55  ;;  %v1212_v40 = vadd.f32 %v1211_v17, %v1210_v49  ;;  %v1308_v57 = vsel %vm1298_vm7, %v1258_v60, %v1307_v41  ;;  %v2026_v36 = vsel %vm1298_vm7, %v1934_v46, %v2025_v21  ;;  %v3800_v41 = vld [vmem:[#allocation2_spill] sm:$0xff] }
 0x2fa   : > { %v1309_v44 = vsel %vm1300_vm8, %v1265_v8, %v1308_v57  ;;  %v1989_v10 = vrot.slane %v1988_v1, 1  ;;  %v1969_v62 = vadd.f32 %v1968_v28, %v3514_v54  ;;  %v2027_v60 = vsel %vm1300_vm8, %v1941_v63, %v2026_v36 }
 0x2fb   : > { %v1942_v18 = vsel %vm967_vm2, %v1884_v37, 0.0  ;;  %v1213_v7 = vrot.slane %v1212_v40, 2  ;;  %v1310_v9 = vsel %vm1302_vm9, %v1272_v27, %v1309_v44  ;;  %v3600_v44 = vld [vmem:[%s3245_s12 + $0x50] sm:$0xff] }
 0x2fc   : > { %v1943_v14 = vrot.slane %v1942_v18, 4  ;;  %v1871_v20 = vpop.permute.xlu1 %1870  ;;  %v1990_v28 = vadd.f32 %v1989_v10, %v1988_v1 }
 0x2fd   : > { %v1891_v33 = vmul.f32 %v1871_v20, %v3358_v31  ;;  %v1214_v42 = vadd.f32 %v1213_v7, %v1212_v40  ;;  %v1955_v7 = vadd.f32 %v1954_v11, %v3454_v47 }
 0x2fe   : > { %v1944_v6 = vadd.f32 %v1943_v14, %v1942_v18  ;;  %v1976_v14 = vadd.f32 %v1975_v22, %v1974_v58  ;;  %v2778_v22 = vld [vmem:[%s3245_s12 + $0x40] sm:$0xff] }
 0x2ff   : > { %v1991_v0 = vsel %vm967_vm2, %v1891_v33, 0.0  ;;  %v1215_v55 = vrot.slane %v1214_v42, 1  ;;  %v2029_v54 = vsel %vm1290_vm3, %v1962_v50, %v1955_v7 }
 0x300   : > { %v1945_v53 = vrot.slane %v1944_v6, 2  ;;  %v1992_v32 = vrot.slane %v1991_v0, 4  ;;  %v1875_v15 = vpop.permute.xlu1 %1874  ;;  %v2030_v25 = vsel %vm1292_vm4, %v1969_v62, %v2029_v54  ;;  %v3616_v54 = vld [vmem:[%s3245_s12 + $0x60] sm:$0xff] }
 0x301   : > { %v1892_v31 = vmul.f32 %v1875_v15, %v3797_v38  ;;  %v1216_v61 = vadd.f32 %v1215_v55, %v1214_v42  ;;  %v924_v38 = vpop.permute.xlu0 %923  ;;  %v2031_v11 = vsel %vm1294_vm5, %v1976_v14, %v2030_v25  ;;  %v2773_v42 = vld [vmem:[%s3245_s12 + $0x8] sm:$0xff] }
 0x302   : > { %v1946_v24 = vadd.f32 %v1945_v53, %v1944_v6  ;;  %v1993_v26 = vadd.f32 %v1992_v32, %v1991_v0  ;;  %v2032_v58 = vsel %vm1296_vm6, %v1983_v56, %v2031_v11  ;;  %v952_v6 = vmul.f32 %v2773_v42, %v3505_v19  ;;  %v2774_v0 = vld [vmem:[%s3245_s12] sm:$0xff]  ;;  %v3578_v53 = vld [vmem:[%s3245_s12 + $0x10] sm:$0xff] }
 0x303   : > { %v1998_v49 = vsel %vm967_vm2, %v1892_v31, 0.0  ;;  %v1303_v5 = vsel %vm1302_vm9, %v1216_v61, %v1301_v51  ;;  %v2033_v39 = vsel %vm1298_vm7, %v1990_v28, %v2032_v58  ;;  %v951_v45 = vmul.f32 %v2774_v0, %v3800_v41 }
 0x304   : > { %v1947_v17 = vrot.slane %v1946_v24, 1  ;;  %v1994_v35 = vrot.slane %v1993_v26, 2  ;;  %v1999_v37 = vrot.slane %v1998_v49, 4  ;;  %2604 = vmatprep.mubr.msk.f32.mxu1 %vm967_vm2, %v1303_v5  ;;  %v953_v32 = vmul.f32 %v3578_v53, %v3516_v16 }
 0x305   : > { %v3544_v29 = vpop.permute.xlu1 %2121  ;;  %2605 = vmatmul.mubr.msk.f32.vlgmr.msra.gmra.mrb[0].mxu1 %vm967_vm2, %v1310_v9  ;;  %v975_v19 = vsel %vm967_vm2, %v952_v6, 0.0  ;;  %v968_v55 = vsel %vm967_vm2, %v951_v45, 0.0 }
 0x306   : > { %v1948_v40 = vadd.f32 %v1947_v17, %v1946_v24  ;;  %v1995_v4 = vadd.f32 %v1994_v35, %v1993_v26  ;;  %v2000_v18 = vadd.f32 %v1999_v37, %v1998_v49  ;;  %2608 = vmatpush3.msk.msra.mxu1 %vm1315_vm1, %v3472_v3  ;;  %v894_v3 = vpop.permute.xlu0 %893  ;;  %v982_v16 = vsel %vm967_vm2, %v953_v32, 0.0  ;;  %v3593_v24 = vld [vmem:[%s3245_s12 + $0x48] sm:$0xff] }
 0x307   : > { %v976_v30 = vrot.slane %v975_v19, 4  ;;  %v969_v63 = vrot.slane %v968_v55, 4  ;;  %v983_v43 = vrot.slane %v982_v16, 4  ;;  %v960_v26 = vmul.f32 %v3593_v24, %v3524_v48 }
 0x308   : > { %v1996_v21 = vrot.slane %v1995_v4, 1  ;;  %v2001_v2 = vrot.slane %v2000_v18, 2  ;;  %v2028_v20 = vsel %vm1302_vm9, %v1948_v40, %v2027_v60  ;;  %v2192_v37 = vmul.f32 %v2778_v22, %v3533_v13  ;;  %v2779_v40 = vld [vmem:[%s3245_s12 + $0x20] sm:$0xff] }
 0x309   : > { %v3562_v34 = vpop.permute.xlu1 %2125  ;;  %2619 = vmatprep.mubr.msk.f32.mxu0 %vm967_vm2, %v2028_v20  ;;  %v977_v61 = vadd.f32 %v976_v30, %v975_v19  ;;  %v970_v27 = vadd.f32 %v969_v63, %v968_v55  ;;  %v984_v17 = vadd.f32 %v983_v43, %v982_v16  ;;  %v1031_v35 = vsel %vm967_vm2, %v960_v26, 0.0 }
 0x30a   : > { %v2002_v52 = vadd.f32 %v2001_v2, %v2000_v18  ;;  %v1997_v47 = vadd.f32 %v1996_v21, %v1995_v4  ;;  %v2138_v57 = vpop.permute.xlu0 %2137  ;;  %v1032_v36 = vrot.slane %v1031_v35, 4  ;;  %v955_v4 = vmul.f32 %v2779_v40, %v894_v3  ;;  %v2781_v3 = vld [vmem:[%s3245_s12 + $0x30] sm:$0xff] }
 0x30b   : > { %v978_v48 = vrot.slane %v977_v61, 2  ;;  %v971_v9 = vrot.slane %v970_v27, 2  ;;  %v2188_v50 = vmul.f32 %v2779_v40, %v2138_v57  ;;  %v2256_v10 = vsel %vm967_vm2, %v2192_v37, 0.0 }
 0x30c   : > { %v2003_v33 = vrot.slane %v2002_v52, 1  ;;  %v2034_v15 = vsel %vm1300_vm8, %v1997_v47, %v2033_v39  ;;  %v1033_v60 = vadd.f32 %v1032_v36, %v1031_v35  ;;  %v996_v13 = vsel %vm967_vm2, %v955_v4, 0.0 }
 0x30d   : > { %v979_v21 = vadd.f32 %v978_v48, %v977_v61  ;;  %v972_v7 = vadd.f32 %v971_v9, %v970_v27  ;;  %v2228_v2 = vsel %vm967_vm2, %v2188_v50, 0.0  ;;  %v2257_v56 = vrot.slane %v2256_v10, 4  ;;  %v3630_v48 = vld [vmem:[%s3245_s12 + $0x70] sm:$0xff] }
 0x30e   : > { %v3570_v12 = vpop.permute.xlu1 %913  ;;  %v2004_v8 = vadd.f32 %v2003_v33, %v2002_v52  ;;  %v934_v1 = vpop.permute.xlu0 %933  ;;  %v2184_v25 = vmul.f32 %v2774_v0, %v3544_v29  ;;  %v997_v11 = vrot.slane %v996_v13, 4  ;;  %v2185_v33 = vmul.f32 %v2773_v42, %v3562_v34 }
 0x30f   : > { %v963_v28 = vmul.f32 %v3616_v54, %v934_v1  ;;  %v980_v6 = vrot.slane %v979_v21, 1  ;;  %v2229_v39 = vrot.slane %v2228_v2, 4  ;;  %v973_v41 = vrot.slane %v972_v7, 1 }
 0x310   : > { %v2035_v46 = vsel %vm1302_vm9, %v2004_v8, %v2034_v15  ;;  %v1034_v8 = vrot.slane %v1033_v60, 2  ;;  %v2258_v32 = vadd.f32 %v2257_v56, %v2256_v10  ;;  %v998_v29 = vadd.f32 %v997_v11, %v996_v13 }
 0x311   : > { %2620 = vmatmul.mubr.msk.f32.vlgmr.msra.gmra.mrb[0].mxu0 %vm967_vm2, %v2035_v46  ;;  %v1052_v15 = vsel %vm967_vm2, %v963_v28, 0.0  ;;  %v2200_v46 = vsel %vm967_vm2, %v2184_v25, 0.0  ;;  %v2207_v0 = vsel %vm967_vm2, %v2185_v33, 0.0  ;;  %v981_v34 = vadd.f32 %v980_v6, %v979_v21  ;;  %v3649_v25 = vld [vmem:[%s3245_s12 + $0x78] sm:$0xff] }
 0x312   : > { %2623 = vmatpush3.msk.msra.mxu0 %vm1315_vm1, %v3490_v59  ;;  %v961_v59 = vmul.f32 %v3600_v44, %v924_v38  ;;  %v904_v5 = vpop.permute.xlu0 %903  ;;  %v985_v38 = vrot.slane %v984_v17, 2  ;;  %v1035_v42 = vadd.f32 %v1034_v8, %v1033_v60  ;;  %v2230_v16 = vadd.f32 %v2229_v39, %v2228_v2  ;;  %v2784_v8 = vld [vmem:[%s3245_s12 + $0x18] sm:$0xff] }
 0x313   : > { %v3586_v31 = vpop.permute.xlu1 %2129  ;;  %v957_v52 = vmul.f32 %v2781_v3, %v904_v5  ;;  %v1053_v43 = vrot.slane %v1052_v15, 4  ;;  %v2201_v1 = vrot.slane %v2200_v46, 4  ;;  %v959_v61 = vmul.f32 %v2778_v22, %v3570_v12 }
 0x314   : > { %v1038_v23 = vsel %vm967_vm2, %v961_v59, 0.0  ;;  %v986_v14 = vadd.f32 %v985_v38, %v984_v17  ;;  %v974_v59 = vadd.f32 %v973_v41, %v972_v7  ;;  %v2259_v17 = vrot.slane %v2258_v32, 2 }
 0x315   : > { %v1039_v18 = vrot.slane %v1038_v23, 4  ;;  %v1010_v57 = vsel %vm967_vm2, %v957_v52, 0.0  ;;  %v2208_v35 = vrot.slane %v2207_v0, 4  ;;  %v999_v5 = vrot.slane %v998_v29, 2 }
 0x316   : > { %v2146_v20 = vpop.permute.xlu0 %2145  ;;  %v987_v45 = vrot.slane %v986_v14, 1  ;;  %v1011_v26 = vrot.slane %v1010_v57, 4  ;;  %v1036_v40 = vrot.slane %v1035_v42, 1  ;;  %v2231_v4 = vrot.slane %v2230_v16, 2 }
 0x317   : > { %v3597_v49 = vpop.permute.xlu1 %2157  ;;  %v1040_v47 = vadd.f32 %v1039_v18, %v1038_v23  ;;  %v2190_v30 = vmul.f32 %v2781_v3, %v2146_v20  ;;  %v1410_v23 = vsel %vm1290_vm3, %v981_v34, %v974_v59  ;;  %v1054_v38 = vadd.f32 %v1053_v43, %v1052_v15 }
 0x318   : > { %v988_v27 = vadd.f32 %v987_v45, %v986_v14  ;;  %v1012_v50 = vadd.f32 %v1011_v26, %v1010_v57  ;;  %v2202_v12 = vadd.f32 %v2201_v1, %v2200_v46  ;;  %v1024_v22 = vsel %vm967_vm2, %v959_v61, 0.0  ;;  %v3656_v45 = vld [vmem:[%s3245_s12 + $0x58] sm:$0xff] }
 0x319   : > { %v1041_v19 = vrot.slane %v1040_v47, 2  ;;  %v2242_v9 = vsel %vm967_vm2, %v2190_v30, 0.0  ;;  %v3641_v60 = vadd.f32 %v2259_v17, %v2258_v32  ;;  %v2209_v13 = vadd.f32 %v2208_v35, %v2207_v0  ;;  %v2786_v35 = vld [vmem:[%s3245_s12 + $0x28] sm:$0xff] }
 0x31a   : > { %v944_v55 = vpop.permute.xlu0 %943  ;;  %v3639_v21 = vsel %vm1292_vm4, %v988_v27, %v1410_v23  ;;  %v2186_v7 = vmul.f32 %v3578_v53, %v3586_v31  ;;  %v1000_v2 = vadd.f32 %v999_v5, %v998_v29  ;;  %v2243_v20 = vrot.slane %v2242_v9, 4 }
 0x31b   : > { %v1042_v37 = vadd.f32 %v1041_v19, %v1040_v47  ;;  %v965_v36 = vmul.f32 %v3630_v48, %v944_v55  ;;  %v3646_v28 = vadd.f32 %v1036_v40, %v1035_v42  ;;  %v2232_v3 = vadd.f32 %v2231_v4, %v2230_v16 }
 0x31c   : > { %v3604_v51 = vpop.permute.xlu1 %888  ;;  %v1025_v52 = vrot.slane %v1024_v22, 4  ;;  %v1055_v11 = vrot.slane %v1054_v38, 2  ;;  %v1013_v33 = vrot.slane %v1012_v50, 2  ;;  %v2203_v6 = vrot.slane %v2202_v12, 2 }
 0x31d   : > { %v1043_v14 = vrot.slane %v1042_v37, 1  ;;  %v1066_v56 = vsel %vm967_vm2, %v965_v36, 0.0  ;;  %v954_v53 = vmul.f32 %v2784_v8, %v3604_v51  ;;  %v2210_v31 = vrot.slane %v2209_v13, 2 }
 0x31e   : > { %v949_v10 = vpop.permute.xlu0 %948  ;;  %v1067_v39 = vrot.slane %v1066_v56, 4  ;;  %v2214_v41 = vsel %vm967_vm2, %v2186_v7, 0.0  ;;  %v2261_v57 = vrot.slane %v3641_v60, 1  ;;  %v1001_v19 = vrot.slane %v1000_v2, 1 }
 0x31f   : > { %v966_v47 = vmul.f32 %v3649_v25, %v949_v10  ;;  %v3660_v46 = vadd.f32 %v1043_v14, %v1042_v37  ;;  %v2244_v29 = vadd.f32 %v2243_v20, %v2242_v9  ;;  %v2233_v0 = vrot.slane %v2232_v3, 1 }
 0x320   : > { %v1026_v55 = vadd.f32 %v1025_v52, %v1024_v22  ;;  %v1056_v42 = vadd.f32 %v1055_v11, %v1054_v38  ;;  %v1014_v16 = vadd.f32 %v1013_v33, %v1012_v50  ;;  %v2215_v30 = vrot.slane %v2214_v41, 4 }
 0x321   : > { %v3611_v62 = vpop.permute.xlu1 %2133  ;;  %v1073_v51 = vsel %vm967_vm2, %v966_v47, 0.0  ;;  %v989_v43 = vsel %vm967_vm2, %v954_v53, 0.0  ;;  %v2211_v26 = vadd.f32 %v2210_v31, %v2209_v13  ;;  %v1068_v1 = vadd.f32 %v1067_v39, %v1066_v56 }
 0x322   : > { %v2187_v34 = vmul.f32 %v2784_v8, %v3611_v62  ;;  %v3666_v59 = vadd.f32 %v1001_v19, %v1000_v2  ;;  %v2245_v27 = vrot.slane %v2244_v29, 2  ;;  %v1074_v17 = vrot.slane %v1073_v51, 4 }
 0x323   : > { %v1027_v36 = vrot.slane %v1026_v55, 2  ;;  %v2193_v62 = vmul.f32 %v3593_v24, %v3597_v49  ;;  %v990_v23 = vrot.slane %v989_v43, 4  ;;  %v1057_v4 = vrot.slane %v1056_v42, 1 }
 0x324   : > { %v2221_v40 = vsel %vm967_vm2, %v2187_v34, 0.0  ;;  %v1015_v9 = vrot.slane %v1014_v16, 1  ;;  %v2216_v38 = vadd.f32 %v2215_v30, %v2214_v41  ;;  %v2212_v10 = vrot.slane %v2211_v26, 1 }
 0x325   : > { %v3622_v58 = vpop.permute.xlu1 %2161  ;;  %v1069_v13 = vrot.slane %v1068_v1, 2  ;;  %v1075_v7 = vadd.f32 %v1074_v17, %v1073_v51  ;;  %v2222_v14 = vrot.slane %v2221_v40, 4  ;;  %v3675_v52 = vadd.f32 %v2245_v27, %v2244_v29 }
 0x326   : > { %v1028_v24 = vadd.f32 %v1027_v36, %v1026_v55  ;;  %v2263_v49 = vsel %vm967_vm2, %v2193_v62, 0.0  ;;  %v991_v47 = vadd.f32 %v990_v23, %v989_v43  ;;  %v3678_v11 = vadd.f32 %v1057_v4, %v1056_v42  ;;  %v2787_v43 = vld [vmem:[%s3245_s12 + $0x68] sm:$0xff] }
 0x327   : > { %v3680_v33 = vadd.f32 %v1015_v9, %v1014_v16  ;;  %v2213_v53 = vadd.f32 %v2212_v10, %v2211_v26  ;;  %v1070_v31 = vadd.f32 %v1069_v13, %v1068_v1  ;;  %v1076_v41 = vrot.slane %v1075_v7, 2 }
 0x328   : > { %v2247_v29 = vrot.slane %v3675_v52, 1  ;;  %v992_v55 = vrot.slane %v991_v47, 2  ;;  %v2194_v51 = vmul.f32 %v3600_v44, %v3622_v58 }
 0x329   : > { %v1071_v1 = vrot.slane %v1070_v31, 1  ;;  %v1077_v17 = vadd.f32 %v1076_v41, %v1075_v7 }
 0x32a   : > { %v929_v63 = vpop.permute.xlu1 %928  ;;  %v993_v44 = vadd.f32 %v992_v55, %v991_v47  ;;  %v2270_v58 = vsel %vm967_vm2, %v2194_v51, 0.0 }
 0x32b   : > { %v962_v32 = vmul.f32 %v3656_v45, %v929_v63  ;;  %v2204_v63 = vadd.f32 %v2203_v6, %v2202_v12  ;;  %v3672_v12 = vadd.f32 %v2233_v0, %v2232_v3  ;;  %v2217_v3 = vrot.slane %v2216_v38, 2 }
 0x32c   : > { %v1029_v0 = vrot.slane %v1028_v24, 1  ;;  %v3694_v10 = vadd.f32 %v1071_v1, %v1070_v31 }
 0x32d   : > { %v1045_v61 = vsel %vm967_vm2, %v962_v32, 0.0  ;;  %v2205_v22 = vrot.slane %v2204_v63, 1  ;;  %v2264_v32 = vrot.slane %v2263_v49, 4  ;;  %v2218_v42 = vadd.f32 %v2217_v3, %v2216_v38 }
 0x32e   : > { %v1046_v50 = vrot.slane %v1045_v61, 4  ;;  %v1030_v36 = vadd.f32 %v1029_v0, %v1028_v24 }
 0x32f   : > { %v3636_v18 = vpop.permute.xlu1 %2165  ;;  %v2206_v8 = vadd.f32 %v2205_v22, %v2204_v63  ;;  %v2219_v23 = vrot.slane %v2218_v42, 1 }
 0x330   : > { %v1047_v6 = vadd.f32 %v1046_v50, %v1045_v61  ;;  %v2195_v30 = vmul.f32 %v3656_v45, %v3636_v18  ;;  %v1417_v47 = vsel %vm1290_vm3, %v3646_v28, %v1030_v36 }
 0x331   : > { %v2329_v26 = vsel %vm1290_vm3, %v2213_v53, %v2206_v8  ;;  %v2220_v3 = vadd.f32 %v2219_v23, %v2218_v42 }
 0x332   : > { %v1048_v16 = vrot.slane %v1047_v6, 2  ;;  %v2277_v18 = vsel %vm967_vm2, %v2195_v30, 0.0 }
 0x333   : > { %v2278_v24 = vrot.slane %v2277_v18, 4 }
 0x334   : > { %v899_v15 = vpop.permute.xlu1 %898 }
 0x335   : > { %v956_v37 = vmul.f32 %v2786_v35, %v899_v15  ;;  %v2223_v15 = vadd.f32 %v2222_v14, %v2221_v40  ;;  %v1049_v40 = vadd.f32 %v1048_v16, %v1047_v6  ;;  %v2271_v14 = vrot.slane %v2270_v58, 4 }
 0x336   : > { %v2279_v28 = vadd.f32 %v2278_v24, %v2277_v18 }
 0x337   : > { %v1003_v2 = vsel %vm967_vm2, %v956_v37, 0.0  ;;  %v2224_v37 = vrot.slane %v2223_v15, 2 }
 0x338   : > { %v1004_v39 = vrot.slane %v1003_v2, 4  ;;  %v2280_v18 = vrot.slane %v2279_v28, 2 }
 0x339   : > { %v2142_v5 = vpop.permute.xlu1 %2141  ;;  %v2225_v7 = vadd.f32 %v2224_v37, %v2223_v15  ;;  %v2272_v15 = vadd.f32 %v2271_v14, %v2270_v58 }
 0x33a   : > { %v2189_v20 = vmul.f32 %v2786_v35, %v2142_v5  ;;  %v1005_v61 = vadd.f32 %v1004_v39, %v1003_v2  ;;  %v2265_v35 = vadd.f32 %v2264_v32, %v2263_v49  ;;  %v1078_v2 = vrot.slane %v1077_v17, 1 }
 0x33b   : > { %v2226_v32 = vrot.slane %v2225_v7, 1 }
 0x33c   : > { %v2235_v19 = vsel %vm967_vm2, %v2189_v20, 0.0  ;;  %v1006_v9 = vrot.slane %v1005_v61, 2  ;;  %v2266_v13 = vrot.slane %v2265_v35, 2  ;;  %v994_v20 = vrot.slane %v993_v44, 1 }
 0x33d   : > { %v2170_v56 = vpop.permute.xlu1 %2169  ;;  %v2236_v27 = vrot.slane %v2235_v19, 4  ;;  %v3703_v55 = vadd.f32 %v1078_v2, %v1077_v17  ;;  %v2227_v17 = vadd.f32 %v2226_v32, %v2225_v7 }
 0x33e   : > { %v2196_v45 = vmul.f32 %v3616_v54, %v2170_v56  ;;  %v1050_v54 = vrot.slane %v1049_v40, 1  ;;  %v1007_v6 = vadd.f32 %v1006_v9, %v1005_v61  ;;  %v3700_v41 = vadd.f32 %v2266_v13, %v2265_v35 }
 0x33f   : > { %v2237_v38 = vadd.f32 %v2236_v27, %v2235_v19  ;;  %v2788_v19 = vld [vmem:[%s3245_s12 + $0x38] sm:$0xff]  ;;  %v995_v51 = vadd.f32 %v994_v20, %v993_v44  ;;  %v2330_v35 = vsel %vm1292_vm4, %v2220_v3, %v2329_v26 }
 0x340   : > { %v2284_v56 = vsel %vm967_vm2, %v2196_v45, 0.0  ;;  %v1051_v42 = vadd.f32 %v1050_v54, %v1049_v40  ;;  %v1008_v1 = vrot.slane %v1007_v6, 1  ;;  %v2268_v37 = vrot.slane %v3700_v41, 1 }
 0x341   : > { %v2238_v8 = vrot.slane %v2237_v38, 2  ;;  %v1412_v44 = vsel %vm1294_vm5, %v995_v51, %v3639_v21 }
 0x342   : > { %v939_v34 = vpop.permute.xlu1 %938  ;;  %v1413_v21 = vsel %vm1296_vm6, %v3666_v59, %v1412_v44  ;;  %v2262_v44 = vadd.f32 %v2261_v57, %v3641_v60 }
 0x343   : > { %v964_v63 = vmul.f32 %v2787_v43, %v939_v34  ;;  %v2285_v34 = vrot.slane %v2284_v56, 4  ;;  %v2239_v61 = vadd.f32 %v2238_v8, %v2237_v38 }
 0x345   : > { %v1059_v5 = vsel %vm967_vm2, %v964_v63, 0.0  ;;  %v1418_v63 = vsel %vm1292_vm4, %v3660_v46, %v1417_v47  ;;  %v2286_v58 = vadd.f32 %v2285_v34, %v2284_v56  ;;  %v2240_v9 = vrot.slane %v2239_v61, 1 }
 0x346   : > { %v1060_v62 = vrot.slane %v1059_v5, 4  ;;  %v1419_v40 = vsel %vm1294_vm5, %v1051_v42, %v1418_v63 }
 0x347   : > { %v2174_v4 = vpop.permute.xlu1 %2173  ;;  %v2287_v14 = vrot.slane %v2286_v58, 2  ;;  %v1420_v24 = vsel %vm1296_vm6, %v3678_v11, %v1419_v40  ;;  %v2241_v56 = vadd.f32 %v2240_v9, %v2239_v61 }
 0x348   : > { %v1061_v50 = vadd.f32 %v1060_v62, %v1059_v5  ;;  %v2197_v22 = vmul.f32 %v2787_v43, %v2174_v4  ;;  %v2273_v5 = vrot.slane %v2272_v15, 2  ;;  %v1009_v4 = vadd.f32 %v1008_v1, %v1007_v6 }
 0x34a   : > { %v1062_v49 = vrot.slane %v1061_v50, 2  ;;  %v2291_v31 = vsel %vm967_vm2, %v2197_v22, 0.0  ;;  %v2274_v22 = vadd.f32 %v2273_v5, %v2272_v15  ;;  %v2288_v15 = vadd.f32 %v2287_v14, %v2286_v58 }
 0x34b   : > { %v2292_v30 = vrot.slane %v2291_v31, 4 }
 0x34c   : > { %v1063_v53 = vadd.f32 %v1062_v49, %v1061_v50  ;;  %v909_v39 = vpop.permute.xlu1 %908  ;;  %v2331_v50 = vsel %vm1294_vm5, %v2227_v17, %v2330_v35  ;;  %v2281_v49 = vadd.f32 %v2280_v18, %v2279_v28 }
 0x34d   : > { %v958_v0 = vmul.f32 %v2788_v19, %v909_v39  ;;  %v2293_v45 = vadd.f32 %v2292_v30, %v2291_v31  ;;  %v2275_v31 = vrot.slane %v2274_v22, 1 }
 0x34e   : > { %v1064_v16 = vrot.slane %v1063_v53, 1 }
 0x34f   : > { %v1017_v43 = vsel %vm967_vm2, %v958_v0, 0.0  ;;  %v2294_v47 = vrot.slane %v2293_v45, 2  ;;  %v2276_v58 = vadd.f32 %v2275_v31, %v2274_v22 }
 0x350   : > { %v1018_v27 = vrot.slane %v1017_v43, 4  ;;  %v1065_v46 = vadd.f32 %v1064_v16, %v1063_v53  ;;  %v1414_v53 = vsel %vm1298_vm7, %v1009_v4, %v1413_v21  ;;  %v2282_v16 = vrot.slane %v2281_v49, 1  ;;  %v2580_v21 = vld [vmem:[%s3781_s4] ss:$0 sm:$0xff] }
 0x351   : > { %v2150_v36 = vpop.permute.xlu1 %2149  ;;  %v2295_v51 = vadd.f32 %v2294_v47, %v2293_v45  ;;  %v1415_v42 = vsel %vm1300_vm8, %v3680_v33, %v1414_v53  ;;  %v2269_v33 = vadd.f32 %v2268_v37, %v3700_v41 }
 0x352   : > { %v1019_v62 = vadd.f32 %v1018_v27, %v1017_v43  ;;  %v2191_v23 = vmul.f32 %v2788_v19, %v2150_v36  ;;  %v1421_v54 = vsel %vm1298_vm7, %v1065_v46, %v1420_v24  ;;  %v2289_v27 = vrot.slane %v2288_v15, 1 }
 0x353   : > { %v1422_v0 = vsel %vm1300_vm8, %v3694_v10, %v1421_v54  ;;  %v2248_v10 = vadd.f32 %v2247_v29, %v3675_v52  ;;  %v2296_v35 = vrot.slane %v2295_v51, 1  ;;  %v2336_v41 = vsel %vm1290_vm3, %v2269_v33, %v2262_v44 }
 0x354   : > { %v1020_v38 = vrot.slane %v1019_v62, 2  ;;  %v2249_v26 = vsel %vm967_vm2, %v2191_v23, 0.0  ;;  %v2290_v29 = vadd.f32 %v2289_v27, %v2288_v15  ;;  %v2337_v46 = vsel %vm1292_vm4, %v2276_v58, %v2336_v41 }
 0x355   : > { %v2250_v13 = vrot.slane %v2249_v26, 4  ;;  %v2178_v7 = vpop.permute.xlu1 %2177  ;;  %v2297_v37 = vadd.f32 %v2296_v35, %v2295_v51 }
 0x356   : > { %v1021_v2 = vadd.f32 %v1020_v38, %v1019_v62  ;;  %v2198_v20 = vmul.f32 %v3630_v48, %v2178_v7  ;;  %v2332_v48 = vsel %vm1296_vm6, %v3672_v12, %v2331_v50  ;;  %v2283_v62 = vadd.f32 %v2282_v16, %v2281_v49 }
 0x357   : > { %v2251_v3 = vadd.f32 %v2250_v13, %v2249_v26  ;;  %v2333_v12 = vsel %vm1298_vm7, %v2241_v56, %v2332_v48 }
 0x358   : > { %v1022_v6 = vrot.slane %v1021_v2, 1  ;;  %v2298_v8 = vsel %vm967_vm2, %v2198_v20, 0.0  ;;  %v2338_v60 = vsel %vm1294_vm5, %v2283_v62, %v2337_v46  ;;  %v2581_v20 = vld [vmem:[%s3782_s5] ss:$0 sm:$0xff] }
 0x359   : > { %v2252_v59 = vrot.slane %v2251_v3, 2  ;;  %v2299_v39 = vrot.slane %v2298_v8, 4  ;;  %v2182_v32 = vpop.permute.xlu1 %2181  ;;  %v2339_v4 = vsel %vm1296_vm6, %v2290_v29, %v2338_v60 }
 0x35a   : > { %v1023_v11 = vadd.f32 %v1022_v6, %v1021_v2  ;;  %v2199_v19 = vmul.f32 %v3649_v25, %v2182_v32  ;;  %v1423_v25 = vsel %vm1302_vm9, %v3703_v55, %v1422_v0  ;;  %v2334_v55 = vsel %vm1300_vm8, %v2248_v10, %v2333_v12 }
 0x35b   : > { %v2253_v28 = vadd.f32 %v2252_v59, %v2251_v3  ;;  %v2300_v34 = vadd.f32 %v2299_v39, %v2298_v8  ;;  %v2340_v38 = vsel %vm1298_vm7, %v2297_v37, %v2339_v4 }
 0x35c   : > { %v2305_v30 = vsel %vm967_vm2, %v2199_v19, 0.0  ;;  %v1416_v43 = vsel %vm1302_vm9, %v1023_v11, %v1415_v42 }
 0x35d   : > { %v2254_v63 = vrot.slane %v2253_v28, 1  ;;  %v2301_v1 = vrot.slane %v2300_v34, 2  ;;  %v2306_v61 = vrot.slane %v2305_v30, 4  ;;  %2609 = vmatprep.mubr.msk.f32.mxu1 %vm967_vm2, %v1416_v43 }
 0x35e   : > { %2610 = vmatmul.mubr.msk.f32.vlgmr.msra.gmra.mrb[0].mxu1 %vm967_vm2, %v1423_v25 }
 0x35f   : > { %v2255_v17 = vadd.f32 %v2254_v63, %v2253_v28  ;;  %v2302_v5 = vadd.f32 %v2301_v1, %v2300_v34  ;;  %v2307_v36 = vadd.f32 %v2306_v61, %v2305_v30 }
 0x361   : > { %v2303_v23 = vrot.slane %v2302_v5, 1  ;;  %v2308_v40 = vrot.slane %v2307_v36, 2  ;;  %v2335_v52 = vsel %vm1302_vm9, %v2255_v17, %v2334_v55 }
 0x362   : > { %2624 = vmatprep.mubr.msk.f32.mxu0 %vm967_vm2, %v2335_v52 }
 0x363   : > { %v2309_v18 = vadd.f32 %v2308_v40, %v2307_v36  ;;  %v2304_v45 = vadd.f32 %v2303_v23, %v2302_v5 }
 0x365   : > { %v2310_v57 = vrot.slane %v2309_v18, 1  ;;  %v2341_v26 = vsel %vm1300_vm8, %v2304_v45, %v2340_v38 }
 0x367   : > { %v2311_v9 = vadd.f32 %v2310_v57, %v2309_v18 }
 0x369   : > { %v2342_v50 = vsel %vm1302_vm9, %v2311_v9, %v2341_v26 }
 0x36a   : > { %2625 = vmatmul.mubr.msk.f32.vlgmr.msra.gmra.mrb[0].mxu0 %vm967_vm2, %v2342_v50 }
 0x431   : > { %v2611_v22 = vpop.f32.mrb[0].mxu1 }
 0x432   : > { %v1497_v13 = vpop.f32.mrb[1].mxu1 }
 0x43d   : > { %v2626_v7 = vpop.f32.mrb[0].mxu0 }
 0x43e   : > { %v2627_v14 = vadd.f32 %v2626_v7, %v2611_v22  ;;  %v2416_v2 = vpop.f32.mrb[1].mxu0 }
 0x43f   : > { %v2628_v24 = vadd.f32 %v2416_v2, %v1497_v13 }
 0x440   : > { %v2435_v49 = vmul.f32 %v2627_v14, %v2580_v21 }
 0x441   : > { %v2434_v47 = vmul.f32 %v2628_v24, %v2580_v21 }
 0x442   : > { %v2444_v3 = vadd.f32 %v2581_v20, %v2435_v49 }
 0x443   : > { %v2443_v54 = vadd.f32 %v2581_v20, %v2434_v47 }
 0x444   : > { %v2446_v56 = vmax.f32 %v2444_v3, 0.0 }
 0x445   : > { %v2445_v6 = vmax.f32 %v2443_v54, 0.0 }
 0x446   : > { %2448 = vst.msk [vmem:[%s325_s8 + $0x8] sm:$0xff] %vm967_vm2, %v2446_v56 }
 0x447   : > { %2447 = vst.msk [vmem:[%s325_s8] sm:$0xff] %vm967_vm2, %v2445_v6 }
 0x448 PF: > { %s16_s23 = sadd.s32 1, %s2811_s23   ;;  %s3801_s21 = smov %s2807_s22 }
 0x449   : > { %p13_p5 = scmp.ge.s32.totalorder %s16_s23, 4   ;;  %s3802_s22 = smov %s3804_s24 }
 0x44b   :  { %15 = sbr.rel (!%p13_p5) target bundleno = 2 (0x2), region = 77 }

// kernel: basic_block_forward.8
= control target key start
LH: loop header
LB: loop body
LE: loop exit
PB: predicated region body
PF: predicated region fallthrough
CT: control target
= control target key end

     0   :  { %s2852_s21 = smov 0   ;;  %s2854_s22 = smov 0   ;;  %s3774_s0 = inlined_call_operand.vmem [shape: f32[2,16,24], index: 0, kind: input, shape index: {}]   ;;  %s3775_s1 = inlined_call_operand.vmem [shape: f32[2,16,8,4], index: 1, kind: input, shape index: {}]   ;;  %s3776_s2 = inlined_call_operand.vmem [shape: f32[3,5], index: 2, kind: input, shape index: {}]   ;;  %s3777_s3 = inlined_call_operand.vmem [shape: f32[20,2], index: 3, kind: input, shape index: {}]   ;;  %s3778_s4 = inlined_call_operand.vmem [shape: f32[1,2], index: 4, kind: input, shape index: {}]   ;;  %s3779_s5 = inlined_call_operand.vmem [shape: f32[1,2], index: 5, kind: input, shape index: {}]   ;;  %s3780_s6 = inlined_call_operand.vmem [shape: f32[2,16,2], index: 6, kind: output, shape index: {}]  }
   0x1   :  { %s2856_s23 = smov 0  }
   0x2 LB: > { %s28_s24 = sadd.s32 1, %s2806_s22  ;;  %p2557_p0 = scmp.ge.s32.totalorder %s2810_s23, 1  ;;  %s2810_s23 = sphi %s2856_s23, %s16_s23   ;;  %s2806_s22 = sphi %s2854_s22, %s3799_s22   ;;  %s2802_s21 = sphi %s2852_s21, %s3798_s21  }
   0x3   : > { %p30_p1 = scmp.ge.s32.totalorder %s28_s24, 2  ;;  %p250_p2 = scmp.lt.s32.totalorder %s2810_s23, 3 }
   0x5   : > { %s3801_s24 = smov (%p30_p1, %s28_s24), 0  ;;  %p251_p3 = pnand %p2557_p0, %p250_p2 }
   0x7   : > { %254 = sbr.rel (%p251_p3) target bundleno = 1094 (0x446), region = 44 }
   0xe   : > { %p298_p4 = scmp.lt.s32.totalorder %s2802_s21, 1  ;;  %v346_v0 = vlaneseq  ;;  %v345_v28 = vld [vmem:[%s3776_s2] sm:$0x7]  ;;  %vm694_vm0 = vcmask 39936   ;;  %vm1315_vm1 = vcmask 1043456   ;;  %vm967_vm2 = vcmask 31744  }
   0xf   : > { %vm1290_vm3 = vcmask 1041409   ;;  %vm1292_vm4 = vcmask 1042434   ;;  %vm1294_vm5 = vcmask 1043459   ;;  %vm1296_vm6 = vcmask 1044484  }
  0x10   : > { %s3803_s21 = smov (!%p298_p4, %s2802_s21), 1  ;;  %v2872_v1 = vshrl.u32 %v346_v0, 7  ;;  %vm1298_vm7 = vcmask 1045509   ;;  %vm1300_vm8 = vcmask 1046534   ;;  %vm1302_vm9 = vcmask 1047559  }
  0x11   : > { %s2583_s25 = sshll.u32 %s3803_s21, 4  ;;  %s2584_s9 = sshll.u32 %s3803_s21, 7  ;;  %vm2445_vm10 = vcmask 15360  }
  0x12   : > { %v2876_v2 = vsub.s32 0, %v2872_v1  ;;  %s305_s28 = scalar_lea.vmem %s3774_s0, %s2583_s25  ;;  %v2884_v3 = vsub.s32 1, %v2872_v1  ;;  %v397_v5 = vsub.s32 7, %v2872_v1  ;;  %v2890_v8 = vsub.s32 2, %v2872_v1  ;;  %s3244_s12 = scalar_lea.vmem %s3775_s1, %s2584_s9 }
  0x13   : > { %v327_v4 = vld [vmem:[%s305_s28] sm:$0xff]  ;;  %v328_v9 = vld [vmem:[%s305_s28 + $0x8] sm:$0xff]  ;;  %v369_v15 = vsub.s32 3, %v2872_v1  ;;  %v376_v18 = vsub.s32 4, %v2872_v1  ;;  %v383_v21 = vsub.s32 5, %v2872_v1  ;;  %v390_v24 = vsub.s32 6, %v2872_v1  ;;  %s325_s8 = scalar_lea.vmem %s3780_s6, %s2583_s25 }
  0x14   : > { %v349_v6 = vrot.slane %v327_v4, %v2876_v2  ;;  %v356_v7 = vrot.slane %v327_v4, %v2884_v3  ;;  %v398_v10 = vrot.slane %v327_v4, %v397_v5  ;;  %v454_v11 = vrot.slane %v328_v9, %v397_v5 }
  0x15   : > { %v405_v12 = vrot.slane %v328_v9, %v2876_v2  ;;  %v363_v13 = vrot.slane %v327_v4, %v2890_v8  ;;  %v412_v14 = vrot.slane %v328_v9, %v2884_v3  ;;  %v419_v16 = vrot.slane %v328_v9, %v2890_v8 }
  0x16   : > { %496 = vbcast.lane.b32.xlu1 %v349_v6, 264  ;;  %351 = vbcast.lane.b32.xlu0 %v349_v6, 256  ;;  %v370_v17 = vrot.slane %v327_v4, %v369_v15  ;;  %v426_v19 = vrot.slane %v328_v9, %v369_v15  ;;  %v377_v20 = vrot.slane %v327_v4, %v376_v18 }
  0x17   : > { %v384_v22 = vrot.slane %v327_v4, %v383_v21  ;;  %v433_v23 = vrot.slane %v328_v9, %v376_v18  ;;  %v391_v25 = vrot.slane %v327_v4, %v390_v24  ;;  %v440_v26 = vrot.slane %v328_v9, %v383_v21 }
  0x18   : > { %v447_v27 = vrot.slane %v328_v9, %v390_v24  ;;  %v2904_v29 = vrot.slane %v345_v28, %v2876_v2  ;;  %v2907_v30 = vrot.slane %v345_v28, %v2884_v3  ;;  %v2921_v61 = vrot.slane %v345_v28, %v2890_v8 }
  0x1a   : > { %500 = vbcast.lane.b32.xlu1 %v356_v7, 264  ;;  %358 = vbcast.lane.b32.xlu0 %v356_v7, 256 }
  0x1e   : > { %407 = vbcast.lane.b32.xlu1 %v405_v12, 256  ;;  %365 = vbcast.lane.b32.xlu0 %v363_v13, 256 }
  0x22   : > { %504 = vbcast.lane.b32.xlu1 %v363_v13, 264  ;;  %414 = vbcast.lane.b32.xlu0 %v412_v14, 256 }
  0x26   : > { %532 = vbcast.lane.b32.xlu1 %v412_v14, 264  ;;  %528 = vbcast.lane.b32.xlu0 %v405_v12, 264 }
  0x2a   : > { %421 = vbcast.lane.b32.xlu1 %v419_v16, 256  ;;  %372 = vbcast.lane.b32.xlu0 %v370_v17, 256 }
  0x2e   : > { %536 = vbcast.lane.b32.xlu1 %v419_v16, 264  ;;  %508 = vbcast.lane.b32.xlu0 %v370_v17, 264 }
  0x32   : > { %600 = vbcast.lane.b32.xlu1 %v356_v7, 272  ;;  %596 = vbcast.lane.b32.xlu0 %v349_v6, 272 }
  0x36   : > { %428 = vbcast.lane.b32.xlu1 %v426_v19, 256  ;;  %379 = vbcast.lane.b32.xlu0 %v377_v20, 256 }
  0x3a   : > { %540 = vbcast.lane.b32.xlu1 %v426_v19, 264  ;;  %512 = vbcast.lane.b32.xlu0 %v377_v20, 264 }
  0x3e   : > { %628 = vbcast.lane.b32.xlu1 %v405_v12, 272  ;;  %604 = vbcast.lane.b32.xlu0 %v363_v13, 272 }
  0x42   : > { %386 = vbcast.lane.b32.xlu1 %v384_v22, 256  ;;  %632 = vbcast.lane.b32.xlu0 %v412_v14, 272 }
  0x46   : > { %516 = vbcast.lane.b32.xlu1 %v384_v22, 264  ;;  %435 = vbcast.lane.b32.xlu0 %v433_v23, 256 }
  0x4a   : > { %608 = vbcast.lane.b32.xlu1 %v370_v17, 272  ;;  %544 = vbcast.lane.b32.xlu0 %v433_v23, 264 }
  0x4e   : > { %393 = vbcast.lane.b32.xlu1 %v391_v25, 256  ;;  %636 = vbcast.lane.b32.xlu0 %v419_v16, 272 }
  0x52   : > { %520 = vbcast.lane.b32.xlu1 %v391_v25, 264  ;;  %442 = vbcast.lane.b32.xlu0 %v440_v26, 256 }
  0x56   : > { %612 = vbcast.lane.b32.xlu1 %v377_v20, 272  ;;  %548 = vbcast.lane.b32.xlu0 %v440_v26, 264 }
  0x5a   : > { %400 = vbcast.lane.b32.xlu1 %v398_v10, 256  ;;  %640 = vbcast.lane.b32.xlu0 %v426_v19, 272 }
  0x5e   : > { %524 = vbcast.lane.b32.xlu1 %v398_v10, 264  ;;  %449 = vbcast.lane.b32.xlu0 %v447_v27, 256 }
  0x62   : > { %616 = vbcast.lane.b32.xlu1 %v384_v22, 272  ;;  %552 = vbcast.lane.b32.xlu0 %v447_v27, 264 }
  0x66   : > { %456 = vbcast.lane.b32.xlu1 %v454_v11, 256  ;;  %644 = vbcast.lane.b32.xlu0 %v433_v23, 272 }
  0x6a   : > { %620 = vbcast.lane.b32.xlu1 %v391_v25, 272  ;;  %556 = vbcast.lane.b32.xlu0 %v454_v11, 264 }
  0x6e   : > { %624 = vbcast.lane.b32.xlu1 %v398_v10, 272  ;;  %648 = vbcast.lane.b32.xlu0 %v440_v26, 272 }
  0x72   : > { %656 = vbcast.lane.b32.xlu1 %v454_v11, 272  ;;  %652 = vbcast.lane.b32.xlu0 %v447_v27, 272 }
  0x88   : > { %v497_v31 = vpop.permute.xlu1 %496  ;;  %v352_v32 = vpop.permute.xlu0 %351 }
  0x89   : > { %v562_v33 = vmul.f32 %v2907_v30, %v497_v31  ;;  %v462_v34 = vmul.f32 %v2904_v29, %v352_v32 }
  0x8b   : > { %v578_v35 = vadd.f32 %v562_v33, %v462_v34 }
  0x8c   : > { %v501_v36 = vpop.permute.xlu1 %500  ;;  %v359_v37 = vpop.permute.xlu0 %358 }
  0x8d   : > { %v563_v38 = vmul.f32 %v2907_v30, %v501_v36  ;;  %v463_v39 = vmul.f32 %v2904_v29, %v359_v37 }
  0x8f   : > { %v579_v40 = vadd.f32 %v563_v38, %v463_v39 }
  0x90   : > { %v408_v41 = vpop.permute.xlu1 %407  ;;  %v366_v42 = vpop.permute.xlu0 %365 }
  0x91   : > { %v464_v45 = vmul.f32 %v2904_v29, %v366_v42  ;;  %v470_v47 = vmul.f32 %v2904_v29, %v408_v41 }
  0x94   : > { %v505_v43 = vpop.permute.xlu1 %504  ;;  %v415_v44 = vpop.permute.xlu0 %414 }
  0x95   : > { %v564_v46 = vmul.f32 %v2907_v30, %v505_v43  ;;  %v471_v51 = vmul.f32 %v2904_v29, %v415_v44 }
  0x97   : > { %v580_v48 = vadd.f32 %v564_v46, %v464_v45 }
  0x98   : > { %v533_v49 = vpop.permute.xlu1 %532  ;;  %v529_v50 = vpop.permute.xlu0 %528 }
  0x99   : > { %v571_v52 = vmul.f32 %v2907_v30, %v533_v49  ;;  %v570_v53 = vmul.f32 %v2907_v30, %v529_v50 }
  0x9b   : > { %v587_v54 = vadd.f32 %v571_v52, %v471_v51  ;;  %v586_v55 = vadd.f32 %v570_v53, %v470_v47 }
  0x9c   : > { %v422_v56 = vpop.permute.xlu1 %421  ;;  %v373_v57 = vpop.permute.xlu0 %372 }
  0x9d   : > { %v472_v58 = vmul.f32 %v2904_v29, %v422_v56  ;;  %v465_v62 = vmul.f32 %v2904_v29, %v373_v57 }
  0xa0   : > { %v537_v59 = vpop.permute.xlu1 %536  ;;  %v509_v60 = vpop.permute.xlu0 %508 }
  0xa1   : > { %v572_v63 = vmul.f32 %v2907_v30, %v537_v59  ;;  %v565_v0 = vmul.f32 %v2907_v30, %v509_v60 }
  0xa3   : > { %v588_v1 = vadd.f32 %v572_v63, %v472_v58  ;;  %v581_v2 = vadd.f32 %v565_v0, %v465_v62 }
  0xa4   : > { %v601_v3 = vpop.permute.xlu1 %600  ;;  %v597_v4 = vpop.permute.xlu0 %596 }
  0xa5   : > { %v663_v5 = vmul.f32 %v2921_v61, %v601_v3  ;;  %v662_v6 = vmul.f32 %v2921_v61, %v597_v4 }
  0xa7   : > { %v2928_v7 = vadd.f32 %v663_v5, %v579_v40  ;;  %v2930_v9 = vadd.f32 %v662_v6, %v578_v35 }
  0xa8   : > { %v429_v8 = vpop.permute.xlu1 %428  ;;  %v380_v10 = vpop.permute.xlu0 %379 }
  0xa9   : > { %v698_v11 = vsel %vm694_vm0, %v2928_v7, -inf  ;;  %v695_v12 = vsel %vm694_vm0, %v2930_v9, -inf  ;;  %v473_v13 = vmul.f32 %v2904_v29, %v429_v8  ;;  %v466_v16 = vmul.f32 %v2904_v29, %v380_v10 }
  0xaa   : > { %699 = vmax.xlane.f32.xlu1 %v698_v11  ;;  %696 = vmax.xlane.f32.xlu0 %v695_v12 }
  0xac   : > { %v541_v14 = vpop.permute.xlu1 %540  ;;  %v513_v15 = vpop.permute.xlu0 %512 }
  0xad   : > { %v573_v17 = vmul.f32 %v2907_v30, %v541_v14  ;;  %v566_v18 = vmul.f32 %v2907_v30, %v513_v15 }
  0xaf   : > { %v589_v19 = vadd.f32 %v573_v17, %v473_v13  ;;  %v582_v20 = vadd.f32 %v566_v18, %v466_v16 }
  0xb0   : > { %v629_v21 = vpop.permute.xlu1 %628  ;;  %v605_v22 = vpop.permute.xlu0 %604 }
  0xb1   : > { %v670_v23 = vmul.f32 %v2921_v61, %v629_v21  ;;  %v664_v24 = vmul.f32 %v2921_v61, %v605_v22 }
  0xb3   : > { %v2942_v25 = vadd.f32 %v664_v24, %v580_v48  ;;  %v2944_v26 = vadd.f32 %v670_v23, %v586_v55 }
  0xb4   : > { %v387_v27 = vpop.permute.xlu1 %386  ;;  %v633_v28 = vpop.permute.xlu0 %632 }
  0xb5   : > { %v671_v31 = vmul.f32 %v2921_v61, %v633_v28  ;;  %v701_v32 = vsel %vm694_vm0, %v2942_v25, -inf  ;;  %v467_v33 = vmul.f32 %v2904_v29, %v387_v27  ;;  %v719_v38 = vsel %vm694_vm0, %v2944_v26, -inf }
  0xb6   : > { %702 = vmax.xlane.f32.xlu0 %v701_v32 }
  0xb7   : > { %v2950_v34 = vadd.f32 %v671_v31, %v587_v54 }
  0xb8   : > { %v517_v35 = vpop.permute.xlu1 %516  ;;  %v436_v36 = vpop.permute.xlu0 %435 }
  0xb9   : > { %v567_v37 = vmul.f32 %v2907_v30, %v517_v35  ;;  %v722_v39 = vsel %vm694_vm0, %v2950_v34, -inf  ;;  %v474_v43 = vmul.f32 %v2904_v29, %v436_v36 }
  0xba   : > { %720 = vmax.xlane.f32.xlu0 %v719_v38  ;;  %723 = vmax.xlane.f32.xlu1 %v722_v39 }
  0xbb   : > { %v583_v40 = vadd.f32 %v567_v37, %v467_v33 }
  0xbc   : > { %v609_v41 = vpop.permute.xlu1 %608  ;;  %v545_v42 = vpop.permute.xlu0 %544 }
  0xbd   : > { %v665_v44 = vmul.f32 %v2921_v61, %v609_v41  ;;  %v574_v45 = vmul.f32 %v2907_v30, %v545_v42 }
  0xbf   : > { %v590_v46 = vadd.f32 %v574_v45, %v474_v43  ;;  %v2960_v47 = vadd.f32 %v665_v44, %v581_v2 }
  0xc0   : > { %v394_v48 = vpop.permute.xlu1 %393  ;;  %v637_v49 = vpop.permute.xlu0 %636 }
  0xc1   : > { %v672_v50 = vmul.f32 %v2921_v61, %v637_v49  ;;  %v704_v51 = vsel %vm694_vm0, %v2960_v47, -inf  ;;  %v468_v52 = vmul.f32 %v2904_v29, %v394_v48 }
  0xc2   : > { %705 = vmax.xlane.f32.xlu0 %v704_v51 }
  0xc3   : > { %v2966_v53 = vadd.f32 %v672_v50, %v588_v1 }
  0xc4   : > { %v521_v54 = vpop.permute.xlu1 %520  ;;  %v443_v55 = vpop.permute.xlu0 %442 }
  0xc5   : > { %v568_v56 = vmul.f32 %v2907_v30, %v521_v54  ;;  %v725_v57 = vsel %vm694_vm0, %v2966_v53, -inf  ;;  %v475_v62 = vmul.f32 %v2904_v29, %v443_v55 }
  0xc6   : > { %726 = vmax.xlane.f32.xlu1 %v725_v57 }
  0xc7   : > { %v584_v58 = vadd.f32 %v568_v56, %v468_v52 }
  0xc8   : > { %v613_v59 = vpop.permute.xlu1 %612  ;;  %v549_v60 = vpop.permute.xlu0 %548 }
  0xc9   : > { %v666_v63 = vmul.f32 %v2921_v61, %v613_v59  ;;  %v575_v0 = vmul.f32 %v2907_v30, %v549_v60 }
  0xcb   : > { %v591_v2 = vadd.f32 %v575_v0, %v475_v62  ;;  %v2974_v1 = vadd.f32 %v666_v63, %v582_v20 }
  0xcc   : > { %v401_v3 = vpop.permute.xlu1 %400  ;;  %v641_v4 = vpop.permute.xlu0 %640 }
  0xcd   : > { %v673_v5 = vmul.f32 %v2921_v61, %v641_v4  ;;  %v707_v6 = vsel %vm694_vm0, %v2974_v1, -inf  ;;  %v469_v8 = vmul.f32 %v2904_v29, %v401_v3 }
  0xce   : > { %708 = vmax.xlane.f32.xlu0 %v707_v6 }
  0xcf   : > { %v2980_v10 = vadd.f32 %v673_v5, %v589_v19 }
  0xd0   : > { %v525_v11 = vpop.permute.xlu1 %524  ;;  %v450_v12 = vpop.permute.xlu0 %449 }
  0xd1   : > { %v569_v13 = vmul.f32 %v2907_v30, %v525_v11  ;;  %v728_v14 = vsel %vm694_vm0, %v2980_v10, -inf  ;;  %v476_v18 = vmul.f32 %v2904_v29, %v450_v12 }
  0xd2   : > { %729 = vmax.xlane.f32.xlu1 %v728_v14 }
  0xd3   : > { %v585_v15 = vadd.f32 %v569_v13, %v469_v8 }
  0xd4   : > { %v617_v16 = vpop.permute.xlu1 %616  ;;  %v553_v17 = vpop.permute.xlu0 %552 }
  0xd5   : > { %v667_v20 = vmul.f32 %v2921_v61, %v617_v16  ;;  %v576_v21 = vmul.f32 %v2907_v30, %v553_v17 }
  0xd7   : > { %v592_v22 = vadd.f32 %v576_v21, %v476_v18  ;;  %v2988_v19 = vadd.f32 %v667_v20, %v583_v40 }
  0xd8   : > { %v457_v23 = vpop.permute.xlu1 %456  ;;  %v645_v24 = vpop.permute.xlu0 %644 }
  0xd9   : > { %v674_v27 = vmul.f32 %v2921_v61, %v645_v24  ;;  %v710_v28 = vsel %vm694_vm0, %v2988_v19, -inf  ;;  %v477_v31 = vmul.f32 %v2904_v29, %v457_v23 }
  0xda   : > { %711 = vmax.xlane.f32.xlu0 %v710_v28 }
  0xdb   : > { %v2994_v32 = vadd.f32 %v674_v27, %v590_v46 }
  0xdc   : > { %v621_v33 = vpop.permute.xlu1 %620  ;;  %v557_v35 = vpop.permute.xlu0 %556 }
  0xdd   : > { %v668_v36 = vmul.f32 %v2921_v61, %v621_v33  ;;  %v577_v37 = vmul.f32 %v2907_v30, %v557_v35  ;;  %v731_v38 = vsel %vm694_vm0, %v2994_v32, -inf }
  0xde   : > { %732 = vmax.xlane.f32.xlu1 %v731_v38 }
  0xdf   : > { %v593_v39 = vadd.f32 %v577_v37, %v477_v31  ;;  %v3000_v40 = vadd.f32 %v668_v36, %v584_v58 }
  0xe0   : > { %v625_v41 = vpop.permute.xlu1 %624  ;;  %v649_v42 = vpop.permute.xlu0 %648 }
  0xe1   : > { %v669_v43 = vmul.f32 %v2921_v61, %v625_v41  ;;  %v675_v29 = vmul.f32 %v2921_v61, %v649_v42  ;;  %v713_v44 = vsel %vm694_vm0, %v3000_v40, -inf }
  0xe2   : > { %714 = vmax.xlane.f32.xlu0 %v713_v44 }
  0xe3   : > { %v3006_v45 = vadd.f32 %v669_v43, %v585_v15  ;;  %v3008_v30 = vadd.f32 %v675_v29, %v591_v2 }
  0xe4   : > { %v657_v46 = vpop.permute.xlu1 %656  ;;  %v653_v48 = vpop.permute.xlu0 %652 }
  0xe5   : > { %v677_v49 = vmul.f32 %v2921_v61, %v657_v46  ;;  %v676_v50 = vmul.f32 %v2921_v61, %v653_v48  ;;  %v716_v51 = vsel %vm694_vm0, %v3006_v45, -inf  ;;  %v734_v52 = vsel %vm694_vm0, %v3008_v30, -inf }
  0xe6   : > { %717 = vmax.xlane.f32.xlu0 %v716_v51  ;;  %735 = vmax.xlane.f32.xlu1 %v734_v52 }
  0xe7   : > { %v3016_v54 = vadd.f32 %v677_v49, %v593_v39  ;;  %v3018_v55 = vadd.f32 %v676_v50, %v592_v22  ;;  %v2812_v39 = vmov 2  }
  0xe8   : > { %2664 = vset.pattern.permute.xlu0 %v2812_v39 }
  0xe9   : > { %v740_v56 = vsel %vm694_vm0, %v3016_v54, -inf  ;;  %v737_v57 = vsel %vm694_vm0, %v3018_v55, -inf }
  0xea   : > { %741 = vmax.xlane.f32.xlu0 %v740_v56  ;;  %738 = vmax.xlane.f32.xlu1 %v737_v57 }
 0x137   : > { %v700_v61 = vpop.xlane.xlu1 %699  ;;  %v697_v58 = vpop.xlane.xlu0 %696 }
 0x138   : > { %v744_v59 = vsub.f32 %v2928_v7, %v700_v61  ;;  %v743_v60 = vsub.f32 %v2930_v9, %v697_v58 }
 0x13a   : > { %v761_v62 = vmul.f32 1.442695, %v744_v59  ;;  %v759_v63 = vmul.f32 1.442695, %v743_v60 }
 0x13c   : > { %2708 = vpow2.f32 %v761_v62 }
 0x13d   : > { %2710 = vpow2.f32 %v759_v63 }
 0x143   : > { %v703_v0 = vpop.xlane.xlu0 %702 }
 0x144   : > { %v745_v2 = vsub.f32 %v2942_v25, %v703_v0 }
 0x146   : > { %v3027_v3 = vpop.eup %2708  ;;  %v763_v4 = vmul.f32 1.442695, %v745_v2 }
 0x147   : > { %v3029_v5 = vpop.eup %2710  ;;  %v724_v6 = vpop.xlane.xlu1 %723  ;;  %v794_v11 = vsel %vm694_vm0, %v3027_v3, 0.0 }
 0x148   : > { %v721_v8 = vpop.xlane.xlu0 %720  ;;  %2712 = vpow2.f32 %v763_v4  ;;  %v752_v7 = vsub.f32 %v2950_v34, %v724_v6  ;;  %795 = vadd.xlane.f32.xlu0 %v794_v11  ;;  %v791_v12 = vsel %vm694_vm0, %v3029_v5, 0.0 }
 0x149   : > { %v751_v9 = vsub.f32 %v2944_v26, %v721_v8  ;;  %792 = vadd.xlane.f32.xlu1 %v791_v12 }
 0x14a   : > { %v777_v25 = vmul.f32 1.442695, %v752_v7 }
 0x14b   : > { %v775_v13 = vmul.f32 1.442695, %v751_v9 }
 0x14c   : > { %2714 = vpow2.f32 %v777_v25 }
 0x14d   : > { %2716 = vpow2.f32 %v775_v13 }
 0x14f   : > { %v706_v14 = vpop.xlane.xlu0 %705 }
 0x150   : > { %v746_v15 = vsub.f32 %v2960_v47, %v706_v14 }
 0x152   : > { %v3038_v16 = vpop.eup %2712  ;;  %v765_v17 = vmul.f32 1.442695, %v746_v15 }
 0x153   : > { %v727_v18 = vpop.xlane.xlu1 %726  ;;  %v797_v34 = vsel %vm694_vm0, %v3038_v16, 0.0 }
 0x154   : > { %2718 = vpow2.f32 %v765_v17  ;;  %v753_v26 = vsub.f32 %v2966_v53, %v727_v18  ;;  %798 = vadd.xlane.f32.xlu1 %v797_v34 }
 0x156   : > { %v3043_v20 = vpop.eup %2714  ;;  %v779_v21 = vmul.f32 1.442695, %v753_v26 }
 0x157   : > { %v3045_v22 = vpop.eup %2716  ;;  %v818_v23 = vsel %vm694_vm0, %v3043_v20, 0.0 }
 0x158   : > { %2720 = vpow2.f32 %v779_v21  ;;  %819 = vadd.xlane.f32.xlu1 %v818_v23  ;;  %v815_v47 = vsel %vm694_vm0, %v3045_v22, 0.0 }
 0x159   : > { %816 = vadd.xlane.f32.xlu0 %v815_v47 }
 0x15b   : > { %v709_v24 = vpop.xlane.xlu0 %708 }
 0x15c   : > { %v747_v27 = vsub.f32 %v2974_v1, %v709_v24  ;;  %v2813_v1 = vmov 0  }
 0x15d   : > { %2663 = vset.pattern.permute.xlu1 %v2813_v1 }
 0x15e   : > { %v3052_v28 = vpop.eup %2718  ;;  %v767_v53 = vmul.f32 1.442695, %v747_v27 }
 0x15f   : > { %v730_v31 = vpop.xlane.xlu1 %729  ;;  %v800_v33 = vsel %vm694_vm0, %v3052_v28, 0.0 }
 0x160   : > { %2722 = vpow2.f32 %v767_v53  ;;  %v754_v35 = vsub.f32 %v2980_v10, %v730_v31  ;;  %801 = vadd.xlane.f32.xlu0 %v800_v33 }
 0x162   : > { %v3057_v36 = vpop.eup %2720  ;;  %v781_v37 = vmul.f32 1.442695, %v754_v35 }
 0x163   : > { %v821_v38 = vsel %vm694_vm0, %v3057_v36, 0.0 }
 0x164   : > { %2724 = vpow2.f32 %v781_v37  ;;  %822 = vadd.xlane.f32.xlu1 %v821_v38 }
 0x167   : > { %v712_v41 = vpop.xlane.xlu0 %711 }
 0x168   : > { %v748_v42 = vsub.f32 %v2988_v19, %v712_v41 }
 0x16a   : > { %v3064_v43 = vpop.eup %2722  ;;  %v769_v10 = vmul.f32 1.442695, %v748_v42 }
 0x16b   : > { %v733_v29 = vpop.xlane.xlu1 %732  ;;  %v803_v44 = vsel %vm694_vm0, %v3064_v43, 0.0 }
 0x16c   : > { %2726 = vpow2.f32 %v769_v10  ;;  %v755_v46 = vsub.f32 %v2994_v32, %v733_v29  ;;  %804 = vadd.xlane.f32.xlu0 %v803_v44 }
 0x16e   : > { %v3069_v48 = vpop.eup %2724  ;;  %v783_v49 = vmul.f32 1.442695, %v755_v46 }
 0x16f   : > { %v715_v50 = vpop.xlane.xlu0 %714  ;;  %v824_v51 = vsel %vm694_vm0, %v3069_v48, 0.0 }
 0x170   : > { %2728 = vpow2.f32 %v783_v49  ;;  %v749_v19 = vsub.f32 %v3000_v40, %v715_v50  ;;  %825 = vadd.xlane.f32.xlu1 %v824_v51 }
 0x172   : > { %v771_v52 = vmul.f32 1.442695, %v749_v19 }
 0x173   : > { %v736_v56 = vpop.xlane.xlu1 %735  ;;  %v718_v57 = vpop.xlane.xlu0 %717 }
 0x174   : > { %2730 = vpow2.f32 %v771_v52  ;;  %v756_v61 = vsub.f32 %v3008_v30, %v736_v56  ;;  %v750_v32 = vsub.f32 %v3006_v45, %v718_v57 }
 0x176   : > { %v3076_v58 = vpop.eup %2726  ;;  %v785_v59 = vmul.f32 1.442695, %v756_v61  ;;  %v773_v60 = vmul.f32 1.442695, %v750_v32 }
 0x177   : > { %v739_v62 = vpop.xlane.xlu1 %738  ;;  %v742_v63 = vpop.xlane.xlu0 %741  ;;  %v806_v0 = vsel %vm694_vm0, %v3076_v58, 0.0 }
 0x178   : > { %2732 = vpow2.f32 %v785_v59  ;;  %v757_v40 = vsub.f32 %v3018_v55, %v739_v62  ;;  %v758_v2 = vsub.f32 %v3016_v54, %v742_v63  ;;  %807 = vadd.xlane.f32.xlu0 %v806_v0 }
 0x179   : > { %2734 = vpow2.f32 %v773_v60 }
 0x17a   : > { %v3082_v4 = vpop.eup %2728  ;;  %v787_v30 = vmul.f32 1.442695, %v757_v40  ;;  %v789_v45 = vmul.f32 1.442695, %v758_v2  ;;  %v2814_v2 = vmov 1  }
 0x17b   : > { %v827_v6 = vsel %vm694_vm0, %v3082_v4, 0.0 }
 0x17c   : > { %2736 = vpow2.f32 %v787_v30  ;;  %828 = vadd.xlane.f32.xlu1 %v827_v6  ;;  %v1698_v30 = vld [vmem:[%s3777_s3 + $0x8] sm:$0xf] }
 0x17d   : > { %2738 = vpow2.f32 %v789_v45  ;;  %2611 = vmatprep.subr.msk.mxu0 %vm1315_vm1, %v1698_v30 }
 0x17e   : > { %v3086_v8 = vpop.eup %2730  ;;  %2612 = vmatpush3.msk.msra.mxu0 %vm1315_vm1, %v1698_v30 }
 0x17f   : > { %v809_v11 = vsel %vm694_vm0, %v3086_v8, 0.0 }
 0x180   : > { %810 = vadd.xlane.f32.xlu0 %v809_v11 }
 0x182   : > { %v3090_v55 = vpop.eup %2732 }
 0x183   : > { %v3092_v54 = vpop.eup %2734  ;;  %v830_v7 = vsel %vm694_vm0, %v3090_v55, 0.0 }
 0x184   : > { %831 = vadd.xlane.f32.xlu1 %v830_v7  ;;  %v812_v9 = vsel %vm694_vm0, %v3092_v54, 0.0  ;;  %v3248_v7 = vld [vmem:[%s3244_s12 + $0x8] sm:$0xff] }
 0x185   : > { %813 = vadd.xlane.f32.xlu0 %v812_v9  ;;  %v3252_v9 = vld [vmem:[%s3244_s12] sm:$0xff] }
 0x186   : > { %v3098_v12 = vpop.eup %2736 }
 0x187   : > { %v3100_v25 = vpop.eup %2738  ;;  %v833_v13 = vsel %vm694_vm0, %v3098_v12, 0.0 }
 0x188   : > { %834 = vadd.xlane.f32.xlu1 %v833_v13  ;;  %v836_v14 = vsel %vm694_vm0, %v3100_v25, 0.0 }
 0x189   : > { %837 = vadd.xlane.f32.xlu0 %v836_v14 }
 0x1d5   : > { %v796_v17 = vpop.xlane.xlu0 %795 }
 0x1d6   : > { %v793_v15 = vpop.xlane.xlu1 %792 }
 0x1d7   : > { %2740 = vrcp.f32 %v793_v15  ;;  %v3259_v15 = vld [vmem:[%s3244_s12 + $0x10] sm:$0xff] }
 0x1d8   : > { %2742 = vrcp.f32 %v796_v17 }
 0x1e1   : > { %v2741_v18 = vpop.eup %2740  ;;  %v799_v34 = vpop.xlane.xlu1 %798 }
 0x1e2   : > { %2744 = vrcp.f32 %v799_v34  ;;  %v3107_v26 = vmul.f32 %v2741_v18, %v3029_v5  ;;  %v2743_v21 = vpop.eup %2742  ;;  %v3264_v18 = vld [vmem:[%s3244_s12 + $0x48] sm:$0xff] }
 0x1e3   : > { %v3112_v24 = vmul.f32 %v2743_v21, %v3027_v3 }
 0x1e4   : > { %873 = vperm.xlu1 %2663, %v3107_v26   ;;  %1507 = vperm.xlu0 %2664, %v3107_v26  }
 0x1e5   : > { %v820_v23 = vpop.xlane.xlu1 %819 }
 0x1e6   : > { %v817_v47 = vpop.xlane.xlu0 %816 }
 0x1e7   : > { %2746 = vrcp.f32 %v817_v47  ;;  %v1273_v47 = vld [vmem:[%s3777_s3 + $0x4] sm:$0xf] }
 0x1e8   : > { %2665 = vset.pattern.permute.xlu1 %v2812_v39  ;;  %2748 = vrcp.f32 %v820_v23  ;;  %2601 = vmatprep.subr.msk.mxu1 %vm1315_vm1, %v1273_v47 }
 0x1e9   : > { %1511 = vperm.xlu1 %2665, %v3112_v24   ;;  %2602 = vmatpush3.msk.msra.mxu1 %vm1315_vm1, %v1273_v47 }
 0x1ec   : > { %v2745_v27 = vpop.eup %2744 }
 0x1ed   : > { %v802_v53 = vpop.xlane.xlu0 %801  ;;  %v3117_v5 = vmul.f32 %v2745_v27, %v3038_v16 }
 0x1ee   : > { %2750 = vrcp.f32 %v802_v53  ;;  %v3274_v53 = vld [vmem:[%s3244_s12 + $0x40] sm:$0xff] }
 0x1ef   : > { %1515 = vperm.xlu1 %2665, %v3117_v5  }
 0x1f1   : > { %v2747_v31 = vpop.eup %2746  ;;  %v823_v33 = vpop.xlane.xlu1 %822 }
 0x1f2   : > { %v3121_v35 = vmul.f32 %v2747_v31, %v3045_v22  ;;  %2752 = vrcp.f32 %v823_v33  ;;  %v2749_v3 = vpop.eup %2748 }
 0x1f3   : > { %v3125_v37 = vmul.f32 %v2749_v3, %v3043_v20 }
 0x1f4   : > { %1539 = vperm.xlu1 %2665, %v3121_v35  }
 0x1f8   : > { %v2751_v38 = vpop.eup %2750  ;;  %1543 = vperm.xlu1 %2665, %v3125_v37  }
 0x1f9   : > { %v3129_v16 = vmul.f32 %v2751_v38, %v3052_v28  ;;  %v805_v39 = vpop.xlane.xlu0 %804 }
 0x1fa   : > { %2754 = vrcp.f32 %v805_v39 }
 0x1fc   : > { %v2753_v41 = vpop.eup %2752  ;;  %1519 = vperm.xlu1 %2665, %v3129_v16  }
 0x1fd   : > { %v826_v22 = vpop.xlane.xlu1 %825  ;;  %v3133_v42 = vmul.f32 %v2753_v41, %v3057_v36 }
 0x1fe   : > { %2756 = vrcp.f32 %v826_v22 }
 0x200   : > { %1547 = vperm.xlu1 %2665, %v3133_v42  }
 0x204   : > { %v2755_v20 = vpop.eup %2754 }
 0x205   : > { %v3137_v10 = vmul.f32 %v2755_v20, %v3064_v43  ;;  %v808_v29 = vpop.xlane.xlu0 %807  ;;  %v3287_v20 = vld [vmem:[%s3244_s12 + $0x18] sm:$0xff] }
 0x206   : > { %2758 = vrcp.f32 %v808_v29  ;;  %v3290_v29 = vld [vmem:[%s3244_s12 + $0x20] sm:$0xff] }
 0x207   : > { %1523 = vperm.xlu1 %2665, %v3137_v10  }
 0x208   : > { %v2757_v28 = vpop.eup %2756 }
 0x209   : > { %v829_v44 = vpop.xlane.xlu1 %828  ;;  %v3141_v46 = vmul.f32 %v2757_v28, %v3069_v48 }
 0x20a   : > { %2760 = vrcp.f32 %v829_v44 }
 0x20b   : > { %1551 = vperm.xlu1 %2665, %v3141_v46  }
 0x20d   : > { %v811_v36 = vpop.xlane.xlu0 %810 }
 0x20e   : > { %2762 = vrcp.f32 %v811_v36  ;;  %v3294_v36 = vld [vmem:[%s3244_s12 + $0x50] sm:$0xff] }
 0x210   : > { %v2759_v49 = vpop.eup %2758 }
 0x211   : > { %v3145_v50 = vmul.f32 %v2759_v49, %v3076_v58  ;;  %v832_v43 = vpop.xlane.xlu1 %831 }
 0x212   : > { %2764 = vrcp.f32 %v832_v43  ;;  %v814_v51 = vpop.xlane.xlu0 %813 }
 0x213   : > { %2766 = vrcp.f32 %v814_v51  ;;  %1527 = vperm.xlu0 %2664, %v3145_v50   ;;  %v3299_v51 = vld [vmem:[%s3244_s12 + $0x58] sm:$0xff] }
 0x214   : > { %v2761_v19 = vpop.eup %2760 }
 0x215   : > { %v835_v52 = vpop.xlane.xlu1 %834  ;;  %v3149_v48 = vmul.f32 %v2761_v19, %v3082_v4  ;;  %v2815_v4 = vmov 3  }
 0x216   : > { %2768 = vrcp.f32 %v835_v52  ;;  %v838_v56 = vpop.xlane.xlu0 %837 }
 0x217   : > { %2770 = vrcp.f32 %v838_v56  ;;  %1555 = vperm.xlu1 %2665, %v3149_v48  }
 0x218   : > { %v2763_v57 = vpop.eup %2762 }
 0x219   : > { %v3153_v61 = vmul.f32 %v2763_v57, %v3086_v8  ;;  %v3781_v8 = vmov 4  }
 0x21b   : > { %1531 = vperm.xlu0 %2664, %v3153_v61  }
 0x21c   : > { %v2765_v32 = vpop.eup %2764 }
 0x21d   : > { %v2767_v58 = vpop.eup %2766  ;;  %v3157_v59 = vmul.f32 %v2765_v32, %v3090_v55  ;;  %v3307_v32 = vld [vmem:[%s3244_s12 + $0x28] sm:$0xff] }
 0x21e   : > { %v3160_v60 = vmul.f32 %v2767_v58, %v3092_v54 }
 0x21f   : > { %1559 = vperm.xlu1 %2665, %v3157_v59  }
 0x220   : > { %v2769_v62 = vpop.eup %2768  ;;  %1535 = vperm.xlu0 %2664, %v3160_v60  }
 0x221   : > { %v2771_v63 = vpop.eup %2770  ;;  %v3165_v0 = vmul.f32 %v2769_v62, %v3098_v12 }
 0x222   : > { %v3168_v40 = vmul.f32 %v2771_v63, %v3100_v25 }
 0x223   : > { %1563 = vperm.xlu1 %2665, %v3165_v0  }
 0x224   : > { %1567 = vperm.xlu0 %2664, %v3168_v40  }
 0x227   : > { %2666 = vset.pattern.permute.xlu1 %v2814_v2 }
 0x228   : > { %2667 = vset.pattern.permute.xlu0 %v2814_v2  ;;  %1082 = vperm.xlu1 %2666, %v3107_v26  }
 0x229   : > { %1086 = vperm.xlu0 %2667, %v3112_v24  }
 0x22c   : > { %2668 = vset.pattern.permute.xlu1 %v2815_v4 }
 0x22d   : > { %1090 = vperm.xlu0 %2667, %v3117_v5   ;;  %1814 = vperm.xlu1 %2668, %v3107_v26  }
 0x231   : > { %1118 = vperm.xlu0 %2667, %v3125_v37   ;;  %1818 = vperm.xlu1 %2668, %v3112_v24  }
 0x235   : > { %2671 = vset.pattern.permute.xlu0 %v2815_v4  ;;  %2669 = vset.pattern.permute.xlu1 %v2814_v2 }
 0x236   : > { %1846 = vperm.xlu0 %2671, %v3121_v35   ;;  %1114 = vperm.xlu1 %2669, %v3121_v35  }
 0x23a   : > { %2673 = vset.pattern.permute.xlu0 %v2814_v2  ;;  %2670 = vset.pattern.permute.xlu1 %v2815_v4 }
 0x23b   : > { %1122 = vperm.xlu0 %2673, %v3133_v42   ;;  %1822 = vperm.xlu1 %2670, %v3117_v5  }
 0x23f   : > { %1098 = vperm.xlu0 %2673, %v3137_v10   ;;  %1850 = vperm.xlu1 %2670, %v3125_v37  }
 0x243   : > { %2676 = vset.pattern.permute.xlu0 %v2815_v4  ;;  %2672 = vset.pattern.permute.xlu1 %v2814_v2 }
 0x244   : > { %1830 = vperm.xlu0 %2676, %v3137_v10   ;;  %1094 = vperm.xlu1 %2672, %v3129_v16  }
 0x248   : > { %2679 = vset.pattern.permute.xlu0 %v2814_v2  ;;  %2674 = vset.pattern.permute.xlu1 %v2815_v4 }
 0x249   : > { %1130 = vperm.xlu0 %2679, %v3149_v48   ;;  %1826 = vperm.xlu1 %2674, %v3129_v16  }
 0x24d   : > { %1106 = vperm.xlu0 %2679, %v3153_v61   ;;  %1854 = vperm.xlu1 %2674, %v3133_v42  }
 0x251   : > { %2682 = vset.pattern.permute.xlu0 %v2815_v4  ;;  %2675 = vset.pattern.permute.xlu1 %v2814_v2 }
 0x252   : > { %1838 = vperm.xlu0 %2682, %v3153_v61   ;;  %1126 = vperm.xlu1 %2675, %v3141_v46  }
 0x256   : > { %2685 = vset.pattern.permute.xlu0 %v2814_v2  ;;  %2677 = vset.pattern.permute.xlu1 %v2815_v4 }
 0x257   : > { %1138 = vperm.xlu0 %2685, %v3165_v0   ;;  %1858 = vperm.xlu1 %2677, %v3141_v46  }
 0x25b   : > { %1142 = vperm.xlu0 %2685, %v3168_v40   ;;  %2678 = vset.pattern.permute.xlu1 %v2814_v2 }
 0x25c   : > { %1102 = vperm.xlu1 %2678, %v3145_v50  }
 0x25f   : > { %2687 = vset.pattern.permute.xlu0 %v2813_v1 }
 0x260   : > { %878 = vperm.xlu0 %2687, %v3112_v24   ;;  %2680 = vset.pattern.permute.xlu1 %v2815_v4 }
 0x261   : > { %1834 = vperm.xlu1 %2680, %v3145_v50  }
 0x263   : > { %v3221_v45 = vpop.permute.xlu1 %873  ;;  %v1508_v12 = vpop.permute.xlu0 %1507 }
 0x264   : > { %3789 = vst [vmem:[#allocation2_spill] sm:$0xff] %v3221_v45  ;;  %883 = vperm.xlu0 %2687, %v3117_v5   ;;  %v1570_v14 = vmul.f32 %v1508_v12, %v3252_v9  ;;  %v3318_v12 = vld [vmem:[%s3244_s12 + $0x60] sm:$0xff] }
 0x265   : > { %1862 = vperm.xlu1 %2680, %v3149_v48  }
 0x266   : > { %v1586_v23 = vsel %vm967_vm2, %v1570_v14, 0.0 }
 0x267   : > { %v1587_v33 = vrot.slane %v1586_v23, 4 }
 0x268   : > { %918 = vperm.xlu0 %2687, %v3125_v37   ;;  %v1512_v6 = vpop.permute.xlu1 %1511 }
 0x269   : > { %2681 = vset.pattern.permute.xlu1 %v2814_v2  ;;  %v1571_v13 = vmul.f32 %v1512_v6, %v3248_v7 }
 0x26a   : > { %1134 = vperm.xlu1 %2681, %v3157_v59  }
 0x26b   : > { %v1593_v17 = vsel %vm967_vm2, %v1571_v13, 0.0 }
 0x26c   : > { %2691 = vset.pattern.permute.xlu0 %v3781_v8  ;;  %v1594_v27 = vrot.slane %v1593_v17, 4 }
 0x26d   : > { %2153 = vperm.xlu0 %2691, %v3121_v35  }
 0x26e   : > { %v1516_v11 = vpop.permute.xlu1 %1515  ;;  %2683 = vset.pattern.permute.xlu1 %v2815_v4  ;;  %v1595_v41 = vadd.f32 %v1594_v27, %v1593_v17 }
 0x26f   : > { %1866 = vperm.xlu1 %2683, %v3157_v59   ;;  %v1572_v34 = vmul.f32 %v1516_v11, %v3259_v15 }
 0x270   : > { %v1596_v49 = vrot.slane %v1595_v41, 2 }
 0x271   : > { %2693 = vset.pattern.permute.xlu0 %v2813_v1  ;;  %v1600_v3 = vsel %vm967_vm2, %v1572_v34, 0.0  ;;  %v3325_v34 = vld [vmem:[%s3777_s3 + $0xc] sm:$0xf] }
 0x272   : > { %923 = vperm.xlu0 %2693, %v3133_v42   ;;  %v1597_v63 = vadd.f32 %v1596_v49, %v1595_v41  ;;  %2616 = vmatprep.subr.msk.mxu0 %vm1315_vm1, %v3325_v34  ;;  %v3333_v41 = vld [vmem:[%s3244_s12 + $0x30] sm:$0xff] }
 0x273   : > { %v1540_v55 = vpop.permute.xlu1 %1539  ;;  %2684 = vset.pattern.permute.xlu1 %v2814_v2 }
 0x274   : > { %1110 = vperm.xlu1 %2684, %v3160_v60   ;;  %v1578_v39 = vmul.f32 %v1540_v55, %v3274_v53 }
 0x276   : > { %893 = vperm.xlu0 %2693, %v3137_v10   ;;  %v1642_v28 = vsel %vm967_vm2, %v1578_v39, 0.0 }
 0x277   : > { %v1544_v54 = vpop.permute.xlu1 %1543  ;;  %v1643_v57 = vrot.slane %v1642_v28, 4 }
 0x278   : > { %2686 = vset.pattern.permute.xlu1 %v2815_v4  ;;  %v1579_v31 = vmul.f32 %v1544_v54, %v3264_v18 }
 0x279   : > { %1842 = vperm.xlu1 %2686, %v3160_v60   ;;  %v1644_v55 = vadd.f32 %v1643_v57, %v1642_v28 }
 0x27a   : > { %2696 = vset.pattern.permute.xlu0 %v3781_v8  ;;  %v1649_v22 = vsel %vm967_vm2, %v1579_v31, 0.0 }
 0x27b   : > { %2137 = vperm.xlu0 %2696, %v3137_v10   ;;  %v1520_v25 = vpop.permute.xlu1 %1519  ;;  %v1588_v10 = vadd.f32 %v1587_v33, %v1586_v23  ;;  %v1650_v44 = vrot.slane %v1649_v22, 4 }
 0x27c   : > { %v1573_v43 = vmul.f32 %v1520_v25, %v3287_v20 }
 0x27d   : > { %1870 = vperm.xlu1 %2686, %v3165_v0   ;;  %v1589_v56 = vrot.slane %v1588_v10, 2  ;;  %v1651_v58 = vadd.f32 %v1650_v44, %v1649_v22 }
 0x27e   : > { %v1607_v2 = vsel %vm967_vm2, %v1573_v43, 0.0 }
 0x27f   : > { %2699 = vset.pattern.permute.xlu0 %v2813_v1  ;;  %v1548_v21 = vpop.permute.xlu1 %1547  ;;  %v1590_v11 = vadd.f32 %v1589_v56, %v1588_v10  ;;  %v1652_v25 = vrot.slane %v1651_v58, 2  ;;  %v1608_v13 = vrot.slane %v1607_v2, 4 }
 0x280   : > { %933 = vperm.xlu0 %2699, %v3149_v48  }
 0x281   : > { %1874 = vperm.xlu1 %2686, %v3168_v40   ;;  %v1653_v22 = vadd.f32 %v1652_v25, %v1651_v58  ;;  %v3341_v58 = vld [vmem:[%s3244_s12 + $0x68] sm:$0xff] }
 0x282   : > { %3790 = vst [vmem:[#allocation3_spill] sm:$0xff] %v3341_v58 }
 0x284   : > { %903 = vperm.xlu0 %2699, %v3153_v61  }
 0x285   : > { %2688 = vset.pattern.permute.xlu1 %v3781_v8 }
 0x286   : > { %2121 = vperm.xlu1 %2688, %v3107_v26   ;;  %v1524_v38 = vpop.permute.xlu1 %1523  ;;  %v1601_v26 = vrot.slane %v1600_v3, 4 }
 0x287   : > { %v1574_v52 = vmul.f32 %v1524_v38, %v3290_v29  ;;  %v1645_v38 = vrot.slane %v1644_v55, 2 }
 0x288   : > { %2702 = vset.pattern.permute.xlu0 %v3781_v8  ;;  %v1602_v19 = vadd.f32 %v1601_v26, %v1600_v3  ;;  %v1591_v3 = vrot.slane %v1590_v11, 1  ;;  %v1609_v26 = vadd.f32 %v1608_v13, %v1607_v2 }
 0x289   : > { %2145 = vperm.xlu0 %2702, %v3153_v61   ;;  %v1580_v61 = vmul.f32 %v1548_v21, %v3294_v36  ;;  %v1614_v6 = vsel %vm967_vm2, %v1574_v52, 0.0  ;;  %v1598_v21 = vrot.slane %v1597_v63, 1 }
 0x28a   : > { %2125 = vperm.xlu1 %2688, %v3112_v24   ;;  %v1552_v24 = vpop.permute.xlu1 %1551  ;;  %v1603_v30 = vrot.slane %v1602_v19, 2  ;;  %v1615_v23 = vrot.slane %v1614_v6, 4  ;;  %v1592_v57 = vadd.f32 %v1591_v3, %v1590_v11  ;;  %v1610_v2 = vrot.slane %v1609_v26, 2 }
 0x28b   : > { %v1581_v62 = vmul.f32 %v1552_v24, %v3299_v51  ;;  %v1656_v54 = vsel %vm967_vm2, %v1580_v61, 0.0  ;;  %v1599_v28 = vadd.f32 %v1598_v21, %v1597_v63 }
 0x28c   : > { %v1657_v27 = vrot.slane %v1656_v54, 4  ;;  %v1616_v44 = vadd.f32 %v1615_v23, %v1614_v6  ;;  %v1611_v3 = vadd.f32 %v1610_v2, %v1609_v26 }
 0x28d   : > { %2705 = vset.pattern.permute.xlu0 %v2813_v1  ;;  %v1663_v14 = vsel %vm967_vm2, %v1581_v62, 0.0  ;;  %v1654_v62 = vrot.slane %v1653_v22, 1  ;;  %v3349_v6 = vsel %vm1290_vm3, %v1599_v28, %v1592_v57 }
 0x28e   : > { %943 = vperm.xlu0 %2705, %v3165_v0   ;;  %2689 = vset.pattern.permute.xlu1 %v2813_v1  ;;  %v1664_v39 = vrot.slane %v1663_v14, 4 }
 0x28f   : > { %913 = vperm.xlu1 %2689, %v3121_v35  }
 0x290   : > { %v1665_v61 = vadd.f32 %v1664_v39, %v1663_v14  ;;  %v3364_v39 = vld [vmem:[%s3244_s12 + $0x78] sm:$0xff] }
 0x291   : > { %3792 = vst [vmem:[#allocation5_spill] sm:$0xff] %v3364_v39 }
 0x292   : > { %948 = vperm.xlu0 %2705, %v3168_v40   ;;  %v1528_v4 = vpop.permute.xlu0 %1527  ;;  %v1666_v23 = vrot.slane %v1665_v61, 2 }
 0x293   : > { %v1575_v35 = vmul.f32 %v1528_v4, %v3307_v32  ;;  %2690 = vset.pattern.permute.xlu1 %v3781_v8 }
 0x294   : > { %2129 = vperm.xlu1 %2690, %v3117_v5   ;;  %v1604_v5 = vadd.f32 %v1603_v30, %v1602_v19  ;;  %v1658_v19 = vadd.f32 %v1657_v27, %v1656_v54  ;;  %v3346_v30 = vld [vmem:[%s3244_s12 + $0x38] sm:$0xff]  ;;  %v1667_v2 = vadd.f32 %v1666_v23, %v1665_v61 }
 0x295   : > { %v1621_v17 = vsel %vm967_vm2, %v1575_v35, 0.0  ;;  %3791 = vst [vmem:[#allocation4_spill] sm:$0xff] %v3346_v30  ;;  %v1617_v35 = vrot.slane %v1616_v44, 2 }
 0x296   : > { %v1556_v47 = vpop.permute.xlu1 %1555  ;;  %2707 = vset.pattern.permute.xlu0 %v3781_v8  ;;  %v1622_v31 = vrot.slane %v1621_v17, 4  ;;  %v1605_v24 = vrot.slane %v1604_v5, 1  ;;  %v1659_v25 = vrot.slane %v1658_v19, 2 }
 0x297   : > { %v1582_v33 = vmul.f32 %v1556_v47, %v3318_v12 }
 0x298   : > { %2157 = vperm.xlu1 %2690, %v3125_v37   ;;  %v1623_v52 = vadd.f32 %v1622_v31, %v1621_v17  ;;  %v3337_v37 = vadd.f32 %v1645_v38, %v1644_v55  ;;  %v3351_v54 = vadd.f32 %v1605_v24, %v1604_v5  ;;  %v3357_v31 = vld [vmem:[%s3244_s12 + $0x70] sm:$0xff] }
 0x299   : > { %v1670_v10 = vsel %vm967_vm2, %v1582_v33, 0.0  ;;  %v3359_v33 = vadd.f32 %v1654_v62, %v1653_v22  ;;  %v1660_v22 = vadd.f32 %v1659_v25, %v1658_v19 }
 0x29a   : > { %v1671_v49 = vrot.slane %v1670_v10, 4  ;;  %v1532_v43 = vpop.permute.xlu0 %1531  ;;  %v1624_v13 = vrot.slane %v1623_v52, 2  ;;  %v1647_v21 = vrot.slane %v3337_v37, 1 }
 0x29b   : > { %v1576_v56 = vmul.f32 %v1532_v43, %v3333_v41  ;;  %v1661_v61 = vrot.slane %v1660_v22, 1 }
 0x29c   : > { %2692 = vset.pattern.permute.xlu1 %v2813_v1  ;;  %v1672_v63 = vadd.f32 %v1671_v49, %v1670_v10  ;;  %v1618_v10 = vadd.f32 %v1617_v35, %v1616_v44  ;;  %v1612_v35 = vrot.slane %v1611_v3, 1 }
 0x29d   : > { %v1628_v4 = vsel %vm967_vm2, %v1576_v56, 0.0  ;;  %888 = vperm.xlu1 %2692, %v3129_v16   ;;  %v1625_v56 = vadd.f32 %v1624_v13, %v1623_v52  ;;  %v1662_v45 = vadd.f32 %v1661_v61, %v1660_v22 }
 0x29e   : > { %v1629_v11 = vrot.slane %v1628_v4, 4  ;;  %v1560_v55 = vpop.permute.xlu1 %1559  ;;  %v1673_v5 = vrot.slane %v1672_v63, 2 }
 0x29f   : > { %v1583_v14 = vmul.f32 %v1560_v55, %v3341_v58  ;;  %v1536_v17 = vpop.permute.xlu0 %1535  ;;  %v1626_v13 = vrot.slane %v1625_v56, 1 }
 0x2a0   : > { %v1630_v47 = vadd.f32 %v1629_v11, %v1628_v4  ;;  %v1577_v27 = vmul.f32 %v1536_v17, %v3346_v30  ;;  %v1674_v55 = vadd.f32 %v1673_v5, %v1672_v63 }
 0x2a1   : > { %v1677_v38 = vsel %vm967_vm2, %v1583_v14, 0.0  ;;  %2694 = vset.pattern.permute.xlu1 %v3781_v8  ;;  %v1627_v30 = vadd.f32 %v1626_v13, %v1625_v56 }
 0x2a2   : > { %v1631_v28 = vrot.slane %v1630_v47, 2  ;;  %v1678_v49 = vrot.slane %v1677_v38, 4  ;;  %v1635_v43 = vsel %vm967_vm2, %v1577_v27, 0.0  ;;  %v1564_v24 = vpop.permute.xlu1 %1563  ;;  %2133 = vperm.xlu1 %2694, %v3129_v16   ;;  %v1619_v16 = vrot.slane %v1618_v10, 1 }
 0x2a3   : > { %v1636_v26 = vrot.slane %v1635_v43, 4  ;;  %v1584_v57 = vmul.f32 %v1564_v24, %v3357_v31  ;;  %v1568_v62 = vpop.permute.xlu0 %1567  ;;  %v1675_v24 = vrot.slane %v1674_v55, 1 }
 0x2a4   : > { %v1632_v4 = vadd.f32 %v1631_v28, %v1630_v47  ;;  %v1679_v11 = vadd.f32 %v1678_v49, %v1677_v38  ;;  %v1585_v44 = vmul.f32 %v1568_v62, %v3364_v39  ;;  %v1668_v38 = vrot.slane %v1667_v2, 1 }
 0x2a5   : > { %v1637_v14 = vadd.f32 %v1636_v26, %v1635_v43  ;;  %v1684_v17 = vsel %vm967_vm2, %v1584_v57, 0.0  ;;  %v1613_v43 = vadd.f32 %v1612_v35, %v1611_v3  ;;  %v1648_v62 = vadd.f32 %v1647_v21, %v3337_v37 }
 0x2a6   : > { %v1680_v19 = vrot.slane %v1679_v11, 2  ;;  %v1685_v52 = vrot.slane %v1684_v17, 4  ;;  %v1691_v25 = vsel %vm967_vm2, %v1585_v44, 0.0  ;;  %2161 = vperm.xlu1 %2694, %v3133_v42   ;;  %v1633_v28 = vrot.slane %v1632_v4, 1 }
 0x2a7   : > { %v1638_v23 = vrot.slane %v1637_v14, 2  ;;  %v1692_v47 = vrot.slane %v1691_v25, 4  ;;  %v1083_v27 = vpop.permute.xlu1 %1082  ;;  %v1620_v44 = vadd.f32 %v1619_v16, %v1618_v10  ;;  %v1716_v37 = vsel %vm1292_vm4, %v3351_v54, %v3349_v6 }
 0x2a8   : > { %v1681_v63 = vadd.f32 %v1680_v19, %v1679_v11  ;;  %v1686_v5 = vadd.f32 %v1685_v52, %v1684_v17  ;;  %v1087_v49 = vpop.permute.xlu0 %1086  ;;  %v1669_v11 = vadd.f32 %v1668_v38, %v1667_v2  ;;  %v1634_v35 = vadd.f32 %v1633_v28, %v1632_v4 }
 0x2a9   : > { %v1639_v26 = vadd.f32 %v1638_v23, %v1637_v14  ;;  %v1693_v57 = vadd.f32 %v1692_v47, %v1691_v25  ;;  %v1722_v21 = vsel %vm1290_vm3, %v3359_v33, %v1648_v62  ;;  %v1676_v10 = vadd.f32 %v1675_v24, %v1674_v55 }
 0x2aa   : > { %v1682_v8 = vrot.slane %v1681_v63, 1  ;;  %v1687_v42 = vrot.slane %v1686_v5, 2  ;;  %2695 = vset.pattern.permute.xlu1 %v2813_v1  ;;  %v1717_v22 = vsel %vm1294_vm5, %v1613_v43, %v1716_v37  ;;  %v1723_v25 = vsel %vm1292_vm4, %v1662_v45, %v1722_v21 }
 0x2ab   : > { %v1694_v58 = vrot.slane %v1693_v57, 2  ;;  %928 = vperm.xlu1 %2695, %v3141_v46   ;;  %v1640_v39 = vrot.slane %v1639_v26, 1  ;;  %v1718_v2 = vsel %vm1296_vm6, %v1620_v44, %v1717_v22  ;;  %v3793_v4 = vmov 4  }
 0x2ac   : > { %v1688_v17 = vadd.f32 %v1687_v42, %v1686_v5  ;;  %v1091_v19 = vpop.permute.xlu0 %1090  ;;  %v1815_v3 = vpop.permute.xlu1 %1814  ;;  %v1683_v56 = vadd.f32 %v1682_v8, %v1681_v63  ;;  %v1719_v13 = vsel %vm1298_vm7, %v1627_v30, %v1718_v2  ;;  %v1724_v6 = vsel %vm1294_vm5, %v1669_v11, %v1723_v25 }
 0x2ad   : > { %v1695_v14 = vadd.f32 %v1694_v58, %v1693_v57  ;;  %v1641_v52 = vadd.f32 %v1640_v39, %v1639_v26  ;;  %v1720_v33 = vsel %vm1300_vm8, %v1634_v35, %v1719_v13  ;;  %v1725_v23 = vsel %vm1296_vm6, %v1676_v10, %v1724_v6 }
 0x2ae   : > { %v1689_v16 = vrot.slane %v1688_v17, 1  ;;  %v1726_v45 = vsel %vm1298_vm7, %v1683_v56, %v1725_v23  ;;  %v1145_v28 = vmul.f32 %v1083_v27, %v3252_v9  ;;  %v1146_v63 = vmul.f32 %v1087_v49, %v3248_v7 }
 0x2af   : > { %v1696_v61 = vrot.slane %v1695_v14, 1  ;;  %2697 = vset.pattern.permute.xlu1 %v3793_v4  ;;  %v1721_v39 = vsel %vm1302_vm9, %v1641_v52, %v1720_v33  ;;  %v1147_v57 = vmul.f32 %v1091_v19, %v3259_v15  ;;  %v1877_v49 = vmul.f32 %v1815_v3, %v3252_v9 }
 0x2b0   : > { %v1690_v54 = vadd.f32 %v1689_v16, %v1688_v17  ;;  %v1119_v58 = vpop.permute.xlu0 %1118  ;;  %v1819_v55 = vpop.permute.xlu1 %1818  ;;  %2165 = vperm.xlu1 %2697, %v3141_v46   ;;  %2613 = vmatprep.mubr.msk.f32.mxu0 %vm967_vm2, %v1721_v39  ;;  %v1161_v43 = vsel %vm967_vm2, %v1145_v28, 0.0  ;;  %v1168_v24 = vsel %vm967_vm2, %v1146_v63, 0.0 }
 0x2b1   : > { %v1697_v8 = vadd.f32 %v1696_v61, %v1695_v14  ;;  %v1169_v27 = vrot.slane %v1168_v24, 4  ;;  %v1175_v44 = vsel %vm967_vm2, %v1147_v57, 0.0  ;;  %v1878_v42 = vmul.f32 %v1819_v55, %v3248_v7 }
 0x2b2   : > { %v1727_v30 = vsel %vm1300_vm8, %v1690_v54, %v1726_v45  ;;  %v1893_v35 = vsel %vm967_vm2, %v1877_v49, 0.0  ;;  %v1154_v19 = vmul.f32 %v1119_v58, %v3264_v18 }
 0x2b3   : > { %v1728_v47 = vsel %vm1302_vm9, %v1697_v8, %v1727_v30  ;;  %v1170_v17 = vadd.f32 %v1169_v27, %v1168_v24  ;;  %v1894_v21 = vrot.slane %v1893_v35, 4  ;;  %v1900_v9 = vsel %vm967_vm2, %v1878_v42, 0.0 }
 0x2b4   : > { %2698 = vset.pattern.permute.xlu1 %v2813_v1  ;;  %2614 = vmatmul.mubr.msk.f32.vlgmr.msra.gmra.mrb[0].mxu0 %vm967_vm2, %v1728_v47  ;;  %v1224_v14 = vsel %vm967_vm2, %v1154_v19, 0.0  ;;  %v1901_v25 = vrot.slane %v1900_v9, 4 }
 0x2b5   : > { %v1115_v38 = vpop.permute.xlu1 %1114  ;;  %898 = vperm.xlu1 %2698, %v3145_v50   ;;  %v1847_v46 = vpop.permute.xlu0 %1846  ;;  %2617 = vmatpush3.msk.msra.mxu0 %vm1315_vm1, %v3325_v34  ;;  %v1162_v34 = vrot.slane %v1161_v43, 4  ;;  %v1171_v7 = vrot.slane %v1170_v17, 2  ;;  %v1895_v13 = vadd.f32 %v1894_v21, %v1893_v35  ;;  %v1225_v6 = vrot.slane %v1224_v14, 4 }
 0x2b6   : > { %v1153_v3 = vmul.f32 %v1115_v38, %v3274_v53  ;;  %v1885_v61 = vmul.f32 %v1847_v46, %v3274_v53 }
 0x2b7   : > { %v1163_v11 = vadd.f32 %v1162_v34, %v1161_v43  ;;  %v1172_v58 = vadd.f32 %v1171_v7, %v1170_v17  ;;  %v1896_v53 = vrot.slane %v1895_v13, 2  ;;  %v1226_v30 = vadd.f32 %v1225_v6, %v1224_v14 }
 0x2b8   : > { %v1217_v54 = vsel %vm967_vm2, %v1153_v3, 0.0 }
 0x2b9   : > { %2700 = vset.pattern.permute.xlu1 %v3793_v4  ;;  %v1164_v10 = vrot.slane %v1163_v11, 2  ;;  %v1218_v45 = vrot.slane %v1217_v54, 4  ;;  %v1173_v28 = vrot.slane %v1172_v58, 1  ;;  %v1897_v49 = vadd.f32 %v1896_v53, %v1895_v13 }
 0x2ba   : > { %v1823_v5 = vpop.permute.xlu1 %1822  ;;  %2141 = vperm.xlu1 %2700, %v3145_v50   ;;  %v1123_v26 = vpop.permute.xlu0 %1122 }
 0x2bb   : > { %v1155_v22 = vmul.f32 %v1123_v26, %v3294_v36  ;;  %v1879_v16 = vmul.f32 %v1823_v5, %v3259_v15  ;;  %v1165_v33 = vadd.f32 %v1164_v10, %v1163_v11  ;;  %v1902_v15 = vadd.f32 %v1901_v25, %v1900_v9 }
 0x2bc   : > { %v1219_v57 = vadd.f32 %v1218_v45, %v1217_v54  ;;  %v1174_v35 = vadd.f32 %v1173_v28, %v1172_v58 }
 0x2bd   : > { %v1231_v55 = vsel %vm967_vm2, %v1155_v22, 0.0  ;;  %v1907_v39 = vsel %vm967_vm2, %v1879_v16, 0.0  ;;  %v1166_v46 = vrot.slane %v1165_v33, 1 }
 0x2be   : > { %v3407_v62 = vpop.permute.xlu1 %1850  ;;  %2169 = vperm.xlu1 %2700, %v3149_v48   ;;  %v1099_v50 = vpop.permute.xlu0 %1098  ;;  %v1176_v48 = vrot.slane %v1175_v44, 4  ;;  %v1232_v47 = vrot.slane %v1231_v55, 4  ;;  %v1908_v63 = vrot.slane %v1907_v39, 4  ;;  %v1220_v3 = vrot.slane %v1219_v57, 2 }
 0x2bf   : > { %v1149_v24 = vmul.f32 %v1099_v50, %v3290_v29  ;;  %v1886_v11 = vmul.f32 %v3407_v62, %v3264_v18  ;;  %v1167_v17 = vadd.f32 %v1166_v46, %v1165_v33  ;;  %v1898_v62 = vrot.slane %v1897_v49, 1 }
 0x2c0   : > { %v1177_v56 = vadd.f32 %v1176_v48, %v1175_v44  ;;  %v1227_v44 = vrot.slane %v1226_v30, 2  ;;  %v1233_v42 = vadd.f32 %v1232_v47, %v1231_v55  ;;  %v1909_v50 = vadd.f32 %v1908_v63, %v1907_v39 }
 0x2c1   : > { %v1956_v14 = vsel %vm967_vm2, %v1886_v11, 0.0  ;;  %v1221_v6 = vadd.f32 %v1220_v3, %v1219_v57  ;;  %v1899_v55 = vadd.f32 %v1898_v62, %v1897_v49  ;;  %v3471_v3 = vld [vmem:[%s3777_s3] sm:$0xf] }
 0x2c2   : > { %2701 = vset.pattern.permute.xlu1 %v2813_v1  ;;  %v1178_v8 = vrot.slane %v1177_v56, 2  ;;  %v1234_v7 = vrot.slane %v1233_v42, 2  ;;  %v1957_v54 = vrot.slane %v1956_v14, 4  ;;  %2606 = vmatprep.subr.msk.mxu1 %vm1315_vm1, %v3471_v3 }
 0x2c3   : > { %v1095_v37 = vpop.permute.xlu1 %1094  ;;  %938 = vperm.xlu1 %2701, %v3157_v59   ;;  %v1831_v52 = vpop.permute.xlu0 %1830 }
 0x2c4   : > { %v1179_v5 = vadd.f32 %v1178_v8, %v1177_v56  ;;  %v1881_v26 = vmul.f32 %v1831_v52, %v3290_v29  ;;  %v1148_v34 = vmul.f32 %v1095_v37, %v3287_v20  ;;  %v1189_v37 = vsel %vm967_vm2, %v1149_v24, 0.0 }
 0x2c5   : > { %v1190_v56 = vrot.slane %v1189_v37, 4  ;;  %v1235_v8 = vadd.f32 %v1234_v7, %v1233_v42 }
 0x2c6   : > { %v1180_v19 = vrot.slane %v1179_v5, 1  ;;  %v1921_v21 = vsel %vm967_vm2, %v1881_v26, 0.0  ;;  %v1182_v10 = vsel %vm967_vm2, %v1148_v34, 0.0 }
 0x2c7   : > { %2703 = vset.pattern.permute.xlu1 %v3793_v4  ;;  %v1922_v16 = vrot.slane %v1921_v21, 4  ;;  %v1191_v45 = vadd.f32 %v1190_v56, %v1189_v37  ;;  %v1236_v26 = vrot.slane %v1235_v8, 1 }
 0x2c8   : > { %v1827_v2 = vpop.permute.xlu1 %1826  ;;  %2173 = vperm.xlu1 %2703, %v3157_v59   ;;  %v1949_v59 = vsel %vm967_vm2, %v1885_v61, 0.0  ;;  %v1131_v38 = vpop.permute.xlu0 %1130  ;;  %v1183_v61 = vrot.slane %v1182_v10, 4  ;;  %v1181_v58 = vadd.f32 %v1180_v19, %v1179_v5  ;;  %v1958_v5 = vadd.f32 %v1957_v54, %v1956_v14 }
 0x2c9   : > { %v1950_v43 = vrot.slane %v1949_v59, 4  ;;  %v1880_v29 = vmul.f32 %v1827_v2, %v3287_v20  ;;  %v1157_v18 = vmul.f32 %v1131_v38, %v3318_v12  ;;  %v1910_v20 = vrot.slane %v1909_v50, 2 }
 0x2ca   : > { %v1291_v2 = vsel %vm1290_vm3, %v1174_v35, %v1167_v17  ;;  %v1923_v53 = vadd.f32 %v1922_v16, %v1921_v21  ;;  %v1184_v38 = vadd.f32 %v1183_v61, %v1182_v10  ;;  %v1959_v37 = vrot.slane %v1958_v5, 2 }
 0x2cb   : > { %v1951_v48 = vadd.f32 %v1950_v43, %v1949_v59  ;;  %v1914_v52 = vsel %vm967_vm2, %v1880_v29, 0.0  ;;  %v1245_v33 = vsel %vm967_vm2, %v1157_v18, 0.0  ;;  %v1911_v59 = vadd.f32 %v1910_v20, %v1909_v50 }
 0x2cc   : > { %v3428_v23 = vpop.permute.xlu1 %1854  ;;  %2704 = vset.pattern.permute.xlu1 %v2813_v1  ;;  %v1903_v1 = vrot.slane %v1902_v15, 2  ;;  %v1915_v39 = vrot.slane %v1914_v52, 4  ;;  %v1246_v46 = vrot.slane %v1245_v33, 4  ;;  %v1222_v43 = vrot.slane %v1221_v6, 1 }
 0x2cd   : > { %908 = vperm.xlu1 %2704, %v3160_v60   ;;  %v1952_v25 = vrot.slane %v1951_v48, 2  ;;  %v3460_v57 = vsel %vm1292_vm4, %v1181_v58, %v1291_v2  ;;  %v1912_v49 = vrot.slane %v1911_v59, 1  ;;  %v1924_v42 = vrot.slane %v1923_v53, 2 }
 0x2ce   : > { %v1904_v9 = vadd.f32 %v1903_v1, %v1902_v15  ;;  %v1916_v1 = vadd.f32 %v1915_v39, %v1914_v52  ;;  %v1247_v17 = vadd.f32 %v1246_v46, %v1245_v33  ;;  %v3477_v2 = vadd.f32 %v1959_v37, %v1958_v5 }
 0x2cf   : > { %v3453_v47 = vadd.f32 %v1952_v25, %v1951_v48  ;;  %v1223_v48 = vadd.f32 %v1222_v43, %v1221_v6  ;;  %v1913_v10 = vadd.f32 %v1912_v49, %v1911_v59  ;;  %v1925_v62 = vadd.f32 %v1924_v42, %v1923_v53  ;;  %v3489_v59 = vld [vmem:[%s3777_s3 + $0x10] sm:$0xf] }
 0x2d0   : > { %v1905_v13 = vrot.slane %v1904_v9, 1  ;;  %v1917_v21 = vrot.slane %v1916_v1, 2  ;;  %v1248_v14 = vrot.slane %v1247_v17, 2  ;;  %2621 = vmatprep.subr.msk.mxu0 %vm1315_vm1, %v3489_v59 }
 0x2d1   : > { %v1127_v27 = vpop.permute.xlu1 %1126  ;;  %2706 = vset.pattern.permute.xlu1 %v3793_v4  ;;  %v1107_v4 = vpop.permute.xlu0 %1106  ;;  %v1954_v11 = vrot.slane %v3453_v47, 1  ;;  %v1926_v39 = vrot.slane %v1925_v62, 1 }
 0x2d2   : > { %2149 = vperm.xlu1 %2706, %v3160_v60   ;;  %v1228_v60 = vadd.f32 %v1227_v44, %v1226_v30  ;;  %v1156_v28 = vmul.f32 %v1127_v27, %v3299_v51  ;;  %v1906_v63 = vadd.f32 %v1905_v13, %v1904_v9  ;;  %v1151_v24 = vmul.f32 %v1107_v4, %v3333_v41 }
 0x2d3   : > { %v1192_v44 = vrot.slane %v1191_v45, 2  ;;  %v1185_v27 = vrot.slane %v1184_v38, 2  ;;  %v1918_v6 = vadd.f32 %v1917_v21, %v1916_v1  ;;  %v3501_v42 = vadd.f32 %v1926_v39, %v1925_v62 }
 0x2d4   : > { %v1238_v35 = vsel %vm967_vm2, %v1156_v28, 0.0  ;;  %v2022_v19 = vsel %vm1290_vm3, %v1906_v63, %v1899_v55 }
 0x2d5   : > { %v1839_v15 = vpop.permute.xlu0 %1838  ;;  %v1193_v18 = vadd.f32 %v1192_v44, %v1191_v45  ;;  %v1186_v7 = vadd.f32 %v1185_v27, %v1184_v38  ;;  %v2023_v55 = vsel %vm1292_vm4, %v1913_v10, %v2022_v19  ;;  %v3794_v38 = vld [vmem:[#allocation5_spill] sm:$0xff]  ;;  %v1919_v43 = vrot.slane %v1918_v6, 1 }
 0x2d6   : > { %v3446_v22 = vpop.permute.xlu1 %1858  ;;  %2177 = vperm.xlu1 %2706, %v3165_v0   ;;  %v1229_v0 = vrot.slane %v1228_v60, 1  ;;  %v1883_v61 = vmul.f32 %v1839_v15, %v3333_v41  ;;  %v1249_v15 = vadd.f32 %v1248_v14, %v1247_v17 }
 0x2d7   : > { %v1187_v41 = vrot.slane %v1186_v7, 1  ;;  %v1888_v5 = vmul.f32 %v3446_v22, %v3299_v51  ;;  %v1920_v37 = vadd.f32 %v1919_v43, %v1918_v6 }
 0x2d8   : > { %v1230_v34 = vadd.f32 %v1229_v0, %v1228_v60  ;;  %v1239_v60 = vrot.slane %v1238_v35, 4 }
 0x2d9   : > { %v1139_v50 = vpop.permute.xlu0 %1138  ;;  %v1188_v27 = vadd.f32 %v1187_v41, %v1186_v7  ;;  %v2024_v6 = vsel %vm1294_vm5, %v1920_v37, %v2023_v55  ;;  %v3796_v55 = vld [vmem:[#allocation4_spill] sm:$0xff] }
 0x2da   : > { %2181 = vperm.xlu1 %2706, %v3168_v40   ;;  %v1887_v40 = vmul.f32 %v3428_v23, %v3294_v36  ;;  %v1203_v36 = vsel %vm967_vm2, %v1151_v24, 0.0  ;;  %v1237_v23 = vadd.f32 %v1236_v26, %v1235_v8  ;;  %v1159_v56 = vmul.f32 %v1139_v50, %v3357_v31  ;;  %v3795_v26 = vld [vmem:[#allocation3_spill] sm:$0xff] }
 0x2db   : > { %v1103_v30 = vpop.permute.xlu1 %1102  ;;  %v1204_v20 = vrot.slane %v1203_v36, 4  ;;  %v1304_v52 = vsel %vm1290_vm3, %v1230_v34, %v1223_v48  ;;  %v1194_v8 = vrot.slane %v1193_v18, 1  ;;  %v1240_v0 = vadd.f32 %v1239_v60, %v1238_v35 }
 0x2dc   : > { %v1963_v4 = vsel %vm967_vm2, %v1887_v40, 0.0  ;;  %v1150_v9 = vmul.f32 %v1103_v30, %v3307_v32  ;;  %v3481_v13 = vsel %vm1292_vm4, %v1237_v23, %v1304_v52  ;;  %v1259_v53 = vsel %vm967_vm2, %v1159_v56, 0.0 }
 0x2dd   : > { %v1964_v25 = vrot.slane %v1963_v4, 4  ;;  %v1143_v54 = vpop.permute.xlu0 %1142  ;;  %v1205_v45 = vadd.f32 %v1204_v20, %v1203_v36  ;;  %v1195_v40 = vadd.f32 %v1194_v8, %v1193_v18  ;;  %v1961_v34 = vrot.slane %v3477_v2, 1 }
 0x2de   : > { %v1196_v33 = vsel %vm967_vm2, %v1150_v9, 0.0  ;;  %v1160_v46 = vmul.f32 %v1143_v54, %v3794_v38  ;;  %v1241_v49 = vrot.slane %v1240_v0, 2  ;;  %v1260_v44 = vrot.slane %v1259_v53, 4 }
 0x2df   : > { %v1965_v30 = vadd.f32 %v1964_v25, %v1963_v4  ;;  %v1197_v28 = vrot.slane %v1196_v33, 4  ;;  %v1206_v17 = vrot.slane %v1205_v45, 2  ;;  %v1250_v48 = vrot.slane %v1249_v15, 1 }
 0x2e0   : > { %v1835_v29 = vpop.permute.xlu1 %1834  ;;  %v1266_v50 = vsel %vm967_vm2, %v1160_v46, 0.0  ;;  %v1970_v23 = vsel %vm967_vm2, %v1888_v5, 0.0  ;;  %v1242_v4 = vadd.f32 %v1241_v49, %v1240_v0  ;;  %v1261_v9 = vadd.f32 %v1260_v44, %v1259_v53 }
 0x2e1   : > { %v1882_v58 = vmul.f32 %v1835_v29, %v3307_v32  ;;  %v1935_v32 = vsel %vm967_vm2, %v1883_v61, 0.0  ;;  %v1198_v29 = vadd.f32 %v1197_v28, %v1196_v33  ;;  %v3504_v19 = vpop.permute.xlu0 %878  ;;  %v1966_v36 = vrot.slane %v1965_v30, 2 }
 0x2e2   : > { %v1936_v35 = vrot.slane %v1935_v32, 4  ;;  %v1207_v62 = vadd.f32 %v1206_v17, %v1205_v45  ;;  %v1267_v7 = vrot.slane %v1266_v50, 4  ;;  %v1295_v25 = vsel %vm1294_vm5, %v1188_v27, %v3460_v57 }
 0x2e3   : > { %v1928_v24 = vsel %vm967_vm2, %v1882_v58, 0.0  ;;  %v1199_v20 = vrot.slane %v1198_v29, 2  ;;  %v1251_v61 = vadd.f32 %v1250_v48, %v1249_v15  ;;  %v3513_v54 = vadd.f32 %v1966_v36, %v1965_v30 }
 0x2e4   : > { %v1863_v16 = vpop.permute.xlu1 %1862  ;;  %v1929_v51 = vrot.slane %v1928_v24, 4  ;;  %v1937_v60 = vadd.f32 %v1936_v35, %v1935_v32  ;;  %v1971_v33 = vrot.slane %v1970_v23, 4  ;;  %v1243_v58 = vrot.slane %v1242_v4, 1 }
 0x2e5   : > { %v1889_v10 = vmul.f32 %v1863_v16, %v3318_v12  ;;  %v1262_v12 = vrot.slane %v1261_v9, 2  ;;  %v3515_v16 = vpop.permute.xlu0 %883  ;;  %v1208_v41 = vrot.slane %v1207_v62, 1  ;;  %v1268_v53 = vadd.f32 %v1267_v7, %v1266_v50 }
 0x2e6   : > { %v1930_v56 = vadd.f32 %v1929_v51, %v1928_v24  ;;  %v1938_v45 = vrot.slane %v1937_v60, 2  ;;  %v1200_v57 = vadd.f32 %v1199_v20, %v1198_v29  ;;  %v1968_v28 = vrot.slane %v3513_v54, 1 }
 0x2e7   : > { %v1977_v8 = vsel %vm967_vm2, %v1889_v10, 0.0  ;;  %v1297_v5 = vsel %vm1296_vm6, %v1195_v40, %v1295_v25  ;;  %v1244_v24 = vadd.f32 %v1243_v58, %v1242_v4  ;;  %v1269_v44 = vrot.slane %v1268_v53, 2 }
 0x2e8   : > { %v1931_v15 = vrot.slane %v1930_v56, 2  ;;  %v1978_v43 = vrot.slane %v1977_v8, 4  ;;  %v1209_v50 = vadd.f32 %v1208_v41, %v1207_v62  ;;  %v1939_v29 = vadd.f32 %v1938_v45, %v1937_v60 }
 0x2e9   : > { %v1135_v63 = vpop.permute.xlu1 %1134  ;;  %v1201_v51 = vrot.slane %v1200_v57, 1  ;;  %v3523_v48 = vpop.permute.xlu0 %918  ;;  %v1306_v4 = vsel %vm1294_vm5, %v1244_v24, %v3481_v13  ;;  %v1270_v62 = vadd.f32 %v1269_v44, %v1268_v53 }
 0x2ea   : > { %v1158_v1 = vmul.f32 %v1135_v63, %v3795_v26  ;;  %v1972_v63 = vadd.f32 %v1971_v33, %v1970_v23  ;;  %v1979_v23 = vadd.f32 %v1978_v43, %v1977_v8  ;;  %v1307_v41 = vsel %vm1296_vm6, %v1251_v61, %v1306_v4 }
 0x2eb   : > { %v1271_v45 = vrot.slane %v1270_v62, 1 }
 0x2ec   : > { %v1252_v22 = vsel %vm967_vm2, %v1158_v1, 0.0  ;;  %v1973_v36 = vrot.slane %v1972_v63, 2 }
 0x2ed   : > { %v1253_v18 = vrot.slane %v1252_v22, 4  ;;  %v3532_v13 = vpop.permute.xlu0 %2153 }
 0x2ee   : > { %v1867_v21 = vpop.permute.xlu1 %1866  ;;  %v1974_v58 = vadd.f32 %v1973_v36, %v1972_v63 }
 0x2ef   : > { %v1890_v14 = vmul.f32 %v1867_v21, %v3795_v26  ;;  %v1254_v52 = vadd.f32 %v1253_v18, %v1252_v22  ;;  %v1263_v26 = vadd.f32 %v1262_v12, %v1261_v9  ;;  %v1932_v22 = vadd.f32 %v1931_v15, %v1930_v56 }
 0x2f0   : > { %v2025_v21 = vsel %vm1296_vm6, %v3501_v42, %v2024_v6  ;;  %v1940_v56 = vrot.slane %v1939_v29, 1  ;;  %v1980_v12 = vrot.slane %v1979_v23, 2 }
 0x2f1   : > { %v1255_v39 = vrot.slane %v1254_v52, 2  ;;  %v1984_v32 = vsel %vm967_vm2, %v1890_v14, 0.0  ;;  %v1264_v9 = vrot.slane %v1263_v26, 1  ;;  %v1933_v25 = vrot.slane %v1932_v22, 1 }
 0x2f2   : > { %v1985_v1 = vrot.slane %v1984_v32, 4  ;;  %v1941_v63 = vadd.f32 %v1940_v56, %v1939_v29  ;;  %v1981_v43 = vadd.f32 %v1980_v12, %v1979_v23 }
 0x2f3   : > { %v1111_v0 = vpop.permute.xlu1 %1110  ;;  %v1256_v46 = vadd.f32 %v1255_v39, %v1254_v52  ;;  %v1202_v52 = vadd.f32 %v1201_v51, %v1200_v57  ;;  %v1265_v8 = vadd.f32 %v1264_v9, %v1263_v26 }
 0x2f4   : > { %v1152_v30 = vmul.f32 %v1111_v0, %v3796_v55  ;;  %v1986_v10 = vadd.f32 %v1985_v1, %v1984_v32  ;;  %v1982_v23 = vrot.slane %v1981_v43, 1 }
 0x2f5   : > { %v1257_v27 = vrot.slane %v1256_v46, 1 }
 0x2f6   : > { %v1210_v49 = vsel %vm967_vm2, %v1152_v30, 0.0  ;;  %v1987_v39 = vrot.slane %v1986_v10, 2  ;;  %v1299_v30 = vsel %vm1298_vm7, %v1202_v52, %v1297_v5  ;;  %v1983_v56 = vadd.f32 %v1982_v23, %v1981_v43 }
 0x2f7   : > { %v1211_v17 = vrot.slane %v1210_v49, 4  ;;  %v1258_v60 = vadd.f32 %v1257_v27, %v1256_v46  ;;  %v1934_v46 = vadd.f32 %v1933_v25, %v1932_v22  ;;  %v1272_v27 = vadd.f32 %v1271_v45, %v1270_v62 }
 0x2f8   : > { %v1843_v35 = vpop.permute.xlu1 %1842  ;;  %v1988_v1 = vadd.f32 %v1987_v39, %v1986_v10  ;;  %v1301_v51 = vsel %vm1300_vm8, %v1209_v50, %v1299_v30  ;;  %v1975_v22 = vrot.slane %v1974_v58, 1  ;;  %v1962_v50 = vadd.f32 %v1961_v34, %v3477_v2 }
 0x2f9   : > { %v1884_v37 = vmul.f32 %v1843_v35, %v3796_v55  ;;  %v1212_v40 = vadd.f32 %v1211_v17, %v1210_v49  ;;  %v1308_v57 = vsel %vm1298_vm7, %v1258_v60, %v1307_v41  ;;  %v2026_v36 = vsel %vm1298_vm7, %v1934_v46, %v2025_v21  ;;  %v3797_v41 = vld [vmem:[#allocation2_spill] sm:$0xff] }
 0x2fa   : > { %v1309_v44 = vsel %vm1300_vm8, %v1265_v8, %v1308_v57  ;;  %v1989_v10 = vrot.slane %v1988_v1, 1  ;;  %v1969_v62 = vadd.f32 %v1968_v28, %v3513_v54  ;;  %v2027_v60 = vsel %vm1300_vm8, %v1941_v63, %v2026_v36 }
 0x2fb   : > { %v1942_v18 = vsel %vm967_vm2, %v1884_v37, 0.0  ;;  %v1213_v7 = vrot.slane %v1212_v40, 2  ;;  %v1310_v9 = vsel %vm1302_vm9, %v1272_v27, %v1309_v44  ;;  %v3599_v44 = vld [vmem:[%s3244_s12 + $0x50] sm:$0xff] }
 0x2fc   : > { %v1943_v14 = vrot.slane %v1942_v18, 4  ;;  %v1871_v20 = vpop.permute.xlu1 %1870  ;;  %v1990_v28 = vadd.f32 %v1989_v10, %v1988_v1 }
 0x2fd   : > { %v1891_v33 = vmul.f32 %v1871_v20, %v3357_v31  ;;  %v1214_v42 = vadd.f32 %v1213_v7, %v1212_v40  ;;  %v1955_v7 = vadd.f32 %v1954_v11, %v3453_v47 }
 0x2fe   : > { %v1944_v6 = vadd.f32 %v1943_v14, %v1942_v18  ;;  %v1976_v14 = vadd.f32 %v1975_v22, %v1974_v58  ;;  %v2777_v22 = vld [vmem:[%s3244_s12 + $0x40] sm:$0xff] }
 0x2ff   : > { %v1991_v0 = vsel %vm967_vm2, %v1891_v33, 0.0  ;;  %v1215_v55 = vrot.slane %v1214_v42, 1  ;;  %v2029_v54 = vsel %vm1290_vm3, %v1962_v50, %v1955_v7 }
 0x300   : > { %v1945_v53 = vrot.slane %v1944_v6, 2  ;;  %v1992_v32 = vrot.slane %v1991_v0, 4  ;;  %v1875_v15 = vpop.permute.xlu1 %1874  ;;  %v2030_v25 = vsel %vm1292_vm4, %v1969_v62, %v2029_v54  ;;  %v3615_v54 = vld [vmem:[%s3244_s12 + $0x60] sm:$0xff] }
 0x301   : > { %v1892_v31 = vmul.f32 %v1875_v15, %v3794_v38  ;;  %v1216_v61 = vadd.f32 %v1215_v55, %v1214_v42  ;;  %v924_v38 = vpop.permute.xlu0 %923  ;;  %v2031_v11 = vsel %vm1294_vm5, %v1976_v14, %v2030_v25  ;;  %v2772_v42 = vld [vmem:[%s3244_s12 + $0x8] sm:$0xff] }
 0x302   : > { %v1946_v24 = vadd.f32 %v1945_v53, %v1944_v6  ;;  %v1993_v26 = vadd.f32 %v1992_v32, %v1991_v0  ;;  %v2032_v58 = vsel %vm1296_vm6, %v1983_v56, %v2031_v11  ;;  %v952_v6 = vmul.f32 %v2772_v42, %v3504_v19  ;;  %v2773_v0 = vld [vmem:[%s3244_s12] sm:$0xff]  ;;  %v3577_v53 = vld [vmem:[%s3244_s12 + $0x10] sm:$0xff] }
 0x303   : > { %v1998_v49 = vsel %vm967_vm2, %v1892_v31, 0.0  ;;  %v1303_v5 = vsel %vm1302_vm9, %v1216_v61, %v1301_v51  ;;  %v2033_v39 = vsel %vm1298_vm7, %v1990_v28, %v2032_v58  ;;  %v951_v45 = vmul.f32 %v2773_v0, %v3797_v41 }
 0x304   : > { %v1947_v17 = vrot.slane %v1946_v24, 1  ;;  %v1994_v35 = vrot.slane %v1993_v26, 2  ;;  %v1999_v37 = vrot.slane %v1998_v49, 4  ;;  %2603 = vmatprep.mubr.msk.f32.mxu1 %vm967_vm2, %v1303_v5  ;;  %v953_v32 = vmul.f32 %v3577_v53, %v3515_v16 }
 0x305   : > { %v3543_v29 = vpop.permute.xlu1 %2121  ;;  %2604 = vmatmul.mubr.msk.f32.vlgmr.msra.gmra.mrb[0].mxu1 %vm967_vm2, %v1310_v9  ;;  %v975_v19 = vsel %vm967_vm2, %v952_v6, 0.0  ;;  %v968_v55 = vsel %vm967_vm2, %v951_v45, 0.0 }
 0x306   : > { %v1948_v40 = vadd.f32 %v1947_v17, %v1946_v24  ;;  %v1995_v4 = vadd.f32 %v1994_v35, %v1993_v26  ;;  %v2000_v18 = vadd.f32 %v1999_v37, %v1998_v49  ;;  %2607 = vmatpush3.msk.msra.mxu1 %vm1315_vm1, %v3471_v3  ;;  %v894_v3 = vpop.permute.xlu0 %893  ;;  %v982_v16 = vsel %vm967_vm2, %v953_v32, 0.0  ;;  %v3592_v24 = vld [vmem:[%s3244_s12 + $0x48] sm:$0xff] }
 0x307   : > { %v976_v30 = vrot.slane %v975_v19, 4  ;;  %v969_v63 = vrot.slane %v968_v55, 4  ;;  %v983_v43 = vrot.slane %v982_v16, 4  ;;  %v960_v26 = vmul.f32 %v3592_v24, %v3523_v48 }
 0x308   : > { %v1996_v21 = vrot.slane %v1995_v4, 1  ;;  %v2001_v2 = vrot.slane %v2000_v18, 2  ;;  %v2028_v20 = vsel %vm1302_vm9, %v1948_v40, %v2027_v60  ;;  %v2192_v37 = vmul.f32 %v2777_v22, %v3532_v13  ;;  %v2778_v40 = vld [vmem:[%s3244_s12 + $0x20] sm:$0xff] }
 0x309   : > { %v3561_v34 = vpop.permute.xlu1 %2125  ;;  %2618 = vmatprep.mubr.msk.f32.mxu0 %vm967_vm2, %v2028_v20  ;;  %v977_v61 = vadd.f32 %v976_v30, %v975_v19  ;;  %v970_v27 = vadd.f32 %v969_v63, %v968_v55  ;;  %v984_v17 = vadd.f32 %v983_v43, %v982_v16  ;;  %v1031_v35 = vsel %vm967_vm2, %v960_v26, 0.0 }
 0x30a   : > { %v2002_v52 = vadd.f32 %v2001_v2, %v2000_v18  ;;  %v1997_v47 = vadd.f32 %v1996_v21, %v1995_v4  ;;  %v2138_v57 = vpop.permute.xlu0 %2137  ;;  %v1032_v36 = vrot.slane %v1031_v35, 4  ;;  %v955_v4 = vmul.f32 %v2778_v40, %v894_v3  ;;  %v2780_v3 = vld [vmem:[%s3244_s12 + $0x30] sm:$0xff] }
 0x30b   : > { %v978_v48 = vrot.slane %v977_v61, 2  ;;  %v971_v9 = vrot.slane %v970_v27, 2  ;;  %v2188_v50 = vmul.f32 %v2778_v40, %v2138_v57  ;;  %v2256_v10 = vsel %vm967_vm2, %v2192_v37, 0.0 }
 0x30c   : > { %v2003_v33 = vrot.slane %v2002_v52, 1  ;;  %v2034_v15 = vsel %vm1300_vm8, %v1997_v47, %v2033_v39  ;;  %v1033_v60 = vadd.f32 %v1032_v36, %v1031_v35  ;;  %v996_v13 = vsel %vm967_vm2, %v955_v4, 0.0 }
 0x30d   : > { %v979_v21 = vadd.f32 %v978_v48, %v977_v61  ;;  %v972_v7 = vadd.f32 %v971_v9, %v970_v27  ;;  %v2228_v2 = vsel %vm967_vm2, %v2188_v50, 0.0  ;;  %v2257_v56 = vrot.slane %v2256_v10, 4  ;;  %v3629_v48 = vld [vmem:[%s3244_s12 + $0x70] sm:$0xff] }
 0x30e   : > { %v3569_v12 = vpop.permute.xlu1 %913  ;;  %v2004_v8 = vadd.f32 %v2003_v33, %v2002_v52  ;;  %v934_v1 = vpop.permute.xlu0 %933  ;;  %v2184_v25 = vmul.f32 %v2773_v0, %v3543_v29  ;;  %v997_v11 = vrot.slane %v996_v13, 4  ;;  %v2185_v33 = vmul.f32 %v2772_v42, %v3561_v34 }
 0x30f   : > { %v963_v28 = vmul.f32 %v3615_v54, %v934_v1  ;;  %v980_v6 = vrot.slane %v979_v21, 1  ;;  %v2229_v39 = vrot.slane %v2228_v2, 4  ;;  %v973_v41 = vrot.slane %v972_v7, 1 }
 0x310   : > { %v2035_v46 = vsel %vm1302_vm9, %v2004_v8, %v2034_v15  ;;  %v1034_v8 = vrot.slane %v1033_v60, 2  ;;  %v2258_v32 = vadd.f32 %v2257_v56, %v2256_v10  ;;  %v998_v29 = vadd.f32 %v997_v11, %v996_v13 }
 0x311   : > { %2619 = vmatmul.mubr.msk.f32.vlgmr.msra.gmra.mrb[0].mxu0 %vm967_vm2, %v2035_v46  ;;  %v1052_v15 = vsel %vm967_vm2, %v963_v28, 0.0  ;;  %v2200_v46 = vsel %vm967_vm2, %v2184_v25, 0.0  ;;  %v2207_v0 = vsel %vm967_vm2, %v2185_v33, 0.0  ;;  %v981_v34 = vadd.f32 %v980_v6, %v979_v21  ;;  %v3648_v25 = vld [vmem:[%s3244_s12 + $0x78] sm:$0xff] }
 0x312   : > { %2622 = vmatpush3.msk.msra.mxu0 %vm1315_vm1, %v3489_v59  ;;  %v961_v59 = vmul.f32 %v3599_v44, %v924_v38  ;;  %v904_v5 = vpop.permute.xlu0 %903  ;;  %v985_v38 = vrot.slane %v984_v17, 2  ;;  %v1035_v42 = vadd.f32 %v1034_v8, %v1033_v60  ;;  %v2230_v16 = vadd.f32 %v2229_v39, %v2228_v2  ;;  %v2783_v8 = vld [vmem:[%s3244_s12 + $0x18] sm:$0xff] }
 0x313   : > { %v3585_v31 = vpop.permute.xlu1 %2129  ;;  %v957_v52 = vmul.f32 %v2780_v3, %v904_v5  ;;  %v1053_v43 = vrot.slane %v1052_v15, 4  ;;  %v2201_v1 = vrot.slane %v2200_v46, 4  ;;  %v959_v61 = vmul.f32 %v2777_v22, %v3569_v12 }
 0x314   : > { %v1038_v23 = vsel %vm967_vm2, %v961_v59, 0.0  ;;  %v986_v14 = vadd.f32 %v985_v38, %v984_v17  ;;  %v974_v59 = vadd.f32 %v973_v41, %v972_v7  ;;  %v2259_v17 = vrot.slane %v2258_v32, 2 }
 0x315   : > { %v1039_v18 = vrot.slane %v1038_v23, 4  ;;  %v1010_v57 = vsel %vm967_vm2, %v957_v52, 0.0  ;;  %v2208_v35 = vrot.slane %v2207_v0, 4  ;;  %v999_v5 = vrot.slane %v998_v29, 2 }
 0x316   : > { %v2146_v20 = vpop.permute.xlu0 %2145  ;;  %v987_v45 = vrot.slane %v986_v14, 1  ;;  %v1011_v26 = vrot.slane %v1010_v57, 4  ;;  %v1036_v40 = vrot.slane %v1035_v42, 1  ;;  %v2231_v4 = vrot.slane %v2230_v16, 2 }
 0x317   : > { %v3596_v49 = vpop.permute.xlu1 %2157  ;;  %v1040_v47 = vadd.f32 %v1039_v18, %v1038_v23  ;;  %v2190_v30 = vmul.f32 %v2780_v3, %v2146_v20  ;;  %v1410_v23 = vsel %vm1290_vm3, %v981_v34, %v974_v59  ;;  %v1054_v38 = vadd.f32 %v1053_v43, %v1052_v15 }
 0x318   : > { %v988_v27 = vadd.f32 %v987_v45, %v986_v14  ;;  %v1012_v50 = vadd.f32 %v1011_v26, %v1010_v57  ;;  %v2202_v12 = vadd.f32 %v2201_v1, %v2200_v46  ;;  %v1024_v22 = vsel %vm967_vm2, %v959_v61, 0.0  ;;  %v3655_v45 = vld [vmem:[%s3244_s12 + $0x58] sm:$0xff] }
 0x319   : > { %v1041_v19 = vrot.slane %v1040_v47, 2  ;;  %v2242_v9 = vsel %vm967_vm2, %v2190_v30, 0.0  ;;  %v3640_v60 = vadd.f32 %v2259_v17, %v2258_v32  ;;  %v2209_v13 = vadd.f32 %v2208_v35, %v2207_v0  ;;  %v2785_v35 = vld [vmem:[%s3244_s12 + $0x28] sm:$0xff] }
 0x31a   : > { %v944_v55 = vpop.permute.xlu0 %943  ;;  %v3638_v21 = vsel %vm1292_vm4, %v988_v27, %v1410_v23  ;;  %v2186_v7 = vmul.f32 %v3577_v53, %v3585_v31  ;;  %v1000_v2 = vadd.f32 %v999_v5, %v998_v29  ;;  %v2243_v20 = vrot.slane %v2242_v9, 4 }
 0x31b   : > { %v1042_v37 = vadd.f32 %v1041_v19, %v1040_v47  ;;  %v965_v36 = vmul.f32 %v3629_v48, %v944_v55  ;;  %v3645_v28 = vadd.f32 %v1036_v40, %v1035_v42  ;;  %v2232_v3 = vadd.f32 %v2231_v4, %v2230_v16 }
 0x31c   : > { %v3603_v51 = vpop.permute.xlu1 %888  ;;  %v1025_v52 = vrot.slane %v1024_v22, 4  ;;  %v1055_v11 = vrot.slane %v1054_v38, 2  ;;  %v1013_v33 = vrot.slane %v1012_v50, 2  ;;  %v2203_v6 = vrot.slane %v2202_v12, 2 }
 0x31d   : > { %v1043_v14 = vrot.slane %v1042_v37, 1  ;;  %v1066_v56 = vsel %vm967_vm2, %v965_v36, 0.0  ;;  %v954_v53 = vmul.f32 %v2783_v8, %v3603_v51  ;;  %v2210_v31 = vrot.slane %v2209_v13, 2 }
 0x31e   : > { %v949_v10 = vpop.permute.xlu0 %948  ;;  %v1067_v39 = vrot.slane %v1066_v56, 4  ;;  %v2214_v41 = vsel %vm967_vm2, %v2186_v7, 0.0  ;;  %v2261_v57 = vrot.slane %v3640_v60, 1  ;;  %v1001_v19 = vrot.slane %v1000_v2, 1 }
 0x31f   : > { %v966_v47 = vmul.f32 %v3648_v25, %v949_v10  ;;  %v3659_v46 = vadd.f32 %v1043_v14, %v1042_v37  ;;  %v2244_v29 = vadd.f32 %v2243_v20, %v2242_v9  ;;  %v2233_v0 = vrot.slane %v2232_v3, 1 }
 0x320   : > { %v1026_v55 = vadd.f32 %v1025_v52, %v1024_v22  ;;  %v1056_v42 = vadd.f32 %v1055_v11, %v1054_v38  ;;  %v1014_v16 = vadd.f32 %v1013_v33, %v1012_v50  ;;  %v2215_v30 = vrot.slane %v2214_v41, 4 }
 0x321   : > { %v3610_v62 = vpop.permute.xlu1 %2133  ;;  %v1073_v51 = vsel %vm967_vm2, %v966_v47, 0.0  ;;  %v989_v43 = vsel %vm967_vm2, %v954_v53, 0.0  ;;  %v2211_v26 = vadd.f32 %v2210_v31, %v2209_v13  ;;  %v1068_v1 = vadd.f32 %v1067_v39, %v1066_v56 }
 0x322   : > { %v2187_v34 = vmul.f32 %v2783_v8, %v3610_v62  ;;  %v3665_v59 = vadd.f32 %v1001_v19, %v1000_v2  ;;  %v2245_v27 = vrot.slane %v2244_v29, 2  ;;  %v1074_v17 = vrot.slane %v1073_v51, 4 }
 0x323   : > { %v1027_v36 = vrot.slane %v1026_v55, 2  ;;  %v2193_v62 = vmul.f32 %v3592_v24, %v3596_v49  ;;  %v990_v23 = vrot.slane %v989_v43, 4  ;;  %v1057_v4 = vrot.slane %v1056_v42, 1 }
 0x324   : > { %v2221_v40 = vsel %vm967_vm2, %v2187_v34, 0.0  ;;  %v1015_v9 = vrot.slane %v1014_v16, 1  ;;  %v2216_v38 = vadd.f32 %v2215_v30, %v2214_v41  ;;  %v2212_v10 = vrot.slane %v2211_v26, 1 }
 0x325   : > { %v3621_v58 = vpop.permute.xlu1 %2161  ;;  %v1069_v13 = vrot.slane %v1068_v1, 2  ;;  %v1075_v7 = vadd.f32 %v1074_v17, %v1073_v51  ;;  %v2222_v14 = vrot.slane %v2221_v40, 4  ;;  %v3674_v52 = vadd.f32 %v2245_v27, %v2244_v29 }
 0x326   : > { %v1028_v24 = vadd.f32 %v1027_v36, %v1026_v55  ;;  %v2263_v49 = vsel %vm967_vm2, %v2193_v62, 0.0  ;;  %v991_v47 = vadd.f32 %v990_v23, %v989_v43  ;;  %v3677_v11 = vadd.f32 %v1057_v4, %v1056_v42  ;;  %v2786_v43 = vld [vmem:[%s3244_s12 + $0x68] sm:$0xff] }
 0x327   : > { %v3679_v33 = vadd.f32 %v1015_v9, %v1014_v16  ;;  %v2213_v53 = vadd.f32 %v2212_v10, %v2211_v26  ;;  %v1070_v31 = vadd.f32 %v1069_v13, %v1068_v1  ;;  %v1076_v41 = vrot.slane %v1075_v7, 2 }
 0x328   : > { %v2247_v29 = vrot.slane %v3674_v52, 1  ;;  %v992_v55 = vrot.slane %v991_v47, 2  ;;  %v2194_v51 = vmul.f32 %v3599_v44, %v3621_v58 }
 0x329   : > { %v1071_v1 = vrot.slane %v1070_v31, 1  ;;  %v1077_v17 = vadd.f32 %v1076_v41, %v1075_v7 }
 0x32a   : > { %v929_v63 = vpop.permute.xlu1 %928  ;;  %v993_v44 = vadd.f32 %v992_v55, %v991_v47  ;;  %v2270_v58 = vsel %vm967_vm2, %v2194_v51, 0.0 }
 0x32b   : > { %v962_v32 = vmul.f32 %v3655_v45, %v929_v63  ;;  %v2204_v63 = vadd.f32 %v2203_v6, %v2202_v12  ;;  %v3671_v12 = vadd.f32 %v2233_v0, %v2232_v3  ;;  %v2217_v3 = vrot.slane %v2216_v38, 2 }
 0x32c   : > { %v1029_v0 = vrot.slane %v1028_v24, 1  ;;  %v3693_v10 = vadd.f32 %v1071_v1, %v1070_v31 }
 0x32d   : > { %v1045_v61 = vsel %vm967_vm2, %v962_v32, 0.0  ;;  %v2205_v22 = vrot.slane %v2204_v63, 1  ;;  %v2264_v32 = vrot.slane %v2263_v49, 4  ;;  %v2218_v42 = vadd.f32 %v2217_v3, %v2216_v38 }
 0x32e   : > { %v1046_v50 = vrot.slane %v1045_v61, 4  ;;  %v1030_v36 = vadd.f32 %v1029_v0, %v1028_v24 }
 0x32f   : > { %v3635_v18 = vpop.permute.xlu1 %2165  ;;  %v2206_v8 = vadd.f32 %v2205_v22, %v2204_v63  ;;  %v2219_v23 = vrot.slane %v2218_v42, 1 }
 0x330   : > { %v1047_v6 = vadd.f32 %v1046_v50, %v1045_v61  ;;  %v2195_v30 = vmul.f32 %v3655_v45, %v3635_v18  ;;  %v1417_v47 = vsel %vm1290_vm3, %v3645_v28, %v1030_v36 }
 0x331   : > { %v2329_v26 = vsel %vm1290_vm3, %v2213_v53, %v2206_v8  ;;  %v2220_v3 = vadd.f32 %v2219_v23, %v2218_v42 }
 0x332   : > { %v1048_v16 = vrot.slane %v1047_v6, 2  ;;  %v2277_v18 = vsel %vm967_vm2, %v2195_v30, 0.0 }
 0x333   : > { %v2278_v24 = vrot.slane %v2277_v18, 4 }
 0x334   : > { %v899_v15 = vpop.permute.xlu1 %898 }
 0x335   : > { %v956_v37 = vmul.f32 %v2785_v35, %v899_v15  ;;  %v2223_v15 = vadd.f32 %v2222_v14, %v2221_v40  ;;  %v1049_v40 = vadd.f32 %v1048_v16, %v1047_v6  ;;  %v2271_v14 = vrot.slane %v2270_v58, 4 }
 0x336   : > { %v2279_v28 = vadd.f32 %v2278_v24, %v2277_v18 }
 0x337   : > { %v1003_v2 = vsel %vm967_vm2, %v956_v37, 0.0  ;;  %v2224_v37 = vrot.slane %v2223_v15, 2 }
 0x338   : > { %v1004_v39 = vrot.slane %v1003_v2, 4  ;;  %v2280_v18 = vrot.slane %v2279_v28, 2 }
 0x339   : > { %v2142_v5 = vpop.permute.xlu1 %2141  ;;  %v2225_v7 = vadd.f32 %v2224_v37, %v2223_v15  ;;  %v2272_v15 = vadd.f32 %v2271_v14, %v2270_v58 }
 0x33a   : > { %v2189_v20 = vmul.f32 %v2785_v35, %v2142_v5  ;;  %v1005_v61 = vadd.f32 %v1004_v39, %v1003_v2  ;;  %v2265_v35 = vadd.f32 %v2264_v32, %v2263_v49  ;;  %v1078_v2 = vrot.slane %v1077_v17, 1 }
 0x33b   : > { %v2226_v32 = vrot.slane %v2225_v7, 1 }
 0x33c   : > { %v2235_v19 = vsel %vm967_vm2, %v2189_v20, 0.0  ;;  %v1006_v9 = vrot.slane %v1005_v61, 2  ;;  %v2266_v13 = vrot.slane %v2265_v35, 2  ;;  %v994_v20 = vrot.slane %v993_v44, 1 }
 0x33d   : > { %v2170_v56 = vpop.permute.xlu1 %2169  ;;  %v2236_v27 = vrot.slane %v2235_v19, 4  ;;  %v3702_v55 = vadd.f32 %v1078_v2, %v1077_v17  ;;  %v2227_v17 = vadd.f32 %v2226_v32, %v2225_v7 }
 0x33e   : > { %v2196_v45 = vmul.f32 %v3615_v54, %v2170_v56  ;;  %v1050_v54 = vrot.slane %v1049_v40, 1  ;;  %v1007_v6 = vadd.f32 %v1006_v9, %v1005_v61  ;;  %v3699_v41 = vadd.f32 %v2266_v13, %v2265_v35 }
 0x33f   : > { %v2237_v38 = vadd.f32 %v2236_v27, %v2235_v19  ;;  %v2787_v19 = vld [vmem:[%s3244_s12 + $0x38] sm:$0xff]  ;;  %v995_v51 = vadd.f32 %v994_v20, %v993_v44  ;;  %v2330_v35 = vsel %vm1292_vm4, %v2220_v3, %v2329_v26 }
 0x340   : > { %v2284_v56 = vsel %vm967_vm2, %v2196_v45, 0.0  ;;  %v1051_v42 = vadd.f32 %v1050_v54, %v1049_v40  ;;  %v1008_v1 = vrot.slane %v1007_v6, 1  ;;  %v2268_v37 = vrot.slane %v3699_v41, 1 }
 0x341   : > { %v2238_v8 = vrot.slane %v2237_v38, 2  ;;  %v1412_v44 = vsel %vm1294_vm5, %v995_v51, %v3638_v21 }
 0x342   : > { %v939_v34 = vpop.permute.xlu1 %938  ;;  %v1413_v21 = vsel %vm1296_vm6, %v3665_v59, %v1412_v44  ;;  %v2262_v44 = vadd.f32 %v2261_v57, %v3640_v60 }
 0x343   : > { %v964_v63 = vmul.f32 %v2786_v43, %v939_v34  ;;  %v2285_v34 = vrot.slane %v2284_v56, 4  ;;  %v2239_v61 = vadd.f32 %v2238_v8, %v2237_v38 }
 0x345   : > { %v1059_v5 = vsel %vm967_vm2, %v964_v63, 0.0  ;;  %v1418_v63 = vsel %vm1292_vm4, %v3659_v46, %v1417_v47  ;;  %v2286_v58 = vadd.f32 %v2285_v34, %v2284_v56  ;;  %v2240_v9 = vrot.slane %v2239_v61, 1 }
 0x346   : > { %v1060_v62 = vrot.slane %v1059_v5, 4  ;;  %v1419_v40 = vsel %vm1294_vm5, %v1051_v42, %v1418_v63 }
 0x347   : > { %v2174_v4 = vpop.permute.xlu1 %2173  ;;  %v2287_v14 = vrot.slane %v2286_v58, 2  ;;  %v1420_v24 = vsel %vm1296_vm6, %v3677_v11, %v1419_v40  ;;  %v2241_v56 = vadd.f32 %v2240_v9, %v2239_v61 }
 0x348   : > { %v1061_v50 = vadd.f32 %v1060_v62, %v1059_v5  ;;  %v2197_v22 = vmul.f32 %v2786_v43, %v2174_v4  ;;  %v2273_v5 = vrot.slane %v2272_v15, 2  ;;  %v1009_v4 = vadd.f32 %v1008_v1, %v1007_v6 }
 0x34a   : > { %v1062_v49 = vrot.slane %v1061_v50, 2  ;;  %v2291_v31 = vsel %vm967_vm2, %v2197_v22, 0.0  ;;  %v2274_v22 = vadd.f32 %v2273_v5, %v2272_v15  ;;  %v2288_v15 = vadd.f32 %v2287_v14, %v2286_v58 }
 0x34b   : > { %v2292_v30 = vrot.slane %v2291_v31, 4 }
 0x34c   : > { %v1063_v53 = vadd.f32 %v1062_v49, %v1061_v50  ;;  %v909_v39 = vpop.permute.xlu1 %908  ;;  %v2331_v50 = vsel %vm1294_vm5, %v2227_v17, %v2330_v35  ;;  %v2281_v49 = vadd.f32 %v2280_v18, %v2279_v28 }
 0x34d   : > { %v958_v0 = vmul.f32 %v2787_v19, %v909_v39  ;;  %v2293_v45 = vadd.f32 %v2292_v30, %v2291_v31  ;;  %v2275_v31 = vrot.slane %v2274_v22, 1 }
 0x34e   : > { %v1064_v16 = vrot.slane %v1063_v53, 1 }
 0x34f   : > { %v1017_v43 = vsel %vm967_vm2, %v958_v0, 0.0  ;;  %v2294_v47 = vrot.slane %v2293_v45, 2  ;;  %v2276_v58 = vadd.f32 %v2275_v31, %v2274_v22 }
 0x350   : > { %v1018_v27 = vrot.slane %v1017_v43, 4  ;;  %v1065_v46 = vadd.f32 %v1064_v16, %v1063_v53  ;;  %v1414_v53 = vsel %vm1298_vm7, %v1009_v4, %v1413_v21  ;;  %v2282_v16 = vrot.slane %v2281_v49, 1  ;;  %v2579_v21 = vld [vmem:[%s3778_s4] ss:$0 sm:$0xff] }
 0x351   : > { %v2150_v36 = vpop.permute.xlu1 %2149  ;;  %v2295_v51 = vadd.f32 %v2294_v47, %v2293_v45  ;;  %v1415_v42 = vsel %vm1300_vm8, %v3679_v33, %v1414_v53  ;;  %v2269_v33 = vadd.f32 %v2268_v37, %v3699_v41 }
 0x352   : > { %v1019_v62 = vadd.f32 %v1018_v27, %v1017_v43  ;;  %v2191_v23 = vmul.f32 %v2787_v19, %v2150_v36  ;;  %v1421_v54 = vsel %vm1298_vm7, %v1065_v46, %v1420_v24  ;;  %v2289_v27 = vrot.slane %v2288_v15, 1 }
 0x353   : > { %v1422_v0 = vsel %vm1300_vm8, %v3693_v10, %v1421_v54  ;;  %v2248_v10 = vadd.f32 %v2247_v29, %v3674_v52  ;;  %v2296_v35 = vrot.slane %v2295_v51, 1  ;;  %v2336_v41 = vsel %vm1290_vm3, %v2269_v33, %v2262_v44 }
 0x354   : > { %v1020_v38 = vrot.slane %v1019_v62, 2  ;;  %v2249_v26 = vsel %vm967_vm2, %v2191_v23, 0.0  ;;  %v2290_v29 = vadd.f32 %v2289_v27, %v2288_v15  ;;  %v2337_v46 = vsel %vm1292_vm4, %v2276_v58, %v2336_v41 }
 0x355   : > { %v2250_v13 = vrot.slane %v2249_v26, 4  ;;  %v2178_v7 = vpop.permute.xlu1 %2177  ;;  %v2297_v37 = vadd.f32 %v2296_v35, %v2295_v51 }
 0x356   : > { %v1021_v2 = vadd.f32 %v1020_v38, %v1019_v62  ;;  %v2198_v20 = vmul.f32 %v3629_v48, %v2178_v7  ;;  %v2332_v48 = vsel %vm1296_vm6, %v3671_v12, %v2331_v50  ;;  %v2283_v62 = vadd.f32 %v2282_v16, %v2281_v49 }
 0x357   : > { %v2251_v3 = vadd.f32 %v2250_v13, %v2249_v26  ;;  %v2333_v12 = vsel %vm1298_vm7, %v2241_v56, %v2332_v48 }
 0x358   : > { %v1022_v6 = vrot.slane %v1021_v2, 1  ;;  %v2298_v8 = vsel %vm967_vm2, %v2198_v20, 0.0  ;;  %v2338_v60 = vsel %vm1294_vm5, %v2283_v62, %v2337_v46  ;;  %v2580_v20 = vld [vmem:[%s3779_s5] ss:$0 sm:$0xff] }
 0x359   : > { %v2252_v59 = vrot.slane %v2251_v3, 2  ;;  %v2299_v39 = vrot.slane %v2298_v8, 4  ;;  %v2182_v32 = vpop.permute.xlu1 %2181  ;;  %v2339_v4 = vsel %vm1296_vm6, %v2290_v29, %v2338_v60 }
 0x35a   : > { %v1023_v11 = vadd.f32 %v1022_v6, %v1021_v2  ;;  %v2199_v19 = vmul.f32 %v3648_v25, %v2182_v32  ;;  %v1423_v25 = vsel %vm1302_vm9, %v3702_v55, %v1422_v0  ;;  %v2334_v55 = vsel %vm1300_vm8, %v2248_v10, %v2333_v12 }
 0x35b   : > { %v2253_v28 = vadd.f32 %v2252_v59, %v2251_v3  ;;  %v2300_v34 = vadd.f32 %v2299_v39, %v2298_v8  ;;  %v2340_v38 = vsel %vm1298_vm7, %v2297_v37, %v2339_v4 }
 0x35c   : > { %v2305_v30 = vsel %vm967_vm2, %v2199_v19, 0.0  ;;  %v1416_v43 = vsel %vm1302_vm9, %v1023_v11, %v1415_v42 }
 0x35d   : > { %v2254_v63 = vrot.slane %v2253_v28, 1  ;;  %v2301_v1 = vrot.slane %v2300_v34, 2  ;;  %v2306_v61 = vrot.slane %v2305_v30, 4  ;;  %2608 = vmatprep.mubr.msk.f32.mxu1 %vm967_vm2, %v1416_v43 }
 0x35e   : > { %2609 = vmatmul.mubr.msk.f32.vlgmr.msra.gmra.mrb[0].mxu1 %vm967_vm2, %v1423_v25 }
 0x35f   : > { %v2255_v17 = vadd.f32 %v2254_v63, %v2253_v28  ;;  %v2302_v5 = vadd.f32 %v2301_v1, %v2300_v34  ;;  %v2307_v36 = vadd.f32 %v2306_v61, %v2305_v30 }
 0x361   : > { %v2303_v23 = vrot.slane %v2302_v5, 1  ;;  %v2308_v40 = vrot.slane %v2307_v36, 2  ;;  %v2335_v52 = vsel %vm1302_vm9, %v2255_v17, %v2334_v55 }
 0x362   : > { %2623 = vmatprep.mubr.msk.f32.mxu0 %vm967_vm2, %v2335_v52 }
 0x363   : > { %v2309_v18 = vadd.f32 %v2308_v40, %v2307_v36  ;;  %v2304_v45 = vadd.f32 %v2303_v23, %v2302_v5 }
 0x365   : > { %v2310_v57 = vrot.slane %v2309_v18, 1  ;;  %v2341_v26 = vsel %vm1300_vm8, %v2304_v45, %v2340_v38 }
 0x367   : > { %v2311_v9 = vadd.f32 %v2310_v57, %v2309_v18 }
 0x369   : > { %v2342_v50 = vsel %vm1302_vm9, %v2311_v9, %v2341_v26 }
 0x36a   : > { %2624 = vmatmul.mubr.msk.f32.vlgmr.msra.gmra.mrb[0].mxu0 %vm967_vm2, %v2342_v50 }
 0x431   : > { %v2610_v22 = vpop.f32.mrb[0].mxu1 }
 0x432   : > { %v1497_v13 = vpop.f32.mrb[1].mxu1 }
 0x43d   : > { %v2625_v7 = vpop.f32.mrb[0].mxu0 }
 0x43e   : > { %v2626_v14 = vadd.f32 %v2625_v7, %v2610_v22  ;;  %v2416_v2 = vpop.f32.mrb[1].mxu0 }
 0x43f   : > { %v2627_v24 = vadd.f32 %v2416_v2, %v1497_v13 }
 0x440   : > { %v2435_v49 = vmul.f32 %v2626_v14, %v2579_v21 }
 0x441   : > { %v2434_v47 = vmul.f32 %v2627_v24, %v2579_v21 }
 0x442   : > { %v2444_v3 = vadd.f32 %v2580_v20, %v2435_v49 }
 0x443   : > { %v2443_v54 = vadd.f32 %v2580_v20, %v2434_v47 }
 0x444   : > { %2447 = vst.msk [vmem:[%s325_s8 + $0x8] sm:$0xff] %vm2445_vm10, %v2444_v3 }
 0x445   : > { %2446 = vst.msk [vmem:[%s325_s8] sm:$0xff] %vm2445_vm10, %v2443_v54 }
 0x446 PF: > { %s16_s23 = sadd.s32 1, %s2810_s23   ;;  %s3798_s21 = smov %s2806_s22 }
 0x447   : > { %p13_p5 = scmp.ge.s32.totalorder %s16_s23, 4   ;;  %s3799_s22 = smov %s3801_s24 }
 0x449   :  { %15 = sbr.rel (!%p13_p5) target bundleno = 2 (0x2), region = 77 }

// kernel: basic_block_forward.9
= control target key start
LH: loop header
LB: loop body
LE: loop exit
PB: predicated region body
PF: predicated region fallthrough
CT: control target
= control target key end

     0   :  { %s3062_s30 = smov 0   ;;  %s3064_s10 = smov 0   ;;  %s4003_s0 = inlined_call_operand.vmem [shape: f32[2,16,24], index: 0, kind: input, shape index: {}]   ;;  %s4004_s1 = inlined_call_operand.vmem [shape: f32[2,16,8,16], index: 1, kind: input, shape index: {}]   ;;  %s4005_s2 = inlined_call_operand.vmem [shape: f32[3,5], index: 2, kind: input, shape index: {}]   ;;  %s4006_s3 = inlined_call_operand.vmem [shape: f32[80,32], index: 3, kind: input, shape index: {}]   ;;  %s4007_s4 = inlined_call_operand.vmem [shape: f32[1,32], index: 4, kind: input, shape index: {}]   ;;  %s4008_s5 = inlined_call_operand.vmem [shape: f32[1,32], index: 5, kind: input, shape index: {}]   ;;  %s4009_s6 = inlined_call_operand.vmem [shape: f32[1,32], index: 6, kind: input, shape index: {}]   ;;  %s4010_s7 = inlined_call_operand.vmem [shape: f32[1,32], index: 7, kind: input, shape index: {}]   ;;  %s4011_s8 = inlined_call_operand.vmem [shape: f32[2,16,1], index: 8, kind: input, shape index: {}]   ;;  %s4012_s9 = inlined_call_operand.vmem [shape: f32[2,16,32], index: 9, kind: output, shape index: {}]  }
   0x1   :  { %s3066_s11 = smov 0  }
   0x2 LB: > { %s31_s12 = sadd.s32 1, %s3001_s10  ;;  %p2717_p0 = scmp.ge.s32.totalorder %s3005_s11, 1  ;;  %s3005_s11 = sphi %s3066_s11, %s19_s11   ;;  %s3001_s10 = sphi %s3064_s10, %s4031_s10   ;;  %s2997_s30 = sphi %s3062_s30, %s4030_s30  }
   0x3   : > { %p33_p1 = scmp.ge.s32.totalorder %s31_s12, 2  ;;  %p342_p2 = scmp.lt.s32.totalorder %s3005_s11, 3 }
   0x5   : > { %s4033_s12 = smov (%p33_p1, %s31_s12), 0  ;;  %p343_p3 = pnand %p2717_p0, %p342_p2 }
   0x7   : > { %346 = sbr.rel (%p343_p3) target bundleno = 1102 (0x44e), region = 56 }
   0xe   : > { %p405_p4 = scmp.lt.s32.totalorder %s2997_s30, 1  ;;  %v463_v0 = vlaneseq  ;;  %v462_v28 = vld [vmem:[%s4005_s2] sm:$0x7]  ;;  %vm811_vm0 = vcmask 39936   ;;  %vm1084_vm1 = vcmask 130048   ;;  %vm1409_vm2 = vcmask 1041409  }
   0xf   : > { %vm1411_vm3 = vcmask 1042434   ;;  %vm1413_vm4 = vcmask 1043459   ;;  %vm1415_vm5 = vcmask 1044484   ;;  %vm1417_vm6 = vcmask 1045509  }
  0x10   : > { %s4035_s30 = smov (!%p405_p4, %s2997_s30), 1  ;;  %v3082_v1 = vshrl.u32 %v463_v0, 7  ;;  %vm1419_vm7 = vcmask 1046534   ;;  %vm1421_vm8 = vcmask 1047559   ;;  %vm2587_vm9 = vcmask 261120  }
  0x11   : > { %s3085_s13 = sshll.u32 %s4035_s30, 4  ;;  %s2743_s23 = sshll.u32 %s4035_s30, 7 }
  0x12   : > { %v3088_v2 = vsub.s32 0, %v3082_v1  ;;  %s412_s16 = scalar_lea.vmem %s4003_s0, %s3085_s13  ;;  %v3095_v3 = vsub.s32 1, %v3082_v1  ;;  %v514_v5 = vsub.s32 7, %v3082_v1  ;;  %v3101_v8 = vsub.s32 2, %v3082_v1  ;;  %s3456_s26 = scalar_lea.vmem %s4004_s1, %s2743_s23 }
  0x13   : > { %v444_v4 = vld [vmem:[%s412_s16] sm:$0xff]  ;;  %v445_v9 = vld [vmem:[%s412_s16 + $0x8] sm:$0xff]  ;;  %v486_v15 = vsub.s32 3, %v3082_v1  ;;  %v493_v18 = vsub.s32 4, %v3082_v1  ;;  %v500_v21 = vsub.s32 5, %v3082_v1  ;;  %v507_v24 = vsub.s32 6, %v3082_v1  ;;  %s3526_s16 = scalar_lea.vmem %s4011_s8, %s3085_s13  ;;  %s442_s22 = scalar_lea.vmem %s4012_s9, %s3085_s13 }
  0x14   : > { %v466_v6 = vrot.slane %v444_v4, %v3088_v2  ;;  %v473_v7 = vrot.slane %v444_v4, %v3095_v3  ;;  %v515_v10 = vrot.slane %v444_v4, %v514_v5  ;;  %v571_v11 = vrot.slane %v445_v9, %v514_v5 }
  0x15   : > { %v522_v12 = vrot.slane %v445_v9, %v3088_v2  ;;  %v480_v13 = vrot.slane %v444_v4, %v3101_v8  ;;  %v529_v14 = vrot.slane %v445_v9, %v3095_v3  ;;  %v536_v16 = vrot.slane %v445_v9, %v3101_v8 }
  0x16   : > { %613 = vbcast.lane.b32.xlu1 %v466_v6, 264  ;;  %468 = vbcast.lane.b32.xlu0 %v466_v6, 256  ;;  %v487_v17 = vrot.slane %v444_v4, %v486_v15  ;;  %v543_v19 = vrot.slane %v445_v9, %v486_v15  ;;  %v494_v20 = vrot.slane %v444_v4, %v493_v18 }
  0x17   : > { %v501_v22 = vrot.slane %v444_v4, %v500_v21  ;;  %v550_v23 = vrot.slane %v445_v9, %v493_v18  ;;  %v508_v25 = vrot.slane %v444_v4, %v507_v24  ;;  %v557_v26 = vrot.slane %v445_v9, %v500_v21 }
  0x18   : > { %v564_v27 = vrot.slane %v445_v9, %v507_v24  ;;  %v3115_v29 = vrot.slane %v462_v28, %v3088_v2  ;;  %v3118_v30 = vrot.slane %v462_v28, %v3095_v3  ;;  %v3132_v61 = vrot.slane %v462_v28, %v3101_v8 }
  0x1a   : > { %617 = vbcast.lane.b32.xlu1 %v473_v7, 264  ;;  %475 = vbcast.lane.b32.xlu0 %v473_v7, 256 }
  0x1e   : > { %524 = vbcast.lane.b32.xlu1 %v522_v12, 256  ;;  %482 = vbcast.lane.b32.xlu0 %v480_v13, 256 }
  0x22   : > { %621 = vbcast.lane.b32.xlu1 %v480_v13, 264  ;;  %531 = vbcast.lane.b32.xlu0 %v529_v14, 256 }
  0x26   : > { %649 = vbcast.lane.b32.xlu1 %v529_v14, 264  ;;  %645 = vbcast.lane.b32.xlu0 %v522_v12, 264 }
  0x2a   : > { %538 = vbcast.lane.b32.xlu1 %v536_v16, 256  ;;  %489 = vbcast.lane.b32.xlu0 %v487_v17, 256 }
  0x2e   : > { %653 = vbcast.lane.b32.xlu1 %v536_v16, 264  ;;  %625 = vbcast.lane.b32.xlu0 %v487_v17, 264 }
  0x32   : > { %717 = vbcast.lane.b32.xlu1 %v473_v7, 272  ;;  %713 = vbcast.lane.b32.xlu0 %v466_v6, 272 }
  0x36   : > { %545 = vbcast.lane.b32.xlu1 %v543_v19, 256  ;;  %496 = vbcast.lane.b32.xlu0 %v494_v20, 256 }
  0x3a   : > { %657 = vbcast.lane.b32.xlu1 %v543_v19, 264  ;;  %629 = vbcast.lane.b32.xlu0 %v494_v20, 264 }
  0x3e   : > { %745 = vbcast.lane.b32.xlu1 %v522_v12, 272  ;;  %721 = vbcast.lane.b32.xlu0 %v480_v13, 272 }
  0x42   : > { %503 = vbcast.lane.b32.xlu1 %v501_v22, 256  ;;  %749 = vbcast.lane.b32.xlu0 %v529_v14, 272 }
  0x46   : > { %633 = vbcast.lane.b32.xlu1 %v501_v22, 264  ;;  %552 = vbcast.lane.b32.xlu0 %v550_v23, 256 }
  0x4a   : > { %725 = vbcast.lane.b32.xlu1 %v487_v17, 272  ;;  %661 = vbcast.lane.b32.xlu0 %v550_v23, 264 }
  0x4e   : > { %510 = vbcast.lane.b32.xlu1 %v508_v25, 256  ;;  %753 = vbcast.lane.b32.xlu0 %v536_v16, 272 }
  0x52   : > { %637 = vbcast.lane.b32.xlu1 %v508_v25, 264  ;;  %559 = vbcast.lane.b32.xlu0 %v557_v26, 256 }
  0x56   : > { %729 = vbcast.lane.b32.xlu1 %v494_v20, 272  ;;  %665 = vbcast.lane.b32.xlu0 %v557_v26, 264 }
  0x5a   : > { %517 = vbcast.lane.b32.xlu1 %v515_v10, 256  ;;  %757 = vbcast.lane.b32.xlu0 %v543_v19, 272 }
  0x5e   : > { %641 = vbcast.lane.b32.xlu1 %v515_v10, 264  ;;  %566 = vbcast.lane.b32.xlu0 %v564_v27, 256 }
  0x62   : > { %733 = vbcast.lane.b32.xlu1 %v501_v22, 272  ;;  %669 = vbcast.lane.b32.xlu0 %v564_v27, 264 }
  0x66   : > { %573 = vbcast.lane.b32.xlu1 %v571_v11, 256  ;;  %761 = vbcast.lane.b32.xlu0 %v550_v23, 272 }
  0x6a   : > { %737 = vbcast.lane.b32.xlu1 %v508_v25, 272  ;;  %673 = vbcast.lane.b32.xlu0 %v571_v11, 264 }
  0x6e   : > { %741 = vbcast.lane.b32.xlu1 %v515_v10, 272  ;;  %765 = vbcast.lane.b32.xlu0 %v557_v26, 272 }
  0x72   : > { %773 = vbcast.lane.b32.xlu1 %v571_v11, 272  ;;  %769 = vbcast.lane.b32.xlu0 %v564_v27, 272 }
  0x88   : > { %v614_v31 = vpop.permute.xlu1 %613  ;;  %v469_v32 = vpop.permute.xlu0 %468 }
  0x89   : > { %v679_v33 = vmul.f32 %v3118_v30, %v614_v31  ;;  %v579_v34 = vmul.f32 %v3115_v29, %v469_v32 }
  0x8b   : > { %v695_v35 = vadd.f32 %v679_v33, %v579_v34 }
  0x8c   : > { %v618_v36 = vpop.permute.xlu1 %617  ;;  %v476_v37 = vpop.permute.xlu0 %475 }
  0x8d   : > { %v680_v38 = vmul.f32 %v3118_v30, %v618_v36  ;;  %v580_v39 = vmul.f32 %v3115_v29, %v476_v37 }
  0x8f   : > { %v696_v40 = vadd.f32 %v680_v38, %v580_v39 }
  0x90   : > { %v525_v41 = vpop.permute.xlu1 %524  ;;  %v483_v42 = vpop.permute.xlu0 %482 }
  0x91   : > { %v581_v45 = vmul.f32 %v3115_v29, %v483_v42  ;;  %v587_v47 = vmul.f32 %v3115_v29, %v525_v41 }
  0x94   : > { %v622_v43 = vpop.permute.xlu1 %621  ;;  %v532_v44 = vpop.permute.xlu0 %531 }
  0x95   : > { %v681_v46 = vmul.f32 %v3118_v30, %v622_v43  ;;  %v588_v51 = vmul.f32 %v3115_v29, %v532_v44 }
  0x97   : > { %v697_v48 = vadd.f32 %v681_v46, %v581_v45 }
  0x98   : > { %v650_v49 = vpop.permute.xlu1 %649  ;;  %v646_v50 = vpop.permute.xlu0 %645 }
  0x99   : > { %v688_v52 = vmul.f32 %v3118_v30, %v650_v49  ;;  %v687_v53 = vmul.f32 %v3118_v30, %v646_v50 }
  0x9b   : > { %v704_v54 = vadd.f32 %v688_v52, %v588_v51  ;;  %v703_v55 = vadd.f32 %v687_v53, %v587_v47 }
  0x9c   : > { %v539_v56 = vpop.permute.xlu1 %538  ;;  %v490_v57 = vpop.permute.xlu0 %489 }
  0x9d   : > { %v589_v58 = vmul.f32 %v3115_v29, %v539_v56  ;;  %v582_v62 = vmul.f32 %v3115_v29, %v490_v57 }
  0xa0   : > { %v654_v59 = vpop.permute.xlu1 %653  ;;  %v626_v60 = vpop.permute.xlu0 %625 }
  0xa1   : > { %v689_v63 = vmul.f32 %v3118_v30, %v654_v59  ;;  %v682_v0 = vmul.f32 %v3118_v30, %v626_v60 }
  0xa3   : > { %v705_v1 = vadd.f32 %v689_v63, %v589_v58  ;;  %v698_v2 = vadd.f32 %v682_v0, %v582_v62 }
  0xa4   : > { %v718_v3 = vpop.permute.xlu1 %717  ;;  %v714_v4 = vpop.permute.xlu0 %713 }
  0xa5   : > { %v780_v5 = vmul.f32 %v3132_v61, %v718_v3  ;;  %v779_v6 = vmul.f32 %v3132_v61, %v714_v4 }
  0xa7   : > { %v3139_v7 = vadd.f32 %v780_v5, %v696_v40  ;;  %v3141_v9 = vadd.f32 %v779_v6, %v695_v35 }
  0xa8   : > { %v546_v8 = vpop.permute.xlu1 %545  ;;  %v497_v10 = vpop.permute.xlu0 %496 }
  0xa9   : > { %v815_v11 = vsel %vm811_vm0, %v3139_v7, -inf  ;;  %v812_v12 = vsel %vm811_vm0, %v3141_v9, -inf  ;;  %v590_v13 = vmul.f32 %v3115_v29, %v546_v8  ;;  %v583_v16 = vmul.f32 %v3115_v29, %v497_v10 }
  0xaa   : > { %816 = vmax.xlane.f32.xlu1 %v815_v11  ;;  %813 = vmax.xlane.f32.xlu0 %v812_v12 }
  0xac   : > { %v658_v14 = vpop.permute.xlu1 %657  ;;  %v630_v15 = vpop.permute.xlu0 %629 }
  0xad   : > { %v690_v17 = vmul.f32 %v3118_v30, %v658_v14  ;;  %v683_v18 = vmul.f32 %v3118_v30, %v630_v15 }
  0xaf   : > { %v706_v19 = vadd.f32 %v690_v17, %v590_v13  ;;  %v699_v20 = vadd.f32 %v683_v18, %v583_v16 }
  0xb0   : > { %v746_v21 = vpop.permute.xlu1 %745  ;;  %v722_v22 = vpop.permute.xlu0 %721 }
  0xb1   : > { %v787_v23 = vmul.f32 %v3132_v61, %v746_v21  ;;  %v781_v24 = vmul.f32 %v3132_v61, %v722_v22 }
  0xb3   : > { %v3153_v25 = vadd.f32 %v781_v24, %v697_v48  ;;  %v3155_v26 = vadd.f32 %v787_v23, %v703_v55 }
  0xb4   : > { %v504_v27 = vpop.permute.xlu1 %503  ;;  %v750_v28 = vpop.permute.xlu0 %749 }
  0xb5   : > { %v788_v31 = vmul.f32 %v3132_v61, %v750_v28  ;;  %v818_v32 = vsel %vm811_vm0, %v3153_v25, -inf  ;;  %v584_v33 = vmul.f32 %v3115_v29, %v504_v27  ;;  %v836_v38 = vsel %vm811_vm0, %v3155_v26, -inf }
  0xb6   : > { %819 = vmax.xlane.f32.xlu0 %v818_v32 }
  0xb7   : > { %v3161_v34 = vadd.f32 %v788_v31, %v704_v54 }
  0xb8   : > { %v634_v35 = vpop.permute.xlu1 %633  ;;  %v553_v36 = vpop.permute.xlu0 %552 }
  0xb9   : > { %v684_v37 = vmul.f32 %v3118_v30, %v634_v35  ;;  %v839_v39 = vsel %vm811_vm0, %v3161_v34, -inf  ;;  %v591_v43 = vmul.f32 %v3115_v29, %v553_v36 }
  0xba   : > { %837 = vmax.xlane.f32.xlu0 %v836_v38  ;;  %840 = vmax.xlane.f32.xlu1 %v839_v39 }
  0xbb   : > { %v700_v40 = vadd.f32 %v684_v37, %v584_v33 }
  0xbc   : > { %v726_v41 = vpop.permute.xlu1 %725  ;;  %v662_v42 = vpop.permute.xlu0 %661 }
  0xbd   : > { %v782_v44 = vmul.f32 %v3132_v61, %v726_v41  ;;  %v691_v45 = vmul.f32 %v3118_v30, %v662_v42 }
  0xbf   : > { %v707_v46 = vadd.f32 %v691_v45, %v591_v43  ;;  %v3171_v47 = vadd.f32 %v782_v44, %v698_v2 }
  0xc0   : > { %v511_v48 = vpop.permute.xlu1 %510  ;;  %v754_v49 = vpop.permute.xlu0 %753 }
  0xc1   : > { %v789_v50 = vmul.f32 %v3132_v61, %v754_v49  ;;  %v821_v51 = vsel %vm811_vm0, %v3171_v47, -inf  ;;  %v585_v52 = vmul.f32 %v3115_v29, %v511_v48 }
  0xc2   : > { %822 = vmax.xlane.f32.xlu0 %v821_v51 }
  0xc3   : > { %v3177_v53 = vadd.f32 %v789_v50, %v705_v1 }
  0xc4   : > { %v638_v54 = vpop.permute.xlu1 %637  ;;  %v560_v55 = vpop.permute.xlu0 %559 }
  0xc5   : > { %v685_v56 = vmul.f32 %v3118_v30, %v638_v54  ;;  %v842_v57 = vsel %vm811_vm0, %v3177_v53, -inf  ;;  %v592_v62 = vmul.f32 %v3115_v29, %v560_v55 }
  0xc6   : > { %843 = vmax.xlane.f32.xlu1 %v842_v57 }
  0xc7   : > { %v701_v58 = vadd.f32 %v685_v56, %v585_v52 }
  0xc8   : > { %v730_v59 = vpop.permute.xlu1 %729  ;;  %v666_v60 = vpop.permute.xlu0 %665 }
  0xc9   : > { %v783_v63 = vmul.f32 %v3132_v61, %v730_v59  ;;  %v692_v0 = vmul.f32 %v3118_v30, %v666_v60 }
  0xcb   : > { %v708_v2 = vadd.f32 %v692_v0, %v592_v62  ;;  %v3185_v1 = vadd.f32 %v783_v63, %v699_v20 }
  0xcc   : > { %v518_v3 = vpop.permute.xlu1 %517  ;;  %v758_v4 = vpop.permute.xlu0 %757 }
  0xcd   : > { %v790_v5 = vmul.f32 %v3132_v61, %v758_v4  ;;  %v824_v6 = vsel %vm811_vm0, %v3185_v1, -inf  ;;  %v586_v8 = vmul.f32 %v3115_v29, %v518_v3 }
  0xce   : > { %825 = vmax.xlane.f32.xlu0 %v824_v6 }
  0xcf   : > { %v3191_v10 = vadd.f32 %v790_v5, %v706_v19 }
  0xd0   : > { %v642_v11 = vpop.permute.xlu1 %641  ;;  %v567_v12 = vpop.permute.xlu0 %566 }
  0xd1   : > { %v686_v13 = vmul.f32 %v3118_v30, %v642_v11  ;;  %v845_v14 = vsel %vm811_vm0, %v3191_v10, -inf  ;;  %v593_v18 = vmul.f32 %v3115_v29, %v567_v12 }
  0xd2   : > { %846 = vmax.xlane.f32.xlu1 %v845_v14 }
  0xd3   : > { %v702_v15 = vadd.f32 %v686_v13, %v586_v8 }
  0xd4   : > { %v734_v16 = vpop.permute.xlu1 %733  ;;  %v670_v17 = vpop.permute.xlu0 %669 }
  0xd5   : > { %v784_v20 = vmul.f32 %v3132_v61, %v734_v16  ;;  %v693_v21 = vmul.f32 %v3118_v30, %v670_v17 }
  0xd7   : > { %v709_v22 = vadd.f32 %v693_v21, %v593_v18  ;;  %v3199_v19 = vadd.f32 %v784_v20, %v700_v40 }
  0xd8   : > { %v574_v23 = vpop.permute.xlu1 %573  ;;  %v762_v24 = vpop.permute.xlu0 %761 }
  0xd9   : > { %v791_v27 = vmul.f32 %v3132_v61, %v762_v24  ;;  %v827_v28 = vsel %vm811_vm0, %v3199_v19, -inf  ;;  %v594_v31 = vmul.f32 %v3115_v29, %v574_v23 }
  0xda   : > { %828 = vmax.xlane.f32.xlu0 %v827_v28 }
  0xdb   : > { %v3205_v32 = vadd.f32 %v791_v27, %v707_v46 }
  0xdc   : > { %v738_v33 = vpop.permute.xlu1 %737  ;;  %v674_v35 = vpop.permute.xlu0 %673 }
  0xdd   : > { %v785_v36 = vmul.f32 %v3132_v61, %v738_v33  ;;  %v694_v37 = vmul.f32 %v3118_v30, %v674_v35  ;;  %v848_v38 = vsel %vm811_vm0, %v3205_v32, -inf }
  0xde   : > { %849 = vmax.xlane.f32.xlu1 %v848_v38 }
  0xdf   : > { %v710_v39 = vadd.f32 %v694_v37, %v594_v31  ;;  %v3211_v40 = vadd.f32 %v785_v36, %v701_v58 }
  0xe0   : > { %v742_v41 = vpop.permute.xlu1 %741  ;;  %v766_v42 = vpop.permute.xlu0 %765 }
  0xe1   : > { %v786_v43 = vmul.f32 %v3132_v61, %v742_v41  ;;  %v792_v29 = vmul.f32 %v3132_v61, %v766_v42  ;;  %v830_v44 = vsel %vm811_vm0, %v3211_v40, -inf }
  0xe2   : > { %831 = vmax.xlane.f32.xlu0 %v830_v44 }
  0xe3   : > { %v3217_v45 = vadd.f32 %v786_v43, %v702_v15  ;;  %v3219_v30 = vadd.f32 %v792_v29, %v708_v2 }
  0xe4   : > { %v774_v46 = vpop.permute.xlu1 %773  ;;  %v770_v48 = vpop.permute.xlu0 %769 }
  0xe5   : > { %v794_v49 = vmul.f32 %v3132_v61, %v774_v46  ;;  %v793_v50 = vmul.f32 %v3132_v61, %v770_v48  ;;  %v833_v51 = vsel %vm811_vm0, %v3217_v45, -inf  ;;  %v851_v52 = vsel %vm811_vm0, %v3219_v30, -inf }
  0xe6   : > { %834 = vmax.xlane.f32.xlu0 %v833_v51  ;;  %852 = vmax.xlane.f32.xlu1 %v851_v52 }
  0xe7   : > { %v3227_v54 = vadd.f32 %v794_v49, %v710_v39  ;;  %v3229_v55 = vadd.f32 %v793_v50, %v709_v22  ;;  %v3007_v39 = vmov 2  }
  0xe8   : > { %2859 = vset.pattern.permute.xlu0 %v3007_v39 }
  0xe9   : > { %v857_v56 = vsel %vm811_vm0, %v3227_v54, -inf  ;;  %v854_v57 = vsel %vm811_vm0, %v3229_v55, -inf }
  0xea   : > { %858 = vmax.xlane.f32.xlu0 %v857_v56  ;;  %855 = vmax.xlane.f32.xlu1 %v854_v57 }
 0x137   : > { %v817_v61 = vpop.xlane.xlu1 %816  ;;  %v814_v58 = vpop.xlane.xlu0 %813 }
 0x138   : > { %v861_v59 = vsub.f32 %v3139_v7, %v817_v61  ;;  %v860_v60 = vsub.f32 %v3141_v9, %v814_v58 }
 0x13a   : > { %v878_v62 = vmul.f32 1.442695, %v861_v59  ;;  %v876_v63 = vmul.f32 1.442695, %v860_v60 }
 0x13c   : > { %2903 = vpow2.f32 %v878_v62 }
 0x13d   : > { %2905 = vpow2.f32 %v876_v63 }
 0x143   : > { %v820_v0 = vpop.xlane.xlu0 %819 }
 0x144   : > { %v862_v2 = vsub.f32 %v3153_v25, %v820_v0 }
 0x146   : > { %v3238_v3 = vpop.eup %2903  ;;  %v880_v4 = vmul.f32 1.442695, %v862_v2 }
 0x147   : > { %v3240_v5 = vpop.eup %2905  ;;  %v841_v6 = vpop.xlane.xlu1 %840  ;;  %v911_v11 = vsel %vm811_vm0, %v3238_v3, 0.0 }
 0x148   : > { %v838_v8 = vpop.xlane.xlu0 %837  ;;  %2907 = vpow2.f32 %v880_v4  ;;  %v869_v7 = vsub.f32 %v3161_v34, %v841_v6  ;;  %912 = vadd.xlane.f32.xlu0 %v911_v11  ;;  %v908_v12 = vsel %vm811_vm0, %v3240_v5, 0.0 }
 0x149   : > { %v868_v9 = vsub.f32 %v3155_v26, %v838_v8  ;;  %909 = vadd.xlane.f32.xlu1 %v908_v12 }
 0x14a   : > { %v894_v25 = vmul.f32 1.442695, %v869_v7 }
 0x14b   : > { %v892_v13 = vmul.f32 1.442695, %v868_v9 }
 0x14c   : > { %2909 = vpow2.f32 %v894_v25 }
 0x14d   : > { %2911 = vpow2.f32 %v892_v13 }
 0x14f   : > { %v823_v14 = vpop.xlane.xlu0 %822 }
 0x150   : > { %v863_v15 = vsub.f32 %v3171_v47, %v823_v14 }
 0x152   : > { %v3249_v16 = vpop.eup %2907  ;;  %v882_v17 = vmul.f32 1.442695, %v863_v15 }
 0x153   : > { %v844_v18 = vpop.xlane.xlu1 %843  ;;  %v914_v34 = vsel %vm811_vm0, %v3249_v16, 0.0 }
 0x154   : > { %2913 = vpow2.f32 %v882_v17  ;;  %v870_v26 = vsub.f32 %v3177_v53, %v844_v18  ;;  %915 = vadd.xlane.f32.xlu1 %v914_v34 }
 0x156   : > { %v3254_v20 = vpop.eup %2909  ;;  %v896_v21 = vmul.f32 1.442695, %v870_v26 }
 0x157   : > { %v3256_v22 = vpop.eup %2911  ;;  %v935_v23 = vsel %vm811_vm0, %v3254_v20, 0.0 }
 0x158   : > { %2915 = vpow2.f32 %v896_v21  ;;  %936 = vadd.xlane.f32.xlu1 %v935_v23  ;;  %v932_v47 = vsel %vm811_vm0, %v3256_v22, 0.0 }
 0x159   : > { %933 = vadd.xlane.f32.xlu0 %v932_v47 }
 0x15b   : > { %v826_v24 = vpop.xlane.xlu0 %825 }
 0x15c   : > { %v864_v27 = vsub.f32 %v3185_v1, %v826_v24  ;;  %v3008_v1 = vmov 0  }
 0x15d   : > { %2858 = vset.pattern.permute.xlu1 %v3008_v1 }
 0x15e   : > { %v3263_v28 = vpop.eup %2913  ;;  %v884_v53 = vmul.f32 1.442695, %v864_v27 }
 0x15f   : > { %v847_v31 = vpop.xlane.xlu1 %846  ;;  %v917_v33 = vsel %vm811_vm0, %v3263_v28, 0.0 }
 0x160   : > { %2917 = vpow2.f32 %v884_v53  ;;  %v871_v35 = vsub.f32 %v3191_v10, %v847_v31  ;;  %918 = vadd.xlane.f32.xlu0 %v917_v33 }
 0x162   : > { %v3268_v36 = vpop.eup %2915  ;;  %v898_v37 = vmul.f32 1.442695, %v871_v35 }
 0x163   : > { %v938_v38 = vsel %vm811_vm0, %v3268_v36, 0.0 }
 0x164   : > { %2919 = vpow2.f32 %v898_v37  ;;  %939 = vadd.xlane.f32.xlu1 %v938_v38 }
 0x167   : > { %v829_v41 = vpop.xlane.xlu0 %828 }
 0x168   : > { %v865_v42 = vsub.f32 %v3199_v19, %v829_v41 }
 0x16a   : > { %v3275_v43 = vpop.eup %2917  ;;  %v886_v10 = vmul.f32 1.442695, %v865_v42 }
 0x16b   : > { %v850_v29 = vpop.xlane.xlu1 %849  ;;  %v920_v44 = vsel %vm811_vm0, %v3275_v43, 0.0 }
 0x16c   : > { %2921 = vpow2.f32 %v886_v10  ;;  %v872_v46 = vsub.f32 %v3205_v32, %v850_v29  ;;  %921 = vadd.xlane.f32.xlu0 %v920_v44 }
 0x16e   : > { %v3280_v48 = vpop.eup %2919  ;;  %v900_v49 = vmul.f32 1.442695, %v872_v46 }
 0x16f   : > { %v832_v50 = vpop.xlane.xlu0 %831  ;;  %v941_v51 = vsel %vm811_vm0, %v3280_v48, 0.0 }
 0x170   : > { %2923 = vpow2.f32 %v900_v49  ;;  %v866_v19 = vsub.f32 %v3211_v40, %v832_v50  ;;  %942 = vadd.xlane.f32.xlu1 %v941_v51 }
 0x172   : > { %v888_v52 = vmul.f32 1.442695, %v866_v19 }
 0x173   : > { %v853_v56 = vpop.xlane.xlu1 %852  ;;  %v835_v57 = vpop.xlane.xlu0 %834 }
 0x174   : > { %2925 = vpow2.f32 %v888_v52  ;;  %v873_v61 = vsub.f32 %v3219_v30, %v853_v56  ;;  %v867_v32 = vsub.f32 %v3217_v45, %v835_v57 }
 0x176   : > { %v3287_v58 = vpop.eup %2921  ;;  %v902_v59 = vmul.f32 1.442695, %v873_v61  ;;  %v890_v60 = vmul.f32 1.442695, %v867_v32 }
 0x177   : > { %v856_v62 = vpop.xlane.xlu1 %855  ;;  %v859_v63 = vpop.xlane.xlu0 %858  ;;  %v923_v0 = vsel %vm811_vm0, %v3287_v58, 0.0 }
 0x178   : > { %2927 = vpow2.f32 %v902_v59  ;;  %v874_v40 = vsub.f32 %v3229_v55, %v856_v62  ;;  %v875_v2 = vsub.f32 %v3227_v54, %v859_v63  ;;  %924 = vadd.xlane.f32.xlu0 %v923_v0 }
 0x179   : > { %2929 = vpow2.f32 %v890_v60 }
 0x17a   : > { %v3293_v4 = vpop.eup %2923  ;;  %v904_v30 = vmul.f32 1.442695, %v874_v40  ;;  %v906_v45 = vmul.f32 1.442695, %v875_v2  ;;  %v3009_v2 = vmov 1  }
 0x17b   : > { %v944_v6 = vsel %vm811_vm0, %v3293_v4, 0.0 }
 0x17c   : > { %2931 = vpow2.f32 %v904_v30  ;;  %945 = vadd.xlane.f32.xlu1 %v944_v6  ;;  %v1810_v30 = vld [vmem:[%s4006_s3 + $0x20] sm:$0xff] }
 0x17d   : > { %2933 = vpow2.f32 %v906_v45  ;;  %v1811_v45 = vld [vmem:[%s4006_s3 + $0x28] sm:$0xff] }
 0x17e   : > { %v3297_v8 = vpop.eup %2925  ;;  %v2809_v6 = vpack.c.bf16 %v1811_v45, %v1810_v30  ;;  %v2115_v45 = vld [vmem:[%s4006_s3 + $0x30] sm:$0xff] }
 0x17f   : > { %v926_v11 = vsel %vm811_vm0, %v3297_v8, 0.0 }
 0x180   : > { %927 = vadd.xlane.f32.xlu0 %v926_v11  ;;  %2810 = vmatprep.subr.bf16.mxu0 %v2809_v6 }
 0x181   : > { %2812 = vmatpush3.bf16.msra.mxu0 %v2809_v6 }
 0x182   : > { %v3301_v55 = vpop.eup %2927 }
 0x183   : > { %v3303_v54 = vpop.eup %2929  ;;  %v947_v7 = vsel %vm811_vm0, %v3301_v55, 0.0 }
 0x184   : > { %948 = vadd.xlane.f32.xlu1 %v947_v7  ;;  %v929_v9 = vsel %vm811_vm0, %v3303_v54, 0.0 }
 0x185   : > { %930 = vadd.xlane.f32.xlu0 %v929_v9 }
 0x186   : > { %v3309_v12 = vpop.eup %2931 }
 0x187   : > { %v3311_v25 = vpop.eup %2933  ;;  %v950_v13 = vsel %vm811_vm0, %v3309_v12, 0.0 }
 0x188   : > { %951 = vadd.xlane.f32.xlu1 %v950_v13  ;;  %v953_v14 = vsel %vm811_vm0, %v3311_v25, 0.0 }
 0x189   : > { %954 = vadd.xlane.f32.xlu0 %v953_v14 }
 0x1d5   : > { %v913_v17 = vpop.xlane.xlu0 %912 }
 0x1d6   : > { %v910_v15 = vpop.xlane.xlu1 %909 }
 0x1d7   : > { %2935 = vrcp.f32 %v910_v15 }
 0x1d8   : > { %2937 = vrcp.f32 %v913_v17 }
 0x1e1   : > { %v2936_v18 = vpop.eup %2935  ;;  %v916_v34 = vpop.xlane.xlu1 %915 }
 0x1e2   : > { %2939 = vrcp.f32 %v916_v34  ;;  %v3318_v26 = vmul.f32 %v2936_v18, %v3240_v5  ;;  %v2938_v21 = vpop.eup %2937  ;;  %v3471_v18 = vld [vmem:[%s3456_s26 + $0x10] sm:$0xff] }
 0x1e3   : > { %v3323_v24 = vmul.f32 %v2938_v21, %v3238_v3  ;;  %v1391_v34 = vld [vmem:[%s4006_s3 + $0x10] sm:$0xff]  ;;  %v1392_v21 = vld [vmem:[%s4006_s3 + $0x18] sm:$0xff] }
 0x1e4   : > { %990 = vperm.xlu1 %2858, %v3318_v26   ;;  %1619 = vperm.xlu0 %2859, %v3318_v26  }
 0x1e5   : > { %v937_v23 = vpop.xlane.xlu1 %936 }
 0x1e6   : > { %v934_v47 = vpop.xlane.xlu0 %933 }
 0x1e7   : > { %2941 = vrcp.f32 %v934_v47 }
 0x1e8   : > { %2860 = vset.pattern.permute.xlu1 %v3007_v39  ;;  %2943 = vrcp.f32 %v937_v23  ;;  %v2801_v23 = vpack.c.bf16 %v1392_v21, %v1391_v34 }
 0x1e9   : > { %1623 = vperm.xlu1 %2860, %v3323_v24  }
 0x1ea   : > { %2802 = vmatprep.subr.bf16.mxu1 %v2801_v23 }
 0x1eb   : > { %2804 = vmatpush3.bf16.msra.mxu1 %v2801_v23  ;;  %v3546_v23 = vld [vmem:[%s3456_s26 + $0x60] sm:$0xff] }
 0x1ec   : > { %v2940_v27 = vpop.eup %2939 }
 0x1ed   : > { %v919_v53 = vpop.xlane.xlu0 %918  ;;  %v3328_v5 = vmul.f32 %v2940_v27, %v3249_v16  ;;  %v3482_v27 = vld [vmem:[%s3456_s26 + $0x48] sm:$0xff] }
 0x1ee   : > { %2945 = vrcp.f32 %v919_v53 }
 0x1ef   : > { %1627 = vperm.xlu1 %2860, %v3328_v5  }
 0x1f1   : > { %v2942_v31 = vpop.eup %2941  ;;  %v940_v33 = vpop.xlane.xlu1 %939 }
 0x1f2   : > { %v3332_v35 = vmul.f32 %v2942_v31, %v3256_v22  ;;  %2947 = vrcp.f32 %v940_v33  ;;  %v2944_v3 = vpop.eup %2943 }
 0x1f3   : > { %v3336_v37 = vmul.f32 %v2944_v3, %v3254_v20 }
 0x1f4   : > { %1651 = vperm.xlu1 %2860, %v3332_v35  }
 0x1f8   : > { %v2946_v38 = vpop.eup %2945  ;;  %1655 = vperm.xlu1 %2860, %v3336_v37  }
 0x1f9   : > { %v3340_v16 = vmul.f32 %v2946_v38, %v3263_v28  ;;  %v922_v39 = vpop.xlane.xlu0 %921  ;;  %v3489_v38 = vld [vmem:[%s3456_s26 + $0x40] sm:$0xff] }
 0x1fa   : > { %2949 = vrcp.f32 %v922_v39 }
 0x1fc   : > { %v2948_v41 = vpop.eup %2947  ;;  %1631 = vperm.xlu1 %2860, %v3340_v16  }
 0x1fd   : > { %v943_v22 = vpop.xlane.xlu1 %942  ;;  %v3344_v42 = vmul.f32 %v2948_v41, %v3268_v36 }
 0x1fe   : > { %2951 = vrcp.f32 %v943_v22 }
 0x200   : > { %1659 = vperm.xlu1 %2860, %v3344_v42  }
 0x204   : > { %v2950_v20 = vpop.eup %2949 }
 0x205   : > { %v3348_v10 = vmul.f32 %v2950_v20, %v3275_v43  ;;  %v925_v29 = vpop.xlane.xlu0 %924 }
 0x206   : > { %2953 = vrcp.f32 %v925_v29 }
 0x207   : > { %1635 = vperm.xlu1 %2860, %v3348_v10  }
 0x208   : > { %v2952_v28 = vpop.eup %2951 }
 0x209   : > { %v946_v44 = vpop.xlane.xlu1 %945  ;;  %v3352_v46 = vmul.f32 %v2952_v28, %v3280_v48 }
 0x20a   : > { %2955 = vrcp.f32 %v946_v44 }
 0x20b   : > { %1663 = vperm.xlu1 %2860, %v3352_v46  }
 0x20d   : > { %v928_v36 = vpop.xlane.xlu0 %927 }
 0x20e   : > { %2957 = vrcp.f32 %v928_v36  ;;  %v3500_v36 = vld [vmem:[%s3456_s26 + $0x18] sm:$0xff] }
 0x210   : > { %v2954_v49 = vpop.eup %2953 }
 0x211   : > { %v3356_v50 = vmul.f32 %v2954_v49, %v3287_v58  ;;  %v949_v43 = vpop.xlane.xlu1 %948  ;;  %v3503_v49 = vld [vmem:[%s3456_s26 + $0x20] sm:$0xff] }
 0x212   : > { %2959 = vrcp.f32 %v949_v43  ;;  %v931_v51 = vpop.xlane.xlu0 %930 }
 0x213   : > { %2961 = vrcp.f32 %v931_v51  ;;  %1639 = vperm.xlu0 %2859, %v3356_v50  }
 0x214   : > { %v2956_v19 = vpop.eup %2955 }
 0x215   : > { %v952_v52 = vpop.xlane.xlu1 %951  ;;  %v3360_v48 = vmul.f32 %v2956_v19, %v3293_v4  ;;  %v3010_v4 = vmov 3   ;;  %v3507_v19 = vld [vmem:[%s3456_s26 + $0x50] sm:$0xff] }
 0x216   : > { %2963 = vrcp.f32 %v952_v52  ;;  %v955_v56 = vpop.xlane.xlu0 %954 }
 0x217   : > { %2965 = vrcp.f32 %v955_v56  ;;  %1667 = vperm.xlu1 %2860, %v3360_v48  }
 0x218   : > { %v2958_v57 = vpop.eup %2957 }
 0x219   : > { %v3364_v61 = vmul.f32 %v2958_v57, %v3297_v8  ;;  %v3512_v57 = vld [vmem:[%s3456_s26 + $0x58] sm:$0xff] }
 0x21b   : > { %1643 = vperm.xlu0 %2859, %v3364_v61  }
 0x21c   : > { %v2960_v32 = vpop.eup %2959 }
 0x21d   : > { %v2962_v58 = vpop.eup %2961  ;;  %v3368_v59 = vmul.f32 %v2960_v32, %v3301_v55  ;;  %v4013_v55 = vmov 4  }
 0x21e   : > { %v3371_v60 = vmul.f32 %v2962_v58, %v3303_v54 }
 0x21f   : > { %1671 = vperm.xlu1 %2860, %v3368_v59  }
 0x220   : > { %v2964_v62 = vpop.eup %2963  ;;  %1647 = vperm.xlu0 %2859, %v3371_v60  }
 0x221   : > { %v2966_v63 = vpop.eup %2965  ;;  %v3376_v0 = vmul.f32 %v2964_v62, %v3309_v12  ;;  %v3460_v12 = vld [vmem:[%s3456_s26 + $0x8] sm:$0xff] }
 0x222   : > { %v3379_v40 = vmul.f32 %v2966_v63, %v3311_v25  ;;  %v3464_v25 = vld [vmem:[%s3456_s26] sm:$0xff] }
 0x223   : > { %1675 = vperm.xlu1 %2860, %v3376_v0  }
 0x224   : > { %1679 = vperm.xlu0 %2859, %v3379_v40  }
 0x227   : > { %2861 = vset.pattern.permute.xlu1 %v3009_v2 }
 0x228   : > { %2862 = vset.pattern.permute.xlu0 %v3009_v2  ;;  %1200 = vperm.xlu1 %2861, %v3318_v26  }
 0x229   : > { %1204 = vperm.xlu0 %2862, %v3323_v24  }
 0x22c   : > { %2863 = vset.pattern.permute.xlu1 %v3010_v4 }
 0x22d   : > { %1208 = vperm.xlu0 %2862, %v3328_v5   ;;  %1924 = vperm.xlu1 %2863, %v3318_v26  }
 0x231   : > { %1236 = vperm.xlu0 %2862, %v3336_v37   ;;  %1928 = vperm.xlu1 %2863, %v3323_v24  }
 0x235   : > { %2866 = vset.pattern.permute.xlu0 %v3010_v4  ;;  %2864 = vset.pattern.permute.xlu1 %v3009_v2 }
 0x236   : > { %1956 = vperm.xlu0 %2866, %v3332_v35   ;;  %1232 = vperm.xlu1 %2864, %v3332_v35  }
 0x23a   : > { %2868 = vset.pattern.permute.xlu0 %v3009_v2  ;;  %2865 = vset.pattern.permute.xlu1 %v3010_v4 }
 0x23b   : > { %1240 = vperm.xlu0 %2868, %v3344_v42   ;;  %1932 = vperm.xlu1 %2865, %v3328_v5  }
 0x23f   : > { %1216 = vperm.xlu0 %2868, %v3348_v10   ;;  %1960 = vperm.xlu1 %2865, %v3336_v37  }
 0x243   : > { %2871 = vset.pattern.permute.xlu0 %v3010_v4  ;;  %2867 = vset.pattern.permute.xlu1 %v3009_v2 }
 0x244   : > { %1940 = vperm.xlu0 %2871, %v3348_v10   ;;  %1212 = vperm.xlu1 %2867, %v3340_v16  }
 0x248   : > { %2874 = vset.pattern.permute.xlu0 %v3009_v2  ;;  %2869 = vset.pattern.permute.xlu1 %v3010_v4 }
 0x249   : > { %1248 = vperm.xlu0 %2874, %v3360_v48   ;;  %1936 = vperm.xlu1 %2869, %v3340_v16  }
 0x24d   : > { %1224 = vperm.xlu0 %2874, %v3364_v61   ;;  %1964 = vperm.xlu1 %2869, %v3344_v42  }
 0x251   : > { %2877 = vset.pattern.permute.xlu0 %v3010_v4  ;;  %2870 = vset.pattern.permute.xlu1 %v3009_v2 }
 0x252   : > { %1948 = vperm.xlu0 %2877, %v3364_v61   ;;  %1244 = vperm.xlu1 %2870, %v3352_v46  }
 0x256   : > { %2880 = vset.pattern.permute.xlu0 %v3009_v2  ;;  %2872 = vset.pattern.permute.xlu1 %v3010_v4 }
 0x257   : > { %1256 = vperm.xlu0 %2880, %v3376_v0   ;;  %1968 = vperm.xlu1 %2872, %v3352_v46  }
 0x25b   : > { %1260 = vperm.xlu0 %2880, %v3379_v40   ;;  %2873 = vset.pattern.permute.xlu1 %v3009_v2 }
 0x25c   : > { %1220 = vperm.xlu1 %2873, %v3356_v50  }
 0x25f   : > { %2882 = vset.pattern.permute.xlu0 %v3008_v1 }
 0x260   : > { %995 = vperm.xlu0 %2882, %v3323_v24   ;;  %2875 = vset.pattern.permute.xlu1 %v3010_v4 }
 0x261   : > { %1944 = vperm.xlu1 %2875, %v3356_v50  }
 0x263   : > { %v3433_v8 = vpop.permute.xlu1 %990  ;;  %v1620_v13 = vpop.permute.xlu0 %1619 }
 0x264   : > { %4021 = vst [vmem:[#allocation2_spill] sm:$0xff] %v3433_v8  ;;  %1000 = vperm.xlu0 %2882, %v3328_v5   ;;  %v1682_v17 = vmul.f32 %v1620_v13, %v3464_v25 }
 0x265   : > { %1972 = vperm.xlu1 %2875, %v3360_v48  }
 0x266   : > { %v1698_v33 = vsel %vm1084_vm1, %v1682_v17, 0.0 }
 0x267   : > { %v1699_v41 = vrot.slane %v1698_v33, 4 }
 0x268   : > { %1035 = vperm.xlu0 %2882, %v3336_v37   ;;  %v1624_v11 = vpop.permute.xlu1 %1623 }
 0x269   : > { %2876 = vset.pattern.permute.xlu1 %v3009_v2  ;;  %v1683_v15 = vmul.f32 %v1624_v11, %v3460_v12 }
 0x26a   : > { %1252 = vperm.xlu1 %2876, %v3368_v59  }
 0x26b   : > { %v1705_v47 = vsel %vm1084_vm1, %v1683_v15, 0.0  ;;  %v2562_v15 = vld [vmem:[%s3526_s16] sm:$0xff] }
 0x26c   : > { %2886 = vset.pattern.permute.xlu0 %v4013_v55  ;;  %v1706_v3 = vrot.slane %v1705_v47, 4 }
 0x26d   : > { %2261 = vperm.xlu0 %2886, %v3332_v35  }
 0x26e   : > { %v1628_v54 = vpop.permute.xlu1 %1627  ;;  %2878 = vset.pattern.permute.xlu1 %v3010_v4  ;;  %v1707_v29 = vadd.f32 %v1706_v3, %v1705_v47 }
 0x26f   : > { %1976 = vperm.xlu1 %2878, %v3368_v59   ;;  %v1684_v53 = vmul.f32 %v1628_v54, %v3471_v18 }
 0x270   : > { %v1708_v52 = vrot.slane %v1707_v29, 2 }
 0x271   : > { %2888 = vset.pattern.permute.xlu0 %v3008_v1  ;;  %v1712_v22 = vsel %vm1084_vm1, %v1684_v53, 0.0 }
 0x272   : > { %1040 = vperm.xlu0 %2888, %v3344_v42   ;;  %v1713_v44 = vrot.slane %v1712_v22, 4  ;;  %v1709_v6 = vadd.f32 %v1708_v52, %v1707_v29 }
 0x273   : > { %v1652_v7 = vpop.permute.xlu1 %1651  ;;  %2879 = vset.pattern.permute.xlu1 %v3009_v2  ;;  %v3520_v2 = vld [vmem:[%s3456_s26 + $0x28] sm:$0xff] }
 0x274   : > { %1228 = vperm.xlu1 %2879, %v3371_v60   ;;  %v1710_v3 = vrot.slane %v1709_v6, 1 }
 0x276   : > { %1010 = vperm.xlu0 %2888, %v3348_v10  }
 0x277   : > { %v1656_v9 = vpop.permute.xlu1 %1655 }
 0x278   : > { %2881 = vset.pattern.permute.xlu1 %v3010_v4  ;;  %v1691_v39 = vmul.f32 %v1656_v9, %v3482_v27 }
 0x279   : > { %1952 = vperm.xlu1 %2881, %v3371_v60  }
 0x27a   : > { %2891 = vset.pattern.permute.xlu0 %v4013_v55  ;;  %v1761_v28 = vsel %vm1084_vm1, %v1691_v39, 0.0 }
 0x27b   : > { %2245 = vperm.xlu0 %2891, %v3348_v10   ;;  %v1632_v14 = vpop.permute.xlu1 %1631  ;;  %v1690_v10 = vmul.f32 %v1652_v7, %v3489_v38  ;;  %v1762_v51 = vrot.slane %v1761_v28, 4 }
 0x27c   : > { %v1685_v56 = vmul.f32 %v1632_v14, %v3500_v36 }
 0x27d   : > { %1980 = vperm.xlu1 %2881, %v3376_v0   ;;  %v1754_v43 = vsel %vm1084_vm1, %v1690_v10, 0.0  ;;  %v1763_v4 = vadd.f32 %v1762_v51, %v1761_v28 }
 0x27e   : > { %v1755_v62 = vrot.slane %v1754_v43, 4  ;;  %v1719_v11 = vsel %vm1084_vm1, %v1685_v56, 0.0  ;;  %v1711_v56 = vadd.f32 %v1710_v3, %v1709_v6 }
 0x27f   : > { %2894 = vset.pattern.permute.xlu0 %v3008_v1  ;;  %v1660_v31 = vpop.permute.xlu1 %1659  ;;  %v1764_v47 = vrot.slane %v1763_v4, 2  ;;  %v1720_v53 = vrot.slane %v1719_v11, 4 }
 0x280   : > { %1050 = vperm.xlu0 %2894, %v3360_v48   ;;  %v1692_v63 = vmul.f32 %v1660_v31, %v3507_v19  ;;  %v1756_v34 = vadd.f32 %v1755_v62, %v1754_v43 }
 0x281   : > { %1984 = vperm.xlu1 %2881, %v3379_v40   ;;  %v1765_v43 = vadd.f32 %v1764_v47, %v1763_v4  ;;  %v1721_v51 = vadd.f32 %v1720_v53, %v1719_v11  ;;  %v3562_v4 = vld [vmem:[%s3456_s26 + $0x68] sm:$0xff] }
 0x282   : > { %v1768_v21 = vsel %vm1084_vm1, %v1692_v63, 0.0  ;;  %v1757_v28 = vrot.slane %v1756_v34, 2  ;;  %4022 = vst [vmem:[#allocation3_spill] sm:$0xff] %v3562_v4 }
 0x283   : > { %v1766_v11 = vrot.slane %v1765_v43, 1 }
 0x284   : > { %1020 = vperm.xlu0 %2894, %v3364_v61  }
 0x285   : > { %2883 = vset.pattern.permute.xlu1 %v4013_v55 }
 0x286   : > { %2229 = vperm.xlu1 %2883, %v3318_v26   ;;  %v1636_v20 = vpop.permute.xlu1 %1635  ;;  %v1700_v26 = vadd.f32 %v1699_v41, %v1698_v33 }
 0x287   : > { %v1686_v32 = vmul.f32 %v1636_v20, %v3503_v49  ;;  %v1769_v20 = vrot.slane %v1768_v21, 4 }
 0x288   : > { %2897 = vset.pattern.permute.xlu0 %v4013_v55  ;;  %v1701_v58 = vrot.slane %v1700_v26, 2 }
 0x289   : > { %2253 = vperm.xlu0 %2897, %v3364_v61   ;;  %v1714_v61 = vadd.f32 %v1713_v44, %v1712_v22  ;;  %v1726_v13 = vsel %vm1084_vm1, %v1686_v32, 0.0  ;;  %v1770_v62 = vadd.f32 %v1769_v20, %v1768_v21 }
 0x28a   : > { %2233 = vperm.xlu1 %2883, %v3323_v24   ;;  %v1664_v24 = vpop.permute.xlu1 %1663  ;;  %v1702_v17 = vadd.f32 %v1701_v58, %v1700_v26  ;;  %v1727_v39 = vrot.slane %v1726_v13, 4  ;;  %v3554_v26 = vld [vmem:[%s3456_s26 + $0x30] sm:$0xff] }
 0x28b   : > { %v1693_v30 = vmul.f32 %v1664_v24, %v3512_v57  ;;  %v1715_v9 = vrot.slane %v1714_v61, 2  ;;  %v1771_v47 = vrot.slane %v1770_v62, 2 }
 0x28c   : > { %v1703_v29 = vrot.slane %v1702_v17, 1  ;;  %v1728_v24 = vadd.f32 %v1727_v39, %v1726_v13  ;;  %v3567_v13 = vld [vmem:[%s3456_s26 + $0x38] sm:$0xff] }
 0x28d   : > { %2900 = vset.pattern.permute.xlu0 %v3008_v1  ;;  %v1775_v31 = vsel %vm1084_vm1, %v1693_v30, 0.0  ;;  %v1716_v22 = vadd.f32 %v1715_v9, %v1714_v61  ;;  %4023 = vst [vmem:[#allocation4_spill] sm:$0xff] %v3567_v13 }
 0x28e   : > { %1060 = vperm.xlu0 %2900, %v3376_v0   ;;  %2884 = vset.pattern.permute.xlu1 %v3008_v1  ;;  %v1776_v44 = vrot.slane %v1775_v31, 4 }
 0x28f   : > { %1030 = vperm.xlu1 %2884, %v3332_v35   ;;  %v2116_v35 = vld [vmem:[%s4006_s3 + $0x38] sm:$0xff]  ;;  %v1717_v58 = vrot.slane %v1716_v22, 1 }
 0x290   : > { %v3537_v7 = vpack.c.bf16 %v2116_v35, %v2115_v45  ;;  %v1704_v45 = vadd.f32 %v1703_v29, %v1702_v17  ;;  %v1777_v35 = vadd.f32 %v1776_v44, %v1775_v31  ;;  %v3585_v44 = vld [vmem:[%s3456_s26 + $0x78] sm:$0xff] }
 0x291   : > { %v3572_v21 = vadd.f32 %v1717_v58, %v1716_v22  ;;  %4024 = vst [vmem:[#allocation5_spill] sm:$0xff] %v3585_v44 }
 0x292   : > { %1065 = vperm.xlu0 %2900, %v3379_v40   ;;  %v1640_v54 = vpop.permute.xlu0 %1639  ;;  %2814 = vmatprep.subr.bf16.mxu0 %v3537_v7  ;;  %v1778_v39 = vrot.slane %v1777_v35, 2 }
 0x293   : > { %v1687_v14 = vmul.f32 %v1640_v54, %v3520_v2  ;;  %2885 = vset.pattern.permute.xlu1 %v4013_v55  ;;  %v1722_v54 = vrot.slane %v1721_v51, 2 }
 0x294   : > { %2237 = vperm.xlu1 %2885, %v3328_v5  }
 0x295   : > { %v1733_v33 = vsel %vm1084_vm1, %v1687_v14, 0.0  ;;  %v3570_v14 = vsel %vm1409_vm2, %v1711_v56, %v1704_v45  ;;  %v1723_v29 = vadd.f32 %v1722_v54, %v1721_v51  ;;  %v1779_v54 = vadd.f32 %v1778_v39, %v1777_v35 }
 0x296   : > { %v1668_v41 = vpop.permute.xlu1 %1667  ;;  %2566 = vperm.xlu0 %2900, %v2562_v15   ;;  %v1734_v10 = vrot.slane %v1733_v33, 4  ;;  %v1729_v15 = vrot.slane %v1728_v24, 2 }
 0x297   : > { %v1694_v5 = vmul.f32 %v1668_v41, %v3546_v23 }
 0x298   : > { %2265 = vperm.xlu1 %2885, %v3336_v37   ;;  %v1735_v63 = vadd.f32 %v1734_v10, %v1733_v33  ;;  %v3558_v37 = vadd.f32 %v1757_v28, %v1756_v34  ;;  %v3578_v10 = vld [vmem:[%s3456_s26 + $0x70] sm:$0xff] }
 0x299   : > { %v1782_v52 = vsel %vm1084_vm1, %v1694_v5, 0.0  ;;  %v3580_v5 = vadd.f32 %v1766_v11, %v1765_v43  ;;  %v1772_v43 = vadd.f32 %v1771_v47, %v1770_v62 }
 0x29a   : > { %v1783_v61 = vrot.slane %v1782_v52, 4  ;;  %v1644_v32 = vpop.permute.xlu0 %1643  ;;  %v1736_v53 = vrot.slane %v1735_v63, 2  ;;  %v1759_v3 = vrot.slane %v3558_v37, 1 }
 0x29b   : > { %v1688_v30 = vmul.f32 %v1644_v32, %v3554_v26  ;;  %v1773_v35 = vrot.slane %v1772_v43, 1 }
 0x29c   : > { %2887 = vset.pattern.permute.xlu1 %v3008_v1  ;;  %v1784_v6 = vadd.f32 %v1783_v61, %v1782_v52  ;;  %v1730_v52 = vadd.f32 %v1729_v15, %v1728_v24  ;;  %v1724_v15 = vrot.slane %v1723_v29, 1 }
 0x29d   : > { %v1740_v9 = vsel %vm1084_vm1, %v1688_v30, 0.0  ;;  %1005 = vperm.xlu1 %2887, %v3340_v16   ;;  %v1737_v30 = vadd.f32 %v1736_v53, %v1735_v63  ;;  %v1774_v8 = vadd.f32 %v1773_v35, %v1772_v43 }
 0x29e   : > { %v1741_v17 = vrot.slane %v1740_v9, 4  ;;  %v1672_v34 = vpop.permute.xlu1 %1671  ;;  %v1785_v22 = vrot.slane %v1784_v6, 2 }
 0x29f   : > { %v1695_v31 = vmul.f32 %v1672_v34, %v3562_v4  ;;  %v1648_v33 = vpop.permute.xlu0 %1647  ;;  %v1738_v53 = vrot.slane %v1737_v30, 1 }
 0x2a0   : > { %v1742_v41 = vadd.f32 %v1741_v17, %v1740_v9  ;;  %v1689_v20 = vmul.f32 %v1648_v33, %v3567_v13  ;;  %v1786_v34 = vadd.f32 %v1785_v22, %v1784_v6 }
 0x2a1   : > { %v1789_v28 = vsel %vm1084_vm1, %v1695_v31, 0.0  ;;  %2889 = vset.pattern.permute.xlu1 %v4013_v55  ;;  %v1739_v13 = vadd.f32 %v1738_v53, %v1737_v30 }
 0x2a2   : > { %v1743_v56 = vrot.slane %v1742_v41, 2  ;;  %v1790_v61 = vrot.slane %v1789_v28, 4  ;;  %v1747_v32 = vsel %vm1084_vm1, %v1689_v20, 0.0  ;;  %v1676_v58 = vpop.permute.xlu1 %1675  ;;  %2241 = vperm.xlu1 %2889, %v3340_v16   ;;  %v1731_v16 = vrot.slane %v1730_v52, 1 }
 0x2a3   : > { %v1748_v51 = vrot.slane %v1747_v32, 4  ;;  %v1696_v45 = vmul.f32 %v1676_v58, %v3578_v10  ;;  %v1680_v11 = vpop.permute.xlu0 %1679  ;;  %v1787_v58 = vrot.slane %v1786_v34, 1 }
 0x2a4   : > { %v1744_v9 = vadd.f32 %v1743_v56, %v1742_v41  ;;  %v1791_v17 = vadd.f32 %v1790_v61, %v1789_v28  ;;  %v1697_v24 = vmul.f32 %v1680_v11, %v3585_v44  ;;  %v1780_v28 = vrot.slane %v1779_v54, 1 }
 0x2a5   : > { %v1749_v31 = vadd.f32 %v1748_v51, %v1747_v32  ;;  %v1796_v33 = vsel %vm1084_vm1, %v1696_v45, 0.0  ;;  %v1725_v32 = vadd.f32 %v1724_v15, %v1723_v29  ;;  %v1760_v11 = vadd.f32 %v1759_v3, %v3558_v37 }
 0x2a6   : > { %v1792_v62 = vrot.slane %v1791_v17, 2  ;;  %v1797_v63 = vrot.slane %v1796_v33, 4  ;;  %v1803_v47 = vsel %vm1084_vm1, %v1697_v24, 0.0  ;;  %2269 = vperm.xlu1 %2889, %v3344_v42   ;;  %v1745_v56 = vrot.slane %v1744_v9, 1 }
 0x2a7   : > { %v1750_v39 = vrot.slane %v1749_v31, 2  ;;  %v1804_v41 = vrot.slane %v1803_v47, 4  ;;  %v1201_v20 = vpop.permute.xlu1 %1200  ;;  %v1732_v24 = vadd.f32 %v1731_v16, %v1730_v52  ;;  %v1829_v37 = vsel %vm1411_vm3, %v3572_v21, %v3570_v14 }
 0x2a8   : > { %v1793_v6 = vadd.f32 %v1792_v62, %v1791_v17  ;;  %v1798_v22 = vadd.f32 %v1797_v63, %v1796_v33  ;;  %v1205_v61 = vpop.permute.xlu0 %1204  ;;  %v1781_v17 = vadd.f32 %v1780_v28, %v1779_v54  ;;  %v1746_v15 = vadd.f32 %v1745_v56, %v1744_v9 }
 0x2a9   : > { %v1751_v51 = vadd.f32 %v1750_v39, %v1749_v31  ;;  %v1805_v45 = vadd.f32 %v1804_v41, %v1803_v47  ;;  %v1835_v3 = vsel %vm1409_vm2, %v3580_v5, %v1760_v11  ;;  %v1788_v52 = vadd.f32 %v1787_v58, %v1786_v34 }
 0x2aa   : > { %v1794_v55 = vrot.slane %v1793_v6, 1  ;;  %v1799_v42 = vrot.slane %v1798_v22, 2  ;;  %2890 = vset.pattern.permute.xlu1 %v3008_v1  ;;  %v1830_v43 = vsel %vm1413_vm4, %v1725_v32, %v1829_v37  ;;  %v1836_v47 = vsel %vm1411_vm3, %v1774_v8, %v1835_v3 }
 0x2ab   : > { %v1806_v4 = vrot.slane %v1805_v45, 2  ;;  %1045 = vperm.xlu1 %2890, %v3352_v46   ;;  %v1752_v44 = vrot.slane %v1751_v51, 1  ;;  %v1831_v54 = vsel %vm1415_vm5, %v1732_v24, %v1830_v43  ;;  %v4025_v9 = vmov 4  }
 0x2ac   : > { %v1800_v33 = vadd.f32 %v1799_v42, %v1798_v22  ;;  %v1209_v62 = vpop.permute.xlu0 %1208  ;;  %v1925_v29 = vpop.permute.xlu1 %1924  ;;  %v1795_v30 = vadd.f32 %v1794_v55, %v1793_v6  ;;  %v1832_v53 = vsel %vm1417_vm6, %v1739_v13, %v1831_v54  ;;  %v1837_v14 = vsel %vm1413_vm4, %v1781_v17, %v1836_v47 }
 0x2ad   : > { %v1807_v31 = vadd.f32 %v1806_v4, %v1805_v45  ;;  %v1753_v63 = vadd.f32 %v1752_v44, %v1751_v51  ;;  %v1833_v5 = vsel %vm1419_vm7, %v1746_v15, %v1832_v53  ;;  %v1838_v39 = vsel %vm1415_vm5, %v1788_v52, %v1837_v14 }
 0x2ae   : > { %v1801_v16 = vrot.slane %v1800_v33, 1  ;;  %v1839_v8 = vsel %vm1417_vm6, %v1795_v30, %v1838_v39  ;;  %v1263_v56 = vmul.f32 %v1201_v20, %v3464_v25  ;;  %v1264_v6 = vmul.f32 %v1205_v61, %v3460_v12 }
 0x2af   : > { %v1808_v35 = vrot.slane %v1807_v31, 1  ;;  %2892 = vset.pattern.permute.xlu1 %v4025_v9  ;;  %v1834_v44 = vsel %vm1421_vm8, %v1753_v63, %v1833_v5  ;;  %v1265_v22 = vmul.f32 %v1209_v62, %v3471_v18  ;;  %v1987_v20 = vmul.f32 %v1925_v29, %v3464_v25 }
 0x2b0   : > { %v1802_v21 = vadd.f32 %v1801_v16, %v1800_v33  ;;  %v1237_v4 = vpop.permute.xlu0 %1236  ;;  %v1929_v34 = vpop.permute.xlu1 %1928  ;;  %2273 = vperm.xlu1 %2892, %v3352_v46   ;;  %2784 = vmatprep.mubr.msk.f32.mxu0 %vm1084_vm1, %v1834_v44  ;;  %v1279_v58 = vsel %vm1084_vm1, %v1263_v56, 0.0  ;;  %v1286_v51 = vsel %vm1084_vm1, %v1264_v6, 0.0 }
 0x2b1   : > { %v1809_v55 = vadd.f32 %v1808_v35, %v1807_v31  ;;  %v1280_v11 = vrot.slane %v1279_v58, 4  ;;  %v1293_v24 = vsel %vm1084_vm1, %v1265_v22, 0.0  ;;  %v1287_v61 = vrot.slane %v1286_v51, 4 }
 0x2b2   : > { %v1840_v13 = vsel %vm1419_vm7, %v1802_v21, %v1839_v8  ;;  %v1294_v42 = vrot.slane %v1293_v24, 4  ;;  %v2003_v33 = vsel %vm1084_vm1, %v1987_v20, 0.0  ;;  %v1272_v15 = vmul.f32 %v1237_v4, %v3482_v27 }
 0x2b3   : > { %v1841_v41 = vsel %vm1421_vm8, %v1809_v55, %v1840_v13  ;;  %v1281_v17 = vadd.f32 %v1280_v11, %v1279_v58  ;;  %v1288_v62 = vadd.f32 %v1287_v61, %v1286_v51  ;;  %v1988_v25 = vmul.f32 %v1929_v34, %v3460_v12 }
 0x2b4   : > { %2893 = vset.pattern.permute.xlu1 %v3008_v1  ;;  %2785 = vmatmul.mubr.msk.f32.vlgmr.msra.gmra.mrb[0].mxu0 %vm1084_vm1, %v1841_v41  ;;  %v1295_v29 = vadd.f32 %v1294_v42, %v1293_v24  ;;  %v1342_v30 = vsel %vm1084_vm1, %v1272_v15, 0.0 }
 0x2b5   : > { %v1233_v28 = vpop.permute.xlu1 %1232  ;;  %1015 = vperm.xlu1 %2893, %v3356_v50   ;;  %v1957_v46 = vpop.permute.xlu0 %1956  ;;  %2816 = vmatpush3.bf16.msra.mxu0 %v3537_v7  ;;  %v1282_v52 = vrot.slane %v1281_v17, 2  ;;  %v1289_v43 = vrot.slane %v1288_v62, 2  ;;  %v2010_v54 = vsel %vm1084_vm1, %v1988_v25, 0.0  ;;  %v1343_v21 = vrot.slane %v1342_v30, 4 }
 0x2b6   : > { %v1271_v37 = vmul.f32 %v1233_v28, %v3489_v38  ;;  %v1296_v12 = vrot.slane %v1295_v29, 2  ;;  %v1995_v14 = vmul.f32 %v1957_v46, %v3489_v38  ;;  %v2011_v44 = vrot.slane %v2010_v54, 4 }
 0x2b7   : > { %v1283_v34 = vadd.f32 %v1282_v52, %v1281_v17  ;;  %v1290_v55 = vadd.f32 %v1289_v43, %v1288_v62  ;;  %v1344_v38 = vadd.f32 %v1343_v21, %v1342_v30 }
 0x2b8   : > { %v1335_v16 = vsel %vm1084_vm1, %v1271_v37, 0.0  ;;  %v1297_v8 = vadd.f32 %v1296_v12, %v1295_v29 }
 0x2b9   : > { %2895 = vset.pattern.permute.xlu1 %v4025_v9  ;;  %v1336_v5 = vrot.slane %v1335_v16, 4  ;;  %v1284_v6 = vrot.slane %v1283_v34, 1  ;;  %v1291_v22 = vrot.slane %v1290_v55, 1  ;;  %v1345_v17 = vrot.slane %v1344_v38, 2 }
 0x2ba   : > { %v1933_v32 = vpop.permute.xlu1 %1932  ;;  %2249 = vperm.xlu1 %2895, %v3356_v50   ;;  %v1241_v45 = vpop.permute.xlu0 %1240  ;;  %v1298_v24 = vrot.slane %v1297_v8, 1 }
 0x2bb   : > { %v1273_v31 = vmul.f32 %v1241_v45, %v3507_v19  ;;  %v1989_v63 = vmul.f32 %v1933_v32, %v3471_v18  ;;  %v1337_v28 = vadd.f32 %v1336_v5, %v1335_v16  ;;  %v2012_v32 = vadd.f32 %v2011_v44, %v2010_v54 }
 0x2bc   : > { %v1285_v37 = vadd.f32 %v1284_v6, %v1283_v34 }
 0x2bd   : > { %v1349_v4 = vsel %vm1084_vm1, %v1273_v31, 0.0  ;;  %v2017_v18 = vsel %vm1084_vm1, %v1989_v63, 0.0  ;;  %v2013_v25 = vrot.slane %v2012_v32, 2  ;;  %v1299_v31 = vadd.f32 %v1298_v24, %v1297_v8 }
 0x2be   : > { %v3629_v7 = vpop.permute.xlu1 %1960  ;;  %2277 = vperm.xlu1 %2895, %v3360_v48   ;;  %v1217_v50 = vpop.permute.xlu0 %1216  ;;  %v2004_v48 = vrot.slane %v2003_v33, 4  ;;  %v1350_v41 = vrot.slane %v1349_v4, 4  ;;  %v2018_v46 = vrot.slane %v2017_v18, 4 }
 0x2bf   : > { %v1267_v51 = vmul.f32 %v1217_v50, %v3503_v49  ;;  %v1996_v15 = vmul.f32 %v3629_v7, %v3482_v27  ;;  %v1292_v50 = vadd.f32 %v1291_v22, %v1290_v55  ;;  %v1346_v7 = vadd.f32 %v1345_v17, %v1344_v38  ;;  %v1197_v17 = vld [vmem:[%s4006_s3] sm:$0xff] }
 0x2c0   : > { %v2005_v53 = vadd.f32 %v2004_v48, %v2003_v33  ;;  %v1351_v61 = vadd.f32 %v1350_v41, %v1349_v4  ;;  %v1338_v33 = vrot.slane %v1337_v28, 2  ;;  %v2019_v62 = vadd.f32 %v2018_v46, %v2017_v18 }
 0x2c1   : > { %v1307_v29 = vsel %vm1084_vm1, %v1267_v51, 0.0  ;;  %v2066_v63 = vsel %vm1084_vm1, %v1996_v15, 0.0  ;;  %v1347_v44 = vrot.slane %v1346_v7, 1 }
 0x2c2   : > { %2896 = vset.pattern.permute.xlu1 %v3008_v1  ;;  %v2006_v13 = vrot.slane %v2005_v53, 2  ;;  %v1352_v30 = vrot.slane %v1351_v61, 2  ;;  %v2020_v16 = vrot.slane %v2019_v62, 2  ;;  %v2067_v34 = vrot.slane %v2066_v63, 4 }
 0x2c3   : > { %v1213_v3 = vpop.permute.xlu1 %1212  ;;  %1055 = vperm.xlu1 %2896, %v3368_v59   ;;  %v1941_v47 = vpop.permute.xlu0 %1940 }
 0x2c4   : > { %v1991_v45 = vmul.f32 %v1941_v47, %v3503_v49  ;;  %v1266_v11 = vmul.f32 %v1213_v3, %v3500_v36  ;;  %v2007_v20 = vadd.f32 %v2006_v13, %v2005_v53  ;;  %v1410_v53 = vsel %vm1409_vm2, %v1292_v50, %v1285_v37 }
 0x2c5   : > { %v1353_v4 = vadd.f32 %v1352_v30, %v1351_v61  ;;  %v2021_v8 = vadd.f32 %v2020_v16, %v2019_v62  ;;  %v3674_v46 = vsel %vm1411_vm3, %v1299_v31, %v1410_v53  ;;  %v2068_v51 = vadd.f32 %v2067_v34, %v2066_v63 }
 0x2c6   : > { %v2031_v48 = vsel %vm1084_vm1, %v1991_v45, 0.0  ;;  %v2008_v43 = vrot.slane %v2007_v20, 1 }
 0x2c7   : > { %2898 = vset.pattern.permute.xlu1 %v4025_v9  ;;  %v2032_v47 = vrot.slane %v2031_v48, 4 }
 0x2c8   : > { %v1937_v35 = vpop.permute.xlu1 %1936  ;;  %2281 = vperm.xlu1 %2898, %v3368_v59   ;;  %v2059_v59 = vsel %vm1084_vm1, %v1995_v14, 0.0  ;;  %v1249_v56 = vpop.permute.xlu0 %1248  ;;  %v2014_v14 = vadd.f32 %v2013_v25, %v2012_v32  ;;  %v2009_v5 = vadd.f32 %v2008_v43, %v2007_v20  ;;  %v2022_v20 = vrot.slane %v2021_v8, 1 }
 0x2c9   : > { %v2060_v58 = vrot.slane %v2059_v59, 4  ;;  %v1990_v49 = vmul.f32 %v1937_v35, %v3500_v36  ;;  %v1275_v27 = vmul.f32 %v1249_v56, %v3546_v23  ;;  %v1308_v36 = vrot.slane %v1307_v29, 4 }
 0x2ca   : > { %v2033_v41 = vadd.f32 %v2032_v47, %v2031_v48  ;;  %v2015_v56 = vrot.slane %v2014_v14, 1  ;;  %v2069_v48 = vrot.slane %v2068_v51, 2  ;;  %v2023_v31 = vadd.f32 %v2022_v20, %v2021_v8 }
 0x2cb   : > { %v2061_v3 = vadd.f32 %v2060_v58, %v2059_v59  ;;  %v2024_v12 = vsel %vm1084_vm1, %v1990_v49, 0.0  ;;  %v1363_v55 = vsel %vm1084_vm1, %v1275_v27, 0.0  ;;  %v1354_v58 = vrot.slane %v1353_v4, 1 }
 0x2cc   : > { %v3648_v39 = vpop.permute.xlu1 %1964  ;;  %2899 = vset.pattern.permute.xlu1 %v3008_v1  ;;  %v1225_v52 = vpop.permute.xlu0 %1224  ;;  %v2025_v13 = vrot.slane %v2024_v12, 4  ;;  %v1364_v22 = vrot.slane %v1363_v55, 4  ;;  %v2034_v62 = vrot.slane %v2033_v41, 2 }
 0x2cd   : > { %1025 = vperm.xlu1 %2899, %v3371_v60   ;;  %v2062_v21 = vrot.slane %v2061_v3, 2  ;;  %v1269_v45 = vmul.f32 %v1225_v52, %v3554_v26 }
 0x2ce   : > { %v2026_v61 = vadd.f32 %v2025_v13, %v2024_v12  ;;  %v1365_v50 = vadd.f32 %v1364_v22, %v1363_v55 }
 0x2cf   : > { %v3676_v6 = vadd.f32 %v2062_v21, %v2061_v3  ;;  %v3703_v21 = vadd.f32 %v2069_v48, %v2068_v51 }
 0x2d0   : > { %v2027_v43 = vrot.slane %v2026_v61, 2  ;;  %v1366_v63 = vrot.slane %v1365_v50, 2 }
 0x2d1   : > { %v1245_v42 = vpop.permute.xlu1 %1244  ;;  %2901 = vset.pattern.permute.xlu1 %v4025_v9  ;;  %v1300_v9 = vsel %vm1084_vm1, %v1266_v11, 0.0  ;;  %v1949_v59 = vpop.permute.xlu0 %1948  ;;  %v1348_v11 = vadd.f32 %v1347_v44, %v1346_v7  ;;  %v2035_v7 = vadd.f32 %v2034_v62, %v2033_v41  ;;  %v2071_v62 = vrot.slane %v3703_v21, 1 }
 0x2d2   : > { %2257 = vperm.xlu1 %2901, %v3371_v60   ;;  %v1339_v60 = vadd.f32 %v1338_v33, %v1337_v28  ;;  %v1301_v35 = vrot.slane %v1300_v9, 4  ;;  %v1274_v32 = vmul.f32 %v1245_v42, %v3512_v57  ;;  %v1198_v33 = vld [vmem:[%s4006_s3 + $0x8] sm:$0xff]  ;;  %v2028_v55 = vadd.f32 %v2027_v43, %v2026_v61 }
 0x2d3   : > { %v3689_v37 = vpack.c.bf16 %v1198_v33, %v1197_v17  ;;  %v4027_v61 = vld [vmem:[#allocation3_spill] sm:$0xff] }
 0x2d4   : > { %v1340_v18 = vrot.slane %v1339_v60, 1  ;;  %v1302_v38 = vadd.f32 %v1301_v35, %v1300_v9  ;;  %v1356_v25 = vsel %vm1084_vm1, %v1274_v32, 0.0  ;;  %v1321_v9 = vsel %vm1084_vm1, %v1269_v45, 0.0  ;;  %v4026_v32 = vld [vmem:[#allocation5_spill] sm:$0xff]  ;;  %v2563_v33 = vld [vmem:[%s3526_s16 + $0x8] sm:$0xff] }
 0x2d5   : > { %2806 = vmatprep.subr.bf16.mxu1 %v3689_v37  ;;  %v1357_v16 = vrot.slane %v1356_v25, 4 }
 0x2d6   : > { %v3666_v54 = vpop.permute.xlu1 %1968  ;;  %2285 = vperm.xlu1 %2901, %v3376_v0   ;;  %v1309_v0 = vadd.f32 %v1308_v36, %v1307_v29  ;;  %v1341_v24 = vadd.f32 %v1340_v18, %v1339_v60  ;;  %v1303_v15 = vrot.slane %v1302_v38, 2  ;;  %v1257_v49 = vpop.permute.xlu0 %1256  ;;  %v1355_v29 = vadd.f32 %v1354_v58, %v1353_v4 }
 0x2d7   : > { %v1322_v36 = vrot.slane %v1321_v9, 4  ;;  %v1277_v35 = vmul.f32 %v1257_v49, %v3578_v10  ;;  %v1993_v4 = vmul.f32 %v1949_v59, %v3554_v26  ;;  %v2421_v26 = vld [vmem:[%s4006_s3 + $0x48] sm:$0xff]  ;;  %v1367_v59 = vadd.f32 %v1366_v63, %v1365_v50 }
 0x2d8   : > { %v1310_v42 = vrot.slane %v1309_v0, 2  ;;  %v1304_v60 = vadd.f32 %v1303_v15, %v1302_v38  ;;  %v1358_v38 = vadd.f32 %v1357_v16, %v1356_v25 }
 0x2d9   : > { %v1377_v22 = vsel %vm1084_vm1, %v1277_v35, 0.0 }
 0x2da   : > { %2289 = vperm.xlu1 %2901, %v3379_v40   ;;  %v1997_v40 = vmul.f32 %v3648_v39, %v3507_v19  ;;  %v2016_v19 = vadd.f32 %v2015_v56, %v2014_v14  ;;  %v2064_v39 = vrot.slane %v3676_v6, 1  ;;  %v1311_v27 = vadd.f32 %v1310_v42, %v1309_v0  ;;  %v1261_v44 = vpop.permute.xlu0 %1260 }
 0x2db   : > { %v1221_v28 = vpop.permute.xlu1 %1220  ;;  %v2036_v0 = vrot.slane %v2035_v7, 1  ;;  %v1305_v41 = vrot.slane %v1304_v60, 1  ;;  %v1278_v58 = vmul.f32 %v1261_v44, %v4026_v32  ;;  %v1359_v15 = vrot.slane %v1358_v38, 2 }
 0x2dc   : > { %v2073_v52 = vsel %vm1084_vm1, %v1997_v40, 0.0  ;;  %v1268_v30 = vmul.f32 %v1221_v28, %v3520_v2  ;;  %v2133_v53 = vsel %vm1409_vm2, %v2016_v19, %v2009_v5  ;;  %v1312_v13 = vrot.slane %v1311_v27, 1  ;;  %v2420_v5 = vld [vmem:[%s4006_s3 + $0x40] sm:$0xff] }
 0x2dd   : > { %v2074_v47 = vrot.slane %v2073_v52, 4  ;;  %v2134_v34 = vsel %vm1411_vm3, %v2023_v31, %v2133_v53  ;;  %v1323_v28 = vadd.f32 %v1322_v36, %v1321_v9  ;;  %v3718_v40 = vpack.c.bf16 %v2421_v26, %v2420_v5 }
 0x2de   : > { %2902 = vset.pattern.permute.xlu1 %v3008_v1  ;;  %v1423_v1 = vsel %vm1409_vm2, %v1348_v11, %v1341_v24  ;;  %v1314_v18 = vsel %vm1084_vm1, %v1268_v30, 0.0  ;;  %v2029_v11 = vrot.slane %v2028_v55, 1  ;;  %v1998_v24 = vmul.f32 %v3666_v54, %v3512_v57 }
 0x2df   : > { %v3701_v14 = vsel %vm1411_vm3, %v1355_v29, %v1423_v1  ;;  %v2075_v56 = vadd.f32 %v2074_v47, %v2073_v52  ;;  %v1315_v51 = vrot.slane %v1314_v18, 4  ;;  %v1313_v42 = vadd.f32 %v1312_v13, %v1311_v27  ;;  %2818 = vmatprep.subr.bf16.mxu0 %v3718_v40  ;;  %2571 = vperm.xlu1 %2902, %v2563_v33   ;;  %v3730_v29 = vpop.permute.xlu0 %995 }
 0x2e0   : > { %v1945_v3 = vpop.permute.xlu1 %1944  ;;  %v1378_v19 = vrot.slane %v1377_v22, 4  ;;  %v3727_v50 = vadd.f32 %v2036_v0, %v2035_v7  ;;  %v1306_v25 = vadd.f32 %v1305_v41, %v1304_v60  ;;  %v1324_v49 = vrot.slane %v1323_v28, 2 }
 0x2e1   : > { %v1992_v8 = vmul.f32 %v1945_v3, %v3520_v2  ;;  %v2045_v2 = vsel %vm1084_vm1, %v1993_v4, 0.0  ;;  %v1384_v57 = vsel %vm1084_vm1, %v1278_v58, 0.0  ;;  %v1316_v54 = vadd.f32 %v1315_v51, %v1314_v18 }
 0x2e2   : > { %v2046_v3 = vrot.slane %v2045_v2, 4  ;;  %v1368_v52 = vrot.slane %v1367_v59, 1  ;;  %v2030_v1 = vadd.f32 %v2029_v11, %v2028_v55  ;;  %v2076_v31 = vrot.slane %v2075_v56, 2 }
 0x2e3   : > { %v2038_v20 = vsel %vm1084_vm1, %v1992_v8, 0.0  ;;  %v2080_v43 = vsel %vm1084_vm1, %v1998_v24, 0.0  ;;  %v1360_v27 = vadd.f32 %v1359_v15, %v1358_v38  ;;  %v1379_v7 = vadd.f32 %v1378_v19, %v1377_v22 }
 0x2e4   : > { %v1973_v12 = vpop.permute.xlu1 %1972  ;;  %v2039_v48 = vrot.slane %v2038_v20, 4  ;;  %v1325_v63 = vadd.f32 %v1324_v49, %v1323_v28  ;;  %v2047_v36 = vadd.f32 %v2046_v3, %v2045_v2  ;;  %v1385_v47 = vrot.slane %v1384_v57, 4 }
 0x2e5   : > { %v1999_v60 = vmul.f32 %v1973_v12, %v3546_v23  ;;  %v1317_v53 = vrot.slane %v1316_v54, 2  ;;  %v1414_v55 = vsel %vm1413_vm4, %v1306_v25, %v3674_v46  ;;  %v1369_v18 = vadd.f32 %v1368_v52, %v1367_v59  ;;  %v3741_v12 = vpop.permute.xlu0 %1000 }
 0x2e6   : > { %v2040_v4 = vadd.f32 %v2039_v48, %v2038_v20  ;;  %v2135_v8 = vsel %vm1413_vm4, %v2030_v1, %v2134_v34  ;;  %v3739_v13 = vadd.f32 %v2076_v31, %v2075_v56  ;;  %v2081_v0 = vrot.slane %v2080_v43, 4  ;;  %v4028_v34 = vld [vmem:[#allocation4_spill] sm:$0xff] }
 0x2e7   : > { %v1361_v41 = vrot.slane %v1360_v27, 1  ;;  %v1380_v23 = vrot.slane %v1379_v7, 2  ;;  %v2087_v38 = vsel %vm1084_vm1, %v1999_v60, 0.0  ;;  %v1326_v28 = vrot.slane %v1325_v63, 1 }
 0x2e8   : > { %v2048_v22 = vrot.slane %v2047_v36, 2  ;;  %v1386_v2 = vadd.f32 %v1385_v47, %v1384_v57  ;;  %v1318_v46 = vadd.f32 %v1317_v53, %v1316_v54  ;;  %v2041_v59 = vrot.slane %v2040_v4, 2 }
 0x2e9   : > { %v1253_v45 = vpop.permute.xlu1 %1252  ;;  %v2082_v11 = vadd.f32 %v2081_v0, %v2080_v43  ;;  %v2088_v24 = vrot.slane %v2087_v38, 4  ;;  %v1416_v20 = vsel %vm1415_vm5, %v1313_v42, %v1414_v55  ;;  %v1327_v57 = vadd.f32 %v1326_v28, %v1325_v63  ;;  %v3749_v52 = vpop.permute.xlu0 %1035 }
 0x2ea   : > { %v1276_v17 = vmul.f32 %v1253_v45, %v4027_v61  ;;  %v2078_v45 = vrot.slane %v3739_v13, 1  ;;  %v1387_v19 = vrot.slane %v1386_v2, 2  ;;  %v2049_v54 = vadd.f32 %v2048_v22, %v2047_v36 }
 0x2eb   : > { %v1319_v48 = vrot.slane %v1318_v46, 1  ;;  %v2083_v31 = vrot.slane %v2082_v11, 2  ;;  %v2089_v43 = vadd.f32 %v2088_v24, %v2087_v38 }
 0x2ec   : > { %v1370_v9 = vsel %vm1084_vm1, %v1276_v17, 0.0  ;;  %v1381_v17 = vadd.f32 %v1380_v23, %v1379_v7  ;;  %v1388_v63 = vadd.f32 %v1387_v19, %v1386_v2 }
 0x2ed   : > { %v1371_v16 = vrot.slane %v1370_v9, 4  ;;  %v2090_v23 = vrot.slane %v2089_v43, 2 }
 0x2ee   : > { %v1977_v30 = vpop.permute.xlu1 %1976  ;;  %v1382_v7 = vrot.slane %v1381_v17, 1  ;;  %v1389_v22 = vrot.slane %v1388_v63, 1 }
 0x2ef   : > { %v2000_v35 = vmul.f32 %v1977_v30, %v4027_v61  ;;  %v1372_v44 = vadd.f32 %v1371_v16, %v1370_v9  ;;  %v1362_v61 = vadd.f32 %v1361_v41, %v1360_v27  ;;  %v2042_v9 = vadd.f32 %v2041_v59, %v2040_v4 }
 0x2f0   : > { %v2136_v30 = vsel %vm1415_vm5, %v3727_v50, %v2135_v8  ;;  %v2050_v4 = vrot.slane %v2049_v54, 1  ;;  %v2084_v41 = vadd.f32 %v2083_v31, %v2082_v11  ;;  %v1383_v38 = vadd.f32 %v1382_v7, %v1381_v17 }
 0x2f1   : > { %v1373_v5 = vrot.slane %v1372_v44, 2  ;;  %v2094_v58 = vsel %vm1084_vm1, %v2000_v35, 0.0  ;;  %v1425_v27 = vsel %vm1413_vm4, %v1362_v61, %v3701_v14  ;;  %v2043_v55 = vrot.slane %v2042_v9, 1  ;;  %v3758_v14 = vpop.permute.xlu0 %2261 }
 0x2f2   : > { %v2095_v33 = vrot.slane %v2094_v58, 4  ;;  %v1426_v28 = vsel %vm1415_vm5, %v1369_v18, %v1425_v27  ;;  %v2051_v11 = vadd.f32 %v2050_v4, %v2049_v54  ;;  %v2091_v24 = vadd.f32 %v2090_v23, %v2089_v43 }
 0x2f3   : > { %v1229_v26 = vpop.permute.xlu1 %1228  ;;  %v1374_v51 = vadd.f32 %v1373_v5, %v1372_v44  ;;  %v1320_v44 = vadd.f32 %v1319_v48, %v1318_v46 }
 0x2f4   : > { %v1270_v56 = vmul.f32 %v1229_v26, %v4028_v34  ;;  %v2096_v60 = vadd.f32 %v2095_v33, %v2094_v58  ;;  %v2092_v43 = vrot.slane %v2091_v24, 1 }
 0x2f5   : > { %v1375_v25 = vrot.slane %v1374_v51, 1 }
 0x2f6   : > { %v1328_v15 = vsel %vm1084_vm1, %v1270_v56, 0.0  ;;  %v2097_v5 = vrot.slane %v2096_v60, 2  ;;  %v1418_v56 = vsel %vm1417_vm6, %v1320_v44, %v1416_v20  ;;  %v2093_v4 = vadd.f32 %v2092_v43, %v2091_v24 }
 0x2f7   : > { %v1329_v49 = vrot.slane %v1328_v15, 4  ;;  %v1376_v36 = vadd.f32 %v1375_v25, %v1374_v51  ;;  %v2044_v51 = vadd.f32 %v2043_v55, %v2042_v9  ;;  %v1390_v25 = vadd.f32 %v1389_v22, %v1388_v63 }
 0x2f8   : > { %v1953_v3 = vpop.permute.xlu1 %1952  ;;  %v2098_v33 = vadd.f32 %v2097_v5, %v2096_v60  ;;  %v1420_v48 = vsel %vm1419_vm7, %v1327_v57, %v1418_v56  ;;  %v2085_v9 = vrot.slane %v2084_v41, 1  ;;  %v2072_v57 = vadd.f32 %v2071_v62, %v3703_v21 }
 0x2f9   : > { %v1994_v1 = vmul.f32 %v1953_v3, %v4028_v34  ;;  %v1330_v42 = vadd.f32 %v1329_v49, %v1328_v15  ;;  %v1427_v46 = vsel %vm1417_vm6, %v1376_v36, %v1426_v28  ;;  %v2137_v31 = vsel %vm1417_vm6, %v2044_v51, %v2136_v30  ;;  %v4029_v28 = vld [vmem:[#allocation2_spill] sm:$0xff] }
 0x2fa   : > { %v1428_v19 = vsel %vm1419_vm7, %v1383_v38, %v1427_v46  ;;  %v2099_v60 = vrot.slane %v2098_v33, 1  ;;  %v2079_v63 = vadd.f32 %v2078_v45, %v3739_v13  ;;  %v2138_v36 = vsel %vm1419_vm7, %v2051_v11, %v2137_v31 }
 0x2fb   : > { %v2052_v16 = vsel %vm1084_vm1, %v1994_v1, 0.0  ;;  %v1331_v47 = vrot.slane %v1330_v42, 2  ;;  %v1429_v7 = vsel %vm1421_vm8, %v1390_v25, %v1428_v19  ;;  %v3823_v19 = vld [vmem:[%s3456_s26 + $0x50] sm:$0xff] }
 0x2fc   : > { %v2053_v35 = vrot.slane %v2052_v16, 4  ;;  %v1981_v53 = vpop.permute.xlu1 %1980  ;;  %v2100_v45 = vadd.f32 %v2099_v60, %v2098_v33 }
 0x2fd   : > { %v2001_v0 = vmul.f32 %v1981_v53, %v3578_v10  ;;  %v1332_v50 = vadd.f32 %v1331_v47, %v1330_v42  ;;  %v2065_v47 = vadd.f32 %v2064_v39, %v3676_v6 }
 0x2fe   : > { %v2054_v8 = vadd.f32 %v2053_v35, %v2052_v16  ;;  %v2086_v35 = vadd.f32 %v2085_v9, %v2084_v41  ;;  %v2972_v9 = vld [vmem:[%s3456_s26 + $0x40] sm:$0xff] }
 0x2ff   : > { %v2101_v26 = vsel %vm1084_vm1, %v2001_v0, 0.0  ;;  %v1333_v34 = vrot.slane %v1332_v50, 1  ;;  %v2140_v13 = vsel %vm1409_vm2, %v2072_v57, %v2065_v47 }
 0x300   : > { %v2055_v2 = vrot.slane %v2054_v8, 2  ;;  %v2102_v58 = vrot.slane %v2101_v26, 4  ;;  %v1985_v59 = vpop.permute.xlu1 %1984  ;;  %v2141_v55 = vsel %vm1411_vm3, %v2079_v63, %v2140_v13  ;;  %v3839_v13 = vld [vmem:[%s3456_s26 + $0x60] sm:$0xff] }
 0x301   : > { %v2002_v10 = vmul.f32 %v1985_v59, %v4026_v32  ;;  %v1334_v18 = vadd.f32 %v1333_v34, %v1332_v50  ;;  %v1041_v32 = vpop.permute.xlu0 %1040  ;;  %v2142_v39 = vsel %vm1413_vm4, %v2086_v35, %v2141_v55  ;;  %v2967_v50 = vld [vmem:[%s3456_s26 + $0x8] sm:$0xff] }
 0x302   : > { %v2056_v61 = vadd.f32 %v2055_v2, %v2054_v8  ;;  %v2103_v17 = vadd.f32 %v2102_v58, %v2101_v26  ;;  %v2143_v41 = vsel %vm1415_vm5, %v2093_v4, %v2142_v39  ;;  %v1069_v8 = vmul.f32 %v2967_v50, %v3730_v29  ;;  %v2968_v26 = vld [vmem:[%s3456_s26] sm:$0xff]  ;;  %v3802_v2 = vld [vmem:[%s3456_s26 + $0x10] sm:$0xff] }
 0x303   : > { %v2108_v15 = vsel %vm1084_vm1, %v2002_v10, 0.0  ;;  %v1422_v20 = vsel %vm1421_vm8, %v1334_v18, %v1420_v48  ;;  %v2144_v5 = vsel %vm1417_vm6, %v2100_v45, %v2143_v41  ;;  %v1068_v22 = vmul.f32 %v2968_v26, %v4029_v28 }
 0x304   : > { %v2057_v49 = vrot.slane %v2056_v61, 1  ;;  %v2104_v3 = vrot.slane %v2103_v17, 2  ;;  %v2109_v1 = vrot.slane %v2108_v15, 4  ;;  %2770 = vmatprep.mubr.msk.f32.mxu1 %vm1084_vm1, %v1422_v20  ;;  %v1070_v58 = vmul.f32 %v3802_v2, %v3741_v12 }
 0x305   : > { %v3769_v54 = vpop.permute.xlu1 %2229  ;;  %2771 = vmatmul.mubr.msk.f32.vlgmr.msra.gmra.mrb[0].mxu1 %vm1084_vm1, %v1429_v7  ;;  %v1092_v29 = vsel %vm1084_vm1, %v1069_v8, 0.0  ;;  %v1085_v34 = vsel %vm1084_vm1, %v1068_v22, 0.0 }
 0x306   : > { %v2058_v42 = vadd.f32 %v2057_v49, %v2056_v61  ;;  %v2105_v27 = vadd.f32 %v2104_v3, %v2103_v17  ;;  %v2110_v16 = vadd.f32 %v2109_v1, %v2108_v15  ;;  %2808 = vmatpush3.bf16.msra.mxu1 %v3689_v37  ;;  %v1011_v37 = vpop.permute.xlu0 %1010  ;;  %v1099_v56 = vsel %vm1084_vm1, %v1070_v58, 0.0  ;;  %v3816_v61 = vld [vmem:[%s3456_s26 + $0x48] sm:$0xff] }
 0x307   : > { %v1093_v12 = vrot.slane %v1092_v29, 4  ;;  %v1086_v11 = vrot.slane %v1085_v34, 4  ;;  %v1100_v24 = vrot.slane %v1099_v56, 4  ;;  %v1077_v17 = vmul.f32 %v3816_v61, %v3749_v52 }
 0x308   : > { %v2106_v30 = vrot.slane %v2105_v27, 1  ;;  %v2111_v21 = vrot.slane %v2110_v16, 2  ;;  %v2139_v53 = vsel %vm1421_vm8, %v2058_v42, %v2138_v36  ;;  %v2300_v1 = vmul.f32 %v2972_v9, %v3758_v14  ;;  %v2973_v42 = vld [vmem:[%s3456_s26 + $0x20] sm:$0xff] }
 0x309   : > { %v3786_v62 = vpop.permute.xlu1 %2233  ;;  %2791 = vmatprep.mubr.msk.f32.mxu0 %vm1084_vm1, %v2139_v53  ;;  %v1094_v18 = vadd.f32 %v1093_v12, %v1092_v29  ;;  %v1087_v25 = vadd.f32 %v1086_v11, %v1085_v34  ;;  %v1101_v49 = vadd.f32 %v1100_v24, %v1099_v56  ;;  %v1148_v3 = vsel %vm1084_vm1, %v1077_v17, 0.0 }
 0x30a   : > { %v2112_v44 = vadd.f32 %v2111_v21, %v2110_v16  ;;  %v2107_v6 = vadd.f32 %v2106_v30, %v2105_v27  ;;  %v2246_v46 = vpop.permute.xlu0 %2245  ;;  %v1149_v31 = vrot.slane %v1148_v3, 4  ;;  %v1072_v27 = vmul.f32 %v2973_v42, %v1011_v37  ;;  %v2975_v37 = vld [vmem:[%s3456_s26 + $0x30] sm:$0xff] }
 0x30b   : > { %v1095_v52 = vrot.slane %v1094_v18, 2  ;;  %v1088_v7 = vrot.slane %v1087_v25, 2  ;;  %v2296_v57 = vmul.f32 %v2973_v42, %v2246_v46  ;;  %v2364_v60 = vsel %vm1084_vm1, %v2300_v1, 0.0 }
 0x30c   : > { %v2113_v0 = vrot.slane %v2112_v44, 1  ;;  %v2145_v59 = vsel %vm1419_vm7, %v2107_v6, %v2144_v5  ;;  %v1150_v36 = vadd.f32 %v1149_v31, %v1148_v3  ;;  %v1113_v14 = vsel %vm1084_vm1, %v1072_v27, 0.0 }
 0x30d   : > { %v1096_v30 = vadd.f32 %v1095_v52, %v1094_v18  ;;  %v1089_v47 = vadd.f32 %v1088_v7, %v1087_v25  ;;  %v2336_v21 = vsel %vm1084_vm1, %v2296_v57, 0.0  ;;  %v2365_v4 = vrot.slane %v2364_v60, 4  ;;  %v3853_v52 = vld [vmem:[%s3456_s26 + $0x70] sm:$0xff] }
 0x30e   : > { %v3794_v23 = vpop.permute.xlu1 %1030  ;;  %v2114_v38 = vadd.f32 %v2113_v0, %v2112_v44  ;;  %v1051_v33 = vpop.permute.xlu0 %1050  ;;  %v2292_v55 = vmul.f32 %v2968_v26, %v3769_v54  ;;  %v1114_v39 = vrot.slane %v1113_v14, 4  ;;  %v2293_v0 = vmul.f32 %v2967_v50, %v3786_v62 }
 0x30f   : > { %v1080_v45 = vmul.f32 %v3839_v13, %v1051_v33  ;;  %v1097_v8 = vrot.slane %v1096_v30, 1  ;;  %v2337_v5 = vrot.slane %v2336_v21, 4  ;;  %v1090_v28 = vrot.slane %v1089_v47, 1 }
 0x310   : > { %v2146_v51 = vsel %vm1421_vm8, %v2114_v38, %v2145_v59  ;;  %v1151_v38 = vrot.slane %v1150_v36, 2  ;;  %v2366_v58 = vadd.f32 %v2365_v4, %v2364_v60  ;;  %v1115_v54 = vadd.f32 %v1114_v39, %v1113_v14 }
 0x311   : > { %2792 = vmatmul.mubr.msk.f32.vlgmr.msra.gmra.mrb[0].mxu0 %vm1084_vm1, %v2146_v51  ;;  %v1169_v59 = vsel %vm1084_vm1, %v1080_v45, 0.0  ;;  %v2308_v51 = vsel %vm1084_vm1, %v2292_v55, 0.0  ;;  %v2315_v26 = vsel %vm1084_vm1, %v2293_v0, 0.0  ;;  %v1098_v62 = vadd.f32 %v1097_v8, %v1096_v30  ;;  %v3872_v55 = vld [vmem:[%s3456_s26 + $0x78] sm:$0xff] }
 0x312   : > { %2820 = vmatpush3.bf16.msra.mxu0 %v3718_v40  ;;  %v1078_v40 = vmul.f32 %v3823_v19, %v1041_v32  ;;  %v1021_v20 = vpop.permute.xlu0 %1020  ;;  %v1102_v32 = vrot.slane %v1101_v49, 2  ;;  %v1152_v50 = vadd.f32 %v1151_v38, %v1150_v36  ;;  %v2338_v56 = vadd.f32 %v2337_v5, %v2336_v21  ;;  %v2978_v38 = vld [vmem:[%s3456_s26 + $0x18] sm:$0xff] }
 0x313   : > { %v3810_v10 = vpop.permute.xlu1 %2237  ;;  %v1074_v44 = vmul.f32 %v2975_v37, %v1021_v20  ;;  %v1170_v24 = vrot.slane %v1169_v59, 4  ;;  %v2309_v33 = vrot.slane %v2308_v51, 4  ;;  %v1076_v18 = vmul.f32 %v2972_v9, %v3794_v23 }
 0x314   : > { %v1155_v43 = vsel %vm1084_vm1, %v1078_v40, 0.0  ;;  %v1103_v35 = vadd.f32 %v1102_v32, %v1101_v49  ;;  %v1091_v40 = vadd.f32 %v1090_v28, %v1089_v47  ;;  %v2367_v49 = vrot.slane %v2366_v58, 2 }
 0x315   : > { %v1156_v16 = vrot.slane %v1155_v43, 4  ;;  %v1127_v46 = vsel %vm1084_vm1, %v1074_v44, 0.0  ;;  %v2316_v3 = vrot.slane %v2315_v26, 4  ;;  %v1116_v20 = vrot.slane %v1115_v54, 2 }
 0x316   : > { %v2254_v53 = vpop.permute.xlu0 %2253  ;;  %v1104_v22 = vrot.slane %v1103_v35, 1  ;;  %v1128_v17 = vrot.slane %v1127_v46, 4  ;;  %v1153_v42 = vrot.slane %v1152_v50, 1  ;;  %v2339_v27 = vrot.slane %v2338_v56, 2 }
 0x317   : > { %v3820_v15 = vpop.permute.xlu1 %2265  ;;  %v1157_v6 = vadd.f32 %v1156_v16, %v1155_v43  ;;  %v2298_v12 = vmul.f32 %v2975_v37, %v2254_v53  ;;  %v1525_v43 = vsel %vm1409_vm2, %v1098_v62, %v1091_v40  ;;  %v1171_v32 = vadd.f32 %v1170_v24, %v1169_v59 }
 0x318   : > { %v1105_v25 = vadd.f32 %v1104_v22, %v1103_v35  ;;  %v1129_v57 = vadd.f32 %v1128_v17, %v1127_v46  ;;  %v2310_v23 = vadd.f32 %v2309_v33, %v2308_v51  ;;  %v1141_v9 = vsel %vm1084_vm1, %v1076_v18, 0.0  ;;  %v3879_v22 = vld [vmem:[%s3456_s26 + $0x58] sm:$0xff] }
 0x319   : > { %v1158_v29 = vrot.slane %v1157_v6, 2  ;;  %v2350_v7 = vsel %vm1084_vm1, %v2298_v12, 0.0  ;;  %v3864_v36 = vadd.f32 %v2367_v49, %v2366_v58  ;;  %v2317_v14 = vadd.f32 %v2316_v3, %v2315_v26  ;;  %v2980_v3 = vld [vmem:[%s3456_s26 + $0x28] sm:$0xff] }
 0x31a   : > { %v1061_v34 = vpop.permute.xlu0 %1060  ;;  %v3862_v30 = vsel %vm1411_vm3, %v1105_v25, %v1525_v43  ;;  %v2294_v47 = vmul.f32 %v3802_v2, %v3810_v10  ;;  %v1117_v21 = vadd.f32 %v1116_v20, %v1115_v54  ;;  %v2351_v53 = vrot.slane %v2350_v7, 4 }
 0x31b   : > { %v1159_v1 = vadd.f32 %v1158_v29, %v1157_v6  ;;  %v1082_v31 = vmul.f32 %v3853_v52, %v1061_v34  ;;  %v3869_v45 = vadd.f32 %v1153_v42, %v1152_v50  ;;  %v2340_v37 = vadd.f32 %v2339_v27, %v2338_v56 }
 0x31c   : > { %v3827_v48 = vpop.permute.xlu1 %1005  ;;  %v1142_v44 = vrot.slane %v1141_v9, 4  ;;  %v1172_v39 = vrot.slane %v1171_v32, 2  ;;  %v1130_v0 = vrot.slane %v1129_v57, 2  ;;  %v2311_v8 = vrot.slane %v2310_v23, 2 }
 0x31d   : > { %v1160_v35 = vrot.slane %v1159_v1, 1  ;;  %v1183_v4 = vsel %vm1084_vm1, %v1082_v31, 0.0  ;;  %v1071_v2 = vmul.f32 %v2978_v38, %v3827_v48  ;;  %v2318_v10 = vrot.slane %v2317_v14, 2 }
 0x31e   : > { %v1066_v60 = vpop.permute.xlu0 %1065  ;;  %v1184_v5 = vrot.slane %v1183_v4, 4  ;;  %v2322_v28 = vsel %vm1084_vm1, %v2294_v47, 0.0  ;;  %v2369_v46 = vrot.slane %v3864_v36, 1  ;;  %v1118_v29 = vrot.slane %v1117_v21, 1 }
 0x31f   : > { %v1083_v6 = vmul.f32 %v3872_v55, %v1066_v60  ;;  %v3883_v51 = vadd.f32 %v1160_v35, %v1159_v1  ;;  %v2352_v54 = vadd.f32 %v2351_v53, %v2350_v7  ;;  %v2341_v26 = vrot.slane %v2340_v37, 1 }
 0x320   : > { %v1143_v34 = vadd.f32 %v1142_v44, %v1141_v9  ;;  %v1173_v50 = vadd.f32 %v1172_v39, %v1171_v32  ;;  %v1131_v56 = vadd.f32 %v1130_v0, %v1129_v57  ;;  %v2323_v12 = vrot.slane %v2322_v28, 4 }
 0x321   : > { %v3834_v63 = vpop.permute.xlu1 %2241  ;;  %v1190_v48 = vsel %vm1084_vm1, %v1083_v6, 0.0  ;;  %v1106_v24 = vsel %vm1084_vm1, %v1071_v2, 0.0  ;;  %v2319_v17 = vadd.f32 %v2318_v10, %v2317_v14  ;;  %v1185_v33 = vadd.f32 %v1184_v5, %v1183_v4 }
 0x322   : > { %v2295_v62 = vmul.f32 %v2978_v38, %v3834_v63  ;;  %v3889_v40 = vadd.f32 %v1118_v29, %v1117_v21  ;;  %v2353_v25 = vrot.slane %v2352_v54, 2  ;;  %v1191_v49 = vrot.slane %v1190_v48, 4 }
 0x323   : > { %v1144_v31 = vrot.slane %v1143_v34, 2  ;;  %v2301_v63 = vmul.f32 %v3816_v61, %v3820_v15  ;;  %v1107_v43 = vrot.slane %v1106_v24, 4  ;;  %v1174_v27 = vrot.slane %v1173_v50, 1 }
 0x324   : > { %v2329_v42 = vsel %vm1084_vm1, %v2295_v62, 0.0  ;;  %v1132_v7 = vrot.slane %v1131_v56, 1  ;;  %v2324_v32 = vadd.f32 %v2323_v12, %v2322_v28  ;;  %v2320_v60 = vrot.slane %v2319_v17, 1 }
 0x325   : > { %v3845_v41 = vpop.permute.xlu1 %2269  ;;  %v1186_v14 = vrot.slane %v1185_v33, 2  ;;  %v1192_v47 = vadd.f32 %v1191_v49, %v1190_v48  ;;  %v2330_v35 = vrot.slane %v2329_v42, 4  ;;  %v3898_v44 = vadd.f32 %v2353_v25, %v2352_v54 }
 0x326   : > { %v1145_v61 = vadd.f32 %v1144_v31, %v1143_v34  ;;  %v2371_v15 = vsel %vm1084_vm1, %v2301_v63, 0.0  ;;  %v1108_v6 = vadd.f32 %v1107_v43, %v1106_v24  ;;  %v3901_v39 = vadd.f32 %v1174_v27, %v1173_v50  ;;  %v2981_v24 = vld [vmem:[%s3456_s26 + $0x68] sm:$0xff] }
 0x327   : > { %v3903_v0 = vadd.f32 %v1132_v7, %v1131_v56  ;;  %v2321_v2 = vadd.f32 %v2320_v60, %v2319_v17  ;;  %v1187_v10 = vadd.f32 %v1186_v14, %v1185_v33  ;;  %v1193_v28 = vrot.slane %v1192_v47, 2 }
 0x328   : > { %v2355_v54 = vrot.slane %v3898_v44, 1  ;;  %v1109_v34 = vrot.slane %v1108_v6, 2  ;;  %v2302_v48 = vmul.f32 %v3823_v19, %v3845_v41 }
 0x329   : > { %v1188_v33 = vrot.slane %v1187_v10, 1  ;;  %v1194_v49 = vadd.f32 %v1193_v28, %v1192_v47 }
 0x32a   : > { %v1046_v11 = vpop.permute.xlu1 %1045  ;;  %v1110_v19 = vadd.f32 %v1109_v34, %v1108_v6  ;;  %v2378_v41 = vsel %vm1084_vm1, %v2302_v48, 0.0 }
 0x32b   : > { %v1079_v58 = vmul.f32 %v3879_v22, %v1046_v11  ;;  %v2312_v11 = vadd.f32 %v2311_v8, %v2310_v23  ;;  %v3895_v23 = vadd.f32 %v2341_v26, %v2340_v37  ;;  %v2325_v37 = vrot.slane %v2324_v32, 2 }
 0x32c   : > { %v1146_v26 = vrot.slane %v1145_v61, 1  ;;  %v3917_v60 = vadd.f32 %v1188_v33, %v1187_v10 }
 0x32d   : > { %v1162_v18 = vsel %vm1084_vm1, %v1079_v58, 0.0  ;;  %v2313_v9 = vrot.slane %v2312_v11, 1  ;;  %v2372_v58 = vrot.slane %v2371_v15, 4  ;;  %v2326_v50 = vadd.f32 %v2325_v37, %v2324_v32 }
 0x32e   : > { %v1163_v57 = vrot.slane %v1162_v18, 4  ;;  %v1147_v31 = vadd.f32 %v1146_v26, %v1145_v61 }
 0x32f   : > { %v3859_v16 = vpop.permute.xlu1 %2273  ;;  %v2314_v38 = vadd.f32 %v2313_v9, %v2312_v11  ;;  %v2327_v43 = vrot.slane %v2326_v50, 1 }
 0x330   : > { %v1164_v8 = vadd.f32 %v1163_v57, %v1162_v18  ;;  %v2303_v12 = vmul.f32 %v3879_v22, %v3859_v16  ;;  %v1532_v6 = vsel %vm1409_vm2, %v3869_v45, %v1147_v31 }
 0x331   : > { %v2438_v17 = vsel %vm1409_vm2, %v2321_v2, %v2314_v38  ;;  %v2328_v37 = vadd.f32 %v2327_v43, %v2326_v50 }
 0x332   : > { %v1165_v56 = vrot.slane %v1164_v8, 2  ;;  %v2385_v16 = vsel %vm1084_vm1, %v2303_v12, 0.0 }
 0x333   : > { %v2386_v61 = vrot.slane %v2385_v16, 4 }
 0x334   : > { %v1016_v59 = vpop.permute.xlu1 %1015 }
 0x335   : > { %v1073_v1 = vmul.f32 %v2980_v3, %v1016_v59  ;;  %v2331_v59 = vadd.f32 %v2330_v35, %v2329_v42  ;;  %v1166_v42 = vadd.f32 %v1165_v56, %v1164_v8  ;;  %v2379_v35 = vrot.slane %v2378_v41, 4 }
 0x336   : > { %v2387_v45 = vadd.f32 %v2386_v61, %v2385_v16 }
 0x337   : > { %v1120_v21 = vsel %vm1084_vm1, %v1073_v1, 0.0  ;;  %v2332_v1 = vrot.slane %v2331_v59, 2 }
 0x338   : > { %v1121_v5 = vrot.slane %v1120_v21, 4  ;;  %v2388_v16 = vrot.slane %v2387_v45, 2 }
 0x339   : > { %v2250_v20 = vpop.permute.xlu1 %2249  ;;  %v2333_v47 = vadd.f32 %v2332_v1, %v2331_v59  ;;  %v2380_v59 = vadd.f32 %v2379_v35, %v2378_v41 }
 0x33a   : > { %v2297_v53 = vmul.f32 %v2980_v3, %v2250_v20  ;;  %v1122_v18 = vadd.f32 %v1121_v5, %v1120_v21  ;;  %v2373_v3 = vadd.f32 %v2372_v58, %v2371_v15  ;;  %v1195_v21 = vrot.slane %v1194_v49, 1 }
 0x33b   : > { %v2334_v58 = vrot.slane %v2333_v47, 1 }
 0x33c   : > { %v2343_v29 = vsel %vm1084_vm1, %v2297_v53, 0.0  ;;  %v1123_v7 = vrot.slane %v1122_v18, 2  ;;  %v2374_v14 = vrot.slane %v2373_v3, 2  ;;  %v1111_v53 = vrot.slane %v1110_v19, 1 }
 0x33d   : > { %v2278_v4 = vpop.permute.xlu1 %2277  ;;  %v2344_v25 = vrot.slane %v2343_v29, 4  ;;  %v3926_v34 = vadd.f32 %v1195_v21, %v1194_v49  ;;  %v2335_v49 = vadd.f32 %v2334_v58, %v2333_v47 }
 0x33e   : > { %v2304_v22 = vmul.f32 %v3839_v13, %v2278_v4  ;;  %v1167_v13 = vrot.slane %v1166_v42, 1  ;;  %v1124_v8 = vadd.f32 %v1123_v7, %v1122_v18  ;;  %v3923_v28 = vadd.f32 %v2374_v14, %v2373_v3 }
 0x33f   : > { %v2345_v32 = vadd.f32 %v2344_v25, %v2343_v29  ;;  %v2982_v29 = vld [vmem:[%s3456_s26 + $0x38] sm:$0xff]  ;;  %v1112_v48 = vadd.f32 %v1111_v53, %v1110_v19  ;;  %v2439_v3 = vsel %vm1411_vm3, %v2328_v37, %v2438_v17 }
 0x340   : > { %v2392_v4 = vsel %vm1084_vm1, %v2304_v22, 0.0  ;;  %v1168_v50 = vadd.f32 %v1167_v13, %v1166_v42  ;;  %v1125_v33 = vrot.slane %v1124_v8, 1  ;;  %v2376_v1 = vrot.slane %v3923_v28, 1 }
 0x341   : > { %v2346_v38 = vrot.slane %v2345_v32, 2  ;;  %v1527_v19 = vsel %vm1413_vm4, %v1112_v48, %v3862_v30 }
 0x342   : > { %v1056_v62 = vpop.permute.xlu1 %1055  ;;  %v1528_v30 = vsel %vm1415_vm5, %v3889_v40, %v1527_v19  ;;  %v2370_v19 = vadd.f32 %v2369_v46, %v3864_v36 }
 0x343   : > { %v1081_v11 = vmul.f32 %v2981_v24, %v1056_v62  ;;  %v2393_v62 = vrot.slane %v2392_v4, 4  ;;  %v2347_v18 = vadd.f32 %v2346_v38, %v2345_v32 }
 0x345   : > { %v1176_v20 = vsel %vm1084_vm1, %v1081_v11, 0.0  ;;  %v1533_v11 = vsel %vm1411_vm3, %v3883_v51, %v1532_v6  ;;  %v2394_v41 = vadd.f32 %v2393_v62, %v2392_v4  ;;  %v2348_v7 = vrot.slane %v2347_v18, 1 }
 0x346   : > { %v1177_v63 = vrot.slane %v1176_v20, 4  ;;  %v1534_v42 = vsel %vm1413_vm4, %v1168_v50, %v1533_v11 }
 0x347   : > { %v2282_v27 = vpop.permute.xlu1 %2281  ;;  %v2395_v35 = vrot.slane %v2394_v41, 2  ;;  %v1535_v61 = vsel %vm1415_vm5, %v3901_v39, %v1534_v42  ;;  %v2349_v4 = vadd.f32 %v2348_v7, %v2347_v18 }
 0x348   : > { %v1178_v57 = vadd.f32 %v1177_v63, %v1176_v20  ;;  %v2305_v9 = vmul.f32 %v2981_v24, %v2282_v27  ;;  %v2381_v20 = vrot.slane %v2380_v59, 2  ;;  %v1126_v27 = vadd.f32 %v1125_v33, %v1124_v8 }
 0x34a   : > { %v1179_v15 = vrot.slane %v1178_v57, 2  ;;  %v2399_v10 = vsel %vm1084_vm1, %v2305_v9, 0.0  ;;  %v2382_v9 = vadd.f32 %v2381_v20, %v2380_v59  ;;  %v2396_v59 = vadd.f32 %v2395_v35, %v2394_v41 }
 0x34b   : > { %v2400_v12 = vrot.slane %v2399_v10, 4 }
 0x34c   : > { %v1180_v2 = vadd.f32 %v1179_v15, %v1178_v57  ;;  %v1026_v5 = vpop.permute.xlu1 %1025  ;;  %v2440_v57 = vsel %vm1413_vm4, %v2335_v49, %v2439_v3  ;;  %v2389_v15 = vadd.f32 %v2388_v16, %v2387_v45 }
 0x34d   : > { %v1075_v26 = vmul.f32 %v2982_v29, %v1026_v5  ;;  %v2401_v22 = vadd.f32 %v2400_v12, %v2399_v10  ;;  %v2383_v10 = vrot.slane %v2382_v9, 1 }
 0x34e   : > { %v1181_v56 = vrot.slane %v1180_v2, 1 }
 0x34f   : > { %v1134_v24 = vsel %vm1084_vm1, %v1075_v26, 0.0  ;;  %v2402_v6 = vrot.slane %v2401_v22, 2  ;;  %v2384_v41 = vadd.f32 %v2383_v10, %v2382_v9 }
 0x350   : > { %v1135_v25 = vrot.slane %v1134_v24, 4  ;;  %v1182_v51 = vadd.f32 %v1181_v56, %v1180_v2  ;;  %v1529_v2 = vsel %vm1417_vm6, %v1126_v27, %v1528_v30  ;;  %v2390_v56 = vrot.slane %v2389_v15, 1  ;;  %v2736_v30 = vld [vmem:[%s4007_s4] ss:$0 sm:$0xff] }
 0x351   : > { %v2258_v31 = vpop.permute.xlu1 %2257  ;;  %v2403_v48 = vadd.f32 %v2402_v6, %v2401_v22  ;;  %v1530_v50 = vsel %vm1419_vm7, %v3903_v0, %v1529_v2  ;;  %v2377_v0 = vadd.f32 %v2376_v1, %v3923_v28  ;;  %v2739_v2 = vld [vmem:[%s4009_s6] ss:$0 sm:$0xff] }
 0x352   : > { %v1136_v63 = vadd.f32 %v1135_v25, %v1134_v24  ;;  %v2299_v43 = vmul.f32 %v2982_v29, %v2258_v31  ;;  %v1536_v13 = vsel %vm1417_vm6, %v1182_v51, %v1535_v61  ;;  %v2397_v25 = vrot.slane %v2396_v59, 1 }
 0x353   : > { %v1537_v26 = vsel %vm1419_vm7, %v3917_v60, %v1536_v13  ;;  %v2356_v60 = vadd.f32 %v2355_v54, %v3898_v44  ;;  %v2404_v3 = vrot.slane %v2403_v48, 1  ;;  %v2445_v28 = vsel %vm1409_vm2, %v2377_v0, %v2370_v19 }
 0x354   : > { %v1137_v32 = vrot.slane %v1136_v63, 2  ;;  %v2357_v17 = vsel %vm1084_vm1, %v2299_v43, 0.0  ;;  %v2398_v54 = vadd.f32 %v2397_v25, %v2396_v59  ;;  %v2446_v51 = vsel %vm1411_vm3, %v2384_v41, %v2445_v28 }
 0x355   : > { %v2358_v14 = vrot.slane %v2357_v17, 4  ;;  %v2286_v47 = vpop.permute.xlu1 %2285  ;;  %v2405_v1 = vadd.f32 %v2404_v3, %v2403_v48 }
 0x356   : > { %v1138_v21 = vadd.f32 %v1137_v32, %v1136_v63  ;;  %v2306_v53 = vmul.f32 %v3853_v52, %v2286_v47  ;;  %v2441_v52 = vsel %vm1415_vm5, %v3895_v23, %v2440_v57  ;;  %v2391_v63 = vadd.f32 %v2390_v56, %v2389_v15 }
 0x357   : > { %v2359_v37 = vadd.f32 %v2358_v14, %v2357_v17  ;;  %v2442_v23 = vsel %vm1417_vm6, %v2349_v4, %v2441_v52  ;;  %v2738_v4 = vld [vmem:[%s4010_s7] ss:$0 sm:$0xff] }
 0x358   : > { %v1139_v8 = vrot.slane %v1138_v21, 1  ;;  %v2406_v38 = vsel %vm1084_vm1, %v2306_v53, 0.0  ;;  %v2447_v36 = vsel %vm1413_vm4, %v2391_v63, %v2446_v51  ;;  %v2737_v53 = vld [vmem:[%s4008_s5] ss:$0 sm:$0xff] }
 0x359   : > { %v2360_v40 = vrot.slane %v2359_v37, 2  ;;  %v2407_v5 = vrot.slane %v2406_v38, 4  ;;  %v2290_v58 = vpop.permute.xlu1 %2289  ;;  %v2448_v27 = vsel %vm1415_vm5, %v2398_v54, %v2447_v36 }
 0x35a   : > { %v1140_v39 = vadd.f32 %v1139_v8, %v1138_v21  ;;  %v2307_v29 = vmul.f32 %v3872_v55, %v2290_v58  ;;  %v1538_v55 = vsel %vm1421_vm8, %v3926_v34, %v1537_v26  ;;  %v2443_v34 = vsel %vm1419_vm7, %v2356_v60, %v2442_v23  ;;  %v2567_v58 = vpop.permute.xlu0 %2566 }
 0x35b   : > { %v2361_v45 = vadd.f32 %v2360_v40, %v2359_v37  ;;  %v2408_v62 = vadd.f32 %v2407_v5, %v2406_v38  ;;  %v2449_v32 = vsel %vm1417_vm6, %v2405_v1, %v2448_v27 }
 0x35c   : > { %v2413_v12 = vsel %vm1084_vm1, %v2307_v29, 0.0  ;;  %v1531_v24 = vsel %vm1421_vm8, %v1140_v39, %v1530_v50 }
 0x35d   : > { %v2362_v11 = vrot.slane %v2361_v45, 1  ;;  %v2409_v33 = vrot.slane %v2408_v62, 2  ;;  %v2414_v18 = vrot.slane %v2413_v12, 4  ;;  %2777 = vmatprep.mubr.msk.f32.mxu1 %vm1084_vm1, %v1531_v24 }
 0x35e   : > { %2778 = vmatmul.mubr.msk.f32.vlgmr.msra.gmra.mrb[0].mxu1 %vm1084_vm1, %v1538_v55  ;;  %v2572_v10 = vpop.permute.xlu1 %2571 }
 0x35f   : > { %v2363_v49 = vadd.f32 %v2362_v11, %v2361_v45  ;;  %v2410_v20 = vadd.f32 %v2409_v33, %v2408_v62  ;;  %v2415_v31 = vadd.f32 %v2414_v18, %v2413_v12 }
 0x361   : > { %v2411_v43 = vrot.slane %v2410_v20, 1  ;;  %v2416_v42 = vrot.slane %v2415_v31, 2  ;;  %v2444_v44 = vsel %vm1421_vm8, %v2363_v49, %v2443_v34 }
 0x362   : > { %2798 = vmatprep.mubr.msk.f32.mxu0 %vm1084_vm1, %v2444_v44 }
 0x363   : > { %v2417_v16 = vadd.f32 %v2416_v42, %v2415_v31  ;;  %v2412_v22 = vadd.f32 %v2411_v43, %v2410_v20 }
 0x365   : > { %v2418_v46 = vrot.slane %v2417_v16, 1  ;;  %v2450_v17 = vsel %vm1419_vm7, %v2412_v22, %v2449_v32 }
 0x367   : > { %v2419_v7 = vadd.f32 %v2418_v46, %v2417_v16 }
 0x369   : > { %v2451_v57 = vsel %vm1421_vm8, %v2419_v7, %v2450_v17 }
 0x36a   : > { %2799 = vmatmul.mubr.msk.f32.vlgmr.msra.gmra.mrb[0].mxu0 %vm1084_vm1, %v2451_v57 }
 0x431   : > { %v2779_v9 = vpop.f32.mrb[0].mxu1 }
 0x432   : > { %v1609_v14 = vpop.f32.mrb[1].mxu1 }
 0x43d   : > { %v2800_v47 = vpop.f32.mrb[0].mxu0 }
 0x43e   : > { %v2821_v35 = vadd.f32 %v2800_v47, %v2779_v9  ;;  %v2522_v21 = vpop.f32.mrb[1].mxu0 }
 0x43f   : > { %v2822_v61 = vadd.f32 %v2522_v21, %v1609_v14 }
 0x440   : > { %v2541_v15 = vmul.f32 %v2821_v35, %v2736_v30 }
 0x441   : > { %v2540_v6 = vmul.f32 %v2822_v61, %v2736_v30 }
 0x442   : > { %v2550_v37 = vadd.f32 %v2737_v53, %v2541_v15 }
 0x443   : > { %v2549_v13 = vadd.f32 %v2737_v53, %v2540_v6 }
 0x444   : > { %v2552_v8 = vmax.f32 %v2550_v37, 0.0 }
 0x445   : > { %v2551_v38 = vmax.f32 %v2549_v13, 0.0 }
 0x446   : > { %v2561_v40 = vmul.f32 %v2738_v4, %v2552_v8  ;;  %v2584_v59 = vmul.f32 %v2739_v2, %v2552_v8 }
 0x447   : > { %v2560_v5 = vmul.f32 %v2738_v4, %v2551_v38  ;;  %v2583_v29 = vmul.f32 %v2739_v2, %v2551_v38 }
 0x448   : > { %v2575_v52 = vmul.f32 %v2572_v10, %v2561_v40 }
 0x449   : > { %v2574_v39 = vmul.f32 %v2567_v58, %v2560_v5 }
 0x44a   : > { %v2586_v26 = vadd.f32 %v2584_v59, %v2575_v52 }
 0x44b   : > { %v2585_v48 = vadd.f32 %v2583_v29, %v2574_v39 }
 0x44c   : > { %2589 = vst.msk [vmem:[%s442_s22 + $0x8] sm:$0xff] %vm2587_vm9, %v2586_v26 }
 0x44d   : > { %2588 = vst.msk [vmem:[%s442_s22] sm:$0xff] %vm2587_vm9, %v2585_v48 }
 0x44e PF: > { %s19_s11 = sadd.s32 1, %s3005_s11   ;;  %s4030_s30 = smov %s3001_s10 }
 0x44f   : > { %p16_p5 = scmp.ge.s32.totalorder %s19_s11, 4   ;;  %s4031_s10 = smov %s4033_s12 }
 0x451   :  { %18 = sbr.rel (!%p16_p5) target bundleno = 2 (0x2), region = 92 }

// kernel: basic_block_forward.10
= control target key start
LH: loop header
LB: loop body
LE: loop exit
PB: predicated region body
PF: predicated region fallthrough
CT: control target
= control target key end

     0   :  { %s3121_s30 = smov 0   ;;  %s3123_s10 = smov 0   ;;  %s4102_s0 = inlined_call_operand.vmem [shape: f32[2,16,24], index: 0, kind: input, shape index: {}]   ;;  %s4103_s1 = inlined_call_operand.vmem [shape: f32[2,16,8,32], index: 1, kind: input, shape index: {}]   ;;  %s4104_s2 = inlined_call_operand.vmem [shape: f32[3,5], index: 2, kind: input, shape index: {}]   ;;  %s4105_s3 = inlined_call_operand.vmem [shape: f32[160,32], index: 3, kind: input, shape index: {}]   ;;  %s4106_s4 = inlined_call_operand.vmem [shape: f32[1,32], index: 4, kind: input, shape index: {}]   ;;  %s4107_s5 = inlined_call_operand.vmem [shape: f32[1,32], index: 5, kind: input, shape index: {}]   ;;  %s4108_s6 = inlined_call_operand.vmem [shape: f32[1,32], index: 6, kind: input, shape index: {}]   ;;  %s4109_s7 = inlined_call_operand.vmem [shape: f32[1,32], index: 7, kind: input, shape index: {}]   ;;  %s4110_s8 = inlined_call_operand.vmem [shape: f32[2,16,1], index: 8, kind: input, shape index: {}]   ;;  %s4111_s9 = inlined_call_operand.vmem [shape: f32[2,16,32], index: 9, kind: output, shape index: {}]  }
   0x1   :  { %s3125_s11 = smov 0  }
   0x2 LB: > { %s31_s12 = sadd.s32 1, %s3060_s10  ;;  %p2726_p0 = scmp.ge.s32.totalorder %s3064_s11, 1  ;;  %s3064_s11 = sphi %s3125_s11, %s19_s11   ;;  %s3060_s10 = sphi %s3123_s10, %s4130_s10   ;;  %s3056_s30 = sphi %s3121_s30, %s4129_s30  }
   0x3   : > { %p33_p1 = scmp.ge.s32.totalorder %s31_s12, 2  ;;  %p342_p2 = scmp.lt.s32.totalorder %s3064_s11, 3 }
   0x5   : > { %s4132_s12 = smov (%p33_p1, %s31_s12), 0  ;;  %p343_p3 = pnand %p2726_p0, %p342_p2 }
   0x7   : > { %346 = sbr.rel (%p343_p3) target bundleno = 1102 (0x44e), region = 56 }
   0xe   : > { %p405_p4 = scmp.lt.s32.totalorder %s3056_s30, 1  ;;  %v463_v0 = vlaneseq  ;;  %v462_v28 = vld [vmem:[%s4104_s2] sm:$0x7]  ;;  %vm811_vm0 = vcmask 39936   ;;  %vm1084_vm1 = vcmask 261120   ;;  %vm1413_vm2 = vcmask 1041409  }
   0xf   : > { %vm1415_vm3 = vcmask 1042434   ;;  %vm1417_vm4 = vcmask 1043459   ;;  %vm1419_vm5 = vcmask 1044484   ;;  %vm1421_vm6 = vcmask 1045509  }
  0x10   : > { %s4134_s30 = smov (!%p405_p4, %s3056_s30), 1  ;;  %v3141_v1 = vshrl.u32 %v463_v0, 7  ;;  %vm1423_vm7 = vcmask 1046534   ;;  %vm1425_vm8 = vcmask 1047559  }
  0x11   : > { %s3144_s13 = sshll.u32 %s4134_s30, 4  ;;  %s2752_s27 = sshll.u32 %s4134_s30, 7 }
  0x12   : > { %v3147_v2 = vsub.s32 0, %v3141_v1  ;;  %s412_s16 = scalar_lea.vmem %s4102_s0, %s3144_s13  ;;  %v3154_v3 = vsub.s32 1, %v3141_v1  ;;  %v514_v5 = vsub.s32 7, %v3141_v1  ;;  %v3160_v8 = vsub.s32 2, %v3141_v1  ;;  %s3521_s14 = scalar_lea.vmem %s4103_s1, %s2752_s27 }
  0x13   : > { %v444_v4 = vld [vmem:[%s412_s16] sm:$0xff]  ;;  %v445_v9 = vld [vmem:[%s412_s16 + $0x8] sm:$0xff]  ;;  %v486_v15 = vsub.s32 3, %v3141_v1  ;;  %v493_v18 = vsub.s32 4, %v3141_v1  ;;  %v500_v21 = vsub.s32 5, %v3141_v1  ;;  %v507_v24 = vsub.s32 6, %v3141_v1  ;;  %s3605_s28 = scalar_lea.vmem %s4110_s8, %s3144_s13  ;;  %s442_s26 = scalar_lea.vmem %s4111_s9, %s3144_s13 }
  0x14   : > { %v466_v6 = vrot.slane %v444_v4, %v3147_v2  ;;  %v473_v7 = vrot.slane %v444_v4, %v3154_v3  ;;  %v515_v10 = vrot.slane %v444_v4, %v514_v5  ;;  %v571_v11 = vrot.slane %v445_v9, %v514_v5 }
  0x15   : > { %v522_v12 = vrot.slane %v445_v9, %v3147_v2  ;;  %v480_v13 = vrot.slane %v444_v4, %v3160_v8  ;;  %v529_v14 = vrot.slane %v445_v9, %v3154_v3  ;;  %v536_v16 = vrot.slane %v445_v9, %v3160_v8 }
  0x16   : > { %613 = vbcast.lane.b32.xlu1 %v466_v6, 264  ;;  %468 = vbcast.lane.b32.xlu0 %v466_v6, 256  ;;  %v487_v17 = vrot.slane %v444_v4, %v486_v15  ;;  %v543_v19 = vrot.slane %v445_v9, %v486_v15  ;;  %v494_v20 = vrot.slane %v444_v4, %v493_v18 }
  0x17   : > { %v501_v22 = vrot.slane %v444_v4, %v500_v21  ;;  %v550_v23 = vrot.slane %v445_v9, %v493_v18  ;;  %v508_v25 = vrot.slane %v444_v4, %v507_v24  ;;  %v557_v26 = vrot.slane %v445_v9, %v500_v21 }
  0x18   : > { %v564_v27 = vrot.slane %v445_v9, %v507_v24  ;;  %v3174_v29 = vrot.slane %v462_v28, %v3147_v2  ;;  %v3177_v30 = vrot.slane %v462_v28, %v3154_v3  ;;  %v3191_v61 = vrot.slane %v462_v28, %v3160_v8 }
  0x1a   : > { %617 = vbcast.lane.b32.xlu1 %v473_v7, 264  ;;  %475 = vbcast.lane.b32.xlu0 %v473_v7, 256 }
  0x1e   : > { %524 = vbcast.lane.b32.xlu1 %v522_v12, 256  ;;  %482 = vbcast.lane.b32.xlu0 %v480_v13, 256 }
  0x22   : > { %621 = vbcast.lane.b32.xlu1 %v480_v13, 264  ;;  %531 = vbcast.lane.b32.xlu0 %v529_v14, 256 }
  0x26   : > { %649 = vbcast.lane.b32.xlu1 %v529_v14, 264  ;;  %645 = vbcast.lane.b32.xlu0 %v522_v12, 264 }
  0x2a   : > { %538 = vbcast.lane.b32.xlu1 %v536_v16, 256  ;;  %489 = vbcast.lane.b32.xlu0 %v487_v17, 256 }
  0x2e   : > { %653 = vbcast.lane.b32.xlu1 %v536_v16, 264  ;;  %625 = vbcast.lane.b32.xlu0 %v487_v17, 264 }
  0x32   : > { %717 = vbcast.lane.b32.xlu1 %v473_v7, 272  ;;  %713 = vbcast.lane.b32.xlu0 %v466_v6, 272 }
  0x36   : > { %545 = vbcast.lane.b32.xlu1 %v543_v19, 256  ;;  %496 = vbcast.lane.b32.xlu0 %v494_v20, 256 }
  0x3a   : > { %657 = vbcast.lane.b32.xlu1 %v543_v19, 264  ;;  %629 = vbcast.lane.b32.xlu0 %v494_v20, 264 }
  0x3e   : > { %745 = vbcast.lane.b32.xlu1 %v522_v12, 272  ;;  %721 = vbcast.lane.b32.xlu0 %v480_v13, 272 }
  0x42   : > { %503 = vbcast.lane.b32.xlu1 %v501_v22, 256  ;;  %749 = vbcast.lane.b32.xlu0 %v529_v14, 272 }
  0x46   : > { %633 = vbcast.lane.b32.xlu1 %v501_v22, 264  ;;  %552 = vbcast.lane.b32.xlu0 %v550_v23, 256 }
  0x4a   : > { %725 = vbcast.lane.b32.xlu1 %v487_v17, 272  ;;  %661 = vbcast.lane.b32.xlu0 %v550_v23, 264 }
  0x4e   : > { %510 = vbcast.lane.b32.xlu1 %v508_v25, 256  ;;  %753 = vbcast.lane.b32.xlu0 %v536_v16, 272 }
  0x52   : > { %637 = vbcast.lane.b32.xlu1 %v508_v25, 264  ;;  %559 = vbcast.lane.b32.xlu0 %v557_v26, 256 }
  0x56   : > { %729 = vbcast.lane.b32.xlu1 %v494_v20, 272  ;;  %665 = vbcast.lane.b32.xlu0 %v557_v26, 264 }
  0x5a   : > { %517 = vbcast.lane.b32.xlu1 %v515_v10, 256  ;;  %757 = vbcast.lane.b32.xlu0 %v543_v19, 272 }
  0x5e   : > { %641 = vbcast.lane.b32.xlu1 %v515_v10, 264  ;;  %566 = vbcast.lane.b32.xlu0 %v564_v27, 256 }
  0x62   : > { %733 = vbcast.lane.b32.xlu1 %v501_v22, 272  ;;  %669 = vbcast.lane.b32.xlu0 %v564_v27, 264 }
  0x66   : > { %573 = vbcast.lane.b32.xlu1 %v571_v11, 256  ;;  %761 = vbcast.lane.b32.xlu0 %v550_v23, 272 }
  0x6a   : > { %737 = vbcast.lane.b32.xlu1 %v508_v25, 272  ;;  %673 = vbcast.lane.b32.xlu0 %v571_v11, 264 }
  0x6e   : > { %741 = vbcast.lane.b32.xlu1 %v515_v10, 272  ;;  %765 = vbcast.lane.b32.xlu0 %v557_v26, 272 }
  0x72   : > { %773 = vbcast.lane.b32.xlu1 %v571_v11, 272  ;;  %769 = vbcast.lane.b32.xlu0 %v564_v27, 272 }
  0x88   : > { %v614_v31 = vpop.permute.xlu1 %613  ;;  %v469_v32 = vpop.permute.xlu0 %468 }
  0x89   : > { %v679_v33 = vmul.f32 %v3177_v30, %v614_v31  ;;  %v579_v34 = vmul.f32 %v3174_v29, %v469_v32 }
  0x8b   : > { %v695_v35 = vadd.f32 %v679_v33, %v579_v34 }
  0x8c   : > { %v618_v36 = vpop.permute.xlu1 %617  ;;  %v476_v37 = vpop.permute.xlu0 %475 }
  0x8d   : > { %v680_v38 = vmul.f32 %v3177_v30, %v618_v36  ;;  %v580_v39 = vmul.f32 %v3174_v29, %v476_v37 }
  0x8f   : > { %v696_v40 = vadd.f32 %v680_v38, %v580_v39 }
  0x90   : > { %v525_v41 = vpop.permute.xlu1 %524  ;;  %v483_v42 = vpop.permute.xlu0 %482 }
  0x91   : > { %v581_v45 = vmul.f32 %v3174_v29, %v483_v42  ;;  %v587_v47 = vmul.f32 %v3174_v29, %v525_v41 }
  0x94   : > { %v622_v43 = vpop.permute.xlu1 %621  ;;  %v532_v44 = vpop.permute.xlu0 %531 }
  0x95   : > { %v681_v46 = vmul.f32 %v3177_v30, %v622_v43  ;;  %v588_v51 = vmul.f32 %v3174_v29, %v532_v44 }
  0x97   : > { %v697_v48 = vadd.f32 %v681_v46, %v581_v45 }
  0x98   : > { %v650_v49 = vpop.permute.xlu1 %649  ;;  %v646_v50 = vpop.permute.xlu0 %645 }
  0x99   : > { %v688_v52 = vmul.f32 %v3177_v30, %v650_v49  ;;  %v687_v53 = vmul.f32 %v3177_v30, %v646_v50 }
  0x9b   : > { %v704_v54 = vadd.f32 %v688_v52, %v588_v51  ;;  %v703_v55 = vadd.f32 %v687_v53, %v587_v47 }
  0x9c   : > { %v539_v56 = vpop.permute.xlu1 %538  ;;  %v490_v57 = vpop.permute.xlu0 %489 }
  0x9d   : > { %v589_v58 = vmul.f32 %v3174_v29, %v539_v56  ;;  %v582_v62 = vmul.f32 %v3174_v29, %v490_v57 }
  0xa0   : > { %v654_v59 = vpop.permute.xlu1 %653  ;;  %v626_v60 = vpop.permute.xlu0 %625 }
  0xa1   : > { %v689_v63 = vmul.f32 %v3177_v30, %v654_v59  ;;  %v682_v0 = vmul.f32 %v3177_v30, %v626_v60 }
  0xa3   : > { %v705_v1 = vadd.f32 %v689_v63, %v589_v58  ;;  %v698_v2 = vadd.f32 %v682_v0, %v582_v62 }
  0xa4   : > { %v718_v3 = vpop.permute.xlu1 %717  ;;  %v714_v4 = vpop.permute.xlu0 %713 }
  0xa5   : > { %v780_v5 = vmul.f32 %v3191_v61, %v718_v3  ;;  %v779_v6 = vmul.f32 %v3191_v61, %v714_v4 }
  0xa7   : > { %v3198_v7 = vadd.f32 %v780_v5, %v696_v40  ;;  %v3200_v9 = vadd.f32 %v779_v6, %v695_v35 }
  0xa8   : > { %v546_v8 = vpop.permute.xlu1 %545  ;;  %v497_v10 = vpop.permute.xlu0 %496 }
  0xa9   : > { %v815_v11 = vsel %vm811_vm0, %v3198_v7, -inf  ;;  %v812_v12 = vsel %vm811_vm0, %v3200_v9, -inf  ;;  %v590_v13 = vmul.f32 %v3174_v29, %v546_v8  ;;  %v583_v16 = vmul.f32 %v3174_v29, %v497_v10 }
  0xaa   : > { %816 = vmax.xlane.f32.xlu1 %v815_v11  ;;  %813 = vmax.xlane.f32.xlu0 %v812_v12 }
  0xac   : > { %v658_v14 = vpop.permute.xlu1 %657  ;;  %v630_v15 = vpop.permute.xlu0 %629 }
  0xad   : > { %v690_v17 = vmul.f32 %v3177_v30, %v658_v14  ;;  %v683_v18 = vmul.f32 %v3177_v30, %v630_v15 }
  0xaf   : > { %v706_v19 = vadd.f32 %v690_v17, %v590_v13  ;;  %v699_v20 = vadd.f32 %v683_v18, %v583_v16 }
  0xb0   : > { %v746_v21 = vpop.permute.xlu1 %745  ;;  %v722_v22 = vpop.permute.xlu0 %721 }
  0xb1   : > { %v787_v23 = vmul.f32 %v3191_v61, %v746_v21  ;;  %v781_v24 = vmul.f32 %v3191_v61, %v722_v22 }
  0xb3   : > { %v3212_v25 = vadd.f32 %v781_v24, %v697_v48  ;;  %v3214_v26 = vadd.f32 %v787_v23, %v703_v55 }
  0xb4   : > { %v504_v27 = vpop.permute.xlu1 %503  ;;  %v750_v28 = vpop.permute.xlu0 %749 }
  0xb5   : > { %v788_v31 = vmul.f32 %v3191_v61, %v750_v28  ;;  %v818_v32 = vsel %vm811_vm0, %v3212_v25, -inf  ;;  %v584_v33 = vmul.f32 %v3174_v29, %v504_v27  ;;  %v836_v38 = vsel %vm811_vm0, %v3214_v26, -inf }
  0xb6   : > { %819 = vmax.xlane.f32.xlu0 %v818_v32 }
  0xb7   : > { %v3220_v34 = vadd.f32 %v788_v31, %v704_v54 }
  0xb8   : > { %v634_v35 = vpop.permute.xlu1 %633  ;;  %v553_v36 = vpop.permute.xlu0 %552 }
  0xb9   : > { %v684_v37 = vmul.f32 %v3177_v30, %v634_v35  ;;  %v839_v39 = vsel %vm811_vm0, %v3220_v34, -inf  ;;  %v591_v43 = vmul.f32 %v3174_v29, %v553_v36 }
  0xba   : > { %837 = vmax.xlane.f32.xlu0 %v836_v38  ;;  %840 = vmax.xlane.f32.xlu1 %v839_v39 }
  0xbb   : > { %v700_v40 = vadd.f32 %v684_v37, %v584_v33 }
  0xbc   : > { %v726_v41 = vpop.permute.xlu1 %725  ;;  %v662_v42 = vpop.permute.xlu0 %661 }
  0xbd   : > { %v782_v44 = vmul.f32 %v3191_v61, %v726_v41  ;;  %v691_v45 = vmul.f32 %v3177_v30, %v662_v42 }
  0xbf   : > { %v707_v46 = vadd.f32 %v691_v45, %v591_v43  ;;  %v3230_v47 = vadd.f32 %v782_v44, %v698_v2 }
  0xc0   : > { %v511_v48 = vpop.permute.xlu1 %510  ;;  %v754_v49 = vpop.permute.xlu0 %753 }
  0xc1   : > { %v789_v50 = vmul.f32 %v3191_v61, %v754_v49  ;;  %v821_v51 = vsel %vm811_vm0, %v3230_v47, -inf  ;;  %v585_v52 = vmul.f32 %v3174_v29, %v511_v48 }
  0xc2   : > { %822 = vmax.xlane.f32.xlu0 %v821_v51 }
  0xc3   : > { %v3236_v53 = vadd.f32 %v789_v50, %v705_v1 }
  0xc4   : > { %v638_v54 = vpop.permute.xlu1 %637  ;;  %v560_v55 = vpop.permute.xlu0 %559 }
  0xc5   : > { %v685_v56 = vmul.f32 %v3177_v30, %v638_v54  ;;  %v842_v57 = vsel %vm811_vm0, %v3236_v53, -inf  ;;  %v592_v62 = vmul.f32 %v3174_v29, %v560_v55 }
  0xc6   : > { %843 = vmax.xlane.f32.xlu1 %v842_v57 }
  0xc7   : > { %v701_v58 = vadd.f32 %v685_v56, %v585_v52 }
  0xc8   : > { %v730_v59 = vpop.permute.xlu1 %729  ;;  %v666_v60 = vpop.permute.xlu0 %665 }
  0xc9   : > { %v783_v63 = vmul.f32 %v3191_v61, %v730_v59  ;;  %v692_v0 = vmul.f32 %v3177_v30, %v666_v60 }
  0xcb   : > { %v708_v2 = vadd.f32 %v692_v0, %v592_v62  ;;  %v3244_v1 = vadd.f32 %v783_v63, %v699_v20 }
  0xcc   : > { %v518_v3 = vpop.permute.xlu1 %517  ;;  %v758_v4 = vpop.permute.xlu0 %757 }
  0xcd   : > { %v790_v5 = vmul.f32 %v3191_v61, %v758_v4  ;;  %v824_v6 = vsel %vm811_vm0, %v3244_v1, -inf  ;;  %v586_v8 = vmul.f32 %v3174_v29, %v518_v3 }
  0xce   : > { %825 = vmax.xlane.f32.xlu0 %v824_v6 }
  0xcf   : > { %v3250_v10 = vadd.f32 %v790_v5, %v706_v19 }
  0xd0   : > { %v642_v11 = vpop.permute.xlu1 %641  ;;  %v567_v12 = vpop.permute.xlu0 %566 }
  0xd1   : > { %v686_v13 = vmul.f32 %v3177_v30, %v642_v11  ;;  %v845_v14 = vsel %vm811_vm0, %v3250_v10, -inf  ;;  %v593_v18 = vmul.f32 %v3174_v29, %v567_v12 }
  0xd2   : > { %846 = vmax.xlane.f32.xlu1 %v845_v14 }
  0xd3   : > { %v702_v15 = vadd.f32 %v686_v13, %v586_v8 }
  0xd4   : > { %v734_v16 = vpop.permute.xlu1 %733  ;;  %v670_v17 = vpop.permute.xlu0 %669 }
  0xd5   : > { %v784_v20 = vmul.f32 %v3191_v61, %v734_v16  ;;  %v693_v21 = vmul.f32 %v3177_v30, %v670_v17 }
  0xd7   : > { %v709_v22 = vadd.f32 %v693_v21, %v593_v18  ;;  %v3258_v19 = vadd.f32 %v784_v20, %v700_v40 }
  0xd8   : > { %v574_v23 = vpop.permute.xlu1 %573  ;;  %v762_v24 = vpop.permute.xlu0 %761 }
  0xd9   : > { %v791_v27 = vmul.f32 %v3191_v61, %v762_v24  ;;  %v827_v28 = vsel %vm811_vm0, %v3258_v19, -inf  ;;  %v594_v31 = vmul.f32 %v3174_v29, %v574_v23 }
  0xda   : > { %828 = vmax.xlane.f32.xlu0 %v827_v28 }
  0xdb   : > { %v3264_v32 = vadd.f32 %v791_v27, %v707_v46 }
  0xdc   : > { %v738_v33 = vpop.permute.xlu1 %737  ;;  %v674_v35 = vpop.permute.xlu0 %673 }
  0xdd   : > { %v785_v36 = vmul.f32 %v3191_v61, %v738_v33  ;;  %v694_v37 = vmul.f32 %v3177_v30, %v674_v35  ;;  %v848_v38 = vsel %vm811_vm0, %v3264_v32, -inf }
  0xde   : > { %849 = vmax.xlane.f32.xlu1 %v848_v38 }
  0xdf   : > { %v710_v39 = vadd.f32 %v694_v37, %v594_v31  ;;  %v3270_v40 = vadd.f32 %v785_v36, %v701_v58 }
  0xe0   : > { %v742_v41 = vpop.permute.xlu1 %741  ;;  %v766_v42 = vpop.permute.xlu0 %765 }
  0xe1   : > { %v786_v43 = vmul.f32 %v3191_v61, %v742_v41  ;;  %v792_v29 = vmul.f32 %v3191_v61, %v766_v42  ;;  %v830_v44 = vsel %vm811_vm0, %v3270_v40, -inf }
  0xe2   : > { %831 = vmax.xlane.f32.xlu0 %v830_v44 }
  0xe3   : > { %v3276_v45 = vadd.f32 %v786_v43, %v702_v15  ;;  %v3278_v30 = vadd.f32 %v792_v29, %v708_v2 }
  0xe4   : > { %v774_v46 = vpop.permute.xlu1 %773  ;;  %v770_v48 = vpop.permute.xlu0 %769 }
  0xe5   : > { %v794_v49 = vmul.f32 %v3191_v61, %v774_v46  ;;  %v793_v50 = vmul.f32 %v3191_v61, %v770_v48  ;;  %v833_v51 = vsel %vm811_vm0, %v3276_v45, -inf  ;;  %v851_v52 = vsel %vm811_vm0, %v3278_v30, -inf }
  0xe6   : > { %834 = vmax.xlane.f32.xlu0 %v833_v51  ;;  %852 = vmax.xlane.f32.xlu1 %v851_v52 }
  0xe7   : > { %v3286_v54 = vadd.f32 %v794_v49, %v710_v39  ;;  %v3288_v55 = vadd.f32 %v793_v50, %v709_v22  ;;  %v3066_v39 = vmov 2  }
  0xe8   : > { %2918 = vset.pattern.permute.xlu0 %v3066_v39 }
  0xe9   : > { %v857_v56 = vsel %vm811_vm0, %v3286_v54, -inf  ;;  %v854_v57 = vsel %vm811_vm0, %v3288_v55, -inf }
  0xea   : > { %858 = vmax.xlane.f32.xlu0 %v857_v56  ;;  %855 = vmax.xlane.f32.xlu1 %v854_v57 }
 0x137   : > { %v817_v61 = vpop.xlane.xlu1 %816  ;;  %v814_v58 = vpop.xlane.xlu0 %813 }
 0x138   : > { %v861_v59 = vsub.f32 %v3198_v7, %v817_v61  ;;  %v860_v60 = vsub.f32 %v3200_v9, %v814_v58 }
 0x13a   : > { %v878_v62 = vmul.f32 1.442695, %v861_v59  ;;  %v876_v63 = vmul.f32 1.442695, %v860_v60 }
 0x13c   : > { %2962 = vpow2.f32 %v878_v62 }
 0x13d   : > { %2964 = vpow2.f32 %v876_v63 }
 0x143   : > { %v820_v0 = vpop.xlane.xlu0 %819 }
 0x144   : > { %v862_v2 = vsub.f32 %v3212_v25, %v820_v0 }
 0x146   : > { %v3297_v3 = vpop.eup %2962  ;;  %v880_v4 = vmul.f32 1.442695, %v862_v2 }
 0x147   : > { %v3299_v5 = vpop.eup %2964  ;;  %v841_v6 = vpop.xlane.xlu1 %840  ;;  %v911_v11 = vsel %vm811_vm0, %v3297_v3, 0.0 }
 0x148   : > { %v838_v8 = vpop.xlane.xlu0 %837  ;;  %2966 = vpow2.f32 %v880_v4  ;;  %v869_v7 = vsub.f32 %v3220_v34, %v841_v6  ;;  %912 = vadd.xlane.f32.xlu0 %v911_v11  ;;  %v908_v12 = vsel %vm811_vm0, %v3299_v5, 0.0 }
 0x149   : > { %v868_v9 = vsub.f32 %v3214_v26, %v838_v8  ;;  %909 = vadd.xlane.f32.xlu1 %v908_v12 }
 0x14a   : > { %v894_v25 = vmul.f32 1.442695, %v869_v7 }
 0x14b   : > { %v892_v13 = vmul.f32 1.442695, %v868_v9 }
 0x14c   : > { %2968 = vpow2.f32 %v894_v25 }
 0x14d   : > { %2970 = vpow2.f32 %v892_v13 }
 0x14f   : > { %v823_v14 = vpop.xlane.xlu0 %822 }
 0x150   : > { %v863_v15 = vsub.f32 %v3230_v47, %v823_v14 }
 0x152   : > { %v3308_v16 = vpop.eup %2966  ;;  %v882_v17 = vmul.f32 1.442695, %v863_v15 }
 0x153   : > { %v844_v18 = vpop.xlane.xlu1 %843  ;;  %v914_v34 = vsel %vm811_vm0, %v3308_v16, 0.0 }
 0x154   : > { %2972 = vpow2.f32 %v882_v17  ;;  %v870_v26 = vsub.f32 %v3236_v53, %v844_v18  ;;  %915 = vadd.xlane.f32.xlu1 %v914_v34 }
 0x156   : > { %v3313_v20 = vpop.eup %2968  ;;  %v896_v21 = vmul.f32 1.442695, %v870_v26 }
 0x157   : > { %v3315_v22 = vpop.eup %2970  ;;  %v935_v23 = vsel %vm811_vm0, %v3313_v20, 0.0 }
 0x158   : > { %2974 = vpow2.f32 %v896_v21  ;;  %936 = vadd.xlane.f32.xlu1 %v935_v23  ;;  %v932_v47 = vsel %vm811_vm0, %v3315_v22, 0.0 }
 0x159   : > { %933 = vadd.xlane.f32.xlu0 %v932_v47 }
 0x15b   : > { %v826_v24 = vpop.xlane.xlu0 %825 }
 0x15c   : > { %v864_v27 = vsub.f32 %v3244_v1, %v826_v24  ;;  %v3067_v1 = vmov 0  }
 0x15d   : > { %2917 = vset.pattern.permute.xlu1 %v3067_v1 }
 0x15e   : > { %v3322_v28 = vpop.eup %2972  ;;  %v884_v53 = vmul.f32 1.442695, %v864_v27 }
 0x15f   : > { %v847_v31 = vpop.xlane.xlu1 %846  ;;  %v917_v33 = vsel %vm811_vm0, %v3322_v28, 0.0 }
 0x160   : > { %2976 = vpow2.f32 %v884_v53  ;;  %v871_v35 = vsub.f32 %v3250_v10, %v847_v31  ;;  %918 = vadd.xlane.f32.xlu0 %v917_v33 }
 0x162   : > { %v3327_v36 = vpop.eup %2974  ;;  %v898_v37 = vmul.f32 1.442695, %v871_v35 }
 0x163   : > { %v938_v38 = vsel %vm811_vm0, %v3327_v36, 0.0 }
 0x164   : > { %2978 = vpow2.f32 %v898_v37  ;;  %939 = vadd.xlane.f32.xlu1 %v938_v38 }
 0x167   : > { %v829_v41 = vpop.xlane.xlu0 %828 }
 0x168   : > { %v865_v42 = vsub.f32 %v3258_v19, %v829_v41 }
 0x16a   : > { %v3334_v43 = vpop.eup %2976  ;;  %v886_v10 = vmul.f32 1.442695, %v865_v42 }
 0x16b   : > { %v850_v29 = vpop.xlane.xlu1 %849  ;;  %v920_v44 = vsel %vm811_vm0, %v3334_v43, 0.0 }
 0x16c   : > { %2980 = vpow2.f32 %v886_v10  ;;  %v872_v46 = vsub.f32 %v3264_v32, %v850_v29  ;;  %921 = vadd.xlane.f32.xlu0 %v920_v44 }
 0x16e   : > { %v3339_v48 = vpop.eup %2978  ;;  %v900_v49 = vmul.f32 1.442695, %v872_v46 }
 0x16f   : > { %v832_v50 = vpop.xlane.xlu0 %831  ;;  %v941_v51 = vsel %vm811_vm0, %v3339_v48, 0.0 }
 0x170   : > { %2982 = vpow2.f32 %v900_v49  ;;  %v866_v19 = vsub.f32 %v3270_v40, %v832_v50  ;;  %942 = vadd.xlane.f32.xlu1 %v941_v51 }
 0x172   : > { %v888_v52 = vmul.f32 1.442695, %v866_v19 }
 0x173   : > { %v853_v56 = vpop.xlane.xlu1 %852  ;;  %v835_v57 = vpop.xlane.xlu0 %834 }
 0x174   : > { %2984 = vpow2.f32 %v888_v52  ;;  %v873_v61 = vsub.f32 %v3278_v30, %v853_v56  ;;  %v867_v32 = vsub.f32 %v3276_v45, %v835_v57 }
 0x176   : > { %v3346_v58 = vpop.eup %2980  ;;  %v902_v59 = vmul.f32 1.442695, %v873_v61  ;;  %v890_v60 = vmul.f32 1.442695, %v867_v32 }
 0x177   : > { %v856_v62 = vpop.xlane.xlu1 %855  ;;  %v859_v63 = vpop.xlane.xlu0 %858  ;;  %v923_v0 = vsel %vm811_vm0, %v3346_v58, 0.0 }
 0x178   : > { %2986 = vpow2.f32 %v902_v59  ;;  %v874_v40 = vsub.f32 %v3288_v55, %v856_v62  ;;  %v875_v2 = vsub.f32 %v3286_v54, %v859_v63  ;;  %924 = vadd.xlane.f32.xlu0 %v923_v0 }
 0x179   : > { %2988 = vpow2.f32 %v890_v60 }
 0x17a   : > { %v3352_v4 = vpop.eup %2982  ;;  %v904_v30 = vmul.f32 1.442695, %v874_v40  ;;  %v906_v45 = vmul.f32 1.442695, %v875_v2  ;;  %v3068_v2 = vmov 1  }
 0x17b   : > { %v944_v6 = vsel %vm811_vm0, %v3352_v4, 0.0 }
 0x17c   : > { %2990 = vpow2.f32 %v904_v30  ;;  %945 = vadd.xlane.f32.xlu1 %v944_v6  ;;  %v1815_v30 = vld [vmem:[%s4105_s3 + $0x48] sm:$0xff]  ;;  %v3069_v6 = vmov 3  }
 0x17d   : > { %2992 = vpow2.f32 %v906_v45 }
 0x17e   : > { %v3356_v8 = vpop.eup %2984 }
 0x17f   : > { %v926_v11 = vsel %vm811_vm0, %v3356_v8, 0.0 }
 0x180   : > { %927 = vadd.xlane.f32.xlu0 %v926_v11  ;;  %v1817_v11 = vld [vmem:[%s4105_s3 + $0x58] sm:$0xff] }
 0x182   : > { %v3360_v55 = vpop.eup %2986 }
 0x183   : > { %v3362_v54 = vpop.eup %2988  ;;  %v947_v7 = vsel %vm811_vm0, %v3360_v55, 0.0 }
 0x184   : > { %948 = vadd.xlane.f32.xlu1 %v947_v7  ;;  %v929_v9 = vsel %vm811_vm0, %v3362_v54, 0.0 }
 0x185   : > { %930 = vadd.xlane.f32.xlu0 %v929_v9  ;;  %v4112_v9 = vmov 4  }
 0x186   : > { %v3368_v12 = vpop.eup %2990 }
 0x187   : > { %v3370_v25 = vpop.eup %2992  ;;  %v950_v13 = vsel %vm811_vm0, %v3368_v12, 0.0 }
 0x188   : > { %951 = vadd.xlane.f32.xlu1 %v950_v13  ;;  %v953_v14 = vsel %vm811_vm0, %v3370_v25, 0.0 }
 0x189   : > { %954 = vadd.xlane.f32.xlu0 %v953_v14  ;;  %v3525_v14 = vld [vmem:[%s3521_s14 + $0x8] sm:$0xff] }
 0x1d5   : > { %v913_v17 = vpop.xlane.xlu0 %912 }
 0x1d6   : > { %v910_v15 = vpop.xlane.xlu1 %909 }
 0x1d7   : > { %2994 = vrcp.f32 %v910_v15  ;;  %v1393_v15 = vld [vmem:[%s4105_s3 + $0x20] sm:$0xff] }
 0x1d8   : > { %2996 = vrcp.f32 %v913_v17  ;;  %v1394_v17 = vld [vmem:[%s4105_s3 + $0x28] sm:$0xff] }
 0x1e1   : > { %v2995_v18 = vpop.eup %2994  ;;  %v916_v34 = vpop.xlane.xlu1 %915 }
 0x1e2   : > { %2998 = vrcp.f32 %v916_v34  ;;  %v3377_v26 = vmul.f32 %v2995_v18, %v3299_v5  ;;  %v2997_v21 = vpop.eup %2996  ;;  %v3535_v18 = vld [vmem:[%s3521_s14] sm:$0xff] }
 0x1e3   : > { %v3382_v24 = vmul.f32 %v2997_v21, %v3297_v3 }
 0x1e4   : > { %990 = vperm.xlu1 %2917, %v3377_v26   ;;  %1623 = vperm.xlu0 %2918, %v3377_v26  }
 0x1e5   : > { %v937_v23 = vpop.xlane.xlu1 %936 }
 0x1e6   : > { %v934_v47 = vpop.xlane.xlu0 %933 }
 0x1e7   : > { %3000 = vrcp.f32 %v934_v47 }
 0x1e8   : > { %2919 = vset.pattern.permute.xlu1 %v3066_v39  ;;  %3002 = vrcp.f32 %v937_v23  ;;  %v2840_v23 = vpack.c.bf16 %v1394_v17, %v1393_v15 }
 0x1e9   : > { %1627 = vperm.xlu1 %2919, %v3382_v24  }
 0x1ea   : > { %2841 = vmatprep.subr.bf16.mxu1 %v2840_v23 }
 0x1eb   : > { %2843 = vmatpush3.bf16.msra.mxu1 %v2840_v23 }
 0x1ec   : > { %v2999_v27 = vpop.eup %2998 }
 0x1ed   : > { %v919_v53 = vpop.xlane.xlu0 %918  ;;  %v3387_v5 = vmul.f32 %v2999_v27, %v3308_v16 }
 0x1ee   : > { %3004 = vrcp.f32 %v919_v53  ;;  %v3542_v53 = vld [vmem:[%s3521_s14 + $0x10] sm:$0xff] }
 0x1ef   : > { %1631 = vperm.xlu1 %2919, %v3387_v5  }
 0x1f1   : > { %v3001_v31 = vpop.eup %3000  ;;  %v940_v33 = vpop.xlane.xlu1 %939 }
 0x1f2   : > { %v3391_v35 = vmul.f32 %v3001_v31, %v3315_v22  ;;  %3006 = vrcp.f32 %v940_v33  ;;  %v3003_v3 = vpop.eup %3002  ;;  %v1395_v31 = vld [vmem:[%s4105_s3 + $0x30] sm:$0xff]  ;;  %v1396_v33 = vld [vmem:[%s4105_s3 + $0x38] sm:$0xff] }
 0x1f3   : > { %v3395_v37 = vmul.f32 %v3003_v3, %v3313_v20  ;;  %v2844_v3 = vpack.c.bf16 %v1396_v33, %v1395_v31 }
 0x1f4   : > { %1655 = vperm.xlu1 %2919, %v3391_v35  }
 0x1f5   : > { %2845 = vmatprep.subr.bf16.mxu1 %v2844_v3 }
 0x1f6   : > { %2847 = vmatpush3.bf16.msra.mxu1 %v2844_v3  ;;  %v3618_v3 = vld [vmem:[%s3521_s14 + $0x60] sm:$0xff] }
 0x1f8   : > { %v3005_v38 = vpop.eup %3004  ;;  %1659 = vperm.xlu1 %2919, %v3395_v37  }
 0x1f9   : > { %v3399_v16 = vmul.f32 %v3005_v38, %v3322_v28  ;;  %v922_v39 = vpop.xlane.xlu0 %921 }
 0x1fa   : > { %3008 = vrcp.f32 %v922_v39  ;;  %v3553_v39 = vld [vmem:[%s3521_s14 + $0x48] sm:$0xff] }
 0x1fc   : > { %v3007_v41 = vpop.eup %3006  ;;  %1635 = vperm.xlu1 %2919, %v3399_v16  }
 0x1fd   : > { %v943_v22 = vpop.xlane.xlu1 %942  ;;  %v3403_v42 = vmul.f32 %v3007_v41, %v3327_v36 }
 0x1fe   : > { %3010 = vrcp.f32 %v943_v22 }
 0x200   : > { %1663 = vperm.xlu1 %2919, %v3403_v42  }
 0x204   : > { %v3009_v20 = vpop.eup %3008 }
 0x205   : > { %v3407_v10 = vmul.f32 %v3009_v20, %v3334_v43  ;;  %v925_v29 = vpop.xlane.xlu0 %924 }
 0x206   : > { %3012 = vrcp.f32 %v925_v29  ;;  %v3560_v29 = vld [vmem:[%s3521_s14 + $0x40] sm:$0xff] }
 0x207   : > { %1639 = vperm.xlu1 %2919, %v3407_v10  }
 0x208   : > { %v3011_v28 = vpop.eup %3010 }
 0x209   : > { %v946_v44 = vpop.xlane.xlu1 %945  ;;  %v3411_v46 = vmul.f32 %v3011_v28, %v3339_v48 }
 0x20a   : > { %3014 = vrcp.f32 %v946_v44 }
 0x20b   : > { %1667 = vperm.xlu1 %2919, %v3411_v46  }
 0x20d   : > { %v928_v36 = vpop.xlane.xlu0 %927 }
 0x20e   : > { %3016 = vrcp.f32 %v928_v36 }
 0x210   : > { %v3013_v49 = vpop.eup %3012 }
 0x211   : > { %v3415_v50 = vmul.f32 %v3013_v49, %v3346_v58  ;;  %v949_v43 = vpop.xlane.xlu1 %948 }
 0x212   : > { %3018 = vrcp.f32 %v949_v43  ;;  %v931_v51 = vpop.xlane.xlu0 %930 }
 0x213   : > { %3020 = vrcp.f32 %v931_v51  ;;  %1643 = vperm.xlu0 %2918, %v3415_v50  }
 0x214   : > { %v3015_v19 = vpop.eup %3014 }
 0x215   : > { %v952_v52 = vpop.xlane.xlu1 %951  ;;  %v3419_v48 = vmul.f32 %v3015_v19, %v3352_v4  ;;  %v1814_v4 = vld [vmem:[%s4105_s3 + $0x40] sm:$0xff] }
 0x216   : > { %3022 = vrcp.f32 %v952_v52  ;;  %v955_v56 = vpop.xlane.xlu0 %954  ;;  %v2856_v45 = vpack.c.bf16 %v1815_v30, %v1814_v4  ;;  %v3589_v4 = vld [vmem:[%s3521_s14 + $0x58] sm:$0xff] }
 0x217   : > { %3024 = vrcp.f32 %v955_v56  ;;  %1671 = vperm.xlu1 %2919, %v3419_v48   ;;  %v3571_v56 = vld [vmem:[%s3521_s14 + $0x18] sm:$0xff] }
 0x218   : > { %v3017_v57 = vpop.eup %3016  ;;  %2857 = vmatprep.subr.bf16.mxu0 %v2856_v45 }
 0x219   : > { %v3423_v61 = vmul.f32 %v3017_v57, %v3356_v8  ;;  %2859 = vmatpush3.bf16.msra.mxu0 %v2856_v45  ;;  %v1816_v8 = vld [vmem:[%s4105_s3 + $0x50] sm:$0xff]  ;;  %v3574_v57 = vld [vmem:[%s3521_s14 + $0x20] sm:$0xff] }
 0x21b   : > { %1647 = vperm.xlu0 %2918, %v3423_v61  }
 0x21c   : > { %v3019_v32 = vpop.eup %3018 }
 0x21d   : > { %v3021_v58 = vpop.eup %3020  ;;  %v3427_v59 = vmul.f32 %v3019_v32, %v3360_v55  ;;  %v2860_v55 = vpack.c.bf16 %v1817_v11, %v1816_v8 }
 0x21e   : > { %v3430_v60 = vmul.f32 %v3021_v58, %v3362_v54 }
 0x21f   : > { %1675 = vperm.xlu1 %2919, %v3427_v59   ;;  %2861 = vmatprep.subr.bf16.mxu0 %v2860_v55 }
 0x220   : > { %v3023_v62 = vpop.eup %3022  ;;  %1651 = vperm.xlu0 %2918, %v3430_v60   ;;  %2863 = vmatpush3.bf16.msra.mxu0 %v2860_v55 }
 0x221   : > { %v3025_v63 = vpop.eup %3024  ;;  %v3435_v0 = vmul.f32 %v3023_v62, %v3368_v12  ;;  %v3578_v62 = vld [vmem:[%s3521_s14 + $0x50] sm:$0xff] }
 0x222   : > { %v3438_v40 = vmul.f32 %v3025_v63, %v3370_v25 }
 0x223   : > { %1679 = vperm.xlu1 %2919, %v3435_v0  }
 0x224   : > { %1683 = vperm.xlu0 %2918, %v3438_v40  }
 0x227   : > { %2920 = vset.pattern.permute.xlu1 %v3068_v2 }
 0x228   : > { %2921 = vset.pattern.permute.xlu0 %v3068_v2  ;;  %1202 = vperm.xlu1 %2920, %v3377_v26  }
 0x229   : > { %1206 = vperm.xlu0 %2921, %v3382_v24  }
 0x22c   : > { %2922 = vset.pattern.permute.xlu1 %v3069_v6 }
 0x22d   : > { %1210 = vperm.xlu0 %2921, %v3387_v5   ;;  %1930 = vperm.xlu1 %2922, %v3377_v26  }
 0x231   : > { %1238 = vperm.xlu0 %2921, %v3395_v37   ;;  %1934 = vperm.xlu1 %2922, %v3382_v24  }
 0x235   : > { %2925 = vset.pattern.permute.xlu0 %v3069_v6  ;;  %2923 = vset.pattern.permute.xlu1 %v3068_v2 }
 0x236   : > { %1962 = vperm.xlu0 %2925, %v3391_v35   ;;  %1234 = vperm.xlu1 %2923, %v3391_v35  }
 0x23a   : > { %2927 = vset.pattern.permute.xlu0 %v3068_v2  ;;  %2924 = vset.pattern.permute.xlu1 %v3069_v6 }
 0x23b   : > { %1242 = vperm.xlu0 %2927, %v3403_v42   ;;  %1938 = vperm.xlu1 %2924, %v3387_v5  }
 0x23f   : > { %1218 = vperm.xlu0 %2927, %v3407_v10   ;;  %1966 = vperm.xlu1 %2924, %v3395_v37  }
 0x243   : > { %2930 = vset.pattern.permute.xlu0 %v3069_v6  ;;  %2926 = vset.pattern.permute.xlu1 %v3068_v2 }
 0x244   : > { %1946 = vperm.xlu0 %2930, %v3407_v10   ;;  %1214 = vperm.xlu1 %2926, %v3399_v16  }
 0x248   : > { %2933 = vset.pattern.permute.xlu0 %v3068_v2  ;;  %2928 = vset.pattern.permute.xlu1 %v3069_v6 }
 0x249   : > { %1250 = vperm.xlu0 %2933, %v3419_v48   ;;  %1942 = vperm.xlu1 %2928, %v3399_v16  }
 0x24d   : > { %1226 = vperm.xlu0 %2933, %v3423_v61   ;;  %1970 = vperm.xlu1 %2928, %v3403_v42  }
 0x251   : > { %2936 = vset.pattern.permute.xlu0 %v3069_v6  ;;  %2929 = vset.pattern.permute.xlu1 %v3068_v2 }
 0x252   : > { %1954 = vperm.xlu0 %2936, %v3423_v61   ;;  %1246 = vperm.xlu1 %2929, %v3411_v46  }
 0x256   : > { %2939 = vset.pattern.permute.xlu0 %v3068_v2  ;;  %2931 = vset.pattern.permute.xlu1 %v3069_v6 }
 0x257   : > { %1258 = vperm.xlu0 %2939, %v3435_v0   ;;  %1974 = vperm.xlu1 %2931, %v3411_v46  }
 0x25b   : > { %1262 = vperm.xlu0 %2939, %v3438_v40   ;;  %2932 = vset.pattern.permute.xlu1 %v3068_v2 }
 0x25c   : > { %1222 = vperm.xlu1 %2932, %v3415_v50  }
 0x25f   : > { %2941 = vset.pattern.permute.xlu0 %v3067_v1 }
 0x260   : > { %995 = vperm.xlu0 %2941, %v3382_v24   ;;  %2934 = vset.pattern.permute.xlu1 %v3069_v6 }
 0x261   : > { %1950 = vperm.xlu1 %2934, %v3415_v50  }
 0x263   : > { %v3498_v54 = vpop.permute.xlu1 %990  ;;  %v1624_v34 = vpop.permute.xlu0 %1623 }
 0x264   : > { %4120 = vst [vmem:[#allocation2_spill] sm:$0xff] %v3498_v54  ;;  %1000 = vperm.xlu0 %2941, %v3387_v5   ;;  %v1686_v27 = vmul.f32 %v1624_v34, %v3535_v18 }
 0x265   : > { %1978 = vperm.xlu1 %2934, %v3419_v48  }
 0x266   : > { %v1702_v20 = vsel %vm1084_vm1, %v1686_v27, 0.0 }
 0x267   : > { %v1703_v44 = vrot.slane %v1702_v20, 4 }
 0x268   : > { %1035 = vperm.xlu0 %2941, %v3395_v37   ;;  %v1628_v7 = vpop.permute.xlu1 %1627 }
 0x269   : > { %2935 = vset.pattern.permute.xlu1 %v3068_v2  ;;  %v1687_v47 = vmul.f32 %v1628_v7, %v3525_v14 }
 0x26a   : > { %1254 = vperm.xlu1 %2935, %v3427_v59  }
 0x26b   : > { %v1709_v38 = vsel %vm1084_vm1, %v1687_v47, 0.0  ;;  %v2572_v47 = vld [vmem:[%s3605_s28] sm:$0xff] }
 0x26c   : > { %2945 = vset.pattern.permute.xlu0 %v4112_v9 }
 0x26d   : > { %2269 = vperm.xlu0 %2945, %v3391_v35  }
 0x26e   : > { %v1632_v12 = vpop.permute.xlu1 %1631  ;;  %2937 = vset.pattern.permute.xlu1 %v3069_v6 }
 0x26f   : > { %1982 = vperm.xlu1 %2937, %v3427_v59   ;;  %v1688_v41 = vmul.f32 %v1632_v12, %v3542_v53  ;;  %v3599_v12 = vld [vmem:[%s3521_s14 + $0x28] sm:$0xff] }
 0x271   : > { %2947 = vset.pattern.permute.xlu0 %v3067_v1  ;;  %v1716_v36 = vsel %vm1084_vm1, %v1688_v41, 0.0 }
 0x272   : > { %1040 = vperm.xlu0 %2947, %v3403_v42   ;;  %v1717_v52 = vrot.slane %v1716_v36, 4 }
 0x273   : > { %v1656_v25 = vpop.permute.xlu1 %1655  ;;  %2938 = vset.pattern.permute.xlu1 %v3068_v2 }
 0x274   : > { %1230 = vperm.xlu1 %2938, %v3430_v60   ;;  %v1694_v43 = vmul.f32 %v1656_v25, %v3560_v29 }
 0x276   : > { %1010 = vperm.xlu0 %2947, %v3407_v10   ;;  %v1758_v32 = vsel %vm1084_vm1, %v1694_v43, 0.0 }
 0x277   : > { %v1660_v13 = vpop.permute.xlu1 %1659  ;;  %v1759_v55 = vrot.slane %v1758_v32, 4 }
 0x278   : > { %2940 = vset.pattern.permute.xlu1 %v3069_v6  ;;  %v1695_v28 = vmul.f32 %v1660_v13, %v3553_v39  ;;  %v1718_v6 = vadd.f32 %v1717_v52, %v1716_v36 }
 0x279   : > { %1958 = vperm.xlu1 %2940, %v3430_v60   ;;  %v1760_v31 = vadd.f32 %v1759_v55, %v1758_v32 }
 0x27a   : > { %2950 = vset.pattern.permute.xlu0 %v4112_v9  ;;  %v1765_v19 = vsel %vm1084_vm1, %v1695_v28, 0.0  ;;  %v1719_v34 = vrot.slane %v1718_v6, 2 }
 0x27b   : > { %2253 = vperm.xlu0 %2950, %v3407_v10   ;;  %v1636_v21 = vpop.permute.xlu1 %1635  ;;  %v1710_v10 = vrot.slane %v1709_v38, 4  ;;  %v1766_v58 = vrot.slane %v1765_v19, 4 }
 0x27c   : > { %v1689_v2 = vmul.f32 %v1636_v21, %v3571_v56  ;;  %v1720_v36 = vadd.f32 %v1719_v34, %v1718_v6 }
 0x27d   : > { %1986 = vperm.xlu1 %2940, %v3435_v0   ;;  %v1711_v51 = vadd.f32 %v1710_v10, %v1709_v38  ;;  %v1767_v25 = vadd.f32 %v1766_v58, %v1765_v19 }
 0x27e   : > { %v1721_v6 = vrot.slane %v1720_v36, 1 }
 0x27f   : > { %2953 = vset.pattern.permute.xlu0 %v3067_v1  ;;  %v1664_v22 = vpop.permute.xlu1 %1663  ;;  %v1712_v63 = vrot.slane %v1711_v51, 2  ;;  %v1768_v38 = vrot.slane %v1767_v25, 2 }
 0x280   : > { %1050 = vperm.xlu0 %2953, %v3419_v48   ;;  %v1696_v7 = vmul.f32 %v1664_v22, %v3578_v62 }
 0x281   : > { %1990 = vperm.xlu1 %2940, %v3438_v40   ;;  %v1713_v15 = vadd.f32 %v1712_v63, %v1711_v51  ;;  %v1769_v32 = vadd.f32 %v1768_v38, %v1767_v25  ;;  %v3633_v25 = vld [vmem:[%s3521_s14 + $0x68] sm:$0xff] }
 0x282   : > { %v1772_v33 = vsel %vm1084_vm1, %v1696_v7, 0.0  ;;  %4121 = vst [vmem:[#allocation3_spill] sm:$0xff] %v3633_v25 }
 0x283   : > { %v1714_v10 = vrot.slane %v1713_v15, 1 }
 0x284   : > { %1020 = vperm.xlu0 %2953, %v3423_v61  }
 0x285   : > { %2942 = vset.pattern.permute.xlu1 %v4112_v9 }
 0x286   : > { %2237 = vperm.xlu1 %2942, %v3377_v26   ;;  %v1640_v49 = vpop.permute.xlu1 %1639  ;;  %v1704_v26 = vadd.f32 %v1703_v44, %v1702_v20 }
 0x287   : > { %v1690_v8 = vmul.f32 %v1640_v49, %v3574_v57  ;;  %v1773_v49 = vrot.slane %v1772_v33, 4 }
 0x288   : > { %2956 = vset.pattern.permute.xlu0 %v4112_v9  ;;  %v1705_v11 = vrot.slane %v1704_v26, 2 }
 0x289   : > { %2261 = vperm.xlu0 %2956, %v3423_v61   ;;  %v2121_v61 = vld [vmem:[%s4105_s3 + $0x60] sm:$0xff]  ;;  %v1730_v21 = vsel %vm1084_vm1, %v1690_v8, 0.0  ;;  %v1774_v8 = vadd.f32 %v1773_v49, %v1772_v33  ;;  %v3643_v33 = vadd.f32 %v1721_v6, %v1720_v36 }
 0x28a   : > { %2241 = vperm.xlu1 %2942, %v3382_v24   ;;  %v2122_v24 = vld [vmem:[%s4105_s3 + $0x68] sm:$0xff]  ;;  %v1668_v30 = vpop.permute.xlu1 %1667  ;;  %v1706_v27 = vadd.f32 %v1705_v11, %v1704_v26  ;;  %v1731_v28 = vrot.slane %v1730_v21, 4  ;;  %v3625_v26 = vld [vmem:[%s3521_s14 + $0x30] sm:$0xff] }
 0x28b   : > { %v3593_v45 = vpack.c.bf16 %v2122_v24, %v2121_v61  ;;  %v1697_v13 = vmul.f32 %v1668_v30, %v3589_v4  ;;  %v1715_v24 = vadd.f32 %v1714_v10, %v1713_v15  ;;  %v1775_v38 = vrot.slane %v1774_v8, 2 }
 0x28c   : > { %v1707_v19 = vrot.slane %v1706_v27, 1  ;;  %v1732_v63 = vadd.f32 %v1731_v28, %v1730_v21  ;;  %v3638_v21 = vld [vmem:[%s3521_s14 + $0x38] sm:$0xff] }
 0x28d   : > { %2959 = vset.pattern.permute.xlu0 %v3067_v1  ;;  %2865 = vmatprep.subr.bf16.mxu0 %v3593_v45  ;;  %v1779_v22 = vsel %vm1084_vm1, %v1697_v13, 0.0  ;;  %4122 = vst [vmem:[#allocation4_spill] sm:$0xff] %v3638_v21 }
 0x28e   : > { %1060 = vperm.xlu0 %2959, %v3435_v0   ;;  %2943 = vset.pattern.permute.xlu1 %v3067_v1  ;;  %v1780_v52 = vrot.slane %v1779_v22, 4  ;;  %v1708_v7 = vadd.f32 %v1707_v19, %v1706_v27 }
 0x28f   : > { %1030 = vperm.xlu1 %2943, %v3391_v35   ;;  %v1723_v35 = vsel %vm1084_vm1, %v1689_v2, 0.0 }
 0x290   : > { %v1724_v41 = vrot.slane %v1723_v35, 4  ;;  %v1781_v13 = vadd.f32 %v1780_v52, %v1779_v22  ;;  %v3656_v52 = vld [vmem:[%s3521_s14 + $0x78] sm:$0xff] }
 0x291   : > { %4123 = vst [vmem:[#allocation5_spill] sm:$0xff] %v3656_v52 }
 0x292   : > { %1065 = vperm.xlu0 %2959, %v3438_v40   ;;  %v1644_v17 = vpop.permute.xlu0 %1643  ;;  %v1725_v58 = vadd.f32 %v1724_v41, %v1723_v35  ;;  %v1770_v35 = vrot.slane %v1769_v32, 1  ;;  %v1782_v28 = vrot.slane %v1781_v13, 2 }
 0x293   : > { %v1691_v23 = vmul.f32 %v1644_v17, %v3599_v12  ;;  %2944 = vset.pattern.permute.xlu1 %v4112_v9 }
 0x294   : > { %2245 = vperm.xlu1 %2944, %v3387_v5   ;;  %v1761_v5 = vrot.slane %v1760_v31, 2  ;;  %v1726_v17 = vrot.slane %v1725_v58, 2 }
 0x295   : > { %v1737_v20 = vsel %vm1084_vm1, %v1691_v23, 0.0  ;;  %v3641_v23 = vsel %vm1413_vm2, %v1715_v24, %v1708_v7 }
 0x296   : > { %v1672_v44 = vpop.permute.xlu1 %1671  ;;  %2576 = vperm.xlu0 %2959, %v2572_v47   ;;  %v1738_v43 = vrot.slane %v1737_v20, 4  ;;  %v1733_v47 = vrot.slane %v1732_v63, 2  ;;  %v1727_v19 = vadd.f32 %v1726_v17, %v1725_v58  ;;  %v1783_v17 = vadd.f32 %v1782_v28, %v1781_v13 }
 0x297   : > { %v1698_v51 = vmul.f32 %v1672_v44, %v3618_v3 }
 0x298   : > { %2273 = vperm.xlu1 %2944, %v3395_v37   ;;  %v1739_v11 = vadd.f32 %v1738_v43, %v1737_v20  ;;  %v3629_v37 = vadd.f32 %v1761_v5, %v1760_v31  ;;  %v3649_v43 = vld [vmem:[%s3521_s14 + $0x70] sm:$0xff] }
 0x299   : > { %v1786_v61 = vsel %vm1084_vm1, %v1698_v51, 0.0  ;;  %v3651_v51 = vadd.f32 %v1770_v35, %v1769_v32  ;;  %v1776_v32 = vadd.f32 %v1775_v38, %v1774_v8 }
 0x29a   : > { %v1787_v2 = vrot.slane %v1786_v61, 4  ;;  %v1648_v30 = vpop.permute.xlu0 %1647  ;;  %v1740_v41 = vrot.slane %v1739_v11, 2  ;;  %v1763_v10 = vrot.slane %v3629_v37, 1 }
 0x29b   : > { %v1692_v55 = vmul.f32 %v1648_v30, %v3625_v26  ;;  %v1777_v13 = vrot.slane %v1776_v32, 1 }
 0x29c   : > { %2946 = vset.pattern.permute.xlu1 %v3067_v1  ;;  %v1788_v15 = vadd.f32 %v1787_v2, %v1786_v61  ;;  %v1734_v61 = vadd.f32 %v1733_v47, %v1732_v63  ;;  %v1728_v47 = vrot.slane %v1727_v19, 1 }
 0x29d   : > { %v1744_v34 = vsel %vm1084_vm1, %v1692_v55, 0.0  ;;  %1005 = vperm.xlu1 %2946, %v3399_v16   ;;  %v1741_v55 = vadd.f32 %v1740_v41, %v1739_v11  ;;  %v1778_v54 = vadd.f32 %v1777_v13, %v1776_v32 }
 0x29e   : > { %v1745_v27 = vrot.slane %v1744_v34, 4  ;;  %v1676_v31 = vpop.permute.xlu1 %1675  ;;  %v1789_v36 = vrot.slane %v1788_v15, 2 }
 0x29f   : > { %v1699_v22 = vmul.f32 %v1676_v31, %v3633_v25  ;;  %v1652_v20 = vpop.permute.xlu0 %1651  ;;  %v1742_v41 = vrot.slane %v1741_v55, 1 }
 0x2a0   : > { %v1746_v44 = vadd.f32 %v1745_v27, %v1744_v34  ;;  %v1693_v49 = vmul.f32 %v1652_v20, %v3638_v21  ;;  %v1790_v31 = vadd.f32 %v1789_v36, %v1788_v15 }
 0x2a1   : > { %v1793_v5 = vsel %vm1084_vm1, %v1699_v22, 0.0  ;;  %2948 = vset.pattern.permute.xlu1 %v4112_v9  ;;  %v1743_v21 = vadd.f32 %v1742_v41, %v1741_v55 }
 0x2a2   : > { %v1747_v24 = vrot.slane %v1746_v44, 2  ;;  %v1794_v2 = vrot.slane %v1793_v5, 4  ;;  %v1751_v30 = vsel %vm1084_vm1, %v1693_v49, 0.0  ;;  %v1680_v6 = vpop.permute.xlu1 %1679  ;;  %2249 = vperm.xlu1 %2948, %v3399_v16   ;;  %v1735_v16 = vrot.slane %v1734_v61, 1 }
 0x2a3   : > { %v1752_v58 = vrot.slane %v1751_v30, 4  ;;  %v1700_v7 = vmul.f32 %v1680_v6, %v3649_v43  ;;  %v1684_v35 = vpop.permute.xlu0 %1683  ;;  %v1791_v6 = vrot.slane %v1790_v31, 1 }
 0x2a4   : > { %v1748_v34 = vadd.f32 %v1747_v24, %v1746_v44  ;;  %v1795_v27 = vadd.f32 %v1794_v2, %v1793_v5  ;;  %v1701_v63 = vmul.f32 %v1684_v35, %v3656_v52  ;;  %v1784_v5 = vrot.slane %v1783_v17, 1 }
 0x2a5   : > { %v1753_v22 = vadd.f32 %v1752_v58, %v1751_v30  ;;  %v1800_v20 = vsel %vm1084_vm1, %v1700_v7, 0.0  ;;  %v1729_v30 = vadd.f32 %v1728_v47, %v1727_v19  ;;  %v1764_v35 = vadd.f32 %v1763_v10, %v3629_v37 }
 0x2a6   : > { %v1796_v8 = vrot.slane %v1795_v27, 2  ;;  %v1801_v11 = vrot.slane %v1800_v20, 4  ;;  %v1807_v38 = vsel %vm1084_vm1, %v1701_v63, 0.0  ;;  %2277 = vperm.xlu1 %2948, %v3403_v42   ;;  %v1749_v24 = vrot.slane %v1748_v34, 1 }
 0x2a7   : > { %v1754_v28 = vrot.slane %v1753_v22, 2  ;;  %v1808_v44 = vrot.slane %v1807_v38, 4  ;;  %v1203_v49 = vpop.permute.xlu1 %1202  ;;  %v1736_v63 = vadd.f32 %v1735_v16, %v1734_v61  ;;  %v1835_v37 = vsel %vm1415_vm3, %v3643_v33, %v3641_v23 }
 0x2a8   : > { %v1797_v15 = vadd.f32 %v1796_v8, %v1795_v27  ;;  %v1802_v36 = vadd.f32 %v1801_v11, %v1800_v20  ;;  %v1207_v2 = vpop.permute.xlu0 %1206  ;;  %v1785_v27 = vadd.f32 %v1784_v5, %v1783_v17  ;;  %v1750_v47 = vadd.f32 %v1749_v24, %v1748_v34 }
 0x2a9   : > { %v1755_v58 = vadd.f32 %v1754_v28, %v1753_v22  ;;  %v1809_v7 = vadd.f32 %v1808_v44, %v1807_v38  ;;  %v1841_v10 = vsel %vm1413_vm2, %v3651_v51, %v1764_v35  ;;  %v1792_v61 = vadd.f32 %v1791_v6, %v1790_v31 }
 0x2aa   : > { %v1798_v9 = vrot.slane %v1797_v15, 1  ;;  %v1803_v42 = vrot.slane %v1802_v36, 2  ;;  %2949 = vset.pattern.permute.xlu1 %v3067_v1  ;;  %v1836_v32 = vsel %vm1417_vm4, %v1729_v30, %v1835_v37  ;;  %v1842_v38 = vsel %vm1415_vm3, %v1778_v54, %v1841_v10  ;;  %v2123_v54 = vld [vmem:[%s4105_s3 + $0x70] sm:$0xff] }
 0x2ab   : > { %v1810_v25 = vrot.slane %v1809_v7, 2  ;;  %1045 = vperm.xlu1 %2949, %v3411_v46   ;;  %v1756_v52 = vrot.slane %v1755_v58, 1  ;;  %v1837_v17 = vsel %vm1419_vm5, %v1736_v63, %v1836_v32  ;;  %v4124_v34 = vmov 4  }
 0x2ac   : > { %v1804_v20 = vadd.f32 %v1803_v42, %v1802_v36  ;;  %v1211_v8 = vpop.permute.xlu0 %1210  ;;  %v1931_v19 = vpop.permute.xlu1 %1930  ;;  %v1799_v55 = vadd.f32 %v1798_v9, %v1797_v15  ;;  %v1838_v41 = vsel %vm1421_vm6, %v1743_v21, %v1837_v17  ;;  %v1843_v23 = vsel %vm1417_vm4, %v1785_v27, %v1842_v38  ;;  %v2124_v21 = vld [vmem:[%s4105_s3 + $0x78] sm:$0xff] }
 0x2ad   : > { %v1811_v22 = vadd.f32 %v1810_v25, %v1809_v7  ;;  %v1757_v11 = vadd.f32 %v1756_v52, %v1755_v58  ;;  %v1839_v51 = vsel %vm1423_vm7, %v1750_v47, %v1838_v41  ;;  %v1844_v28 = vsel %vm1419_vm5, %v1792_v61, %v1843_v23 }
 0x2ae   : > { %v1805_v16 = vrot.slane %v1804_v20, 1  ;;  %v1845_v44 = vsel %vm1421_vm6, %v1799_v55, %v1844_v28  ;;  %v1265_v30 = vmul.f32 %v1203_v49, %v3535_v18  ;;  %v1266_v6 = vmul.f32 %v1207_v2, %v3525_v14 }
 0x2af   : > { %v1812_v13 = vrot.slane %v1811_v22, 1  ;;  %2951 = vset.pattern.permute.xlu1 %v4124_v34  ;;  %v1840_v52 = vsel %vm1425_vm8, %v1757_v11, %v1839_v51  ;;  %v1267_v42 = vmul.f32 %v1211_v8, %v3542_v53  ;;  %v1993_v49 = vmul.f32 %v1931_v19, %v3535_v18 }
 0x2b0   : > { %v1806_v33 = vadd.f32 %v1805_v16, %v1804_v20  ;;  %v1239_v25 = vpop.permute.xlu0 %1238  ;;  %v1935_v31 = vpop.permute.xlu1 %1934  ;;  %2281 = vperm.xlu1 %2951, %v3411_v46   ;;  %2815 = vmatprep.mubr.msk.f32.mxu0 %vm1084_vm1, %v1840_v52  ;;  %v2868_v46 = vpack.c.bf16 %v2124_v21, %v2123_v54  ;;  %v1281_v7 = vsel %vm1084_vm1, %v1265_v30, 0.0  ;;  %v1288_v35 = vsel %vm1084_vm1, %v1266_v6, 0.0 }
 0x2b1   : > { %v1813_v9 = vadd.f32 %v1812_v13, %v1811_v22  ;;  %v1282_v27 = vrot.slane %v1281_v7, 4  ;;  %v1289_v2 = vrot.slane %v1288_v35, 4  ;;  %v1295_v20 = vsel %vm1084_vm1, %v1267_v42, 0.0 }
 0x2b2   : > { %v1846_v5 = vsel %vm1423_vm7, %v1806_v33, %v1845_v44  ;;  %v1274_v37 = vmul.f32 %v1239_v25, %v3553_v39  ;;  %v1296_v18 = vrot.slane %v1295_v20, 4 }
 0x2b3   : > { %v1847_v24 = vsel %vm1425_vm8, %v1813_v9, %v1846_v5  ;;  %v1283_v47 = vadd.f32 %v1282_v27, %v1281_v7  ;;  %v1290_v61 = vadd.f32 %v1289_v2, %v1288_v35 }
 0x2b4   : > { %2952 = vset.pattern.permute.xlu1 %v3067_v1  ;;  %2816 = vmatmul.mubr.msk.f32.vlgmr.msra.gmra.mrb[0].mxu0 %vm1084_vm1, %v1847_v24  ;;  %v1344_v16 = vsel %vm1084_vm1, %v1274_v37, 0.0  ;;  %v1297_v13 = vadd.f32 %v1296_v18, %v1295_v20 }
 0x2b5   : > { %v1235_v15 = vpop.permute.xlu1 %1234  ;;  %1015 = vperm.xlu1 %2952, %v3415_v50   ;;  %v1963_v36 = vpop.permute.xlu0 %1962  ;;  %2867 = vmatpush3.bf16.msra.mxu0 %v3593_v45  ;;  %v1284_v55 = vrot.slane %v1283_v47, 2  ;;  %v1291_v11 = vrot.slane %v1290_v61, 2  ;;  %v1345_v25 = vrot.slane %v1344_v16, 4 }
 0x2b6   : > { %2869 = vmatprep.subr.bf16.mxu0 %v2868_v46  ;;  %v1273_v8 = vmul.f32 %v1235_v15, %v3560_v29  ;;  %v2001_v23 = vmul.f32 %v1963_v36, %v3560_v29  ;;  %v1298_v21 = vrot.slane %v1297_v13, 2 }
 0x2b7   : > { %v1285_v9 = vadd.f32 %v1284_v55, %v1283_v47  ;;  %v1292_v28 = vadd.f32 %v1291_v11, %v1290_v61 }
 0x2b8   : > { %v1337_v17 = vsel %vm1084_vm1, %v1273_v8, 0.0  ;;  %v2065_v44 = vsel %vm1084_vm1, %v2001_v23, 0.0 }
 0x2b9   : > { %2954 = vset.pattern.permute.xlu1 %v4124_v34  ;;  %2871 = vmatpush3.bf16.msra.mxu0 %v2868_v46  ;;  %v1338_v52 = vrot.slane %v1337_v17, 4  ;;  %v1286_v24 = vrot.slane %v1285_v9, 1  ;;  %v1293_v6 = vrot.slane %v1292_v28, 1  ;;  %v2066_v7 = vrot.slane %v2065_v44, 4 }
 0x2ba   : > { %v1939_v58 = vpop.permute.xlu1 %1938  ;;  %2257 = vperm.xlu1 %2954, %v3415_v50   ;;  %v1243_v63 = vpop.permute.xlu0 %1242  ;;  %v2009_v50 = vsel %vm1084_vm1, %v1993_v49, 0.0 }
 0x2bb   : > { %v2010_v19 = vrot.slane %v2009_v50, 4  ;;  %v1275_v32 = vmul.f32 %v1243_v63, %v3578_v62  ;;  %v1995_v38 = vmul.f32 %v1939_v58, %v3542_v53  ;;  %v1339_v15 = vadd.f32 %v1338_v52, %v1337_v17 }
 0x2bc   : > { %v1299_v63 = vadd.f32 %v1298_v21, %v1297_v13  ;;  %v1287_v37 = vadd.f32 %v1286_v24, %v1285_v9  ;;  %v1198_v24 = vld [vmem:[%s4105_s3 + $0x8] sm:$0xff] }
 0x2bd   : > { %v2011_v51 = vadd.f32 %v2010_v19, %v2009_v50  ;;  %v2023_v53 = vsel %vm1084_vm1, %v1995_v38, 0.0  ;;  %v1340_v61 = vrot.slane %v1339_v15, 2  ;;  %v2067_v19 = vadd.f32 %v2066_v7, %v2065_v44 }
 0x2be   : > { %v1967_v45 = vpop.permute.xlu1 %1966  ;;  %2285 = vperm.xlu1 %2954, %v3419_v48   ;;  %v1219_v10 = vpop.permute.xlu0 %1218  ;;  %v1994_v48 = vmul.f32 %v1935_v31, %v3525_v14  ;;  %v1351_v31 = vsel %vm1084_vm1, %v1275_v32, 0.0  ;;  %v2024_v36 = vrot.slane %v2023_v53, 4 }
 0x2bf   : > { %v1352_v5 = vrot.slane %v1351_v31, 4  ;;  %v2012_v29 = vrot.slane %v2011_v51, 2  ;;  %v1269_v35 = vmul.f32 %v1219_v10, %v3574_v57  ;;  %v2002_v47 = vmul.f32 %v1967_v45, %v3553_v39 }
 0x2c0   : > { %v2016_v41 = vsel %vm1084_vm1, %v1994_v48, 0.0  ;;  %v2025_v8 = vadd.f32 %v2024_v36, %v2023_v53  ;;  %v1294_v10 = vadd.f32 %v1293_v6, %v1292_v28  ;;  %v1341_v17 = vadd.f32 %v1340_v61, %v1339_v15 }
 0x2c1   : > { %v2017_v54 = vrot.slane %v2016_v41, 4  ;;  %v1353_v42 = vadd.f32 %v1352_v5, %v1351_v31  ;;  %v2013_v2 = vadd.f32 %v2012_v29, %v2011_v51  ;;  %v2072_v11 = vsel %vm1084_vm1, %v2002_v47, 0.0 }
 0x2c2   : > { %2955 = vset.pattern.permute.xlu1 %v3067_v1  ;;  %v2073_v9 = vrot.slane %v2072_v11, 4  ;;  %v1342_v44 = vrot.slane %v1341_v17, 1 }
 0x2c3   : > { %v1215_v22 = vpop.permute.xlu1 %1214  ;;  %1055 = vperm.xlu1 %2955, %v3427_v59   ;;  %v1947_v33 = vpop.permute.xlu0 %1946  ;;  %v2018_v58 = vadd.f32 %v2017_v54, %v2016_v41  ;;  %v1354_v32 = vrot.slane %v1353_v42, 2 }
 0x2c4   : > { %v1997_v27 = vmul.f32 %v1947_v33, %v3574_v57  ;;  %v1268_v49 = vmul.f32 %v1215_v22, %v3571_v56  ;;  %v1309_v57 = vsel %vm1084_vm1, %v1269_v35, 0.0  ;;  %v1300_v22 = vrot.slane %v1299_v63, 1 }
 0x2c5   : > { %v2019_v48 = vrot.slane %v2018_v58, 2  ;;  %v1310_v38 = vrot.slane %v1309_v57, 4  ;;  %v2068_v33 = vrot.slane %v2067_v19, 2  ;;  %v1355_v31 = vadd.f32 %v1354_v32, %v1353_v42 }
 0x2c6   : > { %v2037_v55 = vsel %vm1084_vm1, %v1997_v27, 0.0  ;;  %v1302_v39 = vsel %vm1084_vm1, %v1268_v49, 0.0  ;;  %v1301_v52 = vadd.f32 %v1300_v22, %v1299_v63  ;;  %v2074_v35 = vadd.f32 %v2073_v9, %v2072_v11 }
 0x2c7   : > { %2957 = vset.pattern.permute.xlu1 %v4124_v34  ;;  %v2020_v23 = vadd.f32 %v2019_v48, %v2018_v58  ;;  %v1303_v51 = vrot.slane %v1302_v39, 4  ;;  %v1311_v29 = vadd.f32 %v1310_v38, %v1309_v57  ;;  %v3753_v36 = vadd.f32 %v2068_v33, %v2067_v19 }
 0x2c8   : > { %v1943_v14 = vpop.permute.xlu1 %1942  ;;  %2289 = vperm.xlu1 %2957, %v3427_v59   ;;  %v1346_v59 = vadd.f32 %v1345_v25, %v1344_v16  ;;  %v1251_v30 = vpop.permute.xlu0 %1250  ;;  %v1414_v25 = vsel %vm1413_vm2, %v1294_v10, %v1287_v37  ;;  %v1356_v7 = vrot.slane %v1355_v31, 1  ;;  %v2075_v19 = vrot.slane %v2074_v35, 2 }
 0x2c9   : > { %v1996_v18 = vmul.f32 %v1943_v14, %v3571_v56  ;;  %v1277_v56 = vmul.f32 %v1251_v30, %v3618_v3  ;;  %v2038_v14 = vrot.slane %v2037_v55, 4  ;;  %v2021_v15 = vrot.slane %v2020_v23, 1 }
 0x2ca   : > { %v1347_v20 = vrot.slane %v1346_v59, 2  ;;  %v1304_v6 = vadd.f32 %v1303_v51, %v1302_v39  ;;  %v1312_v37 = vrot.slane %v1311_v29, 2  ;;  %v3762_v61 = vsel %vm1415_vm3, %v1301_v52, %v1414_v25 }
 0x2cb   : > { %v2030_v13 = vsel %vm1084_vm1, %v1996_v18, 0.0  ;;  %v1365_v54 = vsel %vm1084_vm1, %v1277_v56, 0.0  ;;  %v2039_v30 = vadd.f32 %v2038_v14, %v2037_v55  ;;  %v2022_v18 = vadd.f32 %v2021_v15, %v2020_v23 }
 0x2cc   : > { %v3724_v46 = vpop.permute.xlu1 %1970  ;;  %2958 = vset.pattern.permute.xlu1 %v3067_v1  ;;  %v1227_v45 = vpop.permute.xlu0 %1226  ;;  %v1348_v16 = vadd.f32 %v1347_v20, %v1346_v59  ;;  %v2031_v53 = vrot.slane %v2030_v13, 4  ;;  %v1366_v63 = vrot.slane %v1365_v54, 4  ;;  %v1343_v20 = vadd.f32 %v1342_v44, %v1341_v17 }
 0x2cd   : > { %1025 = vperm.xlu1 %2958, %v3430_v60   ;;  %v1271_v27 = vmul.f32 %v1227_v45, %v3625_v26  ;;  %v2003_v49 = vmul.f32 %v3724_v46, %v3578_v62  ;;  %v2040_v10 = vrot.slane %v2039_v30, 2  ;;  %v2070_v48 = vrot.slane %v3753_v36, 1 }
 0x2ce   : > { %v1349_v21 = vrot.slane %v1348_v16, 1  ;;  %v1367_v62 = vadd.f32 %v1366_v63, %v1365_v54  ;;  %v1357_v32 = vadd.f32 %v1356_v7, %v1355_v31  ;;  %v3778_v9 = vadd.f32 %v2075_v19, %v2074_v35  ;;  %v4125_v7 = vld [vmem:[#allocation5_spill] sm:$0xff] }
 0x2cf   : > { %v1323_v39 = vsel %vm1084_vm1, %v1271_v27, 0.0  ;;  %v2041_v56 = vadd.f32 %v2040_v10, %v2039_v30 }
 0x2d0   : > { %v1324_v23 = vrot.slane %v1323_v39, 4  ;;  %v2077_v10 = vrot.slane %v3778_v9, 1 }
 0x2d1   : > { %v1247_v50 = vpop.permute.xlu1 %1246  ;;  %2960 = vset.pattern.permute.xlu1 %v4124_v34  ;;  %v2014_v34 = vrot.slane %v2013_v2, 1  ;;  %v1955_v59 = vpop.permute.xlu0 %1954 }
 0x2d2   : > { %2265 = vperm.xlu1 %2960, %v3430_v60   ;;  %v2026_v60 = vrot.slane %v2025_v8, 2  ;;  %v1276_v42 = vmul.f32 %v1247_v50, %v3589_v4  ;;  %v1305_v50 = vrot.slane %v1304_v6, 2  ;;  %v1325_v30 = vadd.f32 %v1324_v23, %v1323_v39 }
 0x2d3   : > { %v2015_v28 = vadd.f32 %v2014_v34, %v2013_v2 }
 0x2d4   : > { %v2027_v5 = vadd.f32 %v2026_v60, %v2025_v8  ;;  %v1350_v8 = vadd.f32 %v1349_v21, %v1348_v16  ;;  %v1358_v46 = vsel %vm1084_vm1, %v1276_v42, 0.0  ;;  %v1313_v16 = vadd.f32 %v1312_v37, %v1311_v29 }
 0x2d5   : > { %v1306_v17 = vadd.f32 %v1305_v50, %v1304_v6  ;;  %v1999_v60 = vmul.f32 %v1955_v59, %v3625_v26  ;;  %v1359_v38 = vrot.slane %v1358_v46, 4  ;;  %v2141_v25 = vsel %vm1413_vm2, %v2022_v18, %v2015_v28  ;;  %v2429_v28 = vld [vmem:[%s4105_s3 + $0x88] sm:$0xff] }
 0x2d6   : > { %v3741_v41 = vpop.permute.xlu1 %1974  ;;  %2293 = vperm.xlu1 %2960, %v3435_v0   ;;  %v1197_v0 = vld [vmem:[%s4105_s3] sm:$0xff]  ;;  %v2028_v47 = vrot.slane %v2027_v5, 1  ;;  %v1259_v57 = vpop.permute.xlu0 %1258  ;;  %v1427_v45 = vsel %vm1413_vm2, %v1350_v8, %v1343_v20  ;;  %v2042_v29 = vrot.slane %v2041_v56, 1  ;;  %v2573_v8 = vld [vmem:[%s3605_s28 + $0x8] sm:$0xff] }
 0x2d7   : > { %v3759_v2 = vpack.c.bf16 %v1198_v24, %v1197_v0  ;;  %v1279_v14 = vmul.f32 %v1259_v57, %v3649_v43  ;;  %v3776_v31 = vsel %vm1415_vm3, %v1357_v32, %v1427_v45  ;;  %v1307_v59 = vrot.slane %v1306_v17, 1 }
 0x2d8   : > { %v2029_v34 = vadd.f32 %v2028_v47, %v2027_v5  ;;  %v2428_v5 = vld [vmem:[%s4105_s3 + $0x80] sm:$0xff]  ;;  %v2051_v0 = vsel %vm1084_vm1, %v1999_v60, 0.0  ;;  %v1360_v24 = vadd.f32 %v1359_v38, %v1358_v46  ;;  %v4126_v47 = vld [vmem:[#allocation3_spill] sm:$0xff] }
 0x2d9   : > { %2849 = vmatprep.subr.bf16.mxu1 %v3759_v2  ;;  %v2052_v27 = vrot.slane %v2051_v0, 4  ;;  %v1308_v46 = vadd.f32 %v1307_v59, %v1306_v17 }
 0x2da   : > { %2297 = vperm.xlu1 %2960, %v3438_v40   ;;  %v2032_v40 = vadd.f32 %v2031_v53, %v2030_v13  ;;  %v1368_v13 = vrot.slane %v1367_v62, 2  ;;  %v2142_v54 = vsel %vm1415_vm3, %v2029_v34, %v2141_v25  ;;  %v1314_v53 = vrot.slane %v1313_v16, 1  ;;  %v1263_v21 = vpop.permute.xlu0 %1262 }
 0x2db   : > { %v1223_v58 = vpop.permute.xlu1 %1222  ;;  %v1280_v35 = vmul.f32 %v1263_v21, %v4125_v7  ;;  %v1361_v50 = vrot.slane %v1360_v24, 2  ;;  %v2053_v34 = vadd.f32 %v2052_v27, %v2051_v0 }
 0x2dc   : > { %v2033_v55 = vrot.slane %v2032_v40, 2  ;;  %v1270_v11 = vmul.f32 %v1223_v58, %v3599_v12  ;;  %v1369_v15 = vadd.f32 %v1368_v13, %v1367_v62  ;;  %v1379_v58 = vsel %vm1084_vm1, %v1279_v14, 0.0 }
 0x2dd   : > { %v1315_v18 = vadd.f32 %v1314_v53, %v1313_v16  ;;  %v1380_v19 = vrot.slane %v1379_v58, 4  ;;  %v2043_v62 = vadd.f32 %v2042_v29, %v2041_v56  ;;  %v1386_v32 = vsel %vm1084_vm1, %v1280_v35, 0.0  ;;  %v4127_v35 = vld [vmem:[#allocation4_spill] sm:$0xff] }
 0x2de   : > { %2961 = vset.pattern.permute.xlu1 %v3067_v1  ;;  %v2079_v1 = vsel %vm1084_vm1, %v2003_v49, 0.0  ;;  %v2034_v52 = vadd.f32 %v2033_v55, %v2032_v40  ;;  %v1316_v26 = vsel %vm1084_vm1, %v1270_v11, 0.0  ;;  %v3792_v40 = vpack.c.bf16 %v2429_v28, %v2428_v5 }
 0x2df   : > { %v2080_v33 = vrot.slane %v2079_v1, 4  ;;  %v1317_v63 = vrot.slane %v1316_v26, 4  ;;  %v2004_v49 = vmul.f32 %v3741_v41, %v3589_v4  ;;  %2581 = vperm.xlu1 %2961, %v2573_v8   ;;  %v1370_v57 = vrot.slane %v1369_v15, 1  ;;  %v3802_v41 = vpop.permute.xlu0 %995 }
 0x2e0   : > { %v1951_v22 = vpop.permute.xlu1 %1950  ;;  %2873 = vmatprep.subr.bf16.mxu0 %v3792_v40  ;;  %v1362_v60 = vadd.f32 %v1361_v50, %v1360_v24  ;;  %v1381_v38 = vadd.f32 %v1380_v19, %v1379_v58  ;;  %v1387_v23 = vrot.slane %v1386_v32, 4  ;;  %v1418_v14 = vsel %vm1417_vm4, %v1308_v46, %v3762_v61 }
 0x2e1   : > { %v1998_v44 = vmul.f32 %v1951_v22, %v3599_v12  ;;  %v2081_v6 = vadd.f32 %v2080_v33, %v2079_v1  ;;  %v2035_v12 = vrot.slane %v2034_v52, 1  ;;  %v1326_v22 = vrot.slane %v1325_v30, 2 }
 0x2e2   : > { %v1318_v4 = vadd.f32 %v1317_v63, %v1316_v26  ;;  %v2086_v16 = vsel %vm1084_vm1, %v2004_v49, 0.0  ;;  %v3810_v25 = vadd.f32 %v1370_v57, %v1369_v15  ;;  %v2054_v5 = vrot.slane %v2053_v34, 2 }
 0x2e3   : > { %v2044_v20 = vsel %vm1084_vm1, %v1998_v44, 0.0  ;;  %v2036_v1 = vadd.f32 %v2035_v12, %v2034_v52  ;;  %v2082_v45 = vrot.slane %v2081_v6, 2  ;;  %v1327_v13 = vadd.f32 %v1326_v22, %v1325_v30  ;;  %v3815_v29 = vpop.permute.xlu0 %1000 }
 0x2e4   : > { %v1979_v51 = vpop.permute.xlu1 %1978  ;;  %v2045_v55 = vrot.slane %v2044_v20, 4  ;;  %v1319_v52 = vrot.slane %v1318_v4, 2  ;;  %v2087_v28 = vrot.slane %v2086_v16, 4  ;;  %v1388_v15 = vadd.f32 %v1387_v23, %v1386_v32 }
 0x2e5   : > { %v2005_v56 = vmul.f32 %v1979_v51, %v3618_v3  ;;  %v2143_v26 = vsel %vm1417_vm4, %v2036_v1, %v2142_v54  ;;  %v3813_v44 = vadd.f32 %v2082_v45, %v2081_v6  ;;  %v1363_v3 = vrot.slane %v1362_v60, 1 }
 0x2e6   : > { %v2046_v53 = vadd.f32 %v2045_v55, %v2044_v20  ;;  %v1382_v51 = vrot.slane %v1381_v38, 2  ;;  %v1328_v61 = vrot.slane %v1327_v13, 1  ;;  %v1420_v58 = vsel %vm1419_vm5, %v1315_v18, %v1418_v14 }
 0x2e7   : > { %v2093_v59 = vsel %vm1084_vm1, %v2005_v56, 0.0  ;;  %v1320_v12 = vadd.f32 %v1319_v52, %v1318_v4  ;;  %v2055_v27 = vadd.f32 %v2054_v5, %v2053_v34  ;;  %v2088_v49 = vadd.f32 %v2087_v28, %v2086_v16  ;;  %v3823_v55 = vpop.permute.xlu0 %1035 }
 0x2e8   : > { %v2047_v54 = vrot.slane %v2046_v53, 2  ;;  %v2094_v20 = vrot.slane %v2093_v59, 4  ;;  %v1389_v19 = vrot.slane %v1388_v15, 2  ;;  %v1329_v18 = vadd.f32 %v1328_v61, %v1327_v13 }
 0x2e9   : > { %v1255_v42 = vpop.permute.xlu1 %1254  ;;  %v1321_v32 = vrot.slane %v1320_v12, 1  ;;  %v2144_v1 = vsel %vm1419_vm5, %v2043_v62, %v2143_v26  ;;  %v2056_v45 = vrot.slane %v2055_v27, 1  ;;  %v2089_v34 = vrot.slane %v2088_v49, 2 }
 0x2ea   : > { %v1278_v37 = vmul.f32 %v1255_v42, %v4126_v47  ;;  %v2084_v42 = vrot.slane %v3813_v44, 1  ;;  %v2048_v4 = vadd.f32 %v2047_v54, %v2046_v53  ;;  %v2095_v16 = vadd.f32 %v2094_v20, %v2093_v59 }
 0x2eb   : > { %v1390_v62 = vadd.f32 %v1389_v19, %v1388_v15 }
 0x2ec   : > { %v1372_v39 = vsel %vm1084_vm1, %v1278_v37, 0.0  ;;  %v1383_v37 = vadd.f32 %v1382_v51, %v1381_v38  ;;  %v1200_v38 = vld [vmem:[%s4105_s3 + $0x18] sm:$0xff]  ;;  %v2049_v26 = vrot.slane %v2048_v4, 1  ;;  %v2096_v51 = vrot.slane %v2095_v16, 2 }
 0x2ed   : > { %v1373_v17 = vrot.slane %v1372_v39, 4  ;;  %v1391_v54 = vrot.slane %v1390_v62, 1 }
 0x2ee   : > { %v1983_v11 = vpop.permute.xlu1 %1982 }
 0x2ef   : > { %v2006_v33 = vmul.f32 %v1983_v11, %v4126_v47  ;;  %v1374_v21 = vadd.f32 %v1373_v17, %v1372_v39  ;;  %v1364_v47 = vadd.f32 %v1363_v3, %v1362_v60  ;;  %v1199_v60 = vld [vmem:[%s4105_s3 + $0x10] sm:$0xff]  ;;  %v1384_v17 = vrot.slane %v1383_v37, 1 }
 0x2f0   : > { %v3837_v28 = vpack.c.bf16 %v1200_v38, %v1199_v60  ;;  %v2090_v3 = vadd.f32 %v2089_v34, %v2088_v49 }
 0x2f1   : > { %v1375_v0 = vrot.slane %v1374_v21, 2  ;;  %v2100_v30 = vsel %vm1084_vm1, %v2006_v33, 0.0  ;;  %v1429_v56 = vsel %vm1417_vm4, %v1364_v47, %v3776_v31  ;;  %v1385_v31 = vadd.f32 %v1384_v17, %v1383_v37 }
 0x2f2   : > { %v2101_v8 = vrot.slane %v2100_v30, 4  ;;  %v2057_v37 = vadd.f32 %v2056_v45, %v2055_v27 }
 0x2f3   : > { %v1231_v24 = vpop.permute.xlu1 %1230  ;;  %v1376_v6 = vadd.f32 %v1375_v0, %v1374_v21  ;;  %v1322_v21 = vadd.f32 %v1321_v32, %v1320_v12  ;;  %v1392_v32 = vadd.f32 %v1391_v54, %v1390_v62  ;;  %v2085_v62 = vadd.f32 %v2084_v42, %v3813_v44  ;;  %v3027_v54 = vld [vmem:[%s3521_s14] sm:$0xff] }
 0x2f4   : > { %v1272_v63 = vmul.f32 %v1231_v24, %v4127_v35  ;;  %v2102_v13 = vadd.f32 %v2101_v8, %v2100_v30  ;;  %v3839_v24 = vpop.permute.xlu0 %2269  ;;  %v1430_v30 = vsel %vm1419_vm5, %v3810_v25, %v1429_v56  ;;  %v2097_v8 = vadd.f32 %v2096_v51, %v2095_v16  ;;  %v2430_v51 = vld [vmem:[%s4105_s3 + $0x90] sm:$0xff] }
 0x2f5   : > { %v1377_v46 = vrot.slane %v1376_v6, 1  ;;  %v1422_v47 = vsel %vm1421_vm6, %v1322_v21, %v1420_v58 }
 0x2f6   : > { %v1330_v50 = vsel %vm1084_vm1, %v1272_v63, 0.0  ;;  %v2103_v61 = vrot.slane %v2102_v13, 2  ;;  %v2050_v63 = vadd.f32 %v2049_v26, %v2048_v4  ;;  %v1424_v4 = vsel %vm1423_vm7, %v1329_v18, %v1422_v47 }
 0x2f7   : > { %v1331_v57 = vrot.slane %v1330_v50, 4  ;;  %v1378_v33 = vadd.f32 %v1377_v46, %v1376_v6  ;;  %v2098_v16 = vrot.slane %v2097_v8, 1  ;;  %v2078_v18 = vadd.f32 %v2077_v10, %v3778_v9 }
 0x2f8   : > { %v1959_v22 = vpop.permute.xlu1 %1958  ;;  %v2104_v46 = vadd.f32 %v2103_v61, %v2102_v13  ;;  %v2145_v45 = vsel %vm1421_vm6, %v2050_v63, %v2144_v1  ;;  %v3889_v61 = vld [vmem:[%s3521_s14 + $0x8] sm:$0xff] }
 0x2f9   : > { %v2000_v39 = vmul.f32 %v1959_v22, %v4127_v35  ;;  %v1332_v11 = vadd.f32 %v1331_v57, %v1330_v50  ;;  %v2099_v21 = vadd.f32 %v2098_v16, %v2097_v8 }
 0x2fa   : > { %v2105_v13 = vrot.slane %v2104_v46, 1 }
 0x2fb   : > { %v2058_v23 = vsel %vm1084_vm1, %v2000_v39, 0.0  ;;  %v1333_v14 = vrot.slane %v1332_v11, 2 }
 0x2fc   : > { %v2059_v52 = vrot.slane %v2058_v23, 4  ;;  %v1987_v53 = vpop.permute.xlu1 %1986  ;;  %v2106_v42 = vadd.f32 %v2105_v13, %v2104_v46 }
 0x2fd   : > { %v2007_v5 = vmul.f32 %v1987_v53, %v3649_v43  ;;  %v1334_v59 = vadd.f32 %v1333_v14, %v1332_v11  ;;  %v1431_v43 = vsel %vm1421_vm6, %v1378_v33, %v1430_v30  ;;  %v2091_v11 = vrot.slane %v2090_v3, 1 }
 0x2fe   : > { %v2060_v0 = vadd.f32 %v2059_v52, %v2058_v23  ;;  %v1432_v22 = vsel %vm1423_vm7, %v1385_v31, %v1431_v43  ;;  %v2146_v33 = vsel %vm1423_vm7, %v2057_v37, %v2145_v45  ;;  %v2071_v14 = vadd.f32 %v2070_v48, %v3753_v36  ;;  %v3031_v45 = vld [vmem:[%s3521_s14 + $0x40] sm:$0xff] }
 0x2ff   : > { %v2107_v15 = vsel %vm1084_vm1, %v2007_v5, 0.0  ;;  %v1335_v20 = vrot.slane %v1334_v59, 1  ;;  %v1433_v17 = vsel %vm1425_vm8, %v1392_v32, %v1432_v22  ;;  %v2092_v52 = vadd.f32 %v2091_v11, %v2090_v3 }
 0x300   : > { %v2061_v12 = vrot.slane %v2060_v0, 2  ;;  %v2108_v6 = vrot.slane %v2107_v15, 4  ;;  %v1991_v35 = vpop.permute.xlu1 %1990  ;;  %v2148_v44 = vsel %vm1413_vm2, %v2078_v18, %v2071_v14  ;;  %v3032_v18 = vld [vmem:[%s3521_s14 + $0x20] sm:$0xff] }
 0x301   : > { %v2008_v49 = vmul.f32 %v1991_v35, %v4125_v7  ;;  %v1336_v25 = vadd.f32 %v1335_v20, %v1334_v59  ;;  %v3850_v7 = vpop.permute.xlu0 %1040  ;;  %v2149_v36 = vsel %vm1415_vm3, %v2085_v62, %v2148_v44  ;;  %v2431_v59 = vld [vmem:[%s4105_s3 + $0x98] sm:$0xff]  ;;  %v3897_v35 = vld [vmem:[%s3521_s14 + $0x10] sm:$0xff] }
 0x302   : > { %v2062_v50 = vadd.f32 %v2061_v12, %v2060_v0  ;;  %v2109_v19 = vadd.f32 %v2108_v6, %v2107_v15  ;;  %v2150_v5 = vsel %vm1417_vm4, %v2092_v52, %v2149_v36  ;;  %v4128_v12 = vld [vmem:[#allocation2_spill] sm:$0xff]  ;;  %v1070_v43 = vmul.f32 %v3897_v35, %v3815_v29 }
 0x303   : > { %v2114_v57 = vsel %vm1084_vm1, %v2008_v49, 0.0  ;;  %v1426_v58 = vsel %vm1425_vm8, %v1336_v25, %v1424_v4  ;;  %v2151_v0 = vsel %vm1419_vm5, %v2099_v21, %v2150_v5  ;;  %v1068_v6 = vmul.f32 %v3027_v54, %v4128_v12 }
 0x304   : > { %v2063_v39 = vrot.slane %v2062_v50, 1  ;;  %v2110_v34 = vrot.slane %v2109_v19, 2  ;;  %v2115_v60 = vrot.slane %v2114_v57, 4  ;;  %2793 = vmatprep.mubr.msk.f32.mxu1 %vm1084_vm1, %v1426_v58  ;;  %v2152_v30 = vsel %vm1421_vm6, %v2106_v42, %v2151_v0 }
 0x305   : > { %v3853_v27 = vpop.permute.xlu1 %2237  ;;  %2794 = vmatmul.mubr.msk.f32.vlgmr.msra.gmra.mrb[0].mxu1 %vm1084_vm1, %v1433_v17  ;;  %v2876_v49 = vpack.c.bf16 %v2431_v59, %v2430_v51  ;;  %v1085_v8 = vsel %vm1084_vm1, %v1068_v6, 0.0 }
 0x306   : > { %v2064_v38 = vadd.f32 %v2063_v39, %v2062_v50  ;;  %v2111_v56 = vadd.f32 %v2110_v34, %v2109_v19  ;;  %v2116_v23 = vadd.f32 %v2115_v60, %v2114_v57  ;;  %2851 = vmatpush3.bf16.msra.mxu1 %v3759_v2  ;;  %v1011_v2 = vpop.permute.xlu0 %1010  ;;  %v1099_v50 = vsel %vm1084_vm1, %v1070_v43, 0.0  ;;  %v3911_v57 = vld [vmem:[%s3521_s14 + $0x48] sm:$0xff]  ;;  %v3918_v39 = vld [vmem:[%s3521_s14 + $0x50] sm:$0xff] }
 0x307   : > { %2853 = vmatprep.subr.bf16.mxu1 %v3837_v28  ;;  %v1086_v19 = vrot.slane %v1085_v8, 4  ;;  %v1100_v46 = vrot.slane %v1099_v50, 4  ;;  %v1077_v25 = vmul.f32 %v3911_v57, %v3823_v55  ;;  %v1078_v34 = vmul.f32 %v3918_v39, %v3850_v7 }
 0x308   : > { %v2112_v1 = vrot.slane %v2111_v56, 1  ;;  %v2117_v53 = vrot.slane %v2116_v23, 2  ;;  %v2147_v10 = vsel %vm1425_vm8, %v2064_v38, %v2146_v33  ;;  %v2308_v55 = vmul.f32 %v3031_v45, %v3839_v24 }
 0x309   : > { %v3870_v9 = vpop.permute.xlu1 %2241  ;;  %2826 = vmatprep.mubr.msk.f32.mxu0 %vm1084_vm1, %v2147_v10  ;;  %v1087_v4 = vadd.f32 %v1086_v19, %v1085_v8  ;;  %v1101_v11 = vadd.f32 %v1100_v46, %v1099_v50  ;;  %v1148_v60 = vsel %vm1084_vm1, %v1077_v25, 0.0  ;;  %v1155_v17 = vsel %vm1084_vm1, %v1078_v34, 0.0 }
 0x30a   : > { %v2118_v26 = vadd.f32 %v2117_v53, %v2116_v23  ;;  %v2113_v48 = vadd.f32 %v2112_v1, %v2111_v56  ;;  %2855 = vmatpush3.bf16.msra.mxu1 %v3837_v28  ;;  %v1069_v28 = vmul.f32 %v3889_v61, %v3802_v41  ;;  %v2254_v20 = vpop.permute.xlu0 %2253  ;;  %v1149_v56 = vrot.slane %v1148_v60, 4 }
 0x30b   : > { %v1072_v13 = vmul.f32 %v3032_v18, %v1011_v2  ;;  %v1088_v23 = vrot.slane %v1087_v4, 2  ;;  %v1102_v7 = vrot.slane %v1101_v11, 2  ;;  %v2304_v62 = vmul.f32 %v3032_v18, %v2254_v20  ;;  %v3935_v2 = vld [vmem:[%s3521_s14 + $0x60] sm:$0xff] }
 0x30c   : > { %v2119_v3 = vrot.slane %v2118_v26, 1  ;;  %v2153_v63 = vsel %vm1423_vm7, %v2113_v48, %v2152_v30  ;;  %v1092_v41 = vsel %vm1084_vm1, %v1069_v28, 0.0  ;;  %v2372_v1 = vsel %vm1084_vm1, %v2308_v55, 0.0  ;;  %v3034_v48 = vld [vmem:[%s3521_s14 + $0x30] sm:$0xff] }
 0x30d   : > { %v1093_v29 = vrot.slane %v1092_v41, 4  ;;  %v1156_v33 = vrot.slane %v1155_v17, 4  ;;  %v1150_v53 = vadd.f32 %v1149_v56, %v1148_v60  ;;  %v1113_v24 = vsel %vm1084_vm1, %v1072_v13, 0.0 }
 0x30e   : > { %v3886_v31 = vpop.permute.xlu1 %1030  ;;  %v2120_v15 = vadd.f32 %v2119_v3, %v2118_v26  ;;  %v1051_v22 = vpop.permute.xlu0 %1050  ;;  %v1089_v10 = vadd.f32 %v1088_v23, %v1087_v4  ;;  %v1103_v21 = vadd.f32 %v1102_v7, %v1101_v11  ;;  %v2344_v44 = vsel %vm1084_vm1, %v2304_v62, 0.0 }
 0x30f   : > { %v2373_v26 = vrot.slane %v2372_v1, 4  ;;  %v1080_v36 = vmul.f32 %v3935_v2, %v1051_v22  ;;  %v2300_v3 = vmul.f32 %v3027_v54, %v3853_v27  ;;  %v1157_v51 = vadd.f32 %v1156_v33, %v1155_v17 }
 0x310   : > { %v2154_v47 = vsel %vm1425_vm8, %v2120_v15, %v2153_v63  ;;  %v1114_v59 = vrot.slane %v1113_v24, 4  ;;  %v2301_v0 = vmul.f32 %v3889_v61, %v3870_v9  ;;  %v1151_v30 = vrot.slane %v1150_v53, 2 }
 0x311   : > { %2827 = vmatmul.mubr.msk.f32.vlgmr.msra.gmra.mrb[0].mxu0 %vm1084_vm1, %v2154_v47  ;;  %v2345_v12 = vrot.slane %v2344_v44, 4  ;;  %v1090_v6 = vrot.slane %v1089_v10, 1  ;;  %v1104_v43 = vrot.slane %v1103_v21, 1  ;;  %v2374_v63 = vadd.f32 %v2373_v26, %v2372_v1 }
 0x312   : > { %2875 = vmatpush3.bf16.msra.mxu0 %v3792_v40  ;;  %v1094_v40 = vadd.f32 %v1093_v29, %v1092_v41  ;;  %v1021_v16 = vpop.permute.xlu0 %1020  ;;  %v2316_v47 = vsel %vm1084_vm1, %v2300_v3, 0.0  ;;  %v1158_v27 = vrot.slane %v1157_v51, 2  ;;  %v1115_v54 = vadd.f32 %v1114_v59, %v1113_v24  ;;  %v3969_v3 = vld [vmem:[%s3521_s14 + $0x78] sm:$0xff] }
 0x313   : > { %v3905_v37 = vpop.permute.xlu1 %2245  ;;  %2877 = vmatprep.subr.bf16.mxu0 %v2876_v49  ;;  %v1074_v5 = vmul.f32 %v3034_v48, %v1021_v16  ;;  %v2323_v41 = vsel %vm1084_vm1, %v2301_v0, 0.0  ;;  %v1152_v61 = vadd.f32 %v1151_v30, %v1150_v53  ;;  %v2346_v50 = vadd.f32 %v2345_v12, %v2344_v44  ;;  %v3037_v30 = vld [vmem:[%s3521_s14 + $0x18] sm:$0xff] }
 0x314   : > { %v1095_v38 = vrot.slane %v1094_v40, 2  ;;  %v2317_v22 = vrot.slane %v2316_v47, 4  ;;  %v1091_v34 = vadd.f32 %v1090_v6, %v1089_v10  ;;  %v1105_v4 = vadd.f32 %v1104_v43, %v1103_v21  ;;  %v3976_v43 = vld [vmem:[%s3521_s14 + $0x58] sm:$0xff] }
 0x315   : > { %v1127_v20 = vsel %vm1084_vm1, %v1074_v5, 0.0  ;;  %v2375_v11 = vrot.slane %v2374_v63, 2  ;;  %v2324_v60 = vrot.slane %v2323_v41, 4  ;;  %v1159_v55 = vadd.f32 %v1158_v27, %v1157_v51 }
 0x316   : > { %2879 = vmatpush3.bf16.msra.mxu0 %v2876_v49  ;;  %v1096_v52 = vadd.f32 %v1095_v38, %v1094_v40  ;;  %v2262_v42 = vpop.permute.xlu0 %2261  ;;  %v1169_v49 = vsel %vm1084_vm1, %v1080_v36, 0.0  ;;  %v1128_v25 = vrot.slane %v1127_v20, 4  ;;  %v1076_v40 = vmul.f32 %v3031_v45, %v3886_v31  ;;  %v3950_v38 = vld [vmem:[%s3521_s14 + $0x70] sm:$0xff] }
 0x317   : > { %v3915_v32 = vpop.permute.xlu1 %2273  ;;  %v2306_v29 = vmul.f32 %v3034_v48, %v2262_v42  ;;  %v1170_v46 = vrot.slane %v1169_v49, 4  ;;  %v1116_v16 = vrot.slane %v1115_v54, 2  ;;  %v1153_v18 = vrot.slane %v1152_v61, 1 }
 0x318   : > { %v1097_v15 = vrot.slane %v1096_v52, 1  ;;  %v2347_v13 = vrot.slane %v2346_v50, 2  ;;  %v1129_v62 = vadd.f32 %v1128_v25, %v1127_v20  ;;  %v2318_v31 = vadd.f32 %v2317_v22, %v2316_v47 }
 0x319   : > { %v2358_v23 = vsel %vm1084_vm1, %v2306_v29, 0.0  ;;  %v1171_v7 = vadd.f32 %v1170_v46, %v1169_v49  ;;  %v1141_v45 = vsel %vm1084_vm1, %v1076_v40, 0.0  ;;  %v3961_v53 = vadd.f32 %v2375_v11, %v2374_v63 }
 0x31a   : > { %v1061_v8 = vpop.permute.xlu0 %1060  ;;  %v1098_v9 = vadd.f32 %v1097_v15, %v1096_v52  ;;  %v2325_v24 = vadd.f32 %v2324_v60, %v2323_v41  ;;  %v2302_v10 = vmul.f32 %v3897_v35, %v3905_v37  ;;  %v1160_v21 = vrot.slane %v1159_v55, 1  ;;  %v3039_v60 = vld [vmem:[%s3521_s14 + $0x28] sm:$0xff] }
 0x31b   : > { %v1082_v56 = vmul.f32 %v3950_v38, %v1061_v8  ;;  %v1117_v44 = vadd.f32 %v1116_v16, %v1115_v54  ;;  %v2359_v42 = vrot.slane %v2358_v23, 4  ;;  %v3966_v36 = vadd.f32 %v1153_v18, %v1152_v61 }
 0x31c   : > { %v3923_v58 = vpop.permute.xlu1 %1005  ;;  %v1529_v17 = vsel %vm1413_vm2, %v1098_v9, %v1091_v34  ;;  %v2348_v48 = vadd.f32 %v2347_v13, %v2346_v50  ;;  %v1142_v5 = vrot.slane %v1141_v45, 4  ;;  %v1172_v59 = vrot.slane %v1171_v7, 2 }
 0x31d   : > { %v3959_v52 = vsel %vm1415_vm3, %v1105_v4, %v1529_v17  ;;  %v1183_v26 = vsel %vm1084_vm1, %v1082_v56, 0.0  ;;  %v1130_v0 = vrot.slane %v1129_v62, 2  ;;  %v2319_v15 = vrot.slane %v2318_v31, 2 }
 0x31e   : > { %v1066_v1 = vpop.permute.xlu0 %1065  ;;  %v1071_v35 = vmul.f32 %v3037_v30, %v3923_v58  ;;  %v2326_v37 = vrot.slane %v2325_v24, 2  ;;  %v1184_v12 = vrot.slane %v1183_v26, 4  ;;  %v2330_v6 = vsel %vm1084_vm1, %v2302_v10, 0.0 }
 0x31f   : > { %v1083_v51 = vmul.f32 %v3969_v3, %v1066_v1  ;;  %v2377_v20 = vrot.slane %v3961_v53, 1  ;;  %v3980_v47 = vadd.f32 %v1160_v21, %v1159_v55  ;;  %v1118_v27 = vrot.slane %v1117_v44, 1 }
 0x320   : > { %v2360_v54 = vadd.f32 %v2359_v42, %v2358_v23  ;;  %v2349_v41 = vrot.slane %v2348_v48, 1  ;;  %v1143_v8 = vadd.f32 %v1142_v5, %v1141_v45  ;;  %v1173_v61 = vadd.f32 %v1172_v59, %v1171_v7 }
 0x321   : > { %v3930_v14 = vpop.permute.xlu1 %2249  ;;  %v1190_v58 = vsel %vm1084_vm1, %v1083_v51, 0.0  ;;  %v1131_v50 = vadd.f32 %v1130_v0, %v1129_v62  ;;  %v2331_v29 = vrot.slane %v2330_v6, 4  ;;  %v1106_v46 = vsel %vm1084_vm1, %v1071_v35, 0.0 }
 0x322   : > { %v2303_v9 = vmul.f32 %v3037_v30, %v3930_v14  ;;  %v2327_v25 = vadd.f32 %v2326_v37, %v2325_v24  ;;  %v1185_v22 = vadd.f32 %v1184_v12, %v1183_v26  ;;  %v3986_v34 = vadd.f32 %v1118_v27, %v1117_v44 }
 0x323   : > { %v2361_v4 = vrot.slane %v2360_v54, 2  ;;  %v1191_v11 = vrot.slane %v1190_v58, 4  ;;  %v1144_v56 = vrot.slane %v1143_v8, 2  ;;  %v2309_v14 = vmul.f32 %v3911_v57, %v3915_v32 }
 0x324   : > { %v1107_v17 = vrot.slane %v1106_v46, 4  ;;  %v2337_v18 = vsel %vm1084_vm1, %v2303_v9, 0.0  ;;  %v1174_v13 = vrot.slane %v1173_v61, 1  ;;  %v1132_v23 = vrot.slane %v1131_v50, 1 }
 0x325   : > { %v3942_v28 = vpop.permute.xlu1 %2277  ;;  %v2332_v7 = vadd.f32 %v2331_v29, %v2330_v6  ;;  %v2328_v1 = vrot.slane %v2327_v25, 1  ;;  %v1186_v24 = vrot.slane %v1185_v22, 2  ;;  %v1192_v10 = vadd.f32 %v1191_v11, %v1190_v58 }
 0x326   : > { %v2338_v21 = vrot.slane %v2337_v18, 4  ;;  %v3995_v5 = vadd.f32 %v2361_v4, %v2360_v54  ;;  %v1145_v57 = vadd.f32 %v1144_v56, %v1143_v8  ;;  %v2379_v32 = vsel %vm1084_vm1, %v2309_v14, 0.0 }
 0x327   : > { %v1108_v51 = vadd.f32 %v1107_v17, %v1106_v46  ;;  %v3998_v59 = vadd.f32 %v1174_v13, %v1173_v61  ;;  %v4000_v0 = vadd.f32 %v1132_v23, %v1131_v50  ;;  %v2329_v35 = vadd.f32 %v2328_v1, %v2327_v25  ;;  %v3040_v46 = vld [vmem:[%s3521_s14 + $0x68] sm:$0xff] }
 0x328   : > { %v1187_v37 = vadd.f32 %v1186_v24, %v1185_v22  ;;  %v1193_v6 = vrot.slane %v1192_v10, 2  ;;  %v2363_v54 = vrot.slane %v3995_v5, 1  ;;  %v2310_v58 = vmul.f32 %v3918_v39, %v3942_v28 }
 0x329   : > { %v1109_v8 = vrot.slane %v1108_v51, 2 }
 0x32a   : > { %v1046_v19 = vpop.permute.xlu1 %1045  ;;  %v1188_v22 = vrot.slane %v1187_v37, 1  ;;  %v1194_v11 = vadd.f32 %v1193_v6, %v1192_v10  ;;  %v2386_v28 = vsel %vm1084_vm1, %v2310_v58, 0.0 }
 0x32b   : > { %v1079_v63 = vmul.f32 %v3976_v43, %v1046_v19  ;;  %v2320_v19 = vadd.f32 %v2319_v15, %v2318_v31  ;;  %v3992_v31 = vadd.f32 %v2349_v41, %v2348_v48  ;;  %v2333_v48 = vrot.slane %v2332_v7, 2 }
 0x32c   : > { %v1146_v41 = vrot.slane %v1145_v57, 1  ;;  %v1110_v39 = vadd.f32 %v1109_v8, %v1108_v51  ;;  %v4014_v1 = vadd.f32 %v1188_v22, %v1187_v37 }
 0x32d   : > { %v1162_v40 = vsel %vm1084_vm1, %v1079_v63, 0.0  ;;  %v2321_v45 = vrot.slane %v2320_v19, 1  ;;  %v2380_v63 = vrot.slane %v2379_v32, 4  ;;  %v2334_v61 = vadd.f32 %v2333_v48, %v2332_v7 }
 0x32e   : > { %v1163_v62 = vrot.slane %v1162_v40, 4  ;;  %v1147_v56 = vadd.f32 %v1146_v41, %v1145_v57 }
 0x32f   : > { %v3956_v33 = vpop.permute.xlu1 %2281  ;;  %v2322_v30 = vadd.f32 %v2321_v45, %v2320_v19  ;;  %v2335_v17 = vrot.slane %v2334_v61, 1 }
 0x330   : > { %v1164_v15 = vadd.f32 %v1163_v62, %v1162_v40  ;;  %v2311_v29 = vmul.f32 %v3976_v43, %v3956_v33  ;;  %v1536_v51 = vsel %vm1413_vm2, %v3966_v36, %v1147_v56 }
 0x331   : > { %v2448_v25 = vsel %vm1413_vm2, %v2329_v35, %v2322_v30  ;;  %v2336_v48 = vadd.f32 %v2335_v17, %v2334_v61 }
 0x332   : > { %v1165_v50 = vrot.slane %v1164_v15, 2  ;;  %v2393_v33 = vsel %vm1084_vm1, %v2311_v29, 0.0 }
 0x333   : > { %v2394_v57 = vrot.slane %v2393_v33, 4 }
 0x334   : > { %v1016_v49 = vpop.permute.xlu1 %1015 }
 0x335   : > { %v1073_v55 = vmul.f32 %v3039_v60, %v1016_v49  ;;  %v2339_v49 = vadd.f32 %v2338_v21, %v2337_v18  ;;  %v1166_v18 = vadd.f32 %v1165_v50, %v1164_v15  ;;  %v2387_v21 = vrot.slane %v2386_v28, 4 }
 0x336   : > { %v2395_v36 = vadd.f32 %v2394_v57, %v2393_v33 }
 0x337   : > { %v1120_v44 = vsel %vm1084_vm1, %v1073_v55, 0.0  ;;  %v2340_v55 = vrot.slane %v2339_v49, 2 }
 0x338   : > { %v1121_v12 = vrot.slane %v1120_v44, 4  ;;  %v2396_v33 = vrot.slane %v2395_v36, 2 }
 0x339   : > { %v2258_v16 = vpop.permute.xlu1 %2257  ;;  %v2341_v10 = vadd.f32 %v2340_v55, %v2339_v49  ;;  %v2388_v49 = vadd.f32 %v2387_v21, %v2386_v28 }
 0x33a   : > { %v2305_v42 = vmul.f32 %v3039_v60, %v2258_v16  ;;  %v1122_v40 = vadd.f32 %v1121_v12, %v1120_v44  ;;  %v2381_v60 = vadd.f32 %v2380_v63, %v2379_v32  ;;  %v1195_v44 = vrot.slane %v1194_v11, 1 }
 0x33b   : > { %v2342_v63 = vrot.slane %v2341_v10, 1 }
 0x33c   : > { %v2351_v27 = vsel %vm1084_vm1, %v2305_v42, 0.0  ;;  %v1123_v23 = vrot.slane %v1122_v40, 2  ;;  %v2382_v24 = vrot.slane %v2381_v60, 2  ;;  %v1111_v42 = vrot.slane %v1110_v39, 1 }
 0x33d   : > { %v2286_v26 = vpop.permute.xlu1 %2285  ;;  %v2352_v4 = vrot.slane %v2351_v27, 4  ;;  %v4023_v8 = vadd.f32 %v1195_v44, %v1194_v11  ;;  %v2343_v11 = vadd.f32 %v2342_v63, %v2341_v10 }
 0x33e   : > { %v2312_v43 = vmul.f32 %v3935_v2, %v2286_v26  ;;  %v1167_v2 = vrot.slane %v1166_v18, 1  ;;  %v1124_v15 = vadd.f32 %v1123_v23, %v1122_v40  ;;  %v4020_v6 = vadd.f32 %v2382_v24, %v2381_v60 }
 0x33f   : > { %v2353_v7 = vadd.f32 %v2352_v4, %v2351_v27  ;;  %v3041_v27 = vld [vmem:[%s3521_s14 + $0x38] sm:$0xff]  ;;  %v1112_v58 = vadd.f32 %v1111_v42, %v1110_v39  ;;  %v2449_v60 = vsel %vm1415_vm3, %v2336_v48, %v2448_v25 }
 0x340   : > { %v2400_v26 = vsel %vm1084_vm1, %v2312_v43, 0.0  ;;  %v1168_v61 = vadd.f32 %v1167_v2, %v1166_v18  ;;  %v1125_v22 = vrot.slane %v1124_v15, 1  ;;  %v2384_v55 = vrot.slane %v4020_v6, 1 }
 0x341   : > { %v2354_v30 = vrot.slane %v2353_v7, 2  ;;  %v1531_v39 = vsel %vm1417_vm4, %v1112_v58, %v3959_v52 }
 0x342   : > { %v1056_v9 = vpop.permute.xlu1 %1055  ;;  %v1532_v52 = vsel %vm1419_vm5, %v3986_v34, %v1531_v39  ;;  %v2378_v39 = vadd.f32 %v2377_v20, %v3961_v53 }
 0x343   : > { %v1081_v19 = vmul.f32 %v3040_v46, %v1056_v9  ;;  %v2401_v9 = vrot.slane %v2400_v26, 4  ;;  %v2355_v40 = vadd.f32 %v2354_v30, %v2353_v7 }
 0x345   : > { %v1176_v16 = vsel %vm1084_vm1, %v1081_v19, 0.0  ;;  %v1537_v19 = vsel %vm1415_vm3, %v3980_v47, %v1536_v51  ;;  %v2402_v28 = vadd.f32 %v2401_v9, %v2400_v26  ;;  %v2356_v23 = vrot.slane %v2355_v40, 1 }
 0x346   : > { %v1177_v14 = vrot.slane %v1176_v16, 4  ;;  %v1538_v18 = vsel %vm1417_vm4, %v1168_v61, %v1537_v19 }
 0x347   : > { %v2290_v13 = vpop.permute.xlu1 %2289  ;;  %v2403_v21 = vrot.slane %v2402_v28, 2  ;;  %v1539_v57 = vsel %vm1419_vm5, %v3998_v59, %v1538_v18  ;;  %v2357_v26 = vadd.f32 %v2356_v23, %v2355_v40 }
 0x348   : > { %v1178_v62 = vadd.f32 %v1177_v14, %v1176_v16  ;;  %v2313_v45 = vmul.f32 %v3040_v46, %v2290_v13  ;;  %v2389_v16 = vrot.slane %v2388_v49, 2  ;;  %v1126_v13 = vadd.f32 %v1125_v22, %v1124_v15 }
 0x34a   : > { %v1179_v32 = vrot.slane %v1178_v62, 2  ;;  %v2407_v37 = vsel %vm1084_vm1, %v2313_v45, 0.0  ;;  %v2390_v45 = vadd.f32 %v2389_v16, %v2388_v49  ;;  %v2404_v49 = vadd.f32 %v2403_v21, %v2402_v28 }
 0x34b   : > { %v2408_v29 = vrot.slane %v2407_v37, 4 }
 0x34c   : > { %v1180_v35 = vadd.f32 %v1179_v32, %v1178_v62  ;;  %v1026_v12 = vpop.permute.xlu1 %1025  ;;  %v2450_v62 = vsel %vm1417_vm4, %v2343_v11, %v2449_v60  ;;  %v2397_v32 = vadd.f32 %v2396_v33, %v2395_v36 }
 0x34d   : > { %v1075_v41 = vmul.f32 %v3041_v27, %v1026_v12  ;;  %v2409_v43 = vadd.f32 %v2408_v29, %v2407_v37  ;;  %v2391_v37 = vrot.slane %v2390_v45, 1 }
 0x34e   : > { %v1181_v50 = vrot.slane %v1180_v35, 1 }
 0x34f   : > { %v1134_v46 = vsel %vm1084_vm1, %v1075_v41, 0.0  ;;  %v2410_v51 = vrot.slane %v2409_v43, 2  ;;  %v2392_v28 = vadd.f32 %v2391_v37, %v2390_v45 }
 0x350   : > { %v1135_v4 = vrot.slane %v1134_v46, 4  ;;  %v1182_v47 = vadd.f32 %v1181_v50, %v1180_v35  ;;  %v1533_v35 = vsel %vm1421_vm6, %v1126_v13, %v1532_v52  ;;  %v2398_v50 = vrot.slane %v2397_v32, 1  ;;  %v2745_v52 = vld [vmem:[%s4106_s4] ss:$0 sm:$0xff] }
 0x351   : > { %v2266_v56 = vpop.permute.xlu1 %2265  ;;  %v2411_v58 = vadd.f32 %v2410_v51, %v2409_v43  ;;  %v1534_v61 = vsel %vm1423_vm7, %v4000_v0, %v1533_v35  ;;  %v2385_v0 = vadd.f32 %v2384_v55, %v4020_v6  ;;  %v2748_v35 = vld [vmem:[%s4108_s6] ss:$0 sm:$0xff] }
 0x352   : > { %v1136_v14 = vadd.f32 %v1135_v4, %v1134_v46  ;;  %v2307_v17 = vmul.f32 %v3041_v27, %v2266_v56  ;;  %v1540_v2 = vsel %vm1421_vm6, %v1182_v47, %v1539_v57  ;;  %v2405_v4 = vrot.slane %v2404_v49, 1 }
 0x353   : > { %v1541_v41 = vsel %vm1423_vm7, %v4014_v1, %v1540_v2  ;;  %v2364_v1 = vadd.f32 %v2363_v54, %v3995_v5  ;;  %v2412_v60 = vrot.slane %v2411_v58, 1  ;;  %v2455_v6 = vsel %vm1413_vm2, %v2385_v0, %v2378_v39 }
 0x354   : > { %v1137_v7 = vrot.slane %v1136_v14, 2  ;;  %v2365_v25 = vsel %vm1084_vm1, %v2307_v17, 0.0  ;;  %v2406_v54 = vadd.f32 %v2405_v4, %v2404_v49  ;;  %v2456_v47 = vsel %vm1415_vm3, %v2392_v28, %v2455_v6 }
 0x355   : > { %v2366_v24 = vrot.slane %v2365_v25, 4  ;;  %v2294_v10 = vpop.permute.xlu1 %2293  ;;  %v2413_v55 = vadd.f32 %v2412_v60, %v2411_v58 }
 0x356   : > { %v1138_v44 = vadd.f32 %v1137_v7, %v1136_v14  ;;  %v2314_v42 = vmul.f32 %v3950_v38, %v2294_v10  ;;  %v2451_v38 = vsel %vm1419_vm5, %v3992_v31, %v2450_v62  ;;  %v2399_v14 = vadd.f32 %v2398_v50, %v2397_v32 }
 0x357   : > { %v2367_v48 = vadd.f32 %v2366_v24, %v2365_v25  ;;  %v2452_v31 = vsel %vm1421_vm6, %v2357_v26, %v2451_v38  ;;  %v2747_v26 = vld [vmem:[%s4109_s7] ss:$0 sm:$0xff] }
 0x358   : > { %v1139_v15 = vrot.slane %v1138_v44, 1  ;;  %v2414_v30 = vsel %vm1084_vm1, %v2314_v42, 0.0  ;;  %v2457_v53 = vsel %vm1417_vm4, %v2399_v14, %v2456_v47  ;;  %v2746_v42 = vld [vmem:[%s4107_s5] ss:$0 sm:$0xff] }
 0x359   : > { %v2368_v34 = vrot.slane %v2367_v48, 2  ;;  %v2415_v12 = vrot.slane %v2414_v30, 4  ;;  %v2298_v63 = vpop.permute.xlu1 %2297  ;;  %v2458_v13 = vsel %vm1419_vm5, %v2406_v54, %v2457_v53 }
 0x35a   : > { %v1140_v59 = vadd.f32 %v1139_v15, %v1138_v44  ;;  %v2315_v27 = vmul.f32 %v3969_v3, %v2298_v63  ;;  %v1542_v3 = vsel %vm1425_vm8, %v4023_v8, %v1541_v41  ;;  %v2453_v8 = vsel %vm1423_vm7, %v2364_v1, %v2452_v31  ;;  %v2577_v63 = vpop.permute.xlu0 %2576 }
 0x35b   : > { %v2369_v36 = vadd.f32 %v2368_v34, %v2367_v48  ;;  %v2416_v9 = vadd.f32 %v2415_v12, %v2414_v30  ;;  %v2459_v7 = vsel %vm1421_vm6, %v2413_v55, %v2458_v13 }
 0x35c   : > { %v2421_v29 = vsel %vm1084_vm1, %v2315_v27, 0.0  ;;  %v1535_v46 = vsel %vm1425_vm8, %v1140_v59, %v1534_v61 }
 0x35d   : > { %v2370_v19 = vrot.slane %v2369_v36, 1  ;;  %v2417_v22 = vrot.slane %v2416_v9, 2  ;;  %v2422_v40 = vrot.slane %v2421_v29, 4  ;;  %2804 = vmatprep.mubr.msk.f32.mxu1 %vm1084_vm1, %v1535_v46 }
 0x35e   : > { %2805 = vmatmul.mubr.msk.f32.vlgmr.msra.gmra.mrb[0].mxu1 %vm1084_vm1, %v1542_v3  ;;  %v2582_v37 = vpop.permute.xlu1 %2581 }
 0x35f   : > { %v2371_v11 = vadd.f32 %v2370_v19, %v2369_v36  ;;  %v2418_v16 = vadd.f32 %v2417_v22, %v2416_v9  ;;  %v2423_v56 = vadd.f32 %v2422_v40, %v2421_v29 }
 0x361   : > { %v2419_v17 = vrot.slane %v2418_v16, 1  ;;  %v2424_v18 = vrot.slane %v2423_v56, 2  ;;  %v2454_v5 = vsel %vm1425_vm8, %v2371_v11, %v2453_v8 }
 0x362   : > { %2837 = vmatprep.mubr.msk.f32.mxu0 %vm1084_vm1, %v2454_v5 }
 0x363   : > { %v2425_v33 = vadd.f32 %v2424_v18, %v2423_v56  ;;  %v2420_v43 = vadd.f32 %v2419_v17, %v2418_v16 }
 0x365   : > { %v2426_v20 = vrot.slane %v2425_v33, 1  ;;  %v2460_v25 = vsel %vm1423_vm7, %v2420_v43, %v2459_v7 }
 0x367   : > { %v2427_v23 = vadd.f32 %v2426_v20, %v2425_v33 }
 0x369   : > { %v2461_v62 = vsel %vm1425_vm8, %v2427_v23, %v2460_v25 }
 0x36a   : > { %2838 = vmatmul.mubr.msk.f32.vlgmr.msra.gmra.mrb[0].mxu0 %vm1084_vm1, %v2461_v62 }
 0x431   : > { %v2806_v45 = vpop.f32.mrb[0].mxu1 }
 0x432   : > { %v1613_v24 = vpop.f32.mrb[1].mxu1 }
 0x43d   : > { %v2839_v10 = vpop.f32.mrb[0].mxu0 }
 0x43e   : > { %v2880_v21 = vadd.f32 %v2839_v10, %v2806_v45  ;;  %v2532_v44 = vpop.f32.mrb[1].mxu0 }
 0x43f   : > { %v2881_v57 = vadd.f32 %v2532_v44, %v1613_v24 }
 0x440   : > { %v2551_v32 = vmul.f32 %v2880_v21, %v2745_v52 }
 0x441   : > { %v2550_v51 = vmul.f32 %v2881_v57, %v2745_v52 }
 0x442   : > { %v2560_v48 = vadd.f32 %v2746_v42, %v2551_v32 }
 0x443   : > { %v2559_v2 = vadd.f32 %v2746_v42, %v2550_v51 }
 0x444   : > { %v2562_v15 = vmax.f32 %v2560_v48, 0.0 }
 0x445   : > { %v2561_v30 = vmax.f32 %v2559_v2, 0.0 }
 0x446   : > { %v2571_v34 = vmul.f32 %v2747_v26, %v2562_v15  ;;  %v2594_v49 = vmul.f32 %v2748_v35, %v2562_v15 }
 0x447   : > { %v2570_v12 = vmul.f32 %v2747_v26, %v2561_v30  ;;  %v2593_v27 = vmul.f32 %v2748_v35, %v2561_v30 }
 0x448   : > { %v2585_v38 = vmul.f32 %v2582_v37, %v2571_v34 }
 0x449   : > { %v2584_v59 = vmul.f32 %v2577_v63, %v2570_v12 }
 0x44a   : > { %v2596_v41 = vadd.f32 %v2594_v49, %v2585_v38 }
 0x44b   : > { %v2595_v58 = vadd.f32 %v2593_v27, %v2584_v59 }
 0x44c   : > { %2598 = vst.msk [vmem:[%s442_s26 + $0x8] sm:$0xff] %vm1084_vm1, %v2596_v41 }
 0x44d   : > { %2597 = vst.msk [vmem:[%s442_s26] sm:$0xff] %vm1084_vm1, %v2595_v58 }
 0x44e PF: > { %s19_s11 = sadd.s32 1, %s3064_s11   ;;  %s4129_s30 = smov %s3060_s10 }
 0x44f   : > { %p16_p5 = scmp.ge.s32.totalorder %s19_s11, 4   ;;  %s4130_s10 = smov %s4132_s12 }
 0x451   :  { %18 = sbr.rel (!%p16_p5) target bundleno = 2 (0x2), region = 92 }

// kernel: basic_block_forward.11
= control target key start
LH: loop header
LB: loop body
LE: loop exit
PB: predicated region body
PF: predicated region fallthrough
CT: control target
= control target key end

     0   :  { %14 = vsyncpa [#allocation3], 0  ;;  %s1185_s0 = inlined_call_operand.vmem [shape: f32[2,16,64], index: 0, kind: input, shape index: {}]   ;;  %s1186_s1 = inlined_call_operand.vmem [shape: f32[64,32], index: 1, kind: input, shape index: {}]   ;;  %s1187_s2 = inlined_call_operand.vmem [shape: f32[1,32], index: 2, kind: input, shape index: {}]   ;;  %s1188_s3 = inlined_call_operand.vmem [shape: f32[1,32], index: 3, kind: input, shape index: {}]   ;;  %s1189_s4 = inlined_call_operand.vmem [shape: f32[1,32], index: 4, kind: input, shape index: {}]   ;;  %s1190_s5 = inlined_call_operand.vmem [shape: f32[2,16,16], index: 5, kind: input, shape index: {}]   ;;  %s1191_s6 = inlined_call_operand.vmem [shape: f32[16,32], index: 6, kind: input, shape index: {}]   ;;  %s1192_s7 = inlined_call_operand.vmem [shape: f32[1,32], index: 7, kind: input, shape index: {}]   ;;  %s1193_s8 = inlined_call_operand.vmem [shape: f32[1,32], index: 8, kind: input, shape index: {}]   ;;  %s1194_s9 = inlined_call_operand.hbm [shape: f32[2,16,32], index: 9, kind: output, shape index: {}]  }
   0x1   :  { %16 = vsyncpa [#allocation3 + $0x1], 0  ;;  %s1016_s30 = smov 0   ;;  %s1018_s10 = smov 0  }
   0x2   :  { %s1020_s11 = smov 0   ;;  %s1022_s12 = smov 0  }
   0x3   :  { %s1024_s13 = smov 0   ;;  %s1026_s14 = smov 0  }
   0x4 LB: > { %s739_s15 = sadd.s32 4294967295, %s961_s14   ;;  %s740_s16 = sadd.s32 4294967294, %s961_s14   ;;  %s961_s14 = sphi %s1026_s14, %s22_s14   ;;  %s957_s13 = sphi %s1024_s13, %s1204_s13   ;;  %s953_s12 = sphi %s1022_s12, %s1203_s12   ;;  %s949_s11 = sphi %s1020_s11, %s1202_s11   ;;  %s945_s10 = sphi %s1018_s10, %s1201_s10   ;;  %s941_s30 = sphi %s1016_s30, %s1200_s30  }
   0x5   : > { %s34_s17 = sadd.s32 1, %s957_s13  ;;  %s246_s18 = sadd.s32 1, %s949_s11 }
   0x6   : > { %p36_p0 = scmp.ge.s32.totalorder %s34_s17, 2  ;;  %p256_p1 = scmp.ne.s32.totalorder %s949_s11, %s945_s10 }
   0x7   : > { %p257_p2 = scmp.eq.s32.totalorder %s739_s15, 1  ;;  %p262_p3 = scmp.ne.s32.totalorder %s945_s10, %s941_s30 }
   0x8   : > { %s1206_s17 = smov (%p36_p0, %s34_s17), 0  ;;  %p263_p5 = scmp.eq.s32.totalorder %s740_s16, 1 }
   0x9   : > { %1196 = sst [smem:[#allocation5_spill]] %s1206_s17  ;;  %p1056_p4 = por %p257_p2, %p256_p1 }
   0xa   : > { %s241_s20 = ssub.s32 %s957_s13, %s1206_s17  ;;  %p743_p6 = scmp.ge.s32.totalorder %s961_s14, 1 }
   0xb   : > { %p244_p7 = scmp.eq.s32.totalorder %s241_s20, 0  ;;  %p1063_p8 = por %p263_p5, %p262_p3 }
   0xc   : > { %p328_p9 = scmp.lt.s32.totalorder %s961_s14, 3 }
   0xd   : > { %s1069_s22 = scalar_select %p244_p7, %s949_s11, %s246_s18  }
   0xe   : > { %p329_p10 = pnand %p743_p6, %p328_p9 }
   0xf   : > { %v400_v0 = vld [vmem:[%s1186_s1] sm:$0xff] (!%p329_p10)  ;;  %v401_v1 = vld [vmem:[%s1186_s1 + $0x8] sm:$0xff] (!%p329_p10)  ;;  %v402_v2 = vld [vmem:[%s1186_s1 + $0x10] sm:$0xff] (!%p329_p10)  ;;  %p378_p11 = scmp.lt.s32.totalorder (!%p329_p10), %s953_s12, 1  ;;  %vm415_vm0 = vcmask (!%p329_p10), 523264   ;;  %vm519_vm1 = vcmask (!%p329_p10), 130048  }
  0x10   : > { %332 = sbr.rel (%p329_p10) target bundleno = 272 (0x110), region = 56  ;;  %v806_v3 = vpack.c.bf16 (!%p329_p10), %v401_v1, %v400_v0  ;;  %v403_v4 = vld [vmem:[%s1186_s1 + $0x18] sm:$0xff] (!%p329_p10)  ;;  %v404_v6 = vld [vmem:[%s1186_s1 + $0x20] sm:$0xff] (!%p329_p10)  ;;  %v405_v7 = vld [vmem:[%s1186_s1 + $0x28] sm:$0xff] (!%p329_p10)  ;;  %s374_s15 = sand.u32 (!%p329_p10), 1, %s945_s10   ;;  %vm623_vm2 = vcmask (!%p329_p10), 261120  }
  0x11   : > { %v810_v5 = vpack.c.bf16 (!%p329_p10), %v403_v4, %v402_v2  ;;  %v517_v8 = vld [vmem:[%s1191_s6] sm:$0xff] (!%p329_p10)  ;;  %v518_v9 = vld [vmem:[%s1191_s6 + $0x8] sm:$0xff] (!%p329_p10)  ;;  %v814_v11 = vpack.c.bf16 (!%p329_p10), %v405_v7, %v404_v6  ;;  %v406_v12 = vld [vmem:[%s1186_s1 + $0x30] sm:$0xff] (!%p329_p10)  ;;  %s963_s24 = smov (!%p329_p10), [#allocation2]  }
  0x12   : > { %807 = vmatprep.subr.bf16.mxu0 (!%p329_p10), %v806_v3  ;;  %v822_v10 = vpack.c.bf16 (!%p329_p10), %v518_v9, %v517_v8  ;;  %v407_v13 = vld [vmem:[%s1186_s1 + $0x38] sm:$0xff] (!%p329_p10)  ;;  %v756_v21 = vld [vmem:[%s1192_s7] ss:$0 sm:$0xff] (!%p329_p10)  ;;  %s887_s25 = sshll.u32 (!%p329_p10), %s963_s24, 4  ;;  %s888_s25 = int_to_ptr.vmem [resolvable:$false] %s887_s25 }
  0x13   : > { %809 = vmatpush3.bf16.msra.mxu0 (!%p329_p10), %v806_v3  ;;  %v818_v17 = vpack.c.bf16 (!%p329_p10), %v407_v13, %v406_v12  ;;  %v749_v22 = vld [vmem:[%s1187_s2] ss:$0 sm:$0xff] (!%p329_p10)  ;;  %s889_s27 = scalar_lea.vmem (!%p329_p10), %s888_s25, 512 }
  0x14   : > { %811 = vmatprep.subr.bf16.mxu0 (!%p329_p10), %v810_v5  ;;  %823 = vmatprep.subr.bf16.mxu1 (!%p329_p10), %v822_v10  ;;  %v752_v25 = vld [vmem:[%s1188_s3] ss:$0 sm:$0xff] (!%p329_p10) }
  0x15   : > { %825 = vmatpush3.bf16.msra.mxu1 (!%p329_p10), %v822_v10  ;;  %v757_v26 = vld [vmem:[%s1193_s8] ss:$0 sm:$0xff] (!%p329_p10) }
  0x16   : > { %v753_v30 = vld [vmem:[%s1189_s4] ss:$0 sm:$0xff] (!%p329_p10) }
  0x17   : > { %s379_s26 = scalar_select %p378_p11, %s953_s12, 1  ;;  %813 = vmatpush3.bf16.msra.mxu0 %v810_v5 }
  0x18   : > { %815 = vmatprep.subr.bf16.mxu0 %v814_v11 }
  0x19   : > { %s763_s29 = sshll.u32 %s379_s26, 4  ;;  %s765_s26 = sshll.u32 %s953_s12, 8 }
  0x1a   : > { %s385_s23 = scalar_lea.vmem %s1185_s0, %s763_s29  ;;  %s395_s17 = scalar_lea.vmem %s1190_s5, %s763_s29 }
  0x1b   : > { %v398_v14 = vld [vmem:[%s385_s23] sm:$0xff]  ;;  %v516_v16 = vld [vmem:[%s395_s17 + $0x8] sm:$0xff]  ;;  %817 = vmatpush3.bf16.msra.mxu0 %v814_v11  ;;  %s1133_s20 = scalar_lea.hbm %s1194_s9, %s765_s26  ;;  %s1139_s12 = scalar_lea.sflag [#allocation3], %s374_s15 }
  0x1c   : > { %v515_v15 = vld [vmem:[%s395_s17] sm:$0xff]  ;;  %796 = vmatprep.mubr.msk.f32.mxu0 %vm415_vm0, %v398_v14  ;;  %819 = vmatprep.subr.bf16.mxu0 %v818_v17  ;;  %v399_v18 = vld [vmem:[%s385_s23 + $0x8] sm:$0xff]  ;;  %s744_s23 = sshll.u32 %s374_s15, 4 }
  0x1d   : > { %803 = vmatprep.mubr.msk.f32.mxu1 %vm519_vm1, %v515_v15  ;;  %s376_s29 = scalar_lea.vmem [#allocation2], %s744_s23 }
  0x1e   : > { %804 = vmatmul.mubr.msk.f32.vlgmr.msra.gmra.mrb[0].mxu1 %vm519_vm1, %v516_v16  ;;  %s642_s17 = sshll.u32 %s376_s29, 4  ;;  %s1135_s17 = int_to_ptr.vmem [resolvable:$true] %s642_s17 }
  0x1f   : > { %821 = vmatpush3.bf16.msra.mxu0 %v818_v17  ;;  %s883_s23 = scalar_lea.vmem %s1135_s17, 256  ;;  %p890_p1 = scmp.lt.s32.totalorder %s1135_s17, %s888_s25 }
  0x20   : > { %p884_p12 = scmp.ne.s32.totalorder %s1135_s17, %s883_s23  ;;  %p891_p2 = scmp.lt.s32.totalorder %s889_s27, %s883_s23 }
  0x22   : > { %797 = vmatmul.mubr.msk.f32.vlgmr.msra.gmra.mrb[0].mxu0 %vm415_vm0, %v399_v18  ;;  %p885_p13 = pnand %p884_p12, %p1056_p4  ;;  %p892_p3 = por %p891_p2, %p890_p1 }
  0x24   : > { %p886_p0 = pneg %p885_p13 }
  0x26   : > { %p893_p5 = pnand %p892_p3, %p886_p0 }
  0xf1   : > { %v805_v19 = vpop.f32.mrb[0].mxu1 }
  0xf2   : > { %v592_v20 = vpop.f32.mrb[1].mxu1  ;;  %v609_v23 = vmul.f32 %v805_v19, %v756_v21 }
  0xf3   : > { %v608_v27 = vmul.f32 %v756_v21, %v592_v20 }
  0xf4   : > { %v618_v33 = vadd.f32 %v757_v26, %v609_v23 }
  0xf5   : > { %v798_v24 = vpop.f32.mrb[0].mxu0  ;;  %v617_v35 = vadd.f32 %v757_v26, %v608_v27 }
  0xf6   : > { %v494_v28 = vadd.f32 %v798_v24, %v749_v22  ;;  %v488_v29 = vpop.f32.mrb[1].mxu0 }
  0xf7   : > { %v489_v31 = vadd.f32 %v749_v22, %v488_v29 }
  0xf8   : > { %v505_v32 = vmul.f32 %v752_v25, %v494_v28 }
  0xf9   : > { %v504_v34 = vmul.f32 %v752_v25, %v489_v31 }
  0xfa   : > { %v514_v36 = vadd.f32 %v753_v30, %v505_v32 }
  0xfb   : > { %v513_v37 = vadd.f32 %v753_v30, %v504_v34 }
  0xfc   : > { %v620_v38 = vadd.f32 %v618_v33, %v514_v36 }
  0xfd   : > { %v619_v39 = vadd.f32 %v617_v35, %v513_v37 }
  0xfe   : > { %v622_v40 = vmax.f32 %v620_v38, 0.0 }
  0xff   : > { %v621_v41 = vmax.f32 %v619_v39, 0.0 }
 0x100   : > { %625 = vst.msk [vmem:[%s376_s29 + $0x8] sm:$0xff] %vm623_vm2, %v622_v40 }
 0x101   : > { %624 = vst.msk [vmem:[%s376_s29] sm:$0xff] %vm623_vm2, %v621_v41 }
 0x102   : > { %896 = shalt.err (!%p893_p5)
}
 0x103   : > { %s897_s15 = scalar_lea.hbm %s1133_s20, 256  ;;  %s901_s29 = scalar_lea.hbm %s1194_s9, 512 }
 0x104   : > { %p898_p6 = scmp.ne.s32.totalorder %s1133_s20, %s897_s15  ;;  %p902_p10 = scmp.lt.u32.totalorder %s1133_s20, %s1194_s9 }
 0x105   : > { %p903_p11 = scmp.lt.u32.totalorder %s901_s29, %s897_s15  ;;  %p905_p13 = scmp.lt.u32.totalorder %s897_s15, %s1133_s20 }
 0x106   : > { %p899_p7 = pnand %p898_p6, %p1056_p4 }
 0x107   : > { %p904_p12 = por %p903_p11, %p902_p10 }
 0x108   : > { %p900_p9 = pneg %p899_p7 }
 0x109   : > { %p906_p0 = por %p905_p13, %p904_p12 }
 0x10b   : > { %p907_p1 = pnand %p906_p0, %p900_p9 }
 0x10d   : > { %910 = shalt.err (!%p907_p1)
}
 0x10e   : > { %s964_s23 = smov 128   ;;  %s965_s24 = smov 8  }
 0x10f   : > { %826 = dma.vmem_to_hbm [thread:$0]  (%p1056_p4), %s1135_s17, 256, %s1133_s20, %s1139_s12, %s964_s23, %s964_s23, %s965_s24  }
 0x110 PF: > { %p832_p2 = scmp.ge.s32.totalorder %s961_s14, 2  ;;  %s657_s25 = sand.u32 1, %s941_s30  }
 0x111   : > { %s658_s27 = scalar_lea.sflag [#allocation3], %s657_s25 }
 0x112   : > { %p829_p3 = pnand %p832_p2, %p1063_p8 }
 0x114   : > { %936 = dma.done.wait (!%p829_p3), %s658_s27, 256  }
 0x115   : > { %938 = vsyncadd (!%p829_p3), %s658_s27, 4294967040  ;;  %s22_s14 = sadd.s32 1, %s961_s14   ;;  %s1199_s19 = sld [smem:[#allocation5_spill]] }
 0x116   : > { %p19_p5 = scmp.ge.s32.totalorder %s22_s14, 4   ;;  %s1200_s30 = smov %s945_s10 }
 0x117   : > { %s1201_s10 = smov %s949_s11  ;;  %s1202_s11 = smov %s1069_s22 }
 0x118   : > { %s1203_s12 = smov %s957_s13  ;;  %21 = sbr.rel (!%p19_p5) target bundleno = 4 (0x4), region = 94 }
 0x11b   : > { %s1204_s13 = smov %s1199_s19 }
 0x11f   :  { %663 = vsyncpa [#allocation3], 1 }
 0x120   :  { %665 = vsyncpa [#allocation3 + $0x1], 1 }

</bundles_post_ra>
